<compile_context>
chip_gen: v7x
topology: tpu7x:2x2x1
jax: 0.10.0
libtpu: 0.0.40
codegen_flags: <defaults>
</compile_context>

<pallas_src>
from functools import partial

import jax
import jax.numpy as jnp
from jax.experimental import pallas as pl
from jax.experimental.pallas import tpu as pltpu


def _round_up(x, m):
    return ((x + m - 1) // m) * m


def _conv_bias_relu_kernel(x_ref, w_ref, b_ref, o_ref, acc_ref, *,
                           TH, Wo_pad, KH, KW, C, fold_taps):
    """One (batch, output-row-tile) grid step.

    x_ref:   (1, Hp, Wp, C)       bf16 padded image, resident across row tiles
    w_ref:   (KH*KW*C, Cout_pad)  bf16 packed weight slab (tap-major: kh, kw, c)
    b_ref:   (1, Cout_pad)        f32 zero-padded bias
    o_ref:   (1, TM, Cout_pad)    bf16 flat, lane-dense output row tile
    acc_ref: (TM, Cout_pad)       f32 VMEM accumulator scratch
    """
    i = pl.program_id(1)                      # output-row tile index
    r0 = pl.multiple_of(i * TH, TH)           # first output row of this tile
    TM = TH * Wo_pad

    # Gather the KH*KW shifted windows (implicit im2col, no HBM blow-up).
    taps = []
    for kh in range(KH):
        for kw in range(KW):
            t = x_ref[0, pl.ds(r0 + kh, TH), pl.ds(kw, Wo_pad), :]   # (TH, Wo_pad, C)
            taps.append(t.reshape(TM, C))     # Wo_pad % 16 == 0 -> relayout-free

    if fold_taps:
        # Fold all taps into the contraction: one (TM, KH*KW*C) @ (KH*KW*C, Cout_pad)
        # MXU dot instead of KH*KW K=C dots + VPU accumulate adds.
        patch = jnp.concatenate(taps, axis=1)                       # (TM, KH*KW*C) bf16
        acc_ref[...] = jnp.dot(patch, w_ref[...],
                               preferred_element_type=jnp.float32)
    else:
        # Portability fallback (Mosaic without unaligned lane-dim concat):
        # per-tap dots accumulated into the f32 VMEM scratch.
        acc_ref[...] = jnp.dot(taps[0], w_ref[pl.ds(0, C), :],
                               preferred_element_type=jnp.float32)
        for t_idx in range(1, KH * KW):
            acc_ref[...] += jnp.dot(taps[t_idx], w_ref[pl.ds(t_idx * C, C), :],
                                    preferred_element_type=jnp.float32)

    # Fused bias + ReLU in f32, lane-dense bf16 store.
    o_ref[0] = jnp.maximum(acc_ref[...] + b_ref[...], 0.0).astype(o_ref.dtype)


def conv_module_forward(x_nchw, weight, bias, *, stride=1, padding=1,
                        fold_taps=True):
    """ReLU(Conv2d(x) + bias). x_nchw: (N, C, H, W); weight: (Cout, Cin, KH, KW)."""
    N, C, H, W = x_nchw.shape
    Cout, Cin, KH, KW = weight.shape
    assert Cin == C
    # TODO(synk): stride>1 / dilation>1 / groups>1 not implemented in the Pallas path.
    assert stride == 1

    Ho = H + 2 * padding - KH + 1
    Wo = W + 2 * padding - KW + 1

    Wo_pad = _round_up(Wo, 16)                     # bf16 sublane-aligned GEMM rows
    TH = max(1, min(Ho, 512 // max(Wo_pad, 1)))    # target ~512 GEMM rows per tile
    Ho_pad = _round_up(Ho, TH)
    n_row = Ho_pad // TH
    TM = TH * Wo_pad
    Cout_pad = _round_up(Cout, 128)                # lane-dense output channels
    K = KH * KW * C                                # folded contraction depth

    # NCHW -> NHWC once at the module boundary; bf16; pad spatially (conv + tile pad).
    x = jnp.transpose(x_nchw, (0, 2, 3, 1)).astype(jnp.bfloat16)
    x = jnp.pad(x, ((0, 0),
                    (padding, padding + (Ho_pad - Ho)),
                    (padding, padding + (Wo_pad - Wo)),
                    (0, 0)))
    Hp = Ho_pad + KH - 1
    Wp = Wo_pad + KW - 1
    assert x.shape == (N, Hp, Wp, C)

    # Weights: (Cout, Cin, KH, KW) -> (KH, KW, Cin, Cout) -> (KH*KW*C, Cout_pad) bf16,
    # tap-major ordering (kh, kw, c) matching the in-kernel patch concat.
    w = jnp.transpose(weight, (2, 3, 1, 0)).reshape(K, Cout).astype(jnp.bfloat16)
    w = jnp.pad(w, ((0, 0), (0, Cout_pad - Cout)))
    b = jnp.pad(bias.astype(jnp.float32).reshape(1, Cout),
                ((0, 0), (0, Cout_pad - Cout)))

    # Rough per-step VMEM (double-buffered ins/outs + scratch), with layout padding.
    x_blk = Hp * _round_up(Wp, 16) * _round_up(C, 128) * 2
    w_blk = _round_up(K, 16) * Cout_pad * 2
    b_blk = 8 * Cout_pad * 4
    o_blk = TM * Cout_pad * 2
    acc_blk = TM * Cout_pad * 4
    vmem_est = 2 * (x_blk + w_blk + b_blk + o_blk) + acc_blk
    vmem_limit = int(min(max(2 * vmem_est, 32 * 1024 * 1024), 64 * 1024 * 1024))

    # Megacore bias: with N>=2, keep the row-tile axis "arbitrary" so cores split
    # over distinct batch images (the resident image block depends only on n).
    dims = ("parallel", "arbitrary") if N >= 2 else ("parallel", "parallel")

    cost = pl.CostEstimate(
        flops=2 * N * Ho * Wo * K * Cout,
        transcendentals=0,
        bytes_accessed=int(x.size * 2 + w.size * 2 + b.size * 4
                           + N * Ho_pad * Wo_pad * Cout_pad * 2),
    )

    kernel = partial(_conv_bias_relu_kernel, TH=TH, Wo_pad=Wo_pad,
                     KH=KH, KW=KW, C=C, fold_taps=fold_taps)

    out_flat = pl.pallas_call(
        kernel,
        out_shape=jax.ShapeDtypeStruct((N, Ho_pad * Wo_pad, Cout_pad), jnp.bfloat16),
        grid=(N, n_row),
        in_specs=[
            # whole padded image per batch element; block index only depends on n,
            # so it stays resident across the inner row-tile axis (1x HBM traffic).
            pl.BlockSpec((1, Hp, Wp, C), lambda n, i: (n, 0, 0, 0)),
            pl.BlockSpec((K, Cout_pad), lambda n, i: (0, 0)),
            pl.BlockSpec((1, Cout_pad), lambda n, i: (0, 0)),
        ],
        out_specs=pl.BlockSpec((1, TM, Cout_pad), lambda n, i: (n, i, 0)),
        scratch_shapes=[pltpu.VMEM((TM, Cout_pad), jnp.float32)],
        compiler_params=pltpu.CompilerParams(
            dimension_semantics=dims,
            vmem_limit_bytes=vmem_limit),
        cost_estimate=cost,
    )(x, w, b)

    out = out_flat.reshape(N, Ho_pad, Wo_pad, Cout_pad)[:, :Ho, :Wo, :Cout]
    # Back to NCHW for PyTorch API parity (in a real net, hoist this to the model edge).
    return jnp.transpose(out, (0, 3, 1, 2)).astype(x_nchw.dtype)


if __name__ == "__main__":
    key = jax.random.PRNGKey(0)
    k_x, k_w, k_b = jax.random.split(key, 3)

    # ConvModule(in_channels=4, out_channels=8, kernel_size=3, padding=1)
    N, Cin, H, W = 2, 4, 16, 16
    Cout, KH, KW = 8, 3, 3

    x = jax.random.normal(k_x, (N, Cin, H, W), dtype=jnp.float32)
    weight = jax.random.normal(k_w, (Cout, Cin, KH, KW), dtype=jnp.float32) * 0.1
    bias = jax.random.normal(k_b, (Cout,), dtype=jnp.float32) * 0.1

    out = None
    last_err = None
    for fold in (True, False):   # fold=False only if this Mosaic lacks lane-dim concat
        try:
            out = conv_module_forward(x, weight, bias, stride=1, padding=1,
                                      fold_taps=fold)
            out = jax.block_until_ready(out)
            break
        except Exception as e:  # noqa: BLE001 - portability fallback
            last_err = e
            out = None
    if out is None:
        raise last_err

    # Reference: XLA conv on the same bf16-rounded operands (kernel accumulates f32).
    xb = x.astype(jnp.bfloat16).astype(jnp.float32)
    wb = weight.astype(jnp.bfloat16).astype(jnp.float32)
    ref = jax.lax.conv_general_dilated(
        xb, wb, window_strides=(1, 1), padding=((1, 1), (1, 1)),
        dimension_numbers=("NCHW", "OIHW", "NCHW"),
    ) + bias.reshape(1, Cout, 1, 1)
    ref = jnp.maximum(ref, 0.0)

    assert out.shape == (N, Cout, H, W)
    max_err = float(jnp.max(jnp.abs(out - ref)))
    assert jnp.allclose(out, ref, atol=1e-2, rtol=1e-2), max_err
    print("KERNEL_OK")
</pallas_src>

<mosaic_0001>
module attributes {stable_mosaic.version = 11 : i64} {
  func.func @_conv_bias_relu_kernel(%arg0: i32, %arg1: i32, %arg2: memref<1x18x18x4xbf16, #tpu.memory_space<vmem>>, %arg3: memref<36x128xbf16, #tpu.memory_space<vmem>>, %arg4: memref<1x128xf32, #tpu.memory_space<vmem>>, %arg5: memref<1x256x128xbf16, #tpu.memory_space<vmem>>, %arg6: memref<256x128xf32, #tpu.memory_space<vmem>>) attributes {dimension_semantics = [#tpu.dimension_semantics<parallel>, #tpu.dimension_semantics<arbitrary>], iteration_bounds = array<i64: 2, 1>, scalar_prefetch = 0 : i64, scratch_operands = 1 : i64, tpu.core_type = #tpu.core_type<tc>, window_params = [{transform_indices = @transform_0, window_bounds = array<i64: 1, 18, 18, 4>}, {pipeline_mode = #tpu.pipeline_mode<synchronous>, transform_indices = @transform_1, window_bounds = array<i64: 36, 128>}, {pipeline_mode = #tpu.pipeline_mode<synchronous>, transform_indices = @transform_2, window_bounds = array<i64: 1, 128>}, {transform_indices = @transform_3, window_bounds = array<i64: 1, 256, 128>}]} {
    %c16_i32 = arith.constant 16 : i32
    %0 = arith.muli %arg1, %c16_i32 : i32
    %1 = tpu.assume_multiple %0, 16 : i32
    %c0_i32 = arith.constant 0 : i32
    %2 = arith.addi %1, %c0_i32 : i32
    %c0 = arith.constant 0 : index
    %3 = arith.index_cast %2 : i32 to index
    %c0_0 = arith.constant 0 : index
    %c0_1 = arith.constant 0 : index
    %4 = vector.load %arg2[%c0, %3, %c0_0, %c0_1] : memref<1x18x18x4xbf16, #tpu.memory_space<vmem>>, vector<1x16x16x4xbf16>
    %5 = vector.shape_cast %4 : vector<1x16x16x4xbf16> to vector<16x16x4xbf16>
    %6 = vector.shape_cast %5 : vector<16x16x4xbf16> to vector<256x4xbf16>
    %c0_i32_2 = arith.constant 0 : i32
    %7 = arith.addi %1, %c0_i32_2 : i32
    %c0_3 = arith.constant 0 : index
    %8 = arith.index_cast %7 : i32 to index
    %c1 = arith.constant 1 : index
    %c0_4 = arith.constant 0 : index
    %9 = vector.load %arg2[%c0_3, %8, %c1, %c0_4] : memref<1x18x18x4xbf16, #tpu.memory_space<vmem>>, vector<1x16x16x4xbf16>
    %10 = vector.shape_cast %9 : vector<1x16x16x4xbf16> to vector<16x16x4xbf16>
    %11 = vector.shape_cast %10 : vector<16x16x4xbf16> to vector<256x4xbf16>
    %c0_i32_5 = arith.constant 0 : i32
    %12 = arith.addi %1, %c0_i32_5 : i32
    %c0_6 = arith.constant 0 : index
    %13 = arith.index_cast %12 : i32 to index
    %c2 = arith.constant 2 : index
    %c0_7 = arith.constant 0 : index
    %14 = vector.load %arg2[%c0_6, %13, %c2, %c0_7] : memref<1x18x18x4xbf16, #tpu.memory_space<vmem>>, vector<1x16x16x4xbf16>
    %15 = vector.shape_cast %14 : vector<1x16x16x4xbf16> to vector<16x16x4xbf16>
    %16 = vector.shape_cast %15 : vector<16x16x4xbf16> to vector<256x4xbf16>
    %c1_i32 = arith.constant 1 : i32
    %17 = arith.addi %1, %c1_i32 : i32
    %c0_8 = arith.constant 0 : index
    %18 = arith.index_cast %17 : i32 to index
    %c0_9 = arith.constant 0 : index
    %c0_10 = arith.constant 0 : index
    %19 = vector.load %arg2[%c0_8, %18, %c0_9, %c0_10] : memref<1x18x18x4xbf16, #tpu.memory_space<vmem>>, vector<1x16x16x4xbf16>
    %20 = vector.shape_cast %19 : vector<1x16x16x4xbf16> to vector<16x16x4xbf16>
    %21 = vector.shape_cast %20 : vector<16x16x4xbf16> to vector<256x4xbf16>
    %c1_i32_11 = arith.constant 1 : i32
    %22 = arith.addi %1, %c1_i32_11 : i32
    %c0_12 = arith.constant 0 : index
    %23 = arith.index_cast %22 : i32 to index
    %c1_13 = arith.constant 1 : index
    %c0_14 = arith.constant 0 : index
    %24 = vector.load %arg2[%c0_12, %23, %c1_13, %c0_14] : memref<1x18x18x4xbf16, #tpu.memory_space<vmem>>, vector<1x16x16x4xbf16>
    %25 = vector.shape_cast %24 : vector<1x16x16x4xbf16> to vector<16x16x4xbf16>
    %26 = vector.shape_cast %25 : vector<16x16x4xbf16> to vector<256x4xbf16>
    %c1_i32_15 = arith.constant 1 : i32
    %27 = arith.addi %1, %c1_i32_15 : i32
    %c0_16 = arith.constant 0 : index
    %28 = arith.index_cast %27 : i32 to index
    %c2_17 = arith.constant 2 : index
    %c0_18 = arith.constant 0 : index
    %29 = vector.load %arg2[%c0_16, %28, %c2_17, %c0_18] : memref<1x18x18x4xbf16, #tpu.memory_space<vmem>>, vector<1x16x16x4xbf16>
    %30 = vector.shape_cast %29 : vector<1x16x16x4xbf16> to vector<16x16x4xbf16>
    %31 = vector.shape_cast %30 : vector<16x16x4xbf16> to vector<256x4xbf16>
    %c2_i32 = arith.constant 2 : i32
    %32 = arith.addi %1, %c2_i32 : i32
    %c0_19 = arith.constant 0 : index
    %33 = arith.index_cast %32 : i32 to index
    %c0_20 = arith.constant 0 : index
    %c0_21 = arith.constant 0 : index
    %34 = vector.load %arg2[%c0_19, %33, %c0_20, %c0_21] : memref<1x18x18x4xbf16, #tpu.memory_space<vmem>>, vector<1x16x16x4xbf16>
    %35 = vector.shape_cast %34 : vector<1x16x16x4xbf16> to vector<16x16x4xbf16>
    %36 = vector.shape_cast %35 : vector<16x16x4xbf16> to vector<256x4xbf16>
    %c2_i32_22 = arith.constant 2 : i32
    %37 = arith.addi %1, %c2_i32_22 : i32
    %c0_23 = arith.constant 0 : index
    %38 = arith.index_cast %37 : i32 to index
    %c1_24 = arith.constant 1 : index
    %c0_25 = arith.constant 0 : index
    %39 = vector.load %arg2[%c0_23, %38, %c1_24, %c0_25] : memref<1x18x18x4xbf16, #tpu.memory_space<vmem>>, vector<1x16x16x4xbf16>
    %40 = vector.shape_cast %39 : vector<1x16x16x4xbf16> to vector<16x16x4xbf16>
    %41 = vector.shape_cast %40 : vector<16x16x4xbf16> to vector<256x4xbf16>
    %c2_i32_26 = arith.constant 2 : i32
    %42 = arith.addi %1, %c2_i32_26 : i32
    %c0_27 = arith.constant 0 : index
    %43 = arith.index_cast %42 : i32 to index
    %c2_28 = arith.constant 2 : index
    %c0_29 = arith.constant 0 : index
    %44 = vector.load %arg2[%c0_27, %43, %c2_28, %c0_29] : memref<1x18x18x4xbf16, #tpu.memory_space<vmem>>, vector<1x16x16x4xbf16>
    %45 = vector.shape_cast %44 : vector<1x16x16x4xbf16> to vector<16x16x4xbf16>
    %46 = vector.shape_cast %45 : vector<16x16x4xbf16> to vector<256x4xbf16>
    %47 = tpu.concatenate %6, %11, %16, %21, %26, %31, %36, %41, %46 in 1 : vector<256x4xbf16>, vector<256x4xbf16>, vector<256x4xbf16>, vector<256x4xbf16>, vector<256x4xbf16>, vector<256x4xbf16>, vector<256x4xbf16>, vector<256x4xbf16>, vector<256x4xbf16> -> vector<256x36xbf16>
    %c0_30 = arith.constant 0 : index
    %c0_31 = arith.constant 0 : index
    %48 = vector.load %arg3[%c0_30, %c0_31] : memref<36x128xbf16, #tpu.memory_space<vmem>>, vector<36x128xbf16>
    %cst = arith.constant dense<0.000000e+00> : vector<256x128xf32>
    %49 = tpu.matmul %47, %48, %cst {dimension_numbers = #tpu.dot_dimension_numbers<[1], [0], [0], [1], [0, 0, 1, 1], [], []>} : vector<256x36xbf16>, vector<36x128xbf16>, vector<256x128xf32> -> vector<256x128xf32>
    %c0_32 = arith.constant 0 : index
    %c0_33 = arith.constant 0 : index
    %50 = vector.load %arg6[%c0_32, %c0_33] : memref<256x128xf32, #tpu.memory_space<vmem>>, vector<256x128xf32>
    tpu.vector_store %arg6[%c0_32, %c0_33], %49 {strides = array<i32>} : memref<256x128xf32, #tpu.memory_space<vmem>>, vector<256x128xf32>,
    %c0_34 = arith.constant 0 : index
    %c0_35 = arith.constant 0 : index
    %51 = vector.load %arg6[%c0_34, %c0_35] : memref<256x128xf32, #tpu.memory_space<vmem>>, vector<256x128xf32>
    %c0_36 = arith.constant 0 : index
    %c0_37 = arith.constant 0 : index
    %52 = vector.load %arg4[%c0_36, %c0_37] : memref<1x128xf32, #tpu.memory_space<vmem>>, vector<1x128xf32>
    %53 = vector.broadcast %52 : vector<1x128xf32> to vector<256x128xf32>
    %54 = arith.addf %51, %53 : vector<256x128xf32>
    %cst_38 = arith.constant 0.000000e+00 : f32
    %55 = vector.broadcast %cst_38 : f32 to vector<256x128xf32>
    %56 = arith.maximumf %54, %55 : vector<256x128xf32>
    %57 = arith.truncf %56 : vector<256x128xf32> to vector<256x128xbf16>
    %c0_39 = arith.constant 0 : index
    %c0_40 = arith.constant 0 : index
    %c0_41 = arith.constant 0 : index
    %58 = vector.load %arg5[%c0_39, %c0_40, %c0_41] : memref<1x256x128xbf16, #tpu.memory_space<vmem>>, vector<1x256x128xbf16>
    %59 = vector.shape_cast %58 : vector<1x256x128xbf16> to vector<256x128xbf16>
    %60 = vector.shape_cast %57 : vector<256x128xbf16> to vector<1x256x128xbf16>
    tpu.vector_store %arg5[%c0_39, %c0_40, %c0_41], %60 {strides = array<i32>} : memref<1x256x128xbf16, #tpu.memory_space<vmem>>, vector<1x256x128xbf16>,
    return
  }
  func.func @transform_0(%arg0: i32, %arg1: i32) -> (i32, i32, i32, i32) {
    %c0_i32 = arith.constant 0 : i32
    %c0_i32_0 = arith.constant 0 : i32
    %c0_i32_1 = arith.constant 0 : i32
    %c0_i32_2 = arith.constant 0 : i32
    return %arg0, %c0_i32, %c0_i32_0, %c0_i32_1 : i32, i32, i32, i32
  }
  func.func @transform_1(%arg0: i32, %arg1: i32) -> (i32, i32) {
    %c0_i32 = arith.constant 0 : i32
    %c0_i32_0 = arith.constant 0 : i32
    %c0_i32_1 = arith.constant 0 : i32
    return %c0_i32, %c0_i32_0 : i32, i32
  }
  func.func @transform_2(%arg0: i32, %arg1: i32) -> (i32, i32) {
    %c0_i32 = arith.constant 0 : i32
    %c0_i32_0 = arith.constant 0 : i32
    %c0_i32_1 = arith.constant 0 : i32
    return %c0_i32, %c0_i32_0 : i32, i32
  }
  func.func @transform_3(%arg0: i32, %arg1: i32) -> (i32, i32, i32) {
    %c0_i32 = arith.constant 0 : i32
    %c0_i32_0 = arith.constant 0 : i32
    return %arg0, %arg1, %c0_i32 : i32, i32, i32
  }
}

module attributes {stable_mosaic.version = 11 : i64} {
  func.func @_conv_bias_relu_kernel(%arg0: i32, %arg1: i32, %arg2: memref<1x18x18x4xbf16, #tpu.memory_space<vmem>>, %arg3: memref<36x128xbf16, #tpu.memory_space<vmem>>, %arg4: memref<1x128xf32, #tpu.memory_space<vmem>>, %arg5: memref<1x256x128xbf16, #tpu.memory_space<vmem>>, %arg6: memref<256x128xf32, #tpu.memory_space<vmem>>) attributes {dimension_semantics = [#tpu.dimension_semantics<parallel>, #tpu.dimension_semantics<arbitrary>], iteration_bounds = array<i64: 2, 1>, scalar_prefetch = 0 : i64, scratch_operands = 1 : i64, tpu.core_type = #tpu.core_type<tc>, window_params = [{transform_indices = @transform_0, window_bounds = array<i64: 1, 18, 18, 4>}, {pipeline_mode = #tpu.pipeline_mode<synchronous>, transform_indices = @transform_1, window_bounds = array<i64: 36, 128>}, {pipeline_mode = #tpu.pipeline_mode<synchronous>, transform_indices = @transform_2, window_bounds = array<i64: 1, 128>}, {transform_indices = @transform_3, window_bounds = array<i64: 1, 256, 128>}]} {
    %c16_i32 = arith.constant 16 : i32
    %0 = arith.muli %arg1, %c16_i32 : i32
    %1 = tpu.assume_multiple %0, 16 : i32
    %c0_i32 = arith.constant 0 : i32
    %2 = arith.addi %1, %c0_i32 : i32
    %c0 = arith.constant 0 : index
    %3 = arith.index_cast %2 : i32 to index
    %c0_0 = arith.constant 0 : index
    %c0_1 = arith.constant 0 : index
    %4 = vector.load %arg2[%c0, %3, %c0_0, %c0_1] : memref<1x18x18x4xbf16, #tpu.memory_space<vmem>>, vector<1x16x16x4xbf16>
    %5 = vector.shape_cast %4 : vector<1x16x16x4xbf16> to vector<16x16x4xbf16>
    %6 = vector.shape_cast %5 : vector<16x16x4xbf16> to vector<256x4xbf16>
    %c0_i32_2 = arith.constant 0 : i32
    %7 = arith.addi %1, %c0_i32_2 : i32
    %c0_3 = arith.constant 0 : index
    %8 = arith.index_cast %7 : i32 to index
    %c1 = arith.constant 1 : index
    %c0_4 = arith.constant 0 : index
    %9 = vector.load %arg2[%c0_3, %8, %c1, %c0_4] : memref<1x18x18x4xbf16, #tpu.memory_space<vmem>>, vector<1x16x16x4xbf16>
    %10 = vector.shape_cast %9 : vector<1x16x16x4xbf16> to vector<16x16x4xbf16>
    %11 = vector.shape_cast %10 : vector<16x16x4xbf16> to vector<256x4xbf16>
    %c0_i32_5 = arith.constant 0 : i32
    %12 = arith.addi %1, %c0_i32_5 : i32
    %c0_6 = arith.constant 0 : index
    %13 = arith.index_cast %12 : i32 to index
    %c2 = arith.constant 2 : index
    %c0_7 = arith.constant 0 : index
    %14 = vector.load %arg2[%c0_6, %13, %c2, %c0_7] : memref<1x18x18x4xbf16, #tpu.memory_space<vmem>>, vector<1x16x16x4xbf16>
    %15 = vector.shape_cast %14 : vector<1x16x16x4xbf16> to vector<16x16x4xbf16>
    %16 = vector.shape_cast %15 : vector<16x16x4xbf16> to vector<256x4xbf16>
    %c1_i32 = arith.constant 1 : i32
    %17 = arith.addi %1, %c1_i32 : i32
    %c0_8 = arith.constant 0 : index
    %18 = arith.index_cast %17 : i32 to index
    %c0_9 = arith.constant 0 : index
    %c0_10 = arith.constant 0 : index
    %19 = vector.load %arg2[%c0_8, %18, %c0_9, %c0_10] : memref<1x18x18x4xbf16, #tpu.memory_space<vmem>>, vector<1x16x16x4xbf16>
    %20 = vector.shape_cast %19 : vector<1x16x16x4xbf16> to vector<16x16x4xbf16>
    %21 = vector.shape_cast %20 : vector<16x16x4xbf16> to vector<256x4xbf16>
    %c1_i32_11 = arith.constant 1 : i32
    %22 = arith.addi %1, %c1_i32_11 : i32
    %c0_12 = arith.constant 0 : index
    %23 = arith.index_cast %22 : i32 to index
    %c1_13 = arith.constant 1 : index
    %c0_14 = arith.constant 0 : index
    %24 = vector.load %arg2[%c0_12, %23, %c1_13, %c0_14] : memref<1x18x18x4xbf16, #tpu.memory_space<vmem>>, vector<1x16x16x4xbf16>
    %25 = vector.shape_cast %24 : vector<1x16x16x4xbf16> to vector<16x16x4xbf16>
    %26 = vector.shape_cast %25 : vector<16x16x4xbf16> to vector<256x4xbf16>
    %c1_i32_15 = arith.constant 1 : i32
    %27 = arith.addi %1, %c1_i32_15 : i32
    %c0_16 = arith.constant 0 : index
    %28 = arith.index_cast %27 : i32 to index
    %c2_17 = arith.constant 2 : index
    %c0_18 = arith.constant 0 : index
    %29 = vector.load %arg2[%c0_16, %28, %c2_17, %c0_18] : memref<1x18x18x4xbf16, #tpu.memory_space<vmem>>, vector<1x16x16x4xbf16>
    %30 = vector.shape_cast %29 : vector<1x16x16x4xbf16> to vector<16x16x4xbf16>
    %31 = vector.shape_cast %30 : vector<16x16x4xbf16> to vector<256x4xbf16>
    %c2_i32 = arith.constant 2 : i32
    %32 = arith.addi %1, %c2_i32 : i32
    %c0_19 = arith.constant 0 : index
    %33 = arith.index_cast %32 : i32 to index
    %c0_20 = arith.constant 0 : index
    %c0_21 = arith.constant 0 : index
    %34 = vector.load %arg2[%c0_19, %33, %c0_20, %c0_21] : memref<1x18x18x4xbf16, #tpu.memory_space<vmem>>, vector<1x16x16x4xbf16>
    %35 = vector.shape_cast %34 : vector<1x16x16x4xbf16> to vector<16x16x4xbf16>
    %36 = vector.shape_cast %35 : vector<16x16x4xbf16> to vector<256x4xbf16>
    %c2_i32_22 = arith.constant 2 : i32
    %37 = arith.addi %1, %c2_i32_22 : i32
    %c0_23 = arith.constant 0 : index
    %38 = arith.index_cast %37 : i32 to index
    %c1_24 = arith.constant 1 : index
    %c0_25 = arith.constant 0 : index
    %39 = vector.load %arg2[%c0_23, %38, %c1_24, %c0_25] : memref<1x18x18x4xbf16, #tpu.memory_space<vmem>>, vector<1x16x16x4xbf16>
    %40 = vector.shape_cast %39 : vector<1x16x16x4xbf16> to vector<16x16x4xbf16>
    %41 = vector.shape_cast %40 : vector<16x16x4xbf16> to vector<256x4xbf16>
    %c2_i32_26 = arith.constant 2 : i32
    %42 = arith.addi %1, %c2_i32_26 : i32
    %c0_27 = arith.constant 0 : index
    %43 = arith.index_cast %42 : i32 to index
    %c2_28 = arith.constant 2 : index
    %c0_29 = arith.constant 0 : index
    %44 = vector.load %arg2[%c0_27, %43, %c2_28, %c0_29] : memref<1x18x18x4xbf16, #tpu.memory_space<vmem>>, vector<1x16x16x4xbf16>
    %45 = vector.shape_cast %44 : vector<1x16x16x4xbf16> to vector<16x16x4xbf16>
    %46 = vector.shape_cast %45 : vector<16x16x4xbf16> to vector<256x4xbf16>
    %c0_30 = arith.constant 0 : index
    %c0_31 = arith.constant 0 : index
    %47 = vector.load %arg3[%c0_30, %c0_31] : memref<36x128xbf16, #tpu.memory_space<vmem>>, vector<4x128xbf16>
    %cst = arith.constant dense<0.000000e+00> : vector<256x128xf32>
    %48 = tpu.matmul %6, %47, %cst {dimension_numbers = #tpu.dot_dimension_numbers<[1], [0], [0], [1], [0, 0, 1, 1], [], []>} : vector<256x4xbf16>, vector<4x128xbf16>, vector<256x128xf32> -> vector<256x128xf32>
    %c0_32 = arith.constant 0 : index
    %c0_33 = arith.constant 0 : index
    %49 = vector.load %arg6[%c0_32, %c0_33] : memref<256x128xf32, #tpu.memory_space<vmem>>, vector<256x128xf32>
    tpu.vector_store %arg6[%c0_32, %c0_33], %48 {strides = array<i32>} : memref<256x128xf32, #tpu.memory_space<vmem>>, vector<256x128xf32>,
    %c0_34 = arith.constant 0 : index
    %c0_35 = arith.constant 0 : index
    %50 = vector.load %arg6[%c0_34, %c0_35] : memref<256x128xf32, #tpu.memory_space<vmem>>, vector<256x128xf32>
    %c4 = arith.constant 4 : index
    %c0_36 = arith.constant 0 : index
    %51 = vector.load %arg3[%c4, %c0_36] : memref<36x128xbf16, #tpu.memory_space<vmem>>, vector<4x128xbf16>
    %cst_37 = arith.constant dense<0.000000e+00> : vector<256x128xf32>
    %52 = tpu.matmul %11, %51, %cst_37 {dimension_numbers = #tpu.dot_dimension_numbers<[1], [0], [0], [1], [0, 0, 1, 1], [], []>} : vector<256x4xbf16>, vector<4x128xbf16>, vector<256x128xf32> -> vector<256x128xf32>
    %53 = arith.addf %50, %52 : vector<256x128xf32>
    %c0_38 = arith.constant 0 : index
    %c0_39 = arith.constant 0 : index
    %54 = vector.load %arg6[%c0_38, %c0_39] : memref<256x128xf32, #tpu.memory_space<vmem>>, vector<256x128xf32>
    tpu.vector_store %arg6[%c0_38, %c0_39], %53 {strides = array<i32>} : memref<256x128xf32, #tpu.memory_space<vmem>>, vector<256x128xf32>,
    %c0_40 = arith.constant 0 : index
    %c0_41 = arith.constant 0 : index
    %55 = vector.load %arg6[%c0_40, %c0_41] : memref<256x128xf32, #tpu.memory_space<vmem>>, vector<256x128xf32>
    %c8 = arith.constant 8 : index
    %c0_42 = arith.constant 0 : index
    %56 = vector.load %arg3[%c8, %c0_42] : memref<36x128xbf16, #tpu.memory_space<vmem>>, vector<4x128xbf16>
    %cst_43 = arith.constant dense<0.000000e+00> : vector<256x128xf32>
    %57 = tpu.matmul %16, %56, %cst_43 {dimension_numbers = #tpu.dot_dimension_numbers<[1], [0], [0], [1], [0, 0, 1, 1], [], []>} : vector<256x4xbf16>, vector<4x128xbf16>, vector<256x128xf32> -> vector<256x128xf32>
    %58 = arith.addf %55, %57 : vector<256x128xf32>
    %c0_44 = arith.constant 0 : index
    %c0_45 = arith.constant 0 : index
    %59 = vector.load %arg6[%c0_44, %c0_45] : memref<256x128xf32, #tpu.memory_space<vmem>>, vector<256x128xf32>
    tpu.vector_store %arg6[%c0_44, %c0_45], %58 {strides = array<i32>} : memref<256x128xf32, #tpu.memory_space<vmem>>, vector<256x128xf32>,
    %c0_46 = arith.constant 0 : index
    %c0_47 = arith.constant 0 : index
    %60 = vector.load %arg6[%c0_46, %c0_47] : memref<256x128xf32, #tpu.memory_space<vmem>>, vector<256x128xf32>
    %c12 = arith.constant 12 : index
    %c0_48 = arith.constant 0 : index
    %61 = vector.load %arg3[%c12, %c0_48] : memref<36x128xbf16, #tpu.memory_space<vmem>>, vector<4x128xbf16>
    %cst_49 = arith.constant dense<0.000000e+00> : vector<256x128xf32>
    %62 = tpu.matmul %21, %61, %cst_49 {dimension_numbers = #tpu.dot_dimension_numbers<[1], [0], [0], [1], [0, 0, 1, 1], [], []>} : vector<256x4xbf16>, vector<4x128xbf16>, vector<256x128xf32> -> vector<256x128xf32>
    %63 = arith.addf %60, %62 : vector<256x128xf32>
    %c0_50 = arith.constant 0 : index
    %c0_51 = arith.constant 0 : index
    %64 = vector.load %arg6[%c0_50, %c0_51] : memref<256x128xf32, #tpu.memory_space<vmem>>, vector<256x128xf32>
    tpu.vector_store %arg6[%c0_50, %c0_51], %63 {strides = array<i32>} : memref<256x128xf32, #tpu.memory_space<vmem>>, vector<256x128xf32>,
    %c0_52 = arith.constant 0 : index
    %c0_53 = arith.constant 0 : index
    %65 = vector.load %arg6[%c0_52, %c0_53] : memref<256x128xf32, #tpu.memory_space<vmem>>, vector<256x128xf32>
    %c16 = arith.constant 16 : index
    %c0_54 = arith.constant 0 : index
    %66 = vector.load %arg3[%c16, %c0_54] : memref<36x128xbf16, #tpu.memory_space<vmem>>, vector<4x128xbf16>
    %cst_55 = arith.constant dense<0.000000e+00> : vector<256x128xf32>
    %67 = tpu.matmul %26, %66, %cst_55 {dimension_numbers = #tpu.dot_dimension_numbers<[1], [0], [0], [1], [0, 0, 1, 1], [], []>} : vector<256x4xbf16>, vector<4x128xbf16>, vector<256x128xf32> -> vector<256x128xf32>
    %68 = arith.addf %65, %67 : vector<256x128xf32>
    %c0_56 = arith.constant 0 : index
    %c0_57 = arith.constant 0 : index
    %69 = vector.load %arg6[%c0_56, %c0_57] : memref<256x128xf32, #tpu.memory_space<vmem>>, vector<256x128xf32>
    tpu.vector_store %arg6[%c0_56, %c0_57], %68 {strides = array<i32>} : memref<256x128xf32, #tpu.memory_space<vmem>>, vector<256x128xf32>,
    %c0_58 = arith.constant 0 : index
    %c0_59 = arith.constant 0 : index
    %70 = vector.load %arg6[%c0_58, %c0_59] : memref<256x128xf32, #tpu.memory_space<vmem>>, vector<256x128xf32>
    %c20 = arith.constant 20 : index
    %c0_60 = arith.constant 0 : index
    %71 = vector.load %arg3[%c20, %c0_60] : memref<36x128xbf16, #tpu.memory_space<vmem>>, vector<4x128xbf16>
    %cst_61 = arith.constant dense<0.000000e+00> : vector<256x128xf32>
    %72 = tpu.matmul %31, %71, %cst_61 {dimension_numbers = #tpu.dot_dimension_numbers<[1], [0], [0], [1], [0, 0, 1, 1], [], []>} : vector<256x4xbf16>, vector<4x128xbf16>, vector<256x128xf32> -> vector<256x128xf32>
    %73 = arith.addf %70, %72 : vector<256x128xf32>
    %c0_62 = arith.constant 0 : index
    %c0_63 = arith.constant 0 : index
    %74 = vector.load %arg6[%c0_62, %c0_63] : memref<256x128xf32, #tpu.memory_space<vmem>>, vector<256x128xf32>
    tpu.vector_store %arg6[%c0_62, %c0_63], %73 {strides = array<i32>} : memref<256x128xf32, #tpu.memory_space<vmem>>, vector<256x128xf32>,
    %c0_64 = arith.constant 0 : index
    %c0_65 = arith.constant 0 : index
    %75 = vector.load %arg6[%c0_64, %c0_65] : memref<256x128xf32, #tpu.memory_space<vmem>>, vector<256x128xf32>
    %c24 = arith.constant 24 : index
    %c0_66 = arith.constant 0 : index
    %76 = vector.load %arg3[%c24, %c0_66] : memref<36x128xbf16, #tpu.memory_space<vmem>>, vector<4x128xbf16>
    %cst_67 = arith.constant dense<0.000000e+00> : vector<256x128xf32>
    %77 = tpu.matmul %36, %76, %cst_67 {dimension_numbers = #tpu.dot_dimension_numbers<[1], [0], [0], [1], [0, 0, 1, 1], [], []>} : vector<256x4xbf16>, vector<4x128xbf16>, vector<256x128xf32> -> vector<256x128xf32>
    %78 = arith.addf %75, %77 : vector<256x128xf32>
    %c0_68 = arith.constant 0 : index
    %c0_69 = arith.constant 0 : index
    %79 = vector.load %arg6[%c0_68, %c0_69] : memref<256x128xf32, #tpu.memory_space<vmem>>, vector<256x128xf32>
    tpu.vector_store %arg6[%c0_68, %c0_69], %78 {strides = array<i32>} : memref<256x128xf32, #tpu.memory_space<vmem>>, vector<256x128xf32>,
    %c0_70 = arith.constant 0 : index
    %c0_71 = arith.constant 0 : index
    %80 = vector.load %arg6[%c0_70, %c0_71] : memref<256x128xf32, #tpu.memory_space<vmem>>, vector<256x128xf32>
    %c28 = arith.constant 28 : index
    %c0_72 = arith.constant 0 : index
    %81 = vector.load %arg3[%c28, %c0_72] : memref<36x128xbf16, #tpu.memory_space<vmem>>, vector<4x128xbf16>
    %cst_73 = arith.constant dense<0.000000e+00> : vector<256x128xf32>
    %82 = tpu.matmul %41, %81, %cst_73 {dimension_numbers = #tpu.dot_dimension_numbers<[1], [0], [0], [1], [0, 0, 1, 1], [], []>} : vector<256x4xbf16>, vector<4x128xbf16>, vector<256x128xf32> -> vector<256x128xf32>
    %83 = arith.addf %80, %82 : vector<256x128xf32>
    %c0_74 = arith.constant 0 : index
    %c0_75 = arith.constant 0 : index
    %84 = vector.load %arg6[%c0_74, %c0_75] : memref<256x128xf32, #tpu.memory_space<vmem>>, vector<256x128xf32>
    tpu.vector_store %arg6[%c0_74, %c0_75], %83 {strides = array<i32>} : memref<256x128xf32, #tpu.memory_space<vmem>>, vector<256x128xf32>,
    %c0_76 = arith.constant 0 : index
    %c0_77 = arith.constant 0 : index
    %85 = vector.load %arg6[%c0_76, %c0_77] : memref<256x128xf32, #tpu.memory_space<vmem>>, vector<256x128xf32>
    %c32 = arith.constant 32 : index
    %c0_78 = arith.constant 0 : index
    %86 = vector.load %arg3[%c32, %c0_78] : memref<36x128xbf16, #tpu.memory_space<vmem>>, vector<4x128xbf16>
    %cst_79 = arith.constant dense<0.000000e+00> : vector<256x128xf32>
    %87 = tpu.matmul %46, %86, %cst_79 {dimension_numbers = #tpu.dot_dimension_numbers<[1], [0], [0], [1], [0, 0, 1, 1], [], []>} : vector<256x4xbf16>, vector<4x128xbf16>, vector<256x128xf32> -> vector<256x128xf32>
    %88 = arith.addf %85, %87 : vector<256x128xf32>
    %c0_80 = arith.constant 0 : index
    %c0_81 = arith.constant 0 : index
    %89 = vector.load %arg6[%c0_80, %c0_81] : memref<256x128xf32, #tpu.memory_space<vmem>>, vector<256x128xf32>
    tpu.vector_store %arg6[%c0_80, %c0_81], %88 {strides = array<i32>} : memref<256x128xf32, #tpu.memory_space<vmem>>, vector<256x128xf32>,
    %c0_82 = arith.constant 0 : index
    %c0_83 = arith.constant 0 : index
    %90 = vector.load %arg6[%c0_82, %c0_83] : memref<256x128xf32, #tpu.memory_space<vmem>>, vector<256x128xf32>
    %c0_84 = arith.constant 0 : index
    %c0_85 = arith.constant 0 : index
    %91 = vector.load %arg4[%c0_84, %c0_85] : memref<1x128xf32, #tpu.memory_space<vmem>>, vector<1x128xf32>
    %92 = vector.broadcast %91 : vector<1x128xf32> to vector<256x128xf32>
    %93 = arith.addf %90, %92 : vector<256x128xf32>
    %cst_86 = arith.constant 0.000000e+00 : f32
    %94 = vector.broadcast %cst_86 : f32 to vector<256x128xf32>
    %95 = arith.maximumf %93, %94 : vector<256x128xf32>
    %96 = arith.truncf %95 : vector<256x128xf32> to vector<256x128xbf16>
    %c0_87 = arith.constant 0 : index
    %c0_88 = arith.constant 0 : index
    %c0_89 = arith.constant 0 : index
    %97 = vector.load %arg5[%c0_87, %c0_88, %c0_89] : memref<1x256x128xbf16, #tpu.memory_space<vmem>>, vector<1x256x128xbf16>
    %98 = vector.shape_cast %97 : vector<1x256x128xbf16> to vector<256x128xbf16>
    %99 = vector.shape_cast %96 : vector<256x128xbf16> to vector<1x256x128xbf16>
    tpu.vector_store %arg5[%c0_87, %c0_88, %c0_89], %99 {strides = array<i32>} : memref<1x256x128xbf16, #tpu.memory_space<vmem>>, vector<1x256x128xbf16>,
    return
  }
  func.func @transform_0(%arg0: i32, %arg1: i32) -> (i32, i32, i32, i32) {
    %c0_i32 = arith.constant 0 : i32
    %c0_i32_0 = arith.constant 0 : i32
    %c0_i32_1 = arith.constant 0 : i32
    %c0_i32_2 = arith.constant 0 : i32
    return %arg0, %c0_i32, %c0_i32_0, %c0_i32_1 : i32, i32, i32, i32
  }
  func.func @transform_1(%arg0: i32, %arg1: i32) -> (i32, i32) {
    %c0_i32 = arith.constant 0 : i32
    %c0_i32_0 = arith.constant 0 : i32
    %c0_i32_1 = arith.constant 0 : i32
    return %c0_i32, %c0_i32_0 : i32, i32
  }
  func.func @transform_2(%arg0: i32, %arg1: i32) -> (i32, i32) {
    %c0_i32 = arith.constant 0 : i32
    %c0_i32_0 = arith.constant 0 : i32
    %c0_i32_1 = arith.constant 0 : i32
    return %c0_i32, %c0_i32_0 : i32, i32
  }
  func.func @transform_3(%arg0: i32, %arg1: i32) -> (i32, i32, i32) {
    %c0_i32 = arith.constant 0 : i32
    %c0_i32_0 = arith.constant 0 : i32
    return %arg0, %arg1, %c0_i32 : i32, i32, i32
  }
}

</mosaic_0001>

<bundles_post_ra>
// kernel: tpu_custom_call.1
= control target key start
LH: loop header
LB: loop body
LE: loop exit
PB: predicated region body
PF: predicated region fallthrough
CT: control target
= control target key end

     0   :  { %8 = vsyncpa [#allocation4], 0  ;;  %s6467_s0 = inlined_call_operand.vmem [shape: bf16[2,18,18,4], index: 0, kind: input, shape index: {}]   ;;  %s6468_s1 = inlined_call_operand.vmem [shape: bf16[36,128], index: 1, kind: input, shape index: {}]   ;;  %s6469_s2 = inlined_call_operand.vmem [shape: f32[1,128], index: 2, kind: input, shape index: {}]   ;;  %s6470_s3 = inlined_call_operand.hbm [shape: bf16[2,256,128], index: 3, kind: output, shape index: {}]  }
   0x1   :  { %10 = vsyncpa [#allocation4 + $0x1], 0  ;;  %s4486_s12 = smov 0   ;;  %s4488_s13 = smov 0  }
   0x2   :  { %s4490_s14 = smov 0   ;;  %s4492_s15 = smov 0  }
   0x3   :  { %s4494_s16 = smov 0   ;;  %s4496_s17 = smov 0  }
   0x4 LB: > { %s3655_s18 = sadd.s32 4294967295, %s4454_s17   ;;  %s3656_s19 = sadd.s32 4294967294, %s4454_s17   ;;  %s4454_s17 = sphi %s4496_s17, %s16_s17   ;;  %s4450_s16 = sphi %s4494_s16, %s6481_s16   ;;  %s4446_s15 = sphi %s4492_s15, %s6480_s15   ;;  %s4442_s14 = sphi %s4490_s14, %s6479_s14   ;;  %s4438_s13 = sphi %s4488_s13, %s6478_s13   ;;  %s4434_s12 = sphi %s4486_s12, %s6477_s12  }
   0x5   : > { %s28_s20 = sadd.s32 1, %s4450_s16  ;;  %s105_s21 = sadd.s32 1, %s4442_s14 }
   0x6   : > { %p30_p0 = scmp.ge.s32.totalorder %s28_s20, 2  ;;  %p115_p1 = scmp.ne.s32.totalorder %s4442_s14, %s4438_s13 }
   0x7   : > { %p116_p2 = scmp.eq.s32.totalorder %s3655_s18, 1  ;;  %p121_p3 = scmp.ne.s32.totalorder %s4438_s13, %s4434_s12 }
   0x8   : > { %s6483_s20 = smov (%p30_p0, %s28_s20), 0  ;;  %p122_p5 = scmp.eq.s32.totalorder %s3656_s19, 1 }
   0x9   : > { %p4526_p4 = por %p116_p2, %p115_p1  ;;  %s100_s23 = ssub.s32 %s4450_s16, %s6483_s20 }
   0xa   : > { %p3659_p6 = scmp.ge.s32.totalorder %s4454_s17, 1  ;;  %p103_p7 = scmp.eq.s32.totalorder %s100_s23, 0 }
   0xb   : > { %p4533_p8 = por %p122_p5, %p121_p3  ;;  %p154_p9 = scmp.lt.s32.totalorder %s4454_s17, 3 }
   0xc   : > { %s4539_s25 = scalar_select %p103_p7, %s4442_s14, %s105_s21  }
   0xd   : > { %p155_p10 = pnand %p3659_p6, %p154_p9 }
   0xe   : > { %p178_p11 = scmp.lt.s32.totalorder (!%p155_p10), %s4446_s15, 1  ;;  %vm688_vm0 = vcmask (!%p155_p10), 1042432   ;;  %vm689_vm1 = vcmask (!%p155_p10), 1046532   ;;  %s4456_s4 = smov (!%p155_p10), 12   ;;  %vm237_vm3 = vsmask.f32 (!%p155_p10), 3328 }
   0xf   : > { %158 = sbr.rel (%p155_p10) target bundleno = 702 (0x2be), region = 32  ;;  %vm4577_vm2 = vmor (!%p155_p10), %vm688_vm0, %vm689_vm1  ;;  %vm238_vm4 = vsmask.f32 (!%p155_p10), 7440  ;;  %s4457_s5 = smov (!%p155_p10), 8   ;;  %vm2763_vm6 = vcmask (!%p155_p10), 31744   ;;  %vm2812_vm7 = vcmask (!%p155_p10), 64512  }
  0x10   : > { %vm4635_vm5 = vmor (!%p155_p10), %vm237_vm3, %vm238_vm4  ;;  %s4458_s6 = smov (!%p155_p10), 4   ;;  %s4459_s7 = smov (!%p155_p10), 16   ;;  %vm2845_vm8 = vcmask (!%p155_p10), 97280   ;;  %vm2878_vm9 = vcmask (!%p155_p10), 130048   ;;  %vm2911_vm10 = vcmask (!%p155_p10), 162816   ;;  %vm2944_vm11 = vcmask (!%p155_p10), 195584  }
  0x11   : > { %s4460_s8 = smov (!%p155_p10), 20   ;;  %s4461_s9 = smov (!%p155_p10), 24   ;;  %vm2977_vm12 = vcmask (!%p155_p10), 228352   ;;  %vm3010_vm13 = vcmask (!%p155_p10), 261120   ;;  %vm3063_vm14 = vcmask (!%p155_p10), 293888   ;;  %vm3096_vm15 = vcmask (!%p155_p10), 1041408  }
  0x12   : > { %s4462_s10 = smov (!%p155_p10), 28   ;;  %s4463_s11 = smov (!%p155_p10), 32  }
  0x13   : > { %s4464_s19 = smov (!%p155_p10), [#allocation3]  }
  0x14   : > { %s4380_s21 = sshll.u32 (!%p155_p10), %s4464_s19, 4  ;;  %s4381_s21 = int_to_ptr.vmem [resolvable:$false] %s4380_s21 }
  0x15   : > { %s4382_s23 = scalar_lea.vmem (!%p155_p10), %s4381_s21, 4096 }
  0x16   : > { %s179_s26 = scalar_select %p178_p11, %s4446_s15, 1 }
  0x18   : > { %s4232_s27 = smul.u32 216, %s179_s26 }
  0x1a   : > { %s4546_s30 = scalar_lea.vmem %s6467_s0, %s4232_s27 }
  0x1b   : > { %v3694_v0 = vld [vmem:[%s4546_s30 + $0x6c] sm:$0xf]  ;;  %v4550_v1 = vld [vmem:[%s4546_s30 + $0x70] sm:$0xf]  ;;  %v4563_v12 = vld [vmem:[%s4546_s30 + $0x64] sm:$0xf] }
  0x1c   : > { %v3678_v2 = vld [vmem:[%s4546_s30 + $0xc] sm:$0xf]  ;;  %v1057_v3 = vshll.u32 %v4550_v1, 16  ;;  %v1061_v4 = vshrl.u32 %v4550_v1, 16  ;;  %v3894_v5 = vcombine.low %v3694_v0, %v4550_v1  ;;  %v1048_v6 = vshrl.u32 %v3694_v0, 16 }
  0x1d   : > { %v4557_v7 = vld [vmem:[%s4546_s30 + $0x10] sm:$0xf]  ;;  %v1051_v8 = vshll.u32 %v3694_v0, 16  ;;  %v856_v15 = vshrl.u32 %v3678_v2, 16  ;;  %v859_v16 = vshll.u32 %v3678_v2, 16  ;;  %v749_v22 = vrot.slane %v4563_v12, 5 }
  0x1e   : > { %v865_v9 = vshll.u32 %v4557_v7, 16  ;;  %v869_v10 = vshrl.u32 %v4557_v7, 16  ;;  %v3886_v11 = vcombine.low %v3678_v2, %v4557_v7  ;;  %v4565_v13 = vrot.slane %v1061_v4, 4  ;;  %2331 = vrot.lane.b32.xlu1 %v3894_v5, %s4456_s4  ;;  %v4569_v17 = vld [vmem:[%s4546_s30 + $0x68] sm:$0x1] }
  0x1f   : > { %v1050_v14 = vrot.slane %v1048_v6, 4  ;;  %v1053_v18 = vrot.slane %v1051_v8, 5  ;;  %v632_v20 = vld [vmem:[%s4546_s30 + $0x60] sm:$0xe]  ;;  %v752_v23 = vrot.slane %v4569_v17, 5  ;;  %v858_v24 = vrot.slane %v856_v15, 4 }
  0x20   : > { %v4571_v19 = vrot.slane %v869_v10, 4  ;;  %2315 = vrot.lane.b32.xlu0 %v3886_v11, %s4456_s4  ;;  %v861_v25 = vrot.slane %v859_v16, 5  ;;  %v3670_v26 = vrot.slane %v632_v20, 9  ;;  %v4584_v27 = vld [vmem:[%s4546_s30 + $0x4] sm:$0xf]  ;;  %v442_v28 = vshll.u32 %v4563_v12, 16 }
  0x21   : > { %v1054_v29 = vor.u32 %v1053_v18, %v1050_v14  ;;  %v751_v30 = vrot.slane %v749_v22, 4  ;;  %v4588_v31 = vld [vmem:[%s4546_s30 + $0x8] sm:$0x1]  ;;  %v624_v32 = vld [vmem:[%s4546_s30] sm:$0xe]  ;;  %v693_v33 = vrot.slane %v4584_v27, 5 }
  0x22   : > { %v862_v34 = vor.u32 %v861_v25, %v858_v24  ;;  %v750_v35 = vsel %vm4577_vm2, %v3670_v26, %v749_v22  ;;  %v3662_v36 = vrot.slane %v624_v32, 9  ;;  %v696_v37 = vrot.slane %v4588_v31, 5  ;;  %v4596_v38 = vld [vmem:[%s4546_s30 + $0x70] sm:$0xf]  ;;  %v4599_v39 = vld [vmem:[%s4546_s30 + $0x74] sm:$0x1] }
  0x23   : > { %v4601_v40 = vrot.slane %v1054_v29, 4  ;;  %v753_v41 = vsel %vm4577_vm2, %v751_v30, %v752_v23  ;;  %v695_v42 = vrot.slane %v693_v33, 4  ;;  %v633_v43 = vld [vmem:[%s4546_s30 + $0x6c] sm:$0xe]  ;;  %v756_v44 = vrot.slane %v4596_v38, 5 }
  0x24   : > { %v4607_v45 = vrot.slane %v862_v34, 4  ;;  %v3878_v46 = vcombine.low %v750_v35, %v753_v41  ;;  %v694_v47 = vsel %vm4577_vm2, %v3662_v36, %v693_v33  ;;  %v3671_v48 = vrot.slane %v633_v43, 9  ;;  %v192_v49 = vld [vmem:[%s4546_s30 + $0x10] sm:$0xf]  ;;  %v222_v50 = vld [vmem:[%s4546_s30 + $0x14] sm:$0x1] }
  0x25   : > { %v697_v51 = vsel %vm4577_vm2, %v695_v42, %v696_v37  ;;  %v758_v52 = vrot.slane %v756_v44, 4  ;;  %v759_v53 = vrot.slane %v4599_v39, 5  ;;  %v625_v54 = vld [vmem:[%s4546_s30 + $0xc] sm:$0xe]  ;;  %v700_v55 = vrot.slane %v192_v49, 5 }
  0x26   : > { %2235 = vrot.lane.b32.xlu1 %v3878_v46, %s4457_s5  ;;  %v3870_v56 = vcombine.low %v694_v47, %v697_v51  ;;  %v757_v57 = vsel %vm4577_vm2, %v3671_v48, %v756_v44  ;;  %v3663_v58 = vrot.slane %v625_v54, 9  ;;  %v703_v59 = vrot.slane %v222_v50, 5  ;;  %v191_v60 = vld [vmem:[%s4546_s30 + $0xc] sm:$0xf]  ;;  %v189_v2 = vld [vmem:[%s4546_s30] sm:$0xf] }
  0x27   : > { %v760_v61 = vsel %vm4577_vm2, %v758_v52, %v759_v53  ;;  %v702_v62 = vrot.slane %v700_v55, 4  ;;  %v265_v63 = vshrl.u32 %v191_v60, 16  ;;  %v268_v0 = vshll.u32 %v191_v60, 16  ;;  %v207_v23 = vld [vmem:[%s4546_s30 + $0x6c] sm:$0xf] }
  0x28   : > { %2219 = vrot.lane.b32.xlu0 %v3870_v56, %s4457_s5  ;;  %v3879_v4 = vcombine.low %v757_v57, %v760_v61  ;;  %v701_v5 = vsel %vm4577_vm2, %v3663_v58, %v700_v55  ;;  %v274_v6 = vshll.u32 %v192_v49, 16  ;;  %v278_v8 = vshrl.u32 %v192_v49, 16  ;;  %v205_v52 = vld [vmem:[%s4546_s30 + $0x60] sm:$0xf] }
  0x29   : > { %v704_v10 = vsel %vm4577_vm2, %v702_v62, %v703_v59  ;;  %v267_v11 = vrot.slane %v265_v63, 4  ;;  %v270_v14 = vrot.slane %v268_v0, 5  ;;  %v284_v15 = vshll.u32 %v222_v50, 16 }
  0x2a   : > { %2237 = vrot.lane.b32.xlu1 %v3879_v4, %s4457_s5  ;;  %v3871_v16 = vcombine.low %v701_v5, %v704_v10  ;;  %v276_v18 = vrot.slane %v274_v6, 5  ;;  %v280_v20 = vrot.slane %v278_v8, 4  ;;  %v241_v22 = vshrl.u32 %v189_v2, 16  ;;  %v3696_v4 = vld [vmem:[%s4546_s30 + $0x78] sm:$0xf] }
  0x2b   : > { %v271_v24 = vor.u32 %v270_v14, %v267_v11  ;;  %v286_v25 = vrot.slane %v284_v15, 5  ;;  %v244_v26 = vshll.u32 %v189_v2, 16  ;;  %v250_v29 = vshll.u32 %v4584_v27, 16  ;;  %v4658_v10 = vld [vmem:[%s4546_s30 + $0x7c] sm:$0xf] }
  0x2c   : > { %2221 = vrot.lane.b32.xlu0 %v3871_v16, %s4457_s5  ;;  %v281_v32 = vor.u32 %v280_v20, %v276_v18  ;;  %v243_v33 = vrot.slane %v241_v22, 4  ;;  %v254_v34 = vshrl.u32 %v4584_v27, 16  ;;  %v260_v35 = vshll.u32 %v4588_v31, 16 }
  0x2d   : > { %v272_v36 = vrot.slane %v271_v24, 4  ;;  %v246_v37 = vrot.slane %v244_v26, 5  ;;  %v252_v41 = vrot.slane %v250_v29, 5  ;;  %v457_v42 = vshrl.u32 %v207_v23, 16 }
  0x2e   : > { %v282_v43 = vrot.slane %v281_v32, 4  ;;  %v256_v44 = vrot.slane %v254_v34, 4  ;;  %v262_v46 = vrot.slane %v260_v35, 5  ;;  %v460_v47 = vshll.u32 %v207_v23, 16  ;;  %v4665_v23 = vld [vmem:[%s4546_s30 + $0x18] sm:$0xf] }
  0x2f   : > { %v277_v48 = vsel %vm4635_vm5, %v272_v36, %v276_v18  ;;  %v247_v49 = vor.u32 %v246_v37, %v243_v33  ;;  %v459_v50 = vrot.slane %v457_v42, 4  ;;  %v466_v51 = vshll.u32 %v4596_v38, 16  ;;  %v4676_v35 = vld [vmem:[%s4546_s30 + $0x74] sm:$0x1] }
  0x30   : > { %v287_v27 = vsel %vm4635_vm5, %v282_v43, %v286_v25  ;;  %v257_v31 = vor.u32 %v256_v44, %v252_v41  ;;  %v462_v53 = vrot.slane %v460_v47, 5  ;;  %v470_v54 = vshrl.u32 %v4596_v38, 16 }
  0x31   : > { %v3855_v55 = vcombine.low %v277_v48, %v287_v27  ;;  %v248_v56 = vrot.slane %v247_v49, 4  ;;  %v468_v57 = vrot.slane %v466_v51, 5  ;;  %v476_v58 = vshll.u32 %v4599_v39, 16  ;;  %v4686_v48 = vld [vmem:[%s4546_s30 + $0x14] sm:$0x1] }
  0x32   : > { %v258_v59 = vrot.slane %v257_v31, 4  ;;  %v463_v60 = vor.u32 %v462_v53, %v459_v50  ;;  %v472_v61 = vrot.slane %v470_v54, 4  ;;  %v433_v62 = vshrl.u32 %v205_v52, 16 }
  0x33   : > { %2141 = vrot.lane.b32.xlu1 %v3855_v55, %s4458_s6  ;;  %v253_v63 = vsel %vm4635_vm5, %v248_v56, %v252_v41  ;;  %v478_v0 = vrot.slane %v476_v58, 5  ;;  %v436_v2 = vshll.u32 %v205_v52, 16  ;;  %v444_v38 = vrot.slane %v442_v28, 5 }
  0x34   : > { %v263_v39 = vsel %vm4635_vm5, %v258_v59, %v262_v46  ;;  %v464_v5 = vrot.slane %v463_v60, 4  ;;  %v473_v6 = vor.u32 %v472_v61, %v468_v57  ;;  %v435_v8 = vrot.slane %v433_v62, 4 }
  0x35   : > { %v3854_v11 = vcombine.low %v253_v63, %v263_v39  ;;  %v438_v14 = vrot.slane %v436_v2, 5  ;;  %v446_v15 = vshrl.u32 %v4563_v12, 16  ;;  %v452_v16 = vshll.u32 %v4569_v17, 16  ;;  %v4670_v12 = vld [vmem:[%s4546_s30 + $0x1c] sm:$0xf] }
  0x36   : > { %v469_v28 = vsel %vm4635_vm5, %v464_v5, %v468_v57  ;;  %v474_v18 = vrot.slane %v473_v6, 4  ;;  %v1072_v20 = vshrl.u32 %v3696_v4, 16  ;;  %v1075_v22 = vshll.u32 %v3696_v4, 16  ;;  %v4702_v57 = vld [vmem:[%s4546_s30 + $0x80] sm:$0x1] }
  0x37   : > { %2139 = vrot.lane.b32.xlu0 %v3854_v11, %s4458_s6  ;;  %v439_v24 = vor.u32 %v438_v14, %v435_v8  ;;  %v448_v25 = vrot.slane %v446_v15, 4  ;;  %v454_v26 = vrot.slane %v452_v16, 5  ;;  %v1085_v29 = vshrl.u32 %v4658_v10, 16  ;;  %v3734_v8 = vld [vmem:[%s4546_s30 + $0x6c] sm:$0xe] }
  0x38   : > { %v479_v17 = vsel %vm4635_vm5, %v474_v18, %v478_v0  ;;  %v1074_v32 = vrot.slane %v1072_v20, 4  ;;  %v1077_v33 = vrot.slane %v1075_v22, 5  ;;  %v3895_v34 = vcombine.low %v3696_v4, %v4658_v10  ;;  %v4711_v0 = vld [vmem:[%s4546_s30 + $0x20] sm:$0x1] }
  0x39   : > { %v3863_v36 = vcombine.low %v469_v28, %v479_v17  ;;  %v440_v37 = vrot.slane %v439_v24, 4  ;;  %v449_v41 = vor.u32 %v448_v25, %v444_v38  ;;  %v880_v42 = vshrl.u32 %v4665_v23, 16  ;;  %v3726_v28 = vld [vmem:[%s4546_s30 + $0xc] sm:$0xe]  ;;  %v3735_v17 = vld [vmem:[%s4546_s30 + $0x78] sm:$0xe] }
  0x3a   : > { %v883_v43 = vshll.u32 %v4665_v23, 16  ;;  %v893_v44 = vshrl.u32 %v4670_v12, 16  ;;  %v3887_v46 = vcombine.low %v4665_v23, %v4670_v12  ;;  %v1059_v47 = vrot.slane %v1057_v3, 5 }
  0x3b   : > { %2157 = vrot.lane.b32.xlu1 %v3863_v36, %s4458_s6  ;;  %v445_v49 = vsel %vm4635_vm5, %v440_v37, %v444_v38  ;;  %v450_v50 = vrot.slane %v449_v41, 4  ;;  %v882_v51 = vrot.slane %v880_v42, 4  ;;  %v1067_v52 = vshll.u32 %v4676_v35, 16 }
  0x3c   : > { %v885_v27 = vrot.slane %v883_v43, 5  ;;  %v1060_v31 = vsel %vm4635_vm5, %v4601_v40, %v1059_v47  ;;  %v1064_v53 = vor.u32 %v4565_v13, %v1059_v47  ;;  %v867_v3 = vrot.slane %v865_v9, 5  ;;  %v3727_v47 = vld [vmem:[%s4546_s30 + $0x18] sm:$0xe] }
  0x3d   : > { %v455_v54 = vsel %vm4635_vm5, %v450_v50, %v454_v26  ;;  %v1069_v55 = vrot.slane %v1067_v52, 5  ;;  %v875_v56 = vshll.u32 %v4686_v48, 16  ;;  %v1078_v58 = vor.u32 %v1077_v33, %v1074_v32 }
  0x3e   : > { %v3862_v59 = vcombine.low %v445_v49, %v455_v54  ;;  %v1065_v60 = vrot.slane %v1064_v53, 4  ;;  %v868_v40 = vsel %vm4635_vm5, %v4607_v45, %v867_v3  ;;  %v872_v13 = vor.u32 %v4571_v19, %v867_v3  ;;  %v4753_v53 = vld [vmem:[%s4546_s30 + $0x7c] sm:$0xf] }
  0x3f   : > { %2333 = vrot.lane.b32.xlu1 %v3895_v34, %s4456_s4  ;;  %v877_v9 = vrot.slane %v875_v56, 5  ;;  %v1079_v61 = vrot.slane %v1078_v58, 4  ;;  %v1081_v62 = vshll.u32 %v4658_v10, 16  ;;  %v1087_v63 = vrot.slane %v1085_v29, 4  ;;  %v4760_v58 = vld [vmem:[%s4546_s30 + $0x18] sm:$0xf] }
  0x40   : > { %2155 = vrot.lane.b32.xlu0 %v3862_v59, %s4458_s6  ;;  %v1070_v2 = vsel %vm4635_vm5, %v1065_v60, %v1069_v55  ;;  %v873_v38 = vrot.slane %v872_v13, 4  ;;  %v1091_v45 = vshll.u32 %v4702_v57, 16  ;;  %v886_v19 = vor.u32 %v885_v27, %v882_v51  ;;  %v4746_v51 = vld [vmem:[%s4546_s30 + $0x78] sm:$0xf] }
  0x41   : > { %v3910_v4 = vcombine.low %v1060_v31, %v1070_v2  ;;  %v1083_v39 = vrot.slane %v1081_v62, 5  ;;  %v889_v5 = vshll.u32 %v4670_v12, 16  ;;  %v895_v6 = vrot.slane %v893_v44, 4 }
  0x42   : > { %v878_v11 = vsel %vm4635_vm5, %v873_v38, %v877_v9  ;;  %v1093_v14 = vrot.slane %v1091_v45, 5  ;;  %v887_v15 = vrot.slane %v886_v19, 4  ;;  %v899_v16 = vshll.u32 %v4711_v0, 16  ;;  %v4766_v9 = vld [vmem:[%s4546_s30 + $0x1c] sm:$0xf] }
  0x43   : > { %2411 = vrot.lane.b32.xlu1 %v3910_v4, %s4459_s7  ;;  %v3902_v18 = vcombine.low %v868_v40, %v878_v11  ;;  %v1084_v20 = vsel %vm4635_vm5, %v1079_v61, %v1083_v39  ;;  %v1088_v22 = vor.u32 %v1087_v63, %v1083_v39  ;;  %v891_v23 = vrot.slane %v889_v5, 5  ;;  %v4781_v19 = vld [vmem:[%s4546_s30 + $0x88] sm:$0xf] }
  0x44   : > { %2317 = vrot.lane.b32.xlu0 %v3887_v46, %s4456_s4  ;;  %v901_v24 = vrot.slane %v899_v16, 5  ;;  %v3750_v25 = vrot.slane %v3734_v8, 9  ;;  %v1361_v26 = vrot.slane %v4550_v1, 5  ;;  %v1364_v29 = vrot.slane %v4676_v35, 5  ;;  %v4788_v8 = vld [vmem:[%s4546_s30 + $0x24] sm:$0xf] }
  0x45   : > { %v1089_v32 = vrot.slane %v1088_v22, 4  ;;  %v892_v33 = vsel %vm4635_vm5, %v887_v15, %v891_v23  ;;  %v896_v34 = vor.u32 %v895_v6, %v891_v23  ;;  %v3742_v36 = vrot.slane %v3726_v28, 9  ;;  %v4797_v28 = vld [vmem:[%s4546_s30 + $0x28] sm:$0xf] }
  0x46   : > { %v1362_v37 = vsel %vm4577_vm2, %v3750_v25, %v1361_v26  ;;  %v1363_v41 = vrot.slane %v1361_v26, 4  ;;  %v1305_v42 = vrot.slane %v4557_v7, 5  ;;  %v1308_v43 = vrot.slane %v4686_v48, 5 }
  0x47   : > { %v1094_v1 = vsel %vm4635_vm5, %v1089_v32, %v1093_v14  ;;  %v897_v35 = vrot.slane %v896_v34, 4  ;;  %v3751_v44 = vrot.slane %v3735_v17, 9  ;;  %v1368_v46 = vrot.slane %v4658_v10, 5 }
  0x48   : > { %2395 = vrot.lane.b32.xlu0 %v3902_v18, %s4459_s7  ;;  %v3911_v49 = vcombine.low %v1084_v20, %v1094_v1  ;;  %v1365_v50 = vsel %vm4577_vm2, %v1363_v41, %v1364_v29  ;;  %v1306_v7 = vsel %vm4577_vm2, %v3742_v36, %v1305_v42  ;;  %v1307_v48 = vrot.slane %v1305_v42, 4 }
  0x49   : > { %v902_v52 = vsel %vm4635_vm5, %v897_v35, %v901_v24  ;;  %v3926_v27 = vcombine.low %v1362_v37, %v1365_v50  ;;  %v1369_v10 = vsel %vm4577_vm2, %v3751_v44, %v1368_v46  ;;  %v1370_v31 = vrot.slane %v1368_v46, 4  ;;  %v4802_v24 = vld [vmem:[%s4546_s30 + $0x80] sm:$0x1] }
  0x4a   : > { %2413 = vrot.lane.b32.xlu1 %v3911_v49, %s4459_s7  ;;  %v3903_v3 = vcombine.low %v892_v33, %v902_v52  ;;  %v1309_v54 = vsel %vm4577_vm2, %v1307_v48, %v1308_v43  ;;  %v1371_v55 = vrot.slane %v4702_v57, 5  ;;  %v3743_v56 = vrot.slane %v3727_v47, 9  ;;  %v4813_v37 = vld [vmem:[%s4546_s30 + $0x20] sm:$0x1] }
  0x4b   : > { %v3918_v59 = vcombine.low %v1306_v7, %v1309_v54  ;;  %v1312_v60 = vrot.slane %v4670_v12, 5  ;;  %v1315_v40 = vrot.slane %v4711_v0, 5  ;;  %v1660_v13 = vshrl.u32 %v4746_v51, 16  ;;  %v4776_v12 = vld [vmem:[%s4546_s30 + $0x84] sm:$0xf] }
  0x4c   : > { %2397 = vrot.lane.b32.xlu0 %v3903_v3, %s4459_s7  ;;  %v1372_v61 = vsel %vm4577_vm2, %v1370_v31, %v1371_v55  ;;  %v1663_v57 = vshll.u32 %v4746_v51, 16  ;;  %v1673_v62 = vshrl.u32 %v4753_v53, 16  ;;  %v3942_v63 = vcombine.low %v4746_v51, %v4753_v53 }
  0x4d   : > { %v3927_v0 = vcombine.low %v1369_v10, %v1372_v61  ;;  %v1313_v2 = vsel %vm4577_vm2, %v3743_v56, %v1312_v60  ;;  %v1314_v38 = vrot.slane %v1312_v60, 4  ;;  %v1662_v45 = vrot.slane %v1660_v13, 4 }
  0x4e   : > { %2491 = vrot.lane.b32.xlu1 %v3926_v27, %s4460_s8  ;;  %v1665_v4 = vrot.slane %v1663_v57, 5  ;;  %v1468_v39 = vshrl.u32 %v4760_v58, 16  ;;  %v1471_v5 = vshll.u32 %v4760_v58, 16  ;;  %v1481_v6 = vshrl.u32 %v4766_v9, 16  ;;  %v4822_v27 = vld [vmem:[%s4546_s30 + $0x8c] sm:$0x1] }
  0x4f   : > { %v1316_v11 = vsel %vm4577_vm2, %v1314_v38, %v1315_v40  ;;  %v3934_v14 = vcombine.low %v4760_v58, %v4766_v9  ;;  %v1684_v15 = vshrl.u32 %v4776_v12, 16  ;;  %v1687_v16 = vshll.u32 %v4776_v12, 16  ;;  %v4832_v57 = vld [vmem:[%s4546_s30 + $0x2c] sm:$0x1] }
  0x50   : > { %2475 = vrot.lane.b32.xlu0 %v3918_v59, %s4460_s8  ;;  %v3919_v18 = vcombine.low %v1313_v2, %v1316_v11  ;;  %v1470_v20 = vrot.slane %v1468_v39, 4  ;;  %v1473_v22 = vrot.slane %v1471_v5, 5  ;;  %v1697_v23 = vshrl.u32 %v4781_v19, 16 }
  0x51   : > { %v1686_v25 = vrot.slane %v1684_v15, 4  ;;  %v1689_v26 = vrot.slane %v1687_v16, 5  ;;  %v3943_v29 = vcombine.low %v4776_v12, %v4781_v19  ;;  %v1492_v17 = vshrl.u32 %v4788_v8, 16  ;;  %v3806_v16 = vld [vmem:[%s4546_s30 + $0x18] sm:$0xe] }
  0x52   : > { %2493 = vrot.lane.b32.xlu1 %v3927_v0, %s4460_s8  ;;  %v1495_v32 = vshll.u32 %v4788_v8, 16  ;;  %v1505_v33 = vshrl.u32 %v4797_v28, 16  ;;  %v3935_v34 = vcombine.low %v4788_v8, %v4797_v28  ;;  %v1666_v36 = vor.u32 %v1665_v4, %v1662_v45  ;;  %v3814_v45 = vld [vmem:[%s4546_s30 + $0x78] sm:$0xe] }
  0x53   : > { %v1494_v41 = vrot.slane %v1492_v17, 4  ;;  %v1669_v42 = vshll.u32 %v4753_v53, 16  ;;  %v1675_v43 = vrot.slane %v1673_v62, 4  ;;  %v1679_v1 = vshll.u32 %v4802_v24, 16 }
  0x54   : > { %2477 = vrot.lane.b32.xlu0 %v3919_v18, %s4460_s8  ;;  %v1497_v35 = vrot.slane %v1495_v32, 5  ;;  %v1667_v44 = vrot.slane %v1666_v36, 4  ;;  %v1474_v46 = vor.u32 %v1473_v22, %v1470_v20  ;;  %v1477_v47 = vshll.u32 %v4766_v9, 16 }
  0x55   : > { %v1671_v49 = vrot.slane %v1669_v42, 5  ;;  %v1681_v50 = vrot.slane %v1679_v1, 5  ;;  %v1483_v7 = vrot.slane %v1481_v6, 4  ;;  %v1487_v48 = vshll.u32 %v4813_v37, 16  ;;  %v4856_v42 = vld [vmem:[%s4546_s30 + $0x7c] sm:$0xf] }
  0x56   : > { %2587 = vrot.lane.b32.xlu1 %v3942_v63, %s4461_s9  ;;  %v1475_v51 = vrot.slane %v1474_v46, 4  ;;  %v1479_v52 = vrot.slane %v1477_v47, 5  ;;  %v1690_v10 = vor.u32 %v1689_v26, %v1686_v25  ;;  %v1693_v31 = vshll.u32 %v4781_v19, 16  ;;  %v209_v25 = vld [vmem:[%s4546_s30 + $0x78] sm:$0xf] }
  0x57   : > { %v1672_v3 = vsel %vm4635_vm5, %v1667_v44, %v1671_v49  ;;  %v1676_v54 = vor.u32 %v1675_v43, %v1671_v49  ;;  %v1489_v55 = vrot.slane %v1487_v48, 5  ;;  %v1699_v56 = vrot.slane %v1697_v23, 4  ;;  %v4867_v46 = vld [vmem:[%s4546_s30 + $0x80] sm:$0x1]  ;;  %v193_v49 = vld [vmem:[%s4546_s30 + $0x18] sm:$0xf] }
  0x58   : > { %2571 = vrot.lane.b32.xlu0 %v3934_v14, %s4461_s9  ;;  %v1480_v58 = vsel %vm4635_vm5, %v1475_v51, %v1479_v52  ;;  %v1484_v59 = vor.u32 %v1483_v7, %v1479_v52  ;;  %v1691_v60 = vrot.slane %v1690_v10, 4  ;;  %v1695_v40 = vrot.slane %v1693_v31, 5  ;;  %v4875_v51 = vld [vmem:[%s4546_s30 + $0x1c] sm:$0xf] }
  0x59   : > { %v1677_v13 = vrot.slane %v1676_v54, 4  ;;  %v1703_v61 = vshll.u32 %v4822_v27, 16  ;;  %v1498_v62 = vor.u32 %v1497_v35, %v1494_v41  ;;  %v1501_v63 = vshll.u32 %v4797_v28, 16  ;;  %v4881_v54 = vld [vmem:[%s4546_s30 + $0x20] sm:$0x1] }
  0x5a   : > { %2589 = vrot.lane.b32.xlu1 %v3943_v29, %s4461_s9  ;;  %v1485_v12 = vrot.slane %v1484_v59, 4  ;;  %v1696_v0 = vsel %vm4635_vm5, %v1691_v60, %v1695_v40  ;;  %v1700_v2 = vor.u32 %v1699_v56, %v1695_v40  ;;  %v1507_v38 = vrot.slane %v1505_v33, 4 }
  0x5b   : > { %v1682_v4 = vsel %vm4635_vm5, %v1677_v13, %v1681_v50  ;;  %v1705_v39 = vrot.slane %v1703_v61, 5  ;;  %v1499_v5 = vrot.slane %v1498_v62, 4  ;;  %v1503_v6 = vrot.slane %v1501_v63, 5  ;;  %v3815_v62 = vld [vmem:[%s4546_s30 + $0x84] sm:$0xe] }
  0x5c   : > { %2573 = vrot.lane.b32.xlu0 %v3935_v34, %s4461_s9  ;;  %v3958_v8 = vcombine.low %v1672_v3, %v1682_v4  ;;  %v1490_v11 = vsel %vm4635_vm5, %v1485_v12, %v1489_v55  ;;  %v1701_v14 = vrot.slane %v1700_v2, 4  ;;  %v1511_v15 = vshll.u32 %v4832_v57, 16 }
  0x5d   : > { %v3950_v18 = vcombine.low %v1480_v58, %v1490_v11  ;;  %v1504_v20 = vsel %vm4635_vm5, %v1499_v5, %v1503_v6  ;;  %v1508_v22 = vor.u32 %v1507_v38, %v1503_v6  ;;  %v3830_v23 = vrot.slane %v3814_v45, 9  ;;  %v3807_v5 = vld [vmem:[%s4546_s30 + $0x24] sm:$0xe] }
  0x5e   : > { %2667 = vrot.lane.b32.xlu1 %v3958_v8, %s4462_s10  ;;  %v1706_v26 = vsel %vm4635_vm5, %v1701_v14, %v1705_v39  ;;  %v1513_v29 = vrot.slane %v1511_v15, 5  ;;  %v1973_v17 = vrot.slane %v4753_v53, 5  ;;  %v1976_v32 = vrot.slane %v4802_v24, 5 }
  0x5f   : > { %v3959_v33 = vcombine.low %v1696_v0, %v1706_v26  ;;  %v1509_v34 = vrot.slane %v1508_v22, 4  ;;  %v3822_v36 = vrot.slane %v3806_v16, 9  ;;  %v1917_v41 = vrot.slane %v4766_v9, 5  ;;  %v211_v22 = vld [vmem:[%s4546_s30 + $0x84] sm:$0xf] }
  0x60   : > { %2651 = vrot.lane.b32.xlu0 %v3950_v18, %s4462_s10  ;;  %v1974_v43 = vsel %vm4577_vm2, %v3830_v23, %v1973_v17  ;;  %v1975_v1 = vrot.slane %v1973_v17, 4  ;;  %v1920_v35 = vrot.slane %v4813_v37, 5  ;;  %v481_v53 = vshrl.u32 %v209_v25, 16 }
  0x61   : > { %v1514_v24 = vsel %vm4635_vm5, %v1509_v34, %v1513_v29  ;;  %v1918_v44 = vsel %vm4577_vm2, %v3822_v36, %v1917_v41  ;;  %v1919_v9 = vrot.slane %v1917_v41, 4  ;;  %v484_v47 = vshll.u32 %v209_v25, 16  ;;  %v4904_v34 = vld [vmem:[%s4546_s30 + $0x88] sm:$0xf] }
  0x62   : > { %2669 = vrot.lane.b32.xlu1 %v3959_v33, %s4462_s10  ;;  %v3951_v50 = vcombine.low %v1504_v20, %v1514_v24  ;;  %v1977_v7 = vsel %vm4577_vm2, %v1975_v1, %v1976_v32  ;;  %v483_v37 = vrot.slane %v481_v53, 4  ;;  %v490_v48 = vshll.u32 %v4856_v42, 16  ;;  %v195_v24 = vld [vmem:[%s4546_s30 + $0x24] sm:$0xf] }
  0x63   : > { %v3974_v52 = vcombine.low %v1974_v43, %v1977_v7  ;;  %v1921_v10 = vsel %vm4577_vm2, %v1919_v9, %v1920_v35  ;;  %v486_v31 = vrot.slane %v484_v47, 5  ;;  %v494_v3 = vshrl.u32 %v4856_v42, 16  ;;  %v4909_v43 = vld [vmem:[%s4546_s30 + $0x8c] sm:$0x1] }
  0x64   : > { %2653 = vrot.lane.b32.xlu0 %v3951_v50, %s4462_s10  ;;  %v3966_v55 = vcombine.low %v1918_v44, %v1921_v10  ;;  %v492_v56 = vrot.slane %v490_v48, 5  ;;  %v500_v58 = vshll.u32 %v4867_v46, 16  ;;  %v289_v59 = vshrl.u32 %v193_v49, 16  ;;  %v4921_v50 = vld [vmem:[%s4546_s30 + $0x28] sm:$0xf] }
  0x65   : > { %v487_v60 = vor.u32 %v486_v31, %v483_v37  ;;  %v496_v40 = vrot.slane %v494_v3, 4  ;;  %v292_v13 = vshll.u32 %v193_v49, 16  ;;  %v298_v61 = vshll.u32 %v4875_v51, 16  ;;  %v4928_v10 = vld [vmem:[%s4546_s30 + $0x2c] sm:$0x1] }
  0x66   : > { %2747 = vrot.lane.b32.xlu1 %v3974_v52, %s4463_s11  ;;  %v502_v63 = vrot.slane %v500_v58, 5  ;;  %v291_v12 = vrot.slane %v289_v59, 4  ;;  %v302_v0 = vshrl.u32 %v4875_v51, 16  ;;  %v308_v2 = vshll.u32 %v4881_v54, 16  ;;  %v634_v58 = vld [vmem:[%s4546_s30 + $0x78] sm:$0xe] }
  0x67   : > { %v488_v38 = vrot.slane %v487_v60, 4  ;;  %v497_v45 = vor.u32 %v496_v40, %v492_v56  ;;  %v294_v4 = vrot.slane %v292_v13, 5  ;;  %v300_v39 = vrot.slane %v298_v61, 5  ;;  %v4321_v59 = vld [vmem:[%s6468_s1] sm:$0xff]  }
  0x68   : > { %2731 = vrot.lane.b32.xlu0 %v3966_v55, %s4463_s11  ;;  %v304_v6 = vrot.slane %v302_v0, 4  ;;  %v310_v8 = vrot.slane %v308_v2, 5  ;;  %v3831_v11 = vrot.slane %v3815_v62, 9  ;;  %v1980_v14 = vrot.slane %v4781_v19, 5  ;;  %v626_v2 = vld [vmem:[%s4546_s30 + $0x18] sm:$0xe]  ;;  %4186 = vmatprep.subr.bf16.mxu0 %v4321_v59 }
  0x69   : > { %v493_v15 = vsel %vm4635_vm5, %v488_v38, %v492_v56  ;;  %v498_v16 = vrot.slane %v497_v45, 4  ;;  %v295_v18 = vor.u32 %v294_v4, %v291_v12  ;;  %v1983_v20 = vrot.slane %v4822_v27, 5  ;;  %4224 = vmatprep.subr.bf16.mxu1 %v4321_v59  ;;  %4187 = vmatpush3.bf16.msra.mxu0 %v4321_v59 }
  0x6a   : > { %v305_v23 = vor.u32 %v304_v6, %v300_v39  ;;  %v1981_v25 = vsel %vm4577_vm2, %v3831_v11, %v1980_v14  ;;  %v1982_v26 = vrot.slane %v1980_v14, 4  ;;  %v3823_v29 = vrot.slane %v3807_v5, 9  ;;  %v4324_v5 = vld [vmem:[%s6468_s1 + $0x8] sm:$0xff]   ;;  %4227 = vmatpush3.bf16.msra.mxu1 %v4321_v59 }
  0x6b   : > { %v503_v17 = vsel %vm4635_vm5, %v498_v16, %v502_v63  ;;  %v296_v19 = vrot.slane %v295_v18, 4  ;;  %v1924_v32 = vrot.slane %v4797_v28, 5  ;;  %v1927_v33 = vrot.slane %v4832_v57, 5  ;;  %4188 = vmatprep.subr.bf16.mxu0 %v4324_v5  ;;  %4225 = vmatprep.subr.bf16.mxu1 %v4324_v5 }
  0x6c   : > { %v3864_v27 = vcombine.low %v493_v15, %v503_v17  ;;  %v306_v36 = vrot.slane %v305_v23, 4  ;;  %v1984_v41 = vsel %vm4577_vm2, %v1982_v26, %v1983_v20  ;;  %v505_v1 = vshrl.u32 %v211_v22, 16 }
  0x6d   : > { %v301_v35 = vsel %vm4635_vm5, %v296_v19, %v300_v39  ;;  %v3975_v53 = vcombine.low %v1981_v25, %v1984_v41  ;;  %v1925_v28 = vsel %vm4577_vm2, %v3823_v29, %v1924_v32  ;;  %v1926_v57 = vrot.slane %v1924_v32, 4  ;;  %v627_v32 = vld [vmem:[%s4546_s30 + $0x24] sm:$0xe]  ;;  %4189 = vmatpush3.bf16.msra.mxu0 %v4324_v5 }
  0x6e   : > { %2159 = vrot.lane.b32.xlu1 %v3864_v27, %s4458_s6  ;;  %v311_v44 = vsel %vm4635_vm5, %v306_v36, %v310_v8  ;;  %v507_v9 = vrot.slane %v505_v1, 4  ;;  %v508_v47 = vshll.u32 %v211_v22, 16  ;;  %v514_v49 = vshll.u32 %v4904_v34, 16  ;;  %v635_v22 = vld [vmem:[%s4546_s30 + $0x84] sm:$0xe]  ;;  %4228 = vmatpush3.bf16.msra.mxu1 %v4324_v5 }
  0x6f   : > { %v3856_v7 = vcombine.low %v301_v35, %v311_v44  ;;  %v1928_v37 = vsel %vm4577_vm2, %v1926_v57, %v1927_v33  ;;  %v518_v48 = vshrl.u32 %v4904_v34, 16  ;;  %v524_v52 = vshll.u32 %v4909_v43, 16 }
  0x70   : > { %v3967_v31 = vcombine.low %v1925_v28, %v1928_v37  ;;  %v510_v3 = vrot.slane %v508_v47, 5  ;;  %v516_v55 = vrot.slane %v514_v49, 5  ;;  %v313_v56 = vshrl.u32 %v195_v24, 16 }
  0x71   : > { %2143 = vrot.lane.b32.xlu0 %v3856_v7, %s4458_s6  ;;  %v520_v60 = vrot.slane %v518_v48, 4  ;;  %v526_v40 = vrot.slane %v524_v52, 5  ;;  %v316_v13 = vshll.u32 %v195_v24, 16  ;;  %v322_v61 = vshll.u32 %v4921_v50, 16  ;;  %v4978_v48 = vld [vmem:[%s4546_s30 + $0x24] sm:$0xf] }
  0x72   : > { %2749 = vrot.lane.b32.xlu1 %v3975_v53, %s4463_s11  ;;  %v511_v62 = vor.u32 %v510_v3, %v507_v9  ;;  %v315_v63 = vrot.slane %v313_v56, 4  ;;  %v326_v12 = vshrl.u32 %v4921_v50, 16  ;;  %v332_v0 = vshll.u32 %v4928_v10, 16  ;;  %v4971_v9 = vld [vmem:[%s4546_s30 + $0x88] sm:$0xf] }
  0x73   : > { %v521_v38 = vor.u32 %v520_v60, %v516_v55  ;;  %v318_v45 = vrot.slane %v316_v13, 5  ;;  %v324_v4 = vrot.slane %v322_v61, 5  ;;  %v3672_v39 = vrot.slane %v634_v58, 9  ;;  %v4989_v56 = vld [vmem:[%s4546_s30 + $0x28] sm:$0xf] }
  0x74   : > { %v512_v6 = vrot.slane %v511_v62, 4  ;;  %v328_v8 = vrot.slane %v326_v12, 4  ;;  %v334_v11 = vrot.slane %v332_v0, 5  ;;  %v763_v14 = vrot.slane %v4856_v42, 5  ;;  %v3700_v13 = vld [vmem:[%s4546_s30 + $0x90] sm:$0xf] }
  0x75   : > { %2733 = vrot.lane.b32.xlu0 %v3967_v31, %s4463_s11  ;;  %v522_v15 = vrot.slane %v521_v38, 4  ;;  %v319_v16 = vor.u32 %v318_v45, %v315_v63  ;;  %v766_v18 = vrot.slane %v4867_v46, 5  ;;  %v3664_v20 = vrot.slane %v626_v2, 9  ;;  %v4999_v61 = vld [vmem:[%s4546_s30 + $0x94] sm:$0xf] }
  0x76   : > { %v517_v23 = vsel %vm4635_vm5, %v512_v6, %v516_v55  ;;  %v329_v25 = vor.u32 %v328_v8, %v324_v4  ;;  %v764_v26 = vsel %vm4577_vm2, %v3672_v39, %v763_v14  ;;  %v765_v29 = vrot.slane %v763_v14, 4  ;;  %v5005_v2 = vld [vmem:[%s4546_s30 + $0x30] sm:$0xf]  ;;  %v5008_v38 = vld [vmem:[%s4546_s30 + $0x34] sm:$0xf] }
  0x77   : > { %v527_v42 = vsel %vm4635_vm5, %v522_v15, %v526_v40  ;;  %v320_v17 = vrot.slane %v319_v16, 4  ;;  %v707_v19 = vrot.slane %v4875_v51, 5  ;;  %v710_v46 = vrot.slane %v4881_v54, 5  ;;  %v4963_v54 = vld [vmem:[%s4546_s30 + $0x84] sm:$0xf] }
  0x78   : > { %v3865_v33 = vcombine.low %v517_v23, %v527_v42  ;;  %v330_v27 = vrot.slane %v329_v25, 4  ;;  %v767_v36 = vsel %vm4577_vm2, %v765_v29, %v766_v18  ;;  %v3673_v41 = vrot.slane %v635_v22, 9  ;;  %v5021_v22 = vld [vmem:[%s4546_s30 + $0x8c] sm:$0x1] }
  0x79   : > { %v325_v1 = vsel %vm4635_vm5, %v320_v17, %v324_v4  ;;  %v3880_v35 = vcombine.low %v764_v26, %v767_v36  ;;  %v708_v51 = vsel %vm4577_vm2, %v3664_v20, %v707_v19  ;;  %v709_v53 = vrot.slane %v707_v19, 4  ;;  %v5026_v42 = vld [vmem:[%s4546_s30 + $0x2c] sm:$0x1] }
  0x7a   : > { %2161 = vrot.lane.b32.xlu1 %v3865_v33, %s4458_s6  ;;  %v335_v28 = vsel %vm4635_vm5, %v330_v27, %v334_v11  ;;  %v770_v57 = vrot.slane %v4904_v34, 5  ;;  %v773_v24 = vrot.slane %v4909_v43, 5  ;;  %v3665_v44 = vrot.slane %v627_v32, 9 }
  0x7b   : > { %v3857_v47 = vcombine.low %v325_v1, %v335_v28  ;;  %v711_v49 = vsel %vm4577_vm2, %v709_v53, %v710_v46  ;;  %v714_v7 = vrot.slane %v4921_v50, 5  ;;  %v717_v37 = vrot.slane %v4928_v10, 5 }
  0x7c   : > { %v3872_v52 = vcombine.low %v708_v51, %v711_v49  ;;  %v771_v34 = vsel %vm4577_vm2, %v3673_v41, %v770_v57  ;;  %v772_v43 = vrot.slane %v770_v57, 4  ;;  %v1096_v31 = vshrl.u32 %v4963_v54, 16 }
  0x7d   : > { %2145 = vrot.lane.b32.xlu0 %v3857_v47, %s4458_s6  ;;  %v715_v3 = vsel %vm4577_vm2, %v3665_v44, %v714_v7  ;;  %v716_v50 = vrot.slane %v714_v7, 4  ;;  %v1099_v10 = vshll.u32 %v4963_v54, 16  ;;  %v1109_v55 = vshrl.u32 %v4971_v9, 16 }
  0x7e   : > { %2239 = vrot.lane.b32.xlu1 %v3880_v35, %s4457_s5  ;;  %v774_v58 = vsel %vm4577_vm2, %v772_v43, %v773_v24  ;;  %v1098_v59 = vrot.slane %v1096_v31, 4  ;;  %v3896_v60 = vcombine.low %v4963_v54, %v4971_v9  ;;  %v904_v40 = vshrl.u32 %v4978_v48, 16  ;;  %v5035_v24 = vld [vmem:[%s4546_s30 + $0x98] sm:$0x1] }
  0x7f   : > { %v3881_v62 = vcombine.low %v771_v34, %v774_v58  ;;  %v718_v63 = vsel %vm4577_vm2, %v716_v50, %v717_v37  ;;  %v1101_v12 = vrot.slane %v1099_v10, 5  ;;  %v907_v0 = vshll.u32 %v4978_v48, 16  ;;  %v5046_v50 = vld [vmem:[%s4546_s30 + $0x38] sm:$0x1] }
  0x80   : > { %v3873_v45 = vcombine.low %v715_v3, %v718_v63  ;;  %v906_v4 = vrot.slane %v904_v40, 4  ;;  %v917_v39 = vshrl.u32 %v4989_v56, 16  ;;  %v3888_v5 = vcombine.low %v4978_v48, %v4989_v56 }
  0x81   : > { %2223 = vrot.lane.b32.xlu0 %v3872_v52, %s4457_s5  ;;  %v909_v6 = vrot.slane %v907_v0, 5  ;;  %v1120_v8 = vshrl.u32 %v3700_v13, 16  ;;  %v1123_v11 = vshll.u32 %v3700_v13, 16  ;;  %v1133_v14 = vshrl.u32 %v4999_v61, 16 }
  0x82   : > { %2241 = vrot.lane.b32.xlu1 %v3881_v62, %s4457_s5  ;;  %v3897_v15 = vcombine.low %v3700_v13, %v4999_v61  ;;  %v928_v16 = vshrl.u32 %v5005_v2, 16  ;;  %v931_v18 = vshll.u32 %v5005_v2, 16  ;;  %v941_v20 = vshrl.u32 %v5008_v38, 16  ;;  %v3736_v13 = vld [vmem:[%s4546_s30 + $0x84] sm:$0xe] }
  0x83   : > { %v1122_v23 = vrot.slane %v1120_v8, 4  ;;  %v1125_v25 = vrot.slane %v1123_v11, 5  ;;  %v3889_v26 = vcombine.low %v5005_v2, %v5008_v38  ;;  %v1102_v29 = vor.u32 %v1101_v12, %v1098_v59 }
  0x84   : > { %v930_v17 = vrot.slane %v928_v16, 4  ;;  %v933_v19 = vrot.slane %v931_v18, 5  ;;  %v1105_v46 = vshll.u32 %v4971_v9, 16  ;;  %v1111_v32 = vrot.slane %v1109_v55, 4 }
  0x85   : > { %2225 = vrot.lane.b32.xlu0 %v3873_v45, %s4457_s5  ;;  %v1103_v33 = vrot.slane %v1102_v29, 4  ;;  %v1115_v27 = vshll.u32 %v5021_v22, 16  ;;  %v910_v36 = vor.u32 %v909_v6, %v906_v4  ;;  %v913_v41 = vshll.u32 %v4989_v56, 16 }
  0x86   : > { %2335 = vrot.lane.b32.xlu1 %v3896_v60, %s4456_s4  ;;  %v1107_v1 = vrot.slane %v1105_v46, 5  ;;  %v919_v35 = vrot.slane %v917_v39, 4  ;;  %v923_v51 = vshll.u32 %v5026_v42, 16  ;;  %v1126_v53 = vor.u32 %v1125_v25, %v1122_v23 }
  0x87   : > { %v1117_v54 = vrot.slane %v1115_v27, 5  ;;  %v911_v28 = vrot.slane %v910_v36, 4  ;;  %v915_v57 = vrot.slane %v913_v41, 5  ;;  %v1129_v44 = vshll.u32 %v4999_v61, 16  ;;  %v5079_v41 = vld [vmem:[%s4546_s30 + $0x90] sm:$0xf] }
  0x88   : > { %v1108_v47 = vsel %vm4635_vm5, %v1103_v33, %v1107_v1  ;;  %v1112_v49 = vor.u32 %v1111_v32, %v1107_v1  ;;  %v925_v7 = vrot.slane %v923_v51, 5  ;;  %v1127_v37 = vrot.slane %v1126_v53, 4  ;;  %v5086_v53 = vld [vmem:[%s4546_s30 + $0x94] sm:$0xf] }
  0x89   : > { %2319 = vrot.lane.b32.xlu0 %v3888_v5, %s4456_s4  ;;  %v916_v48 = vsel %vm4635_vm5, %v911_v28, %v915_v57  ;;  %v920_v52 = vor.u32 %v919_v35, %v915_v57  ;;  %v1131_v34 = vrot.slane %v1129_v44, 5  ;;  %v1135_v43 = vrot.slane %v1133_v14, 4  ;;  %v3728_v5 = vld [vmem:[%s4546_s30 + $0x24] sm:$0xe]  ;;  %v5093_v44 = vld [vmem:[%s4546_s30 + $0x30] sm:$0xf] }
  0x8a   : > { %2337 = vrot.lane.b32.xlu1 %v3897_v15, %s4456_s4  ;;  %v1113_v31 = vrot.slane %v1112_v49, 4  ;;  %v1139_v3 = vshll.u32 %v5035_v24, 16  ;;  %v934_v10 = vor.u32 %v933_v19, %v930_v17  ;;  %v937_v55 = vshll.u32 %v5008_v38, 16  ;;  %v3737_v15 = vld [vmem:[%s4546_s30 + $0x90] sm:$0xe] }
  0x8b   : > { %v921_v58 = vrot.slane %v920_v52, 4  ;;  %v1132_v59 = vsel %vm4635_vm5, %v1127_v37, %v1131_v34  ;;  %v1136_v60 = vor.u32 %v1135_v43, %v1131_v34  ;;  %v943_v40 = vrot.slane %v941_v20, 4  ;;  %v3729_v19 = vld [vmem:[%s4546_s30 + $0x30] sm:$0xe]  ;;  %v5100_v37 = vld [vmem:[%s4546_s30 + $0x34] sm:$0xf] }
  0x8c   : > { %v1118_v62 = vsel %vm4635_vm5, %v1113_v31, %v1117_v54  ;;  %v1141_v63 = vrot.slane %v1139_v3, 5  ;;  %v935_v12 = vrot.slane %v934_v10, 4  ;;  %v939_v0 = vrot.slane %v937_v55, 5 }
  0x8d   : > { %2321 = vrot.lane.b32.xlu0 %v3889_v26, %s4456_s4  ;;  %v3912_v2 = vcombine.low %v1108_v47, %v1118_v62  ;;  %v926_v45 = vsel %vm4635_vm5, %v921_v58, %v925_v7  ;;  %v1137_v4 = vrot.slane %v1136_v60, 4  ;;  %v947_v39 = vshll.u32 %v5046_v50, 16  ;;  %v5117_v58 = vld [vmem:[%s4546_s30 + $0xa0] sm:$0xf]  ;;  %v5123_v62 = vld [vmem:[%s4546_s30 + $0x3c] sm:$0xf] }
  0x8e   : > { %v3904_v6 = vcombine.low %v916_v48, %v926_v45  ;;  %v940_v8 = vsel %vm4635_vm5, %v935_v12, %v939_v0  ;;  %v944_v11 = vor.u32 %v943_v40, %v939_v0  ;;  %v3752_v14 = vrot.slane %v3736_v13, 9  ;;  %v5133_v45 = vld [vmem:[%s4546_s30 + $0x40] sm:$0xf] }
  0x8f   : > { %2415 = vrot.lane.b32.xlu1 %v3912_v2, %s4459_s7  ;;  %v1142_v16 = vsel %vm4635_vm5, %v1137_v4, %v1141_v63  ;;  %v949_v18 = vrot.slane %v947_v39, 5  ;;  %v1375_v20 = vrot.slane %v4971_v9, 5  ;;  %v1378_v23 = vrot.slane %v5021_v22, 5 }
  0x90   : > { %v3913_v25 = vcombine.low %v1132_v59, %v1142_v16  ;;  %v945_v26 = vrot.slane %v944_v11, 4  ;;  %v3744_v29 = vrot.slane %v3728_v5, 9  ;;  %v1319_v17 = vrot.slane %v4989_v56, 5  ;;  %v5102_v48 = vpop.permute.xlu1 %2331 }
  0x91   : > { %2399 = vrot.lane.b32.xlu0 %v3904_v6, %s4459_s7  ;;  %v1376_v46 = vsel %vm4577_vm2, %v3752_v14, %v1375_v20  ;;  %v1377_v32 = vrot.slane %v1375_v20, 4  ;;  %v1322_v33 = vrot.slane %v5026_v42, 5  ;;  %v3753_v27 = vrot.slane %v3737_v15, 9 }
  0x92   : > { %v950_v9 = vsel %vm4635_vm5, %v945_v26, %v949_v18  ;;  %v1320_v22 = vsel %vm4577_vm2, %v3744_v29, %v1319_v17  ;;  %v1321_v36 = vrot.slane %v1319_v17, 4  ;;  %v1382_v56 = vrot.slane %v4999_v61, 5  ;;  %v5139_v11 = vpop.permute.xlu0 %2315  ;;  %v5152_v17 = vld [vmem:[%s4546_s30 + $0x38] sm:$0x1] }
  0x93   : > { %2417 = vrot.lane.b32.xlu1 %v3913_v25, %s4459_s7  ;;  %v3905_v1 = vcombine.low %v940_v8, %v950_v9  ;;  %v1379_v42 = vsel %vm4577_vm2, %v1377_v32, %v1378_v23  ;;  %v1385_v35 = vrot.slane %v5035_v24, 5  ;;  %v3745_v51 = vrot.slane %v3729_v19, 9  ;;  %v5137_v8 = vld [vmem:[%s4546_s30 + $0x98] sm:$0x1] }
  0x94   : > { %v3928_v54 = vcombine.low %v1376_v46, %v1379_v42  ;;  %v1323_v28 = vsel %vm4577_vm2, %v1321_v36, %v1322_v33  ;;  %v1383_v61 = vsel %vm4577_vm2, %v3753_v27, %v1382_v56  ;;  %v1384_v57 = vrot.slane %v1382_v56, 4 }
  0x95   : > { %2401 = vrot.lane.b32.xlu0 %v3905_v1, %s4459_s7  ;;  %v3920_v47 = vcombine.low %v1320_v22, %v1323_v28  ;;  %v1326_v24 = vrot.slane %v5008_v38, 5  ;;  %v1329_v49 = vrot.slane %v5046_v50, 5  ;;  %v1708_v7 = vshrl.u32 %v5079_v41, 16  ;;  %v5111_v38 = vld [vmem:[%s4546_s30 + $0x9c] sm:$0xf] }
  0x96   : > { %v1386_v52 = vsel %vm4577_vm2, %v1384_v57, %v1385_v35  ;;  %v1711_v34 = vshll.u32 %v5079_v41, 16  ;;  %v1721_v43 = vshrl.u32 %v5086_v53, 16  ;;  %v3944_v31 = vcombine.low %v5079_v41, %v5086_v53 }
  0x97   : > { %2495 = vrot.lane.b32.xlu1 %v3928_v54, %s4460_s8  ;;  %v3929_v3 = vcombine.low %v1383_v61, %v1386_v52  ;;  %v1327_v50 = vsel %vm4577_vm2, %v3745_v51, %v1326_v24  ;;  %v1328_v10 = vrot.slane %v1326_v24, 4  ;;  %v1710_v55 = vrot.slane %v1708_v7, 4  ;;  %v5161_v54 = vld [vmem:[%s4546_s30 + $0xa4] sm:$0x1] }
  0x98   : > { %v1713_v59 = vrot.slane %v1711_v34, 5  ;;  %v1516_v60 = vshrl.u32 %v5093_v44, 16  ;;  %v1519_v40 = vshll.u32 %v5093_v44, 16  ;;  %v1529_v13 = vshrl.u32 %v5100_v37, 16  ;;  %v5145_v20 = vpop.permute.xlu1 %2235 }
  0x99   : > { %2479 = vrot.lane.b32.xlu0 %v3920_v47, %s4460_s8  ;;  %v1330_v63 = vsel %vm4577_vm2, %v1328_v10, %v1329_v49  ;;  %v3936_v12 = vcombine.low %v5093_v44, %v5100_v37  ;;  %v1732_v0 = vshrl.u32 %v5111_v38, 16  ;;  %v1735_v2 = vshll.u32 %v5111_v38, 16 }
  0x9a   : > { %v3921_v4 = vcombine.low %v1327_v50, %v1330_v63  ;;  %v1518_v39 = vrot.slane %v1516_v60, 4  ;;  %v1521_v5 = vrot.slane %v1519_v40, 5  ;;  %v1745_v6 = vshrl.u32 %v5117_v58, 16  ;;  %v5164_v57 = vpop.permute.xlu0 %2219  ;;  %v5176_v50 = vld [vmem:[%s4546_s30 + $0x44] sm:$0x1] }
  0x9b   : > { %2497 = vrot.lane.b32.xlu1 %v3929_v3, %s4460_s8  ;;  %v1734_v14 = vrot.slane %v1732_v0, 4  ;;  %v1737_v15 = vrot.slane %v1735_v2, 5  ;;  %v3945_v16 = vcombine.low %v5111_v38, %v5117_v58  ;;  %v1540_v18 = vshrl.u32 %v5123_v62, 16 }
  0x9c   : > { %v1543_v23 = vshll.u32 %v5123_v62, 16  ;;  %v1553_v25 = vshrl.u32 %v5133_v45, 16  ;;  %v3937_v26 = vcombine.low %v5123_v62, %v5133_v45  ;;  %v1714_v29 = vor.u32 %v1713_v59, %v1710_v55  ;;  %v5169_v7 = vpop.permute.xlu1 %2237  ;;  %v3816_v62 = vld [vmem:[%s4546_s30 + $0x90] sm:$0xe] }
  0x9d   : > { %2481 = vrot.lane.b32.xlu0 %v3921_v4, %s4460_s8  ;;  %v1542_v19 = vrot.slane %v1540_v18, 4  ;;  %v1717_v46 = vshll.u32 %v5086_v53, 16  ;;  %v1723_v32 = vrot.slane %v1721_v43, 4  ;;  %v1727_v33 = vshll.u32 %v5137_v8, 16 }
  0x9e   : > { %v1545_v27 = vrot.slane %v1543_v23, 5  ;;  %v1715_v9 = vrot.slane %v1714_v29, 4  ;;  %v1522_v22 = vor.u32 %v1521_v5, %v1518_v39  ;;  %v1525_v36 = vshll.u32 %v5100_v37, 16 }
  0x9f   : > { %2591 = vrot.lane.b32.xlu1 %v3944_v31, %s4461_s9  ;;  %v1719_v56 = vrot.slane %v1717_v46, 5  ;;  %v1729_v41 = vrot.slane %v1727_v33, 5  ;;  %v1531_v1 = vrot.slane %v1529_v13, 4  ;;  %v1535_v42 = vshll.u32 %v5152_v17, 16 }
  0xa0   : > { %v1523_v35 = vrot.slane %v1522_v22, 4  ;;  %v1527_v51 = vrot.slane %v1525_v36, 5  ;;  %v1738_v28 = vor.u32 %v1737_v15, %v1734_v14  ;;  %v1741_v61 = vshll.u32 %v5117_v58, 16  ;;  %v3808_v14 = vld [vmem:[%s4546_s30 + $0x30] sm:$0xe]  ;;  %v5189_v15 = vpop.permute.xlu0 %2221 }
  0xa1   : > { %2575 = vrot.lane.b32.xlu0 %v3936_v12, %s4461_s9  ;;  %v1720_v44 = vsel %vm4635_vm5, %v1715_v9, %v1719_v56  ;;  %v1724_v47 = vor.u32 %v1723_v32, %v1719_v56  ;;  %v1537_v24 = vrot.slane %v1535_v42, 5  ;;  %v1747_v49 = vrot.slane %v1745_v6, 4  ;;  %v5204_v56 = vld [vmem:[%s4546_s30 + $0x94] sm:$0xf] }
  0xa2   : > { %v1528_v52 = vsel %vm4635_vm5, %v1523_v35, %v1527_v51  ;;  %v1532_v34 = vor.u32 %v1531_v1, %v1527_v51  ;;  %v1739_v43 = vrot.slane %v1738_v28, 4  ;;  %v1743_v31 = vrot.slane %v1741_v61, 5  ;;  %v5214_v28 = vld [vmem:[%s4546_s30 + $0x98] sm:$0x1]  ;;  %v197_v61 = vld [vmem:[%s4546_s30 + $0x30] sm:$0xf] }
  0xa3   : > { %2593 = vrot.lane.b32.xlu1 %v3945_v16, %s4461_s9  ;;  %v1725_v38 = vrot.slane %v1724_v47, 4  ;;  %v1751_v3 = vshll.u32 %v5161_v54, 16  ;;  %v1546_v10 = vor.u32 %v1545_v27, %v1542_v19  ;;  %v1549_v55 = vshll.u32 %v5133_v45, 16 }
  0xa4   : > { %v1533_v59 = vrot.slane %v1532_v34, 4  ;;  %v1744_v60 = vsel %vm4635_vm5, %v1739_v43, %v1743_v31  ;;  %v1748_v40 = vor.u32 %v1747_v49, %v1743_v31  ;;  %v1555_v13 = vrot.slane %v1553_v25, 4  ;;  %v5222_v49 = vld [vmem:[%s4546_s30 + $0x34] sm:$0xf] }
  0xa5   : > { %2577 = vrot.lane.b32.xlu0 %v3937_v26, %s4461_s9  ;;  %v1730_v63 = vsel %vm4635_vm5, %v1725_v38, %v1729_v41  ;;  %v1753_v12 = vrot.slane %v1751_v3, 5  ;;  %v1547_v0 = vrot.slane %v1546_v10, 4  ;;  %v1551_v2 = vrot.slane %v1549_v55, 5  ;;  %v213_v26 = vld [vmem:[%s4546_s30 + $0x90] sm:$0xf]  ;;  %v5194_v29 = vpop.permute.xlu1 %2141 }
  0xa6   : > { %v3960_v4 = vcombine.low %v1720_v44, %v1730_v63  ;;  %v1538_v39 = vsel %vm4635_vm5, %v1533_v59, %v1537_v24  ;;  %v1749_v5 = vrot.slane %v1748_v40, 4  ;;  %v1559_v6 = vshll.u32 %v5176_v50, 16  ;;  %v5228_v3 = vld [vmem:[%s4546_s30 + $0x38] sm:$0x1] }
  0xa7   : > { %v3952_v16 = vcombine.low %v1528_v52, %v1538_v39  ;;  %v1552_v18 = vsel %vm4635_vm5, %v1547_v0, %v1551_v2  ;;  %v1556_v23 = vor.u32 %v1555_v13, %v1551_v2  ;;  %v3832_v25 = vrot.slane %v3816_v62, 9 }
  0xa8   : > { %2671 = vrot.lane.b32.xlu1 %v3960_v4, %s4462_s10  ;;  %v1754_v19 = vsel %vm4635_vm5, %v1749_v5, %v1753_v12  ;;  %v1561_v46 = vrot.slane %v1559_v6, 5  ;;  %v1987_v32 = vrot.slane %v5086_v53, 5  ;;  %v1990_v33 = vrot.slane %v5137_v8, 5 }
  0xa9   : > { %2655 = vrot.lane.b32.xlu0 %v3952_v16, %s4462_s10  ;;  %v3961_v27 = vcombine.low %v1744_v60, %v1754_v19  ;;  %v1557_v9 = vrot.slane %v1556_v23, 4  ;;  %v3824_v22 = vrot.slane %v3808_v14, 9  ;;  %v1931_v36 = vrot.slane %v5100_v37, 5  ;;  %v2140_v52 = vpop.permute.xlu0 %2139 }
  0xaa   : > { %v1988_v41 = vsel %vm4577_vm2, %v3832_v25, %v1987_v32  ;;  %v1989_v1 = vrot.slane %v1987_v32, 4  ;;  %v1934_v42 = vrot.slane %v5152_v17, 5  ;;  %v529_v53 = vshrl.u32 %v213_v26, 16 }
  0xab   : > { %v1562_v8 = vsel %vm4635_vm5, %v1557_v9, %v1561_v46  ;;  %v1932_v35 = vsel %vm4577_vm2, %v3824_v22, %v1931_v36  ;;  %v1933_v51 = vrot.slane %v1931_v36, 4  ;;  %v532_v37 = vshll.u32 %v213_v26, 16 }
  0xac   : > { %2673 = vrot.lane.b32.xlu1 %v3961_v27, %s4462_s10  ;;  %v3953_v44 = vcombine.low %v1552_v18, %v1562_v8  ;;  %v1991_v47 = vsel %vm4577_vm2, %v1989_v1, %v1990_v33  ;;  %v531_v17 = vrot.slane %v529_v53, 4  ;;  %v538_v24 = vshll.u32 %v5204_v56, 16  ;;  %v3817_v18 = vld [vmem:[%s4546_s30 + $0x9c] sm:$0xe]  ;;  %v4348_v33 = vld [vmem:[%s4546_s30 + $0x4] sm:$0xf] }
  0xad   : > { %v3976_v34 = vcombine.low %v1988_v41, %v1991_v47  ;;  %v1935_v43 = vsel %vm4577_vm2, %v1933_v51, %v1934_v42  ;;  %v534_v31 = vrot.slane %v532_v37, 5  ;;  %v542_v38 = vshrl.u32 %v5204_v56, 16  ;;  %v5230_v10 = vpop.permute.xlu1 %2157  ;;  %v4349_v27 = vld [vmem:[%s4546_s30] sm:$0xf]  ;;  %v4350_v41 = vld [vmem:[%s4546_s30 + $0x10] sm:$0xf] }
  0xae   : > { %2657 = vrot.lane.b32.xlu0 %v3953_v44, %s4462_s10  ;;  %v3968_v55 = vcombine.low %v1932_v35, %v1935_v43  ;;  %v540_v59 = vrot.slane %v538_v24, 5  ;;  %v548_v60 = vshll.u32 %v5214_v28, 16  ;;  %v337_v40 = vshrl.u32 %v197_v61, 16  ;;  %v4351_v1 = vld [vmem:[%s4546_s30 + $0xc] sm:$0xf] }
  0xaf   : > { %v535_v13 = vor.u32 %v534_v31, %v531_v17  ;;  %v544_v62 = vrot.slane %v542_v38, 4  ;;  %v340_v63 = vshll.u32 %v197_v61, 16  ;;  %v346_v12 = vshll.u32 %v5222_v49, 16  ;;  %v3809_v8 = vld [vmem:[%s4546_s30 + $0x3c] sm:$0xe] }
  0xb0   : > { %2751 = vrot.lane.b32.xlu1 %v3976_v34, %s4463_s11  ;;  %v550_v0 = vrot.slane %v548_v60, 5  ;;  %v339_v2 = vrot.slane %v337_v40, 4  ;;  %v350_v4 = vshrl.u32 %v5222_v49, 16  ;;  %v356_v39 = vshll.u32 %v5228_v3, 16  ;;  %v215_v24 = vld [vmem:[%s4546_s30 + $0x9c] sm:$0xf] }
  0xb1   : > { %v536_v5 = vrot.slane %v535_v13, 4  ;;  %v545_v6 = vor.u32 %v544_v62, %v540_v59  ;;  %v342_v14 = vrot.slane %v340_v63, 5  ;;  %v348_v16 = vrot.slane %v346_v12, 5  ;;  %v5239_v23 = vpop.permute.xlu1 %2333  ;;  %v4352_v60 = vld [vmem:[%s4546_s30 + $0x70] sm:$0xf] }
  0xb2   : > { %2735 = vrot.lane.b32.xlu0 %v3968_v55, %s4463_s11  ;;  %v352_v25 = vrot.slane %v350_v4, 4  ;;  %v5242_v26 = vpop.permute.xlu0 %2155  ;;  %v3838_v9 = vcombine.low %v4349_v27, %v4348_v33  ;;  %v358_v36 = vrot.slane %v356_v39, 5  ;;  %v3839_v42 = vcombine.low %v4351_v1, %v4350_v41  ;;  %v4353_v40 = vld [vmem:[%s4546_s30 + $0x6c] sm:$0xf]  ;;  %v5273_v62 = vld [vmem:[%s4546_s30 + $0xa0] sm:$0xf] }
  0xb3   : > { %v541_v19 = vsel %vm4635_vm5, %v536_v5, %v540_v59  ;;  %v546_v46 = vrot.slane %v545_v6, 4  ;;  %v343_v32 = vor.u32 %v342_v14, %v339_v2  ;;  %v3833_v53 = vrot.slane %v3817_v18, 9  ;;  %v5282_v2 = vld [vmem:[%s4546_s30 + $0xa4] sm:$0x1]  ;;  %v4355_v6 = vld [vmem:[%s4546_s30 + $0x60] sm:$0xf] }
  0xb4   : > { %v353_v22 = vor.u32 %v352_v25, %v348_v16  ;;  %v1994_v37 = vrot.slane %v5117_v58, 5  ;;  %v2766_v47 = vsel %vm2763_vm6, %v3838_v9, %v2140_v52  ;;  %v1997_v17 = vrot.slane %v5161_v54, 5  ;;  %v4354_v5 = vld [vmem:[%s4546_s30 + $0x64] sm:$0xf] }
  0xb5   : > { %v551_v35 = vsel %vm4635_vm5, %v546_v46, %v550_v0  ;;  %v344_v51 = vrot.slane %v343_v32, 4  ;;  %v5259_v43 = vpop.permute.xlu1 %2411  ;;  %v3825_v55 = vrot.slane %v3809_v8, 9  ;;  %v1938_v52 = vrot.slane %v5133_v45, 5  ;;  %v5298_v32 = vld [vmem:[%s4546_s30 + $0x40] sm:$0xf] }
  0xb6   : > { %v3866_v61 = vcombine.low %v541_v19, %v551_v35  ;;  %v354_v44 = vrot.slane %v353_v22, 4  ;;  %v5257_v34 = vpop.permute.xlu0 %2317  ;;  %v1995_v58 = vsel %vm4577_vm2, %v3833_v53, %v1994_v37  ;;  %v1996_v38 = vrot.slane %v1994_v37, 4 }
  0xb7   : > { %v349_v31 = vsel %vm4635_vm5, %v344_v51, %v348_v16  ;;  %v1941_v59 = vrot.slane %v5176_v50, 5  ;;  %v3847_v13 = vcombine.low %v4353_v40, %v4352_v60  ;;  %v5277_v12 = vsel %vm2763_vm6, %v3839_v42, %v5194_v29  ;;  %v199_v16 = vld [vmem:[%s4546_s30 + $0x3c] sm:$0xf] }
  0xb8   : > { %2163 = vrot.lane.b32.xlu1 %v3866_v61, %s4458_s6  ;;  %v359_v54 = vsel %vm4635_vm5, %v354_v44, %v358_v36  ;;  %v1998_v0 = vsel %vm4577_vm2, %v1996_v38, %v1997_v17  ;;  %v553_v45 = vshrl.u32 %v215_v24, 16  ;;  %v1939_v50 = vsel %vm4577_vm2, %v3825_v55, %v1938_v52 }
  0xb9   : > { %v3858_v63 = vcombine.low %v349_v31, %v359_v54  ;;  %v3977_v4 = vcombine.low %v1995_v58, %v1998_v0  ;;  %v1940_v39 = vrot.slane %v1938_v52, 4  ;;  %v3846_v14 = vcombine.low %v4355_v6, %v4354_v5  ;;  %v628_v0 = vld [vmem:[%s4546_s30 + $0x30] sm:$0xe] }
  0xba   : > { %v5289_v18 = vpop.permute.xlu0 %2395  ;;  %v5294_v29 = vsel %vm2812_vm7, %v2766_v47, %v5164_v57  ;;  %v555_v25 = vrot.slane %v553_v45, 4  ;;  %v556_v19 = vshll.u32 %v215_v24, 16  ;;  %v562_v46 = vshll.u32 %v5273_v62, 16  ;;  %v5308_v57 = vld [vmem:[%s4546_s30 + $0x44] sm:$0x1] }
  0xbb   : > { %2147 = vrot.lane.b32.xlu0 %v3858_v63, %s4458_s6  ;;  %v1942_v33 = vsel %vm4577_vm2, %v1940_v39, %v1941_v59  ;;  %v2793_v27 = vsel %vm2763_vm6, %v3847_v13, %v5230_v10  ;;  %v566_v9 = vshrl.u32 %v5273_v62, 16  ;;  %v572_v22 = vshll.u32 %v5282_v2, 16 }
  0xbc   : > { %2753 = vrot.lane.b32.xlu1 %v3977_v4, %s4463_s11  ;;  %v5310_v36 = vpop.permute.xlu1 %2413  ;;  %v3969_v41 = vcombine.low %v1939_v50, %v1942_v33  ;;  %v558_v1 = vrot.slane %v556_v19, 5  ;;  %v564_v42 = vrot.slane %v562_v46, 5  ;;  %v361_v53 = vshrl.u32 %v199_v16, 16 }
  0xbd   : > { %v2790_v8 = vsel %vm2763_vm6, %v3846_v14, %v5242_v26  ;;  %v568_v35 = vrot.slane %v566_v9, 4  ;;  %v364_v51 = vshll.u32 %v199_v16, 16  ;;  %v370_v10 = vshll.u32 %v5298_v32, 16  ;;  %v636_v26 = vld [vmem:[%s4546_s30 + $0x90] sm:$0xe] }
  0xbe   : > { %v5315_v37 = vpop.permute.xlu0 %2397  ;;  %v559_v61 = vor.u32 %v558_v1, %v555_v25  ;;  %v363_v44 = vrot.slane %v361_v53, 4  ;;  %v374_v47 = vshrl.u32 %v5298_v32, 16  ;;  %v380_v17 = vshll.u32 %v5308_v57, 16 }
  0xbf   : > { %2737 = vrot.lane.b32.xlu0 %v3969_v41, %s4463_s11  ;;  %v569_v24 = vor.u32 %v568_v35, %v564_v42  ;;  %v574_v31 = vrot.slane %v572_v22, 5  ;;  %v366_v58 = vrot.slane %v364_v51, 5  ;;  %v372_v38 = vrot.slane %v370_v10, 5  ;;  %v629_v35 = vld [vmem:[%s4546_s30 + $0x3c] sm:$0xe] }
  0xc0   : > { %v5321_v55 = vpop.permute.xlu1 %2491  ;;  %v2830_v54 = vsel %vm2812_vm7, %v2790_v8, %v5145_v20  ;;  %v560_v52 = vrot.slane %v559_v61, 4  ;;  %v376_v59 = vrot.slane %v374_v47, 4  ;;  %v2832_v60 = vsel %vm2812_vm7, %v2793_v27, %v5169_v7 }
  0xc1   : > { %v570_v40 = vrot.slane %v569_v24, 4  ;;  %v367_v13 = vor.u32 %v366_v58, %v363_v44  ;;  %v382_v63 = vrot.slane %v380_v17, 5  ;;  %v2865_v39 = vsel %vm2845_vm8, %v2832_v60, %v5239_v23 }
  0xc2   : > { %v5328_v45 = vpop.permute.xlu0 %2475  ;;  %v565_v4 = vsel %vm4635_vm5, %v560_v52, %v564_v42  ;;  %v377_v50 = vor.u32 %v376_v59, %v372_v38  ;;  %v3674_v20 = vrot.slane %v636_v26, 9  ;;  %v777_v7 = vrot.slane %v5204_v56, 5  ;;  %v637_v42 = vld [vmem:[%s4546_s30 + $0x9c] sm:$0xe] }
  0xc3   : > { %v575_v5 = vsel %vm4635_vm5, %v570_v40, %v574_v31  ;;  %v368_v6 = vrot.slane %v367_v13, 4  ;;  %v780_v14 = vrot.slane %v5214_v28, 5  ;;  %v3666_v46 = vrot.slane %v628_v0, 9  ;;  %v5378_v31 = vld [vmem:[%s4546_s30 + $0xa0] sm:$0xf] }
  0xc4   : > { %v5338_v16 = vpop.permute.xlu1 %2493  ;;  %v3867_v25 = vcombine.low %v565_v4, %v575_v5  ;;  %v378_v19 = vrot.slane %v377_v50, 4  ;;  %v721_v33 = vrot.slane %v5222_v49, 5  ;;  %v778_v27 = vsel %vm4577_vm2, %v3674_v20, %v777_v7  ;;  %v3686_v26 = vld [vmem:[%s4546_s30 + $0x3c] sm:$0xf]  ;;  %v3704_v4 = vld [vmem:[%s4546_s30 + $0xa8] sm:$0xf] }
  0xc5   : > { %v373_v23 = vsel %vm4635_vm5, %v368_v6, %v372_v38  ;;  %v779_v9 = vrot.slane %v777_v7, 4  ;;  %v724_v56 = vrot.slane %v5228_v3, 5  ;;  %v2816_v49 = vsel %vm2812_vm7, %v5277_v12, %v5189_v15 }
  0xc6   : > { %v5346_v22 = vpop.permute.xlu0 %2477  ;;  %2165 = vrot.lane.b32.xlu1 %v3867_v25, %s4458_s6  ;;  %v383_v28 = vsel %vm4635_vm5, %v378_v19, %v382_v63  ;;  %v722_v41 = vsel %vm4577_vm2, %v3666_v46, %v721_v33  ;;  %v723_v1 = vrot.slane %v721_v33, 4  ;;  %v2849_v3 = vsel %vm2845_vm8, %v2816_v49, %v5257_v34  ;;  %v5372_v34 = vld [vmem:[%s4546_s30 + $0x9c] sm:$0xf]  ;;  %v5407_v63 = vld [vmem:[%s4546_s30 + $0x40] sm:$0xf] }
  0xc7   : > { %v3859_v53 = vcombine.low %v373_v23, %v383_v28  ;;  %v781_v8 = vsel %vm4577_vm2, %v779_v9, %v780_v14  ;;  %v2863_v12 = vsel %vm2845_vm8, %v2830_v54, %v5102_v48  ;;  %v2847_v61 = vsel %vm2845_vm8, %v5294_v29, %v5139_v11  ;;  %v5417_v25 = vld [vmem:[%s4546_s30 + $0xac] sm:$0xf]  ;;  %v3688_v19 = vld [vmem:[%s4546_s30 + $0x48] sm:$0xf] }
  0xc8   : > { %v5362_v51 = vpop.permute.xlu1 %2587  ;;  %v3882_v10 = vcombine.low %v778_v27, %v781_v8  ;;  %v725_v15 = vsel %vm4577_vm2, %v723_v1, %v724_v56  ;;  %v3675_v47 = vrot.slane %v637_v42, 9  ;;  %v784_v17 = vrot.slane %v5273_v62, 5  ;;  %v5425_v9 = vld [vmem:[%s4546_s30 + $0x4c] sm:$0xf] }
  0xc9   : > { %2149 = vrot.lane.b32.xlu0 %v3859_v53, %s4458_s6  ;;  %v3874_v44 = vcombine.low %v722_v41, %v725_v15  ;;  %v787_v24 = vrot.slane %v5282_v2, 5  ;;  %v2896_v48 = vsel %vm2878_vm9, %v2863_v12, %v5259_v43  ;;  %v3667_v11 = vrot.slane %v629_v35, 9  ;;  %v5440_v35 = vld [vmem:[%s4546_s30 + $0xa4] sm:$0x1] }
  0xca   : > { %v5380_v58 = vpop.permute.xlu0 %2571  ;;  %2243 = vrot.lane.b32.xlu1 %v3882_v10, %s4457_s5  ;;  %v728_v29 = vrot.slane %v5298_v32, 5  ;;  %v731_v38 = vrot.slane %v5308_v57, 5  ;;  %v2880_v62 = vsel %vm2878_vm9, %v2847_v61, %v5289_v18  ;;  %v785_v2 = vsel %vm4577_vm2, %v3675_v47, %v784_v17  ;;  %v5445_v61 = vld [vmem:[%s4546_s30 + $0x44] sm:$0x1] }
  0xcb   : > { %v786_v54 = vrot.slane %v784_v17, 4  ;;  %v1144_v52 = vshrl.u32 %v5372_v34, 16  ;;  %v2898_v57 = vsel %vm2878_vm9, %v2865_v39, %v5310_v36  ;;  %v1147_v60 = vshll.u32 %v5372_v34, 16 }
  0xcc   : > { %v5393_v59 = vpop.permute.xlu1 %2589  ;;  %v729_v43 = vsel %vm4577_vm2, %v3667_v11, %v728_v29  ;;  %v730_v32 = vrot.slane %v728_v29, 4  ;;  %v2882_v40 = vsel %vm2878_vm9, %v2849_v3, %v5315_v37  ;;  %v1157_v13 = vshrl.u32 %v5378_v31, 16 }
  0xcd   : > { %2227 = vrot.lane.b32.xlu0 %v3874_v44, %s4457_s5  ;;  %v788_v18 = vsel %vm4577_vm2, %v786_v54, %v787_v24  ;;  %v952_v0 = vshrl.u32 %v3686_v26, 16  ;;  %v1146_v20 = vrot.slane %v1144_v52, 4  ;;  %v955_v5 = vshll.u32 %v3686_v26, 16 }
  0xce   : > { %v5410_v50 = vpop.permute.xlu0 %2573  ;;  %v3883_v36 = vcombine.low %v785_v2, %v788_v18  ;;  %v732_v39 = vsel %vm4577_vm2, %v730_v32, %v731_v38  ;;  %v1149_v7 = vrot.slane %v1147_v60, 5  ;;  %v3898_v37 = vcombine.low %v5372_v34, %v5378_v31  ;;  %v5466_v32 = vld [vmem:[%s4546_s30 + $0xb0] sm:$0x1] }
  0xcf   : > { %v3875_v6 = vcombine.low %v729_v43, %v732_v39  ;;  %v954_v14 = vrot.slane %v952_v0, 4  ;;  %v965_v33 = vshrl.u32 %v5407_v63, 16  ;;  %v1168_v23 = vshrl.u32 %v3704_v4, 16 }
  0xd0   : > { %v5420_v46 = vpop.permute.xlu1 %2667  ;;  %2245 = vrot.lane.b32.xlu1 %v3883_v36, %s4457_s5  ;;  %v1171_v27 = vshll.u32 %v3704_v4, 16  ;;  %v957_v56 = vrot.slane %v955_v5, 5  ;;  %v3890_v28 = vcombine.low %v3686_v26, %v5407_v63  ;;  %v2929_v49 = vsel %vm2911_vm10, %v2896_v48, %v5321_v55 }
  0xd1   : > { %2229 = vrot.lane.b32.xlu0 %v3875_v6, %s4457_s5  ;;  %v5433_v41 = vsel %vm2911_vm10, %v2880_v62, %v5328_v45  ;;  %v1170_v42 = vrot.slane %v1168_v23, 4  ;;  %v1181_v3 = vshrl.u32 %v5417_v25, 16  ;;  %v3899_v8 = vcombine.low %v3704_v4, %v5417_v25 }
  0xd2   : > { %v5435_v1 = vpop.permute.xlu0 %2651  ;;  %v1173_v53 = vrot.slane %v1171_v27, 5  ;;  %v976_v10 = vshrl.u32 %v3688_v19, 16  ;;  %v979_v15 = vshll.u32 %v3688_v19, 16  ;;  %v989_v12 = vshrl.u32 %v5425_v9, 16 }
  0xd3   : > { %v3891_v55 = vcombine.low %v3688_v19, %v5425_v9  ;;  %v5452_v34 = vsel %vm2911_vm10, %v2898_v57, %v5338_v16  ;;  %v5456_v44 = vsel %vm2911_vm10, %v2882_v40, %v5346_v22  ;;  %v1150_v47 = vor.u32 %v1149_v7, %v1146_v20 }
  0xd4   : > { %v5447_v45 = vpop.permute.xlu1 %2669  ;;  %2339 = vrot.lane.b32.xlu1 %v3898_v37, %s4456_s4  ;;  %v1153_v17 = vshll.u32 %v5378_v31, 16  ;;  %v1159_v24 = vrot.slane %v1157_v13, 4  ;;  %v1163_v48 = vshll.u32 %v5440_v35, 16  ;;  %v958_v11 = vor.u32 %v957_v56, %v954_v14  ;;  %v5479_v14 = vld [vmem:[%s4546_s30 + $0x50] sm:$0x1] }
  0xd5   : > { %2323 = vrot.lane.b32.xlu0 %v3890_v28, %s4456_s4  ;;  %v961_v29 = vshll.u32 %v5407_v63, 16  ;;  %v1151_v38 = vrot.slane %v1150_v47, 4  ;;  %v967_v16 = vrot.slane %v965_v33, 4  ;;  %v971_v62 = vshll.u32 %v5445_v61, 16 }
  0xd6   : > { %v1155_v26 = vrot.slane %v1153_v17, 5  ;;  %v5463_v2 = vpop.permute.xlu0 %2653  ;;  %v978_v22 = vrot.slane %v976_v10, 4  ;;  %v981_v54 = vrot.slane %v979_v15, 5  ;;  %v959_v52 = vrot.slane %v958_v11, 4  ;;  %v3738_v15 = vld [vmem:[%s4546_s30 + $0x9c] sm:$0xe] }
  0xd7   : > { %v963_v43 = vrot.slane %v961_v29, 5  ;;  %v1165_v18 = vrot.slane %v1163_v48, 5  ;;  %v973_v0 = vrot.slane %v971_v62, 5  ;;  %v1174_v4 = vor.u32 %v1173_v53, %v1170_v42  ;;  %v3730_v48 = vld [vmem:[%s4546_s30 + $0x3c] sm:$0xe] }
  0xd8   : > { %2341 = vrot.lane.b32.xlu1 %v3899_v8, %s4456_s4  ;;  %v1156_v57 = vsel %vm4635_vm5, %v1151_v38, %v1155_v26  ;;  %v1160_v60 = vor.u32 %v1159_v24, %v1155_v26  ;;  %v5474_v36 = vpop.permute.xlu1 %2747  ;;  %v1177_v20 = vshll.u32 %v5417_v25, 16  ;;  %v1183_v5 = vrot.slane %v1181_v3, 4 }
  0xd9   : > { %2325 = vrot.lane.b32.xlu0 %v3891_v55, %s4456_s4  ;;  %v964_v40 = vsel %vm4635_vm5, %v959_v52, %v963_v43  ;;  %v968_v13 = vor.u32 %v967_v16, %v963_v43  ;;  %v1187_v6 = vshll.u32 %v5466_v32, 16  ;;  %v1175_v37 = vrot.slane %v1174_v4, 4  ;;  %v3739_v52 = vld [vmem:[%s4546_s30 + $0xa8] sm:$0xe] }
  0xda   : > { %v1161_v39 = vrot.slane %v1160_v60, 4  ;;  %v982_v19 = vor.u32 %v981_v54, %v978_v22  ;;  %v985_v33 = vshll.u32 %v5425_v9, 16  ;;  %v2962_v27 = vsel %vm2944_vm11, %v2929_v49, %v5362_v51  ;;  %v5486_v42 = vpop.permute.xlu0 %2731 }
  0xdb   : > { %v969_v7 = vrot.slane %v968_v13, 4  ;;  %v1179_v56 = vrot.slane %v1177_v20, 5  ;;  %v991_v28 = vrot.slane %v989_v12, 4  ;;  %v1189_v17 = vrot.slane %v1187_v6, 5 }
  0xdc   : > { %v1166_v23 = vsel %vm4635_vm5, %v1161_v39, %v1165_v18  ;;  %v983_v8 = vrot.slane %v982_v19, 4  ;;  %v987_v10 = vrot.slane %v985_v33, 5  ;;  %v995_v24 = vshll.u32 %v5479_v14, 16 }
  0xdd   : > { %v3914_v53 = vcombine.low %v1156_v57, %v1166_v23  ;;  %v974_v3 = vsel %vm4635_vm5, %v969_v7, %v973_v0  ;;  %v1184_v47 = vor.u32 %v1183_v5, %v1179_v56  ;;  %v2946_v51 = vsel %vm2944_vm11, %v5433_v41, %v5380_v58  ;;  %v3731_v0 = vld [vmem:[%s4546_s30 + $0x48] sm:$0xe] }
  0xde   : > { %v3906_v55 = vcombine.low %v964_v40, %v974_v3  ;;  %v1180_v49 = vsel %vm4635_vm5, %v1175_v37, %v1179_v56  ;;  %v988_v12 = vsel %vm4635_vm5, %v983_v8, %v987_v10  ;;  %v992_v11 = vor.u32 %v991_v28, %v987_v10  ;;  %v5532_v37 = vld [vmem:[%s4546_s30 + $0xa8] sm:$0xf] }
  0xdf   : > { %2419 = vrot.lane.b32.xlu1 %v3914_v53, %s4459_s7  ;;  %v1185_v38 = vrot.slane %v1184_v47, 4  ;;  %v997_v26 = vrot.slane %v995_v24, 5  ;;  %v3754_v16 = vrot.slane %v3738_v15, 9  ;;  %v1389_v62 = vrot.slane %v5378_v31, 5  ;;  %v5546_v53 = vld [vmem:[%s4546_s30 + $0xac] sm:$0xf] }
  0xe0   : > { %v5501_v29 = vpop.permute.xlu1 %2159  ;;  %2403 = vrot.lane.b32.xlu0 %v3906_v55, %s4459_s7  ;;  %v993_v22 = vrot.slane %v992_v11, 4  ;;  %v1392_v58 = vrot.slane %v5440_v35, 5  ;;  %v3746_v41 = vrot.slane %v3730_v48, 9  ;;  %v1333_v54 = vrot.slane %v5407_v63, 5  ;;  %v3766_v3 = vld [vmem:[%s4546_s30 + $0x48] sm:$0xf] }
  0xe1   : > { %v1190_v43 = vsel %vm4635_vm5, %v1185_v38, %v1189_v17  ;;  %v1390_v57 = vsel %vm4577_vm2, %v3754_v16, %v1389_v62  ;;  %v1391_v60 = vrot.slane %v1389_v62, 4  ;;  %v1336_v18 = vrot.slane %v5445_v61, 5  ;;  %v5567_v15 = vld [vmem:[%s4546_s30 + $0x4c] sm:$0xf]  ;;  %v5570_v55 = vld [vmem:[%s4546_s30 + $0xb4] sm:$0xf] }
  0xe2   : > { %v3915_v31 = vcombine.low %v1180_v49, %v1190_v43  ;;  %v998_v35 = vsel %vm4635_vm5, %v993_v22, %v997_v26  ;;  %v1334_v63 = vsel %vm4577_vm2, %v3746_v41, %v1333_v54  ;;  %v1335_v13 = vrot.slane %v1333_v54, 4  ;;  %v5584_v11 = vld [vmem:[%s4546_s30 + $0x54] sm:$0xf] }
  0xe3   : > { %v5513_v40 = vpop.permute.xlu0 %2143  ;;  %v3907_v4 = vcombine.low %v988_v12, %v998_v35  ;;  %v1393_v39 = vsel %vm4577_vm2, %v1391_v60, %v1392_v58  ;;  %v3755_v20 = vrot.slane %v3739_v52, 9  ;;  %v2964_v61 = vsel %vm2944_vm11, %v5452_v34, %v5393_v59  ;;  %v5581_v12 = vld [vmem:[%s4546_s30 + $0xb8] sm:$0xf]  ;;  %v4329_v35 = vld [vmem:[%s6468_s1 + $0x10] ss:$0 sps:$4 sm:$0x33]  }
  0xe4   : > { %2421 = vrot.lane.b32.xlu1 %v3915_v31, %s4459_s7  ;;  %v2948_v5 = vsel %vm2944_vm11, %v5456_v44, %v5410_v50  ;;  %v3930_v6 = vcombine.low %v1390_v57, %v1393_v39  ;;  %v1337_v7 = vsel %vm4577_vm2, %v1335_v13, %v1336_v18  ;;  %v5534_v19 = vpop.permute.xlu1 %2749  ;;  %v1396_v23 = vrot.slane %v5417_v25, 5  ;;  %v5591_v58 = vld [vmem:[%s4546_s30 + $0x58] sm:$0xf]  ;;  %4230 = vmatprep.subr.msk.bf16.mxu0 %vm3096_vm15, %v4329_v35 }
  0xe5   : > { %2405 = vrot.lane.b32.xlu0 %v3907_v4, %s4459_s7  ;;  %v3922_v33 = vcombine.low %v1334_v63, %v1337_v7  ;;  %v1399_v59 = vrot.slane %v5466_v32, 5  ;;  %v3747_v34 = vrot.slane %v3731_v0, 9  ;;  %v2995_v56 = vsel %vm2977_vm12, %v2962_v27, %v5420_v46  ;;  %v5611_v4 = vld [vmem:[%s4546_s30 + $0xb0] sm:$0x1]  ;;  %4231 = vmatprep.subr.msk.bf16.mxu1 %vm3096_vm15, %v4329_v35 }
  0xe6   : > { %v2979_v50 = vsel %vm2977_vm12, %v2946_v51, %v5435_v1  ;;  %v1340_v44 = vrot.slane %v5425_v9, 5  ;;  %v1343_v28 = vrot.slane %v5479_v14, 5  ;;  %v1397_v25 = vsel %vm4577_vm2, %v3755_v20, %v1396_v23 }
  0xe7   : > { %v1398_v32 = vrot.slane %v1396_v23, 4  ;;  %v1756_v8 = vshrl.u32 %v5532_v37, 16  ;;  %v1759_v46 = vshll.u32 %v5532_v37, 16  ;;  %v5553_v27 = vpop.permute.xlu0 %2733  ;;  %v5560_v14 = vsel %vm2977_vm12, %v2964_v61, %v5447_v45 }
  0xe8   : > { %2499 = vrot.lane.b32.xlu1 %v3930_v6, %s4460_s8  ;;  %v1341_v9 = vsel %vm4577_vm2, %v3747_v34, %v1340_v44  ;;  %v1342_v1 = vrot.slane %v1340_v44, 4  ;;  %v5564_v10 = vsel %vm2977_vm12, %v2948_v5, %v5463_v2  ;;  %v1769_v17 = vshrl.u32 %v5546_v53, 16  ;;  %v5640_v44 = vld [vmem:[%s4546_s30 + $0x7c] sm:$0xf] }
  0xe9   : > { %2483 = vrot.lane.b32.xlu0 %v3922_v33, %s4460_s8  ;;  %v1400_v47 = vsel %vm4577_vm2, %v1398_v32, %v1399_v59  ;;  %v3946_v45 = vcombine.low %v5532_v37, %v5546_v53  ;;  %v1564_v24 = vshrl.u32 %v3766_v3, 16  ;;  %v1758_v51 = vrot.slane %v1756_v8, 4  ;;  %v5632_v59 = vld [vmem:[%s4546_s30 + $0x50] sm:$0x1] }
  0xea   : > { %v3931_v48 = vcombine.low %v1397_v25, %v1400_v47  ;;  %v1344_v2 = vsel %vm4577_vm2, %v1342_v1, %v1343_v28  ;;  %v1567_v49 = vshll.u32 %v3766_v3, 16  ;;  %v1761_v16 = vrot.slane %v1759_v46, 5  ;;  %v5648_v25 = vld [vmem:[%s4546_s30 + $0x1c] sm:$0xf] }
  0xeb   : > { %v3923_v26 = vcombine.low %v1341_v9, %v1344_v2  ;;  %v1577_v62 = vshrl.u32 %v5567_v15, 16  ;;  %v1780_v22 = vshrl.u32 %v5570_v55, 16  ;;  %v1566_v41 = vrot.slane %v1564_v24, 4 }
  0xec   : > { %v5586_v38 = vpop.permute.xlu1 %2161  ;;  %2501 = vrot.lane.b32.xlu1 %v3931_v48, %s4460_s8  ;;  %v1569_v54 = vrot.slane %v1567_v49, 5  ;;  %v3938_v52 = vcombine.low %v3766_v3, %v5567_v15  ;;  %v1783_v43 = vshll.u32 %v5570_v55, 16  ;;  %v1793_v57 = vshrl.u32 %v5581_v12, 16  ;;  %v5645_v3 = vld [vmem:[%s4546_s30 + $0x18] sm:$0xf] }
  0xed   : > { %2485 = vrot.lane.b32.xlu0 %v3923_v26, %s4460_s8  ;;  %v3947_v60 = vcombine.low %v5570_v55, %v5581_v12  ;;  %v1588_v18 = vshrl.u32 %v5584_v11, 16  ;;  %v1591_v31 = vshll.u32 %v5584_v11, 16  ;;  %v5607_v13 = vrot.slane %v1780_v22, 4 }
  0xee   : > { %v1601_v0 = vshrl.u32 %v5591_v58, 16  ;;  %v1785_v20 = vrot.slane %v1783_v43, 5  ;;  %v3939_v61 = vcombine.low %v5584_v11, %v5591_v58  ;;  %v3012_v5 = vsel %vm3010_vm13, %v2979_v50, %v5486_v42  ;;  %v5637_v50 = vld [vmem:[%s4546_s30 + $0x78] sm:$0xf] }
  0xef   : > { %v5605_v63 = vpop.permute.xlu0 %2145  ;;  %v3028_v6 = vsel %vm3010_vm13, %v2995_v56, %v5474_v36  ;;  %v5622_v7 = vrot.slane %v1588_v18, 4  ;;  %v5624_v37 = vrot.slane %v1591_v31, 5  ;;  %4192 = vmatprep.mubr.msk.bf16.mxu0 %vm3063_vm14, %v3012_v5  ;;  %v1762_v33 = vor.u32 %v1761_v16, %v1758_v51  ;;  %v5664_v51 = vld [vmem:[%s4546_s30 + $0xbc] sm:$0x1] }
  0xf0   : > { %v5613_v39 = vpop.permute.xlu1 %2239  ;;  %2595 = vrot.lane.b32.xlu1 %v3946_v45, %s4461_s9  ;;  %4208 = vmatprep.mubr.msk.bf16.mxu1 %vm3063_vm14, %v3028_v6  ;;  %v1765_v42 = vshll.u32 %v5546_v53, 16  ;;  %v1771_v36 = vrot.slane %v1769_v17, 4  ;;  %v1775_v23 = vshll.u32 %v5611_v4, 16  ;;  %v1570_v34 = vor.u32 %v1569_v54, %v1566_v41  ;;  %v5684_v31 = vld [vmem:[%s4546_s30 + $0x5c] sm:$0x1] }
  0xf1   : > { %2579 = vrot.lane.b32.xlu0 %v3938_v52, %s4461_s9  ;;  %v3848_v28 = vcombine.low %v5637_v50, %v5640_v44  ;;  %v3840_v32 = vcombine.low %v5645_v3, %v5648_v25  ;;  %v1763_v8 = vrot.slane %v1762_v33, 4  ;;  %v1573_v46 = vshll.u32 %v5567_v15, 16  ;;  %v3818_v6 = vld [vmem:[%s4546_s30 + $0xa8] sm:$0xe] }
  0xf2   : > { %v1767_v1 = vrot.slane %v1765_v42, 5  ;;  %v1777_v55 = vrot.slane %v1775_v23, 5  ;;  %v1571_v47 = vrot.slane %v1570_v34, 4  ;;  %v1579_v17 = vrot.slane %v1577_v62, 4  ;;  %v4361_v25 = vld [vmem:[%s4546_s30 + $0x88] sm:$0xf] }
  0xf3   : > { %v5634_v56 = vpop.permute.xlu0 %2223  ;;  %v1575_v45 = vrot.slane %v1573_v46, 5  ;;  %v1583_v24 = vshll.u32 %v5632_v59, 16  ;;  %v3098_v48 = vsel %vm3096_vm15, %v4329_v35, 0  ;;  %v3030_v2 = vsel %vm3010_vm13, %v5560_v14, %v5534_v19 }
  0xf4   : > { %v5655_v9 = vpop.permute.xlu1 %2241  ;;  %2597 = vrot.lane.b32.xlu1 %v3947_v60, %s4461_s9  ;;  %v1768_v49 = vsel %vm4635_vm5, %v1763_v8, %v1767_v1  ;;  %v1772_v11 = vor.u32 %v1771_v36, %v1767_v1  ;;  %4191 = vmatpush3.bf16.msra.mxu0 %v3098_v48  ;;  %v3014_v26 = vsel %vm3010_vm13, %v5564_v10, %v5553_v27  ;;  %v1789_v16 = vshll.u32 %v5581_v12, 16 }
  0xf5   : > { %2581 = vrot.lane.b32.xlu0 %v3939_v61, %s4461_s9  ;;  %v1576_v19 = vsel %vm4635_vm5, %v1571_v47, %v1575_v45  ;;  %v1580_v14 = vor.u32 %v1579_v17, %v1575_v45  ;;  %v1585_v22 = vrot.slane %v1583_v24, 5  ;;  %4229 = vmatpush3.bf16.msra.mxu1 %v3098_v48  ;;  %v1786_v41 = vor.u32 %v1785_v20, %v5607_v13  ;;  %v3810_v47 = vld [vmem:[%s4546_s30 + $0x48] sm:$0xe] }
  0xf6   : > { %v1773_v52 = vrot.slane %v1772_v11, 4  ;;  %v1791_v43 = vrot.slane %v1789_v16, 5  ;;  %v1795_v27 = vrot.slane %v1793_v57, 4  ;;  %v1799_v10 = vshll.u32 %v5664_v51, 16 }
  0xf7   : > { %v5673_v62 = vpop.permute.xlu0 %2225  ;;  %v1581_v60 = vrot.slane %v1580_v14, 4  ;;  %v1787_v18 = vrot.slane %v1786_v41, 4  ;;  %v1594_v35 = vor.u32 %v5624_v37, %v5622_v7  ;;  %v1597_v61 = vshll.u32 %v5591_v58, 16  ;;  %4193 = vmatmul.mubr.msk.bf16.vlgmr.msra.gmra.mrb[0].mxu0 %vm3063_vm14, %v3014_v26  ;;  %v4363_v14 = vld [vmem:[%s4546_s30 + $0x28] sm:$0xf] }
  0xf8   : > { %v5678_v54 = vpop.permute.xlu1 %2335  ;;  %v1778_v13 = vsel %vm4635_vm5, %v1773_v52, %v1777_v55  ;;  %v1796_v20 = vor.u32 %v1795_v27, %v1791_v43  ;;  %v1801_v5 = vrot.slane %v1799_v10, 5  ;;  %v1603_v57 = vrot.slane %v1601_v0, 4  ;;  %4209 = vmatmul.mubr.msk.bf16.vlgmr.msra.gmra.mrb[0].mxu1 %vm3063_vm14, %v3030_v2  ;;  %v5750_v10 = vld [vmem:[%s4546_s30 + $0xb0] sm:$0x1] }
  0xf9   : > { %v3962_v42 = vcombine.low %v1768_v49, %v1778_v13  ;;  %v1586_v7 = vsel %vm4635_vm5, %v1581_v60, %v1585_v22  ;;  %v1792_v37 = vsel %vm4635_vm5, %v1787_v18, %v1791_v43  ;;  %v1595_v36 = vrot.slane %v1594_v35, 4  ;;  %v5743_v43 = vld [vmem:[%s4546_s30 + $0xac] sm:$0xf]  ;;  %v201_v35 = vld [vmem:[%s4546_s30 + $0x48] sm:$0xf] }
  0xfa   : > { %v3954_v34 = vcombine.low %v1576_v19, %v1586_v7  ;;  %v1797_v8 = vrot.slane %v1796_v20, 4  ;;  %v1599_v46 = vrot.slane %v1597_v61, 5  ;;  %v1607_v0 = vshll.u32 %v5684_v31, 16  ;;  %v4362_v19 = vld [vmem:[%s4546_s30 + $0x24] sm:$0xf] }
  0xfb   : > { %v5696_v33 = vpop.permute.xlu0 %2319  ;;  %2675 = vrot.lane.b32.xlu1 %v3962_v42, %s4462_s10  ;;  %v3834_v1 = vrot.slane %v3818_v6, 9  ;;  %v2001_v55 = vrot.slane %v5546_v53, 5  ;;  %v5713_v17 = vsel %vm2763_vm6, %v3848_v28, %v5501_v29  ;;  %v5725_v29 = vsel %vm2763_vm6, %v3840_v32, %v5513_v40  ;;  %v217_v28 = vld [vmem:[%s4546_s30 + $0xa8] sm:$0xf]  ;;  %v4360_v40 = vld [vmem:[%s4546_s30 + $0x84] sm:$0xf] }
  0xfc   : > { %v5702_v23 = vpop.permute.xlu1 %2337  ;;  %2659 = vrot.lane.b32.xlu0 %v3954_v34, %s4462_s10  ;;  %v1802_v45 = vsel %vm4635_vm5, %v1797_v8, %v1801_v5  ;;  %v1604_v24 = vor.u32 %v1603_v57, %v1599_v46  ;;  %v1609_v48 = vrot.slane %v1607_v0, 5  ;;  %v1600_v50 = vsel %vm4635_vm5, %v1595_v36, %v1599_v46  ;;  %v5760_v7 = vld [vmem:[%s4546_s30 + $0x4c] sm:$0xf]  ;;  %v5774_v46 = vld [vmem:[%s4546_s30 + $0x50] sm:$0x1] }
  0xfd   : > { %v3963_v53 = vcombine.low %v1792_v37, %v1802_v45  ;;  %v2002_v44 = vsel %vm4577_vm2, %v3834_v1, %v2001_v55  ;;  %v2003_v11 = vrot.slane %v2001_v55, 4  ;;  %v2004_v26 = vrot.slane %v5611_v4, 5 }
  0xfe   : > { %v1605_v49 = vrot.slane %v1604_v24, 4  ;;  %v3826_v16 = vrot.slane %v3810_v47, 9  ;;  %v3849_v32 = vcombine.low %v4360_v40, %v4361_v25  ;;  %v3841_v22 = vcombine.low %v4362_v19, %v4363_v14  ;;  %v3811_v14 = vld [vmem:[%s4546_s30 + $0x54] sm:$0xe] }
  0xff   : > { %v5718_v2 = vpop.permute.xlu0 %2321  ;;  %2677 = vrot.lane.b32.xlu1 %v3963_v53, %s4462_s10  ;;  %v1945_v41 = vrot.slane %v5567_v15, 5  ;;  %v1948_v52 = vrot.slane %v5632_v59, 5  ;;  %v2005_v27 = vsel %vm4577_vm2, %v2003_v11, %v2004_v26  ;;  %v577_v60 = vshrl.u32 %v217_v28, 16  ;;  %v3819_v26 = vld [vmem:[%s4546_s30 + $0xb4] sm:$0xe] }
 0x100   : > { %v1610_v4 = vsel %vm4635_vm5, %v1605_v49, %v1609_v48  ;;  %v580_v18 = vshll.u32 %v217_v28, 16  ;;  %v3978_v13 = vcombine.low %v2002_v44, %v2005_v27  ;;  %v586_v6 = vshll.u32 %v5743_v43, 16 }
 0x101   : > { %v5733_v3 = vpop.permute.xlu1 %2415  ;;  %v3955_v15 = vcombine.low %v1600_v50, %v1610_v4  ;;  %v1946_v59 = vsel %vm4577_vm2, %v3826_v16, %v1945_v41  ;;  %v1947_v20 = vrot.slane %v1945_v41, 4  ;;  %v579_v5 = vrot.slane %v577_v60, 4 }
 0x102   : > { %v582_v57 = vrot.slane %v580_v18, 5  ;;  %v590_v42 = vshrl.u32 %v5743_v43, 16  ;;  %v5767_v36 = vsel %vm2763_vm6, %v3849_v32, %v5586_v38  ;;  %v596_v8 = vshll.u32 %v5750_v10, 16 }
 0x103   : > { %v5753_v61 = vpop.permute.xlu0 %2399  ;;  %2661 = vrot.lane.b32.xlu0 %v3955_v15, %s4462_s10  ;;  %2755 = vrot.lane.b32.xlu1 %v3978_v13, %s4463_s11  ;;  %v1949_v34 = vsel %vm4577_vm2, %v1947_v20, %v1948_v52  ;;  %v385_v0 = vshrl.u32 %v201_v35, 16  ;;  %v588_v47 = vrot.slane %v586_v6, 5  ;;  %v388_v53 = vshll.u32 %v201_v35, 16  ;;  %v5809_v15 = vld [vmem:[%s4546_s30 + $0xb4] sm:$0xf] }
 0x104   : > { %v3970_v1 = vcombine.low %v1946_v59, %v1949_v34  ;;  %v583_v55 = vor.u32 %v582_v57, %v579_v5  ;;  %v592_v45 = vrot.slane %v590_v42, 4  ;;  %v598_v38 = vrot.slane %v596_v8, 5  ;;  %v5819_v34 = vld [vmem:[%s4546_s30 + $0xb8] sm:$0xf] }
 0x105   : > { %v5762_v37 = vpop.permute.xlu1 %2417  ;;  %v387_v48 = vrot.slane %v385_v0, 4  ;;  %v394_v50 = vshll.u32 %v5760_v7, 16  ;;  %v398_v49 = vshrl.u32 %v5760_v7, 16  ;;  %v404_v11 = vshll.u32 %v5774_v46, 16 }
 0x106   : > { %v584_v44 = vrot.slane %v583_v55, 4  ;;  %v593_v28 = vor.u32 %v592_v45, %v588_v47  ;;  %v5786_v40 = vsel %vm2763_vm6, %v3841_v22, %v5605_v63  ;;  %v5792_v25 = vsel %vm2812_vm7, %v5713_v17, %v5613_v39 }
 0x107   : > { %v5776_v24 = vpop.permute.xlu0 %2401  ;;  %2739 = vrot.lane.b32.xlu0 %v3970_v1, %s4463_s11  ;;  %v390_v32 = vrot.slane %v388_v53, 5  ;;  %v396_v19 = vrot.slane %v394_v50, 5  ;;  %v5798_v41 = vsel %vm2812_vm7, %v5725_v29, %v5634_v56  ;;  %v400_v52 = vrot.slane %v398_v49, 4 }
 0x108   : > { %v589_v63 = vsel %vm4635_vm5, %v584_v44, %v588_v47  ;;  %v594_v22 = vrot.slane %v593_v28, 4  ;;  %v406_v60 = vrot.slane %v404_v11, 5  ;;  %v3835_v39 = vrot.slane %v3819_v26, 9  ;;  %v5830_v47 = vld [vmem:[%s4546_s30 + $0xbc] sm:$0x1] }
 0x109   : > { %v5782_v16 = vpop.permute.xlu1 %2495  ;;  %v391_v27 = vor.u32 %v390_v32, %v387_v48  ;;  %v2008_v17 = vrot.slane %v5581_v12, 5  ;;  %v401_v35 = vor.u32 %v400_v52, %v396_v19  ;;  %v2011_v56 = vrot.slane %v5664_v51, 5  ;;  %v5845_v26 = vld [vmem:[%s4546_s30 + $0x58] sm:$0xf] }
 0x10a   : > { %v599_v18 = vsel %vm4635_vm5, %v594_v22, %v598_v38  ;;  %v3827_v29 = vrot.slane %v3811_v14, 9  ;;  %v794_v12 = vrot.slane %v5750_v10, 5  ;;  %v1952_v42 = vrot.slane %v5591_v58, 5 }
 0x10b   : > { %v5802_v4 = vpop.permute.xlu0 %2479  ;;  %v3868_v59 = vcombine.low %v589_v63, %v599_v18  ;;  %v392_v20 = vrot.slane %v391_v27, 4  ;;  %v2009_v5 = vsel %vm4577_vm2, %v3835_v39, %v2008_v17  ;;  %v2010_v57 = vrot.slane %v2008_v17, 4  ;;  %v5852_v63 = vld [vmem:[%s4546_s30 + $0x5c] sm:$0x1] }
 0x10c   : > { %v402_v6 = vrot.slane %v401_v35, 4  ;;  %v1955_v51 = vrot.slane %v5684_v31, 5  ;;  %v738_v1 = vrot.slane %v5774_v46, 5  ;;  %v601_v58 = vshrl.u32 %v5809_v15, 16  ;;  %v5834_v31 = vld [vmem:[%s4546_s30 + $0x54] sm:$0xf] }
 0x10d   : > { %v5811_v13 = vpop.permute.xlu1 %2497  ;;  %2167 = vrot.lane.b32.xlu1 %v3868_v59, %s4458_s6  ;;  %v397_v0 = vsel %vm4635_vm5, %v392_v20, %v396_v19  ;;  %v2012_v55 = vsel %vm4577_vm2, %v2010_v57, %v2011_v56  ;;  %v1953_v48 = vsel %vm4577_vm2, %v3827_v29, %v1952_v42  ;;  %v1954_v53 = vrot.slane %v1952_v42, 4  ;;  %v638_v59 = vld [vmem:[%s4546_s30 + $0xa8] sm:$0xe] }
 0x10e   : > { %v407_v45 = vsel %vm4635_vm5, %v402_v6, %v406_v60  ;;  %v3979_v38 = vcombine.low %v2009_v5, %v2012_v55  ;;  %v603_v28 = vrot.slane %v601_v58, 4  ;;  %v604_v49 = vshll.u32 %v5809_v15, 16 }
 0x10f   : > { %v5821_v8 = vpop.permute.xlu0 %2481  ;;  %v3860_v44 = vcombine.low %v397_v0, %v407_v45  ;;  %v610_v11 = vshll.u32 %v5819_v34, 16  ;;  %v1956_v32 = vsel %vm4577_vm2, %v1954_v53, %v1955_v51  ;;  %v614_v19 = vshrl.u32 %v5819_v34, 16  ;;  %v630_v51 = vld [vmem:[%s4546_s30 + $0x48] sm:$0xe] }
 0x110   : > { %v620_v14 = vshll.u32 %v5830_v47, 16  ;;  %v409_v22 = vshrl.u32 %v5834_v31, 16  ;;  %v3971_v27 = vcombine.low %v1953_v48, %v1956_v32  ;;  %v606_v60 = vrot.slane %v604_v49, 5 }
 0x111   : > { %v5840_v50 = vpop.permute.xlu1 %2591  ;;  %2151 = vrot.lane.b32.xlu0 %v3860_v44, %s4458_s6  ;;  %2757 = vrot.lane.b32.xlu1 %v3979_v38, %s4463_s11  ;;  %v612_v39 = vrot.slane %v610_v11, 5  ;;  %v412_v17 = vshll.u32 %v5834_v31, 16  ;;  %v2836_v18 = vsel %vm2812_vm7, %v5767_v36, %v5655_v9  ;;  %v616_v35 = vrot.slane %v614_v19, 4 }
 0x112   : > { %v411_v56 = vrot.slane %v409_v22, 4  ;;  %v418_v29 = vshll.u32 %v5845_v26, 16  ;;  %v607_v5 = vor.u32 %v606_v60, %v603_v28  ;;  %v422_v6 = vshrl.u32 %v5845_v26, 16 }
 0x113   : > { %v5855_v52 = vpop.permute.xlu0 %2575  ;;  %v414_v57 = vrot.slane %v412_v17, 5  ;;  %v428_v42 = vshll.u32 %v5852_v63, 16  ;;  %v2820_v0 = vsel %vm2812_vm7, %v5786_v40, %v5673_v62  ;;  %v617_v55 = vor.u32 %v616_v35, %v612_v39 }
 0x114   : > { %v622_v9 = vrot.slane %v620_v14, 5  ;;  %v420_v36 = vrot.slane %v418_v29, 5  ;;  %v608_v58 = vrot.slane %v607_v5, 4  ;;  %v424_v38 = vrot.slane %v422_v6, 4  ;;  %v639_v14 = vld [vmem:[%s4546_s30 + $0xb4] sm:$0xe] }
 0x115   : > { %v5865_v20 = vpop.permute.xlu1 %2593  ;;  %2741 = vrot.lane.b32.xlu0 %v3971_v27, %s4463_s11  ;;  %v415_v45 = vor.u32 %v414_v57, %v411_v56  ;;  %v430_v48 = vrot.slane %v428_v42, 5  ;;  %v618_v44 = vrot.slane %v617_v55, 4  ;;  %v3676_v28 = vrot.slane %v638_v59, 9 }
 0x116   : > { %v791_v49 = vrot.slane %v5743_v43, 5  ;;  %v3668_v11 = vrot.slane %v630_v51, 9  ;;  %v613_v62 = vsel %vm4635_vm5, %v608_v58, %v612_v39  ;;  %v425_v32 = vor.u32 %v424_v38, %v420_v36  ;;  %v5921_v38 = vld [vmem:[%s4546_s30 + $0x54] sm:$0xf] }
 0x117   : > { %v5874_v53 = vpop.permute.xlu0 %2577  ;;  %v416_v40 = vrot.slane %v415_v45, 4  ;;  %v735_v19 = vrot.slane %v5760_v7, 5  ;;  %v2867_v22 = vsel %vm2845_vm8, %v5792_v25, %v5678_v54  ;;  %v623_v27 = vsel %vm4635_vm5, %v618_v44, %v622_v9  ;;  %v631_v54 = vld [vmem:[%s4546_s30 + $0x54] sm:$0xe] }
 0x118   : > { %v792_v43 = vsel %vm4577_vm2, %v3676_v28, %v791_v49  ;;  %v793_v60 = vrot.slane %v791_v49, 4  ;;  %v2851_v39 = vsel %vm2845_vm8, %v5798_v41, %v5696_v33  ;;  %v3869_v35 = vcombine.low %v613_v62, %v623_v27  ;;  %v3706_v9 = vld [vmem:[%s4546_s30 + $0xb4] sm:$0xf]  ;;  %v5943_v62 = vld [vmem:[%s4546_s30 + $0x58] sm:$0xf] }
 0x119   : > { %v421_v7 = vsel %vm4635_vm5, %v416_v40, %v420_v36  ;;  %v426_v56 = vrot.slane %v425_v32, 4  ;;  %v736_v29 = vsel %vm4577_vm2, %v3668_v11, %v735_v19  ;;  %v737_v59 = vrot.slane %v735_v19, 4  ;;  %v3708_v32 = vld [vmem:[%s4546_s30 + $0xc0] sm:$0xf] }
 0x11a   : > { %v5888_v17 = vpop.permute.xlu1 %2671  ;;  %v795_v25 = vsel %vm4577_vm2, %v793_v60, %v794_v12  ;;  %v3677_v5 = vrot.slane %v639_v14, 9  ;;  %2169 = vrot.lane.b32.xlu1 %v3869_v35, %s4458_s6  ;;  %v798_v57 = vrot.slane %v5819_v34, 5  ;;  %v801_v6 = vrot.slane %v5830_v47, 5 }
 0x11b   : > { %v431_v33 = vsel %vm4635_vm5, %v426_v56, %v430_v48  ;;  %v3884_v41 = vcombine.low %v792_v43, %v795_v25  ;;  %v5907_v10 = vpop.permute.xlu0 %2655  ;;  %v739_v42 = vsel %vm4577_vm2, %v737_v59, %v738_v1  ;;  %v3669_v51 = vrot.slane %v631_v54, 9 }
 0x11c   : > { %v3861_v12 = vcombine.low %v421_v7, %v431_v33  ;;  %v742_v55 = vrot.slane %v5845_v26, 5  ;;  %v2869_v36 = vsel %vm2845_vm8, %v2836_v18, %v5702_v23  ;;  %v799_v58 = vsel %vm4577_vm2, %v3677_v5, %v798_v57  ;;  %v5929_v18 = vld [vmem:[%s4546_s30 + $0xb8] sm:$0xf]  ;;  %v3692_v7 = vld [vmem:[%s4546_s30 + $0x60] sm:$0xf] }
 0x11d   : > { %v800_v47 = vrot.slane %v798_v57, 4  ;;  %v745_v45 = vrot.slane %v5852_v63, 5  ;;  %v2853_v46 = vsel %vm2845_vm8, %v2820_v0, %v5718_v2  ;;  %v3876_v1 = vcombine.low %v736_v29, %v739_v42  ;;  %v5966_v29 = vld [vmem:[%s4546_s30 + $0x64] sm:$0xf]  ;;  %v5979_v57 = vld [vmem:[%s4546_s30 + $0xbc] sm:$0x1] }
 0x11e   : > { %2153 = vrot.lane.b32.xlu0 %v3861_v12, %s4458_s6  ;;  %v2900_v48 = vsel %vm2878_vm9, %v2867_v22, %v5733_v3  ;;  %v744_v23 = vrot.slane %v742_v55, 4  ;;  %v5931_v44 = vpop.permute.xlu1 %2673  ;;  %2247 = vrot.lane.b32.xlu1 %v3884_v41, %s4457_s5  ;;  %v743_v28 = vsel %vm4577_vm2, %v3669_v51, %v742_v55  ;;  %v1192_v49 = vshrl.u32 %v3706_v9, 16 }
 0x11f   : > { %v802_v63 = vsel %vm4577_vm2, %v800_v47, %v801_v6  ;;  %v1195_v2 = vshll.u32 %v3706_v9, 16  ;;  %v2884_v0 = vsel %vm2878_vm9, %v2851_v39, %v5753_v61  ;;  %v1000_v40 = vshrl.u32 %v5921_v38, 16 }
 0x120   : > { %v3885_v3 = vcombine.low %v799_v58, %v802_v63  ;;  %v746_v11 = vsel %vm4577_vm2, %v744_v23, %v745_v45  ;;  %v2902_v19 = vsel %vm2878_vm9, %v2869_v36, %v5762_v37  ;;  %v5951_v14 = vsel %vm2878_vm9, %v2853_v46, %v5776_v24  ;;  %v5955_v27 = vpop.permute.xlu0 %2657  ;;  %v5960_v37 = vld [vmem:[%s4546_s30 + $0xc4] sm:$0xf] }
 0x121   : > { %v1205_v61 = vshrl.u32 %v5929_v18, 16  ;;  %v1003_v22 = vshll.u32 %v5921_v38, 16  ;;  %v3877_v43 = vcombine.low %v743_v28, %v746_v11  ;;  %v1194_v60 = vrot.slane %v1192_v49, 4  ;;  %v5999_v11 = vld [vmem:[%s4546_s30 + $0xc8] sm:$0x1] }
 0x122   : > { %2231 = vrot.lane.b32.xlu0 %v3876_v1, %s4457_s5  ;;  %v1197_v39 = vrot.slane %v1195_v2, 5  ;;  %v3900_v35 = vcombine.low %v3706_v9, %v5929_v18  ;;  %2249 = vrot.lane.b32.xlu1 %v3885_v3, %s4457_s5  ;;  %v1002_v24 = vrot.slane %v1000_v40, 4  ;;  %v1013_v56 = vshrl.u32 %v5943_v62, 16  ;;  %v5981_v6 = vpop.permute.xlu1 %2751  ;;  %v5986_v9 = vld [vmem:[%s4546_s30 + $0x5c] sm:$0x1] }
 0x123   : > { %v1216_v54 = vshrl.u32 %v3708_v32, 16  ;;  %v1219_v25 = vshll.u32 %v3708_v32, 16  ;;  %v1005_v59 = vrot.slane %v1003_v22, 5  ;;  %v3892_v5 = vcombine.low %v5921_v38, %v5943_v62 }
 0x124   : > { %v5972_v33 = vsel %vm2911_vm10, %v2900_v48, %v5782_v16  ;;  %v5976_v41 = vsel %vm2911_vm10, %v2884_v0, %v5802_v4  ;;  %v1229_v12 = vshrl.u32 %v5960_v37, 16  ;;  %v3901_v42 = vcombine.low %v3708_v32, %v5960_v37  ;;  %v5994_v1 = vpop.permute.xlu0 %2735 }
 0x125   : > { %v1024_v51 = vshrl.u32 %v3692_v7, 16  ;;  %v1027_v55 = vshll.u32 %v3692_v7, 16  ;;  %v1218_v16 = vrot.slane %v1216_v54, 4  ;;  %v1221_v36 = vrot.slane %v1219_v25, 5 }
 0x126   : > { %2233 = vrot.lane.b32.xlu0 %v3877_v43, %s4457_s5  ;;  %v1037_v58 = vshrl.u32 %v5966_v29, 16  ;;  %v3893_v4 = vcombine.low %v3692_v7, %v5966_v29  ;;  %2343 = vrot.lane.b32.xlu1 %v3900_v35, %s4456_s4  ;;  %v1198_v47 = vor.u32 %v1197_v39, %v1194_v60  ;;  %v1201_v45 = vshll.u32 %v5929_v18, 16 }
 0x127   : > { %v1207_v38 = vrot.slane %v1205_v61, 4  ;;  %v1211_v46 = vshll.u32 %v5979_v57, 16  ;;  %v1006_v48 = vor.u32 %v1005_v59, %v1002_v24  ;;  %v1009_v23 = vshll.u32 %v5943_v62, 16 }
 0x128   : > { %v1015_v63 = vrot.slane %v1013_v56, 4  ;;  %v1019_v28 = vshll.u32 %v5986_v9, 16  ;;  %v1026_v49 = vrot.slane %v1024_v51, 4  ;;  %v1029_v2 = vrot.slane %v1027_v55, 5 }
 0x129   : > { %v1199_v0 = vrot.slane %v1198_v47, 4  ;;  %v1203_v3 = vrot.slane %v1201_v45, 5  ;;  %v6004_v40 = vsel %vm2911_vm10, %v2902_v19, %v5811_v13  ;;  %v1213_v32 = vrot.slane %v1211_v46, 5 }
 0x12a   : > { %2327 = vrot.lane.b32.xlu0 %v3892_v5, %s4456_s4  ;;  %v1007_v61 = vrot.slane %v1006_v48, 4  ;;  %v1011_v22 = vrot.slane %v1009_v23, 5  ;;  %v6006_v43 = vpop.permute.xlu1 %2163  ;;  %2345 = vrot.lane.b32.xlu1 %v3901_v42, %s4456_s4  ;;  %v1021_v39 = vrot.slane %v1019_v28, 5  ;;  %v1222_v35 = vor.u32 %v1221_v36, %v1218_v16  ;;  %v6014_v5 = vld [vmem:[%s4546_s30 + $0x68] sm:$0x1] }
 0x12b   : > { %v1208_v60 = vor.u32 %v1207_v38, %v1203_v3  ;;  %v1225_v7 = vshll.u32 %v5960_v37, 16  ;;  %v1204_v24 = vsel %vm4635_vm5, %v1199_v0, %v1203_v3  ;;  %v1231_v54 = vrot.slane %v1229_v12, 4  ;;  %v3740_v48 = vld [vmem:[%s4546_s30 + $0xb4] sm:$0xe] }
 0x12c   : > { %v1016_v56 = vor.u32 %v1015_v63, %v1011_v22  ;;  %v1235_v13 = vshll.u32 %v5999_v11, 16  ;;  %v1223_v25 = vrot.slane %v1222_v35, 4  ;;  %v1030_v51 = vor.u32 %v1029_v2, %v1026_v49  ;;  %v3732_v49 = vld [vmem:[%s4546_s30 + $0x54] sm:$0xe] }
 0x12d   : > { %v1209_v19 = vrot.slane %v1208_v60, 4  ;;  %v1227_v59 = vrot.slane %v1225_v7, 5  ;;  %v6016_v42 = vpop.permute.xlu0 %2147  ;;  %v1012_v55 = vsel %vm4635_vm5, %v1007_v61, %v1011_v22  ;;  %v1033_v12 = vshll.u32 %v5966_v29, 16 }
 0x12e   : > { %2329 = vrot.lane.b32.xlu0 %v3893_v4, %s4456_s4  ;;  %v1017_v16 = vrot.slane %v1016_v56, 4  ;;  %v1039_v36 = vrot.slane %v1037_v58, 4  ;;  %v1237_v38 = vrot.slane %v1235_v13, 5  ;;  %v1031_v46 = vrot.slane %v1030_v51, 4  ;;  %v6029_v2 = vpop.permute.xlu1 %2753 }
 0x12f   : > { %v1214_v47 = vsel %vm4635_vm5, %v1209_v19, %v1213_v32  ;;  %v1232_v45 = vor.u32 %v1231_v54, %v1227_v59  ;;  %v1035_v28 = vrot.slane %v1033_v12, 5  ;;  %v1043_v4 = vshll.u32 %v6014_v5, 16 }
 0x130   : > { %v3916_v23 = vcombine.low %v1204_v24, %v1214_v47  ;;  %v1022_v63 = vsel %vm4635_vm5, %v1017_v16, %v1021_v39  ;;  %v2919_v58 = vsel %vm2911_vm10, %v5951_v14, %v5821_v8  ;;  %v1228_v3 = vsel %vm4635_vm5, %v1223_v25, %v1227_v59  ;;  %v3741_v24 = vld [vmem:[%s4546_s30 + $0xc0] sm:$0xe] }
 0x131   : > { %v3908_v0 = vcombine.low %v1012_v55, %v1022_v63  ;;  %v1233_v32 = vrot.slane %v1232_v45, 4  ;;  %v1036_v61 = vsel %vm4635_vm5, %v1031_v46, %v1035_v28  ;;  %v1040_v22 = vor.u32 %v1039_v36, %v1035_v28  ;;  %v6045_v56 = vpop.permute.xlu0 %2737  ;;  %v3733_v55 = vld [vmem:[%s4546_s30 + $0x60] sm:$0xe] }
 0x132   : > { %2423 = vrot.lane.b32.xlu1 %v3916_v23, %s4459_s7  ;;  %v1045_v60 = vrot.slane %v1043_v4, 5  ;;  %v3756_v39 = vrot.slane %v3740_v48, 9  ;;  %v1403_v8 = vrot.slane %v5929_v18, 5  ;;  %v1406_v14 = vrot.slane %v5979_v57, 5  ;;  %v3786_v48 = vld [vmem:[%s4546_s30 + $0xc0] sm:$0xf] }
 0x133   : > { %2407 = vrot.lane.b32.xlu0 %v3908_v0, %s4459_s7  ;;  %v1238_v35 = vsel %vm4635_vm5, %v1233_v32, %v1237_v38  ;;  %v3748_v7 = vrot.slane %v3732_v49, 9  ;;  %v1041_v13 = vrot.slane %v1040_v22, 4  ;;  %v1347_v19 = vrot.slane %v5943_v62, 5  ;;  %v6078_v4 = vld [vmem:[%s4546_s30 + $0x60] sm:$0xf] }
 0x134   : > { %v3917_v54 = vcombine.low %v1228_v3, %v1238_v35  ;;  %v1350_v25 = vrot.slane %v5986_v9, 5  ;;  %v2966_v59 = vsel %vm2944_vm11, %v5972_v33, %v5840_v50  ;;  %v2950_v18 = vsel %vm2944_vm11, %v5976_v41, %v5855_v52  ;;  %v6097_v22 = vld [vmem:[%s4546_s30 + $0xc4] sm:$0xf]  ;;  %v3788_v35 = vld [vmem:[%s4546_s30 + $0xcc] sm:$0xf] }
 0x135   : > { %v1404_v57 = vsel %vm4577_vm2, %v3756_v39, %v1403_v8  ;;  %v1405_v51 = vrot.slane %v1403_v8, 4  ;;  %v1046_v62 = vsel %vm4635_vm5, %v1041_v13, %v1045_v60  ;;  %v1348_v9 = vsel %vm4577_vm2, %v3748_v7, %v1347_v19  ;;  %v6112_v7 = vld [vmem:[%s4546_s30 + $0x6c] sm:$0xf] }
 0x136   : > { %2425 = vrot.lane.b32.xlu1 %v3917_v54, %s4459_s7  ;;  %v1349_v16 = vrot.slane %v1347_v19, 4  ;;  %v3757_v50 = vrot.slane %v3741_v24, 9  ;;  %v3909_v52 = vcombine.low %v1036_v61, %v1046_v62  ;;  %v1410_v12 = vrot.slane %v5960_v37, 5 }
 0x137   : > { %v1407_v41 = vsel %vm4577_vm2, %v1405_v51, %v1406_v14  ;;  %v1413_v36 = vrot.slane %v5999_v11, 5  ;;  %v3749_v38 = vrot.slane %v3733_v55, 9  ;;  %v1354_v46 = vrot.slane %v5966_v29, 5  ;;  %v6131_v55 = vld [vmem:[%s4546_s30 + $0x70] sm:$0xf] }
 0x138   : > { %v6063_v33 = vpop.permute.xlu1 %2165  ;;  %v3932_v47 = vcombine.low %v1404_v57, %v1407_v41  ;;  %v1351_v45 = vsel %vm4577_vm2, %v1349_v16, %v1350_v25  ;;  %2409 = vrot.lane.b32.xlu0 %v3909_v52, %s4459_s7  ;;  %v1411_v63 = vsel %vm4577_vm2, %v3757_v50, %v1410_v12  ;;  %v1412_v28 = vrot.slane %v1410_v12, 4  ;;  %v6120_v25 = vld [vmem:[%s4546_s30 + $0x64] sm:$0xf]  ;;  %s4071_s7 = sshll.u32 %s4446_s15, 11 }
 0x139   : > { %v3924_v23 = vcombine.low %v1348_v9, %v1351_v45  ;;  %v1357_v37 = vrot.slane %v6014_v5, 5  ;;  %v2968_v29 = vsel %vm2944_vm11, %v6004_v40, %v5865_v20  ;;  %v2952_v49 = vsel %vm2944_vm11, %v2919_v58, %v5874_v53 }
 0x13a   : > { %2503 = vrot.lane.b32.xlu1 %v3932_v47, %s4460_s8  ;;  %v1355_v0 = vsel %vm4577_vm2, %v3749_v38, %v1354_v46  ;;  %v1356_v3 = vrot.slane %v1354_v46, 4  ;;  %v2999_v5 = vsel %vm2977_vm12, %v2966_v59, %v5888_v17  ;;  %v1414_v61 = vsel %vm4577_vm2, %v1412_v28, %v1413_v36 }
 0x13b   : > { %v6080_v11 = vpop.permute.xlu0 %2149  ;;  %v1804_v20 = vshrl.u32 %v3786_v48, 16  ;;  %v1807_v40 = vshll.u32 %v3786_v48, 16  ;;  %v2983_v53 = vsel %vm2977_vm12, %v2950_v18, %v5907_v10  ;;  %v3933_v58 = vcombine.low %v1411_v63, %v1414_v61 }
 0x13c   : > { %v6090_v32 = vpop.permute.xlu1 %2243  ;;  %v1358_v60 = vsel %vm4577_vm2, %v1356_v3, %v1357_v37  ;;  %v1612_v39 = vshrl.u32 %v6078_v4, 16  ;;  %2487 = vrot.lane.b32.xlu0 %v3924_v23, %s4460_s8  ;;  %v3001_v8 = vsel %vm2977_vm12, %v2968_v29, %v5931_v44  ;;  %v2985_v14 = vsel %vm2977_vm12, %v2952_v49, %v5955_v27  ;;  %v6125_v27 = vld [vmem:[%s4546_s30 + $0xd0] sm:$0xf] }
 0x13d   : > { %v3925_v17 = vcombine.low %v1355_v0, %v1358_v60  ;;  %v1615_v10 = vshll.u32 %v6078_v4, 16  ;;  %v1806_v54 = vrot.slane %v1804_v20, 4  ;;  %v1817_v13 = vshrl.u32 %v6097_v22, 16 }
 0x13e   : > { %2505 = vrot.lane.b32.xlu1 %v3933_v58, %s4460_s8  ;;  %v3948_v19 = vcombine.low %v3786_v48, %v6097_v22  ;;  %v3032_v44 = vsel %vm3010_vm13, %v2999_v5, %v5981_v6  ;;  %v1809_v59 = vrot.slane %v1807_v40, 5  ;;  %v3016_v18 = vsel %vm3010_vm13, %v2983_v53, %v5994_v1  ;;  %v6137_v6 = vld [vmem:[%s4546_s30 + $0xc8] sm:$0x1] }
 0x13f   : > { %v6114_v24 = vpop.permute.xlu0 %2227  ;;  %v1828_v57 = vshrl.u32 %v3788_v35, 16  ;;  %v1831_v51 = vshll.u32 %v3788_v35, 16  ;;  %4212 = vmatprep.mubr.msk.bf16.mxu1 %vm3063_vm14, %v3032_v44  ;;  %v1614_v62 = vrot.slane %v1612_v39, 4  ;;  %v1617_v9 = vrot.slane %v1615_v10, 5  ;;  %4196 = vmatprep.mubr.msk.bf16.mxu0 %vm3063_vm14, %v3016_v18  ;;  %v6169_v10 = vld [vmem:[%s4546_s30 + $0xd4] sm:$0x1] }
 0x140   : > { %v1636_v16 = vshrl.u32 %v6112_v7, 16  ;;  %v1639_v50 = vshll.u32 %v6112_v7, 16  ;;  %2489 = vrot.lane.b32.xlu0 %v3925_v17, %s4460_s8  ;;  %v1625_v1 = vshrl.u32 %v6120_v25, 16  ;;  %v3940_v41 = vcombine.low %v6078_v4, %v6120_v25  ;;  %v6156_v4 = vld [vmem:[%s4546_s30 + $0x68] sm:$0x1] }
 0x141   : > { %v1841_v12 = vshrl.u32 %v6125_v27, 16  ;;  %v3949_v36 = vcombine.low %v3788_v35, %v6125_v27  ;;  %v1830_v45 = vrot.slane %v1828_v57, 4  ;;  %v1833_v38 = vrot.slane %v1831_v51, 5 }
 0x142   : > { %v6139_v52 = vpop.permute.xlu1 %2245  ;;  %2599 = vrot.lane.b32.xlu1 %v3948_v19, %s4461_s9  ;;  %v1649_v46 = vshrl.u32 %v6131_v55, 16  ;;  %v3941_v48 = vcombine.low %v6112_v7, %v6131_v55  ;;  %v1810_v23 = vor.u32 %v1809_v59, %v1806_v54  ;;  %v1813_v63 = vshll.u32 %v6097_v22, 16 }
 0x143   : > { %v6147_v47 = vpop.permute.xlu0 %2229  ;;  %v1819_v28 = vrot.slane %v1817_v13, 4  ;;  %v1823_v37 = vshll.u32 %v6137_v6, 16  ;;  %v1638_v29 = vrot.slane %v1636_v16, 4  ;;  %v1641_v49 = vrot.slane %v1639_v50, 5 }
 0x144   : > { %v1618_v0 = vor.u32 %v1617_v9, %v1614_v62  ;;  %v1621_v3 = vshll.u32 %v6120_v25, 16  ;;  %2583 = vrot.lane.b32.xlu0 %v3940_v41, %s4461_s9  ;;  %v1811_v61 = vrot.slane %v1810_v23, 4  ;;  %v1815_v20 = vrot.slane %v1813_v63, 5 }
 0x145   : > { %v1825_v40 = vrot.slane %v1823_v37, 5  ;;  %v1627_v53 = vrot.slane %v1625_v1, 4  ;;  %v1631_v35 = vshll.u32 %v6156_v4, 16  ;;  %v3034_v17 = vsel %vm3010_vm13, %v3001_v8, %v6029_v2  ;;  %v6180_v2 = vld [vmem:[%s4546_s30 + $0x74] sm:$0x1] }
 0x146   : > { %v6159_v5 = vpop.permute.xlu1 %2339  ;;  %2601 = vrot.lane.b32.xlu1 %v3949_v36, %s4461_s9  ;;  %v1619_v60 = vrot.slane %v1618_v0, 4  ;;  %v1623_v39 = vrot.slane %v1621_v3, 5  ;;  %v1816_v7 = vsel %vm4635_vm5, %v1811_v61, %v1815_v20  ;;  %v1820_v54 = vor.u32 %v1819_v28, %v1815_v20  ;;  %4213 = vmatmul.mubr.msk.bf16.gmra.mrb[4].mxu1 %vm3063_vm14, %v3034_v17 }
 0x147   : > { %v6162_v58 = vpop.permute.xlu0 %2323  ;;  %v3018_v13 = vsel %vm3010_vm13, %v2985_v14, %v6045_v56  ;;  %v1834_v19 = vor.u32 %v1833_v38, %v1830_v45  ;;  %v1633_v18 = vrot.slane %v1631_v35, 5  ;;  %v1837_v57 = vshll.u32 %v6125_v27, 16 }
 0x148   : > { %v1624_v44 = vsel %vm4635_vm5, %v1619_v60, %v1623_v39  ;;  %v1628_v59 = vor.u32 %v1627_v53, %v1623_v39  ;;  %4197 = vmatmul.mubr.msk.bf16.gmra.mrb[4].mxu0 %vm3063_vm14, %v3018_v13  ;;  %2585 = vrot.lane.b32.xlu0 %v3941_v48, %s4461_s9  ;;  %v1821_v8 = vrot.slane %v1820_v54, 4  ;;  %v1843_v56 = vrot.slane %v1841_v12, 4  ;;  %v3820_v48 = vld [vmem:[%s4546_s30 + $0xc0] sm:$0xe]  ;;  %v3821_v54 = vld [vmem:[%s4546_s30 + $0xcc] sm:$0xe] }
 0x149   : > { %v1835_v51 = vrot.slane %v1834_v19, 4  ;;  %v1847_v14 = vshll.u32 %v6169_v10, 16  ;;  %v1839_v16 = vrot.slane %v1837_v57, 5  ;;  %v1642_v50 = vor.u32 %v1641_v49, %v1638_v29  ;;  %v3812_v49 = vld [vmem:[%s4546_s30 + $0x60] sm:$0xe] }
 0x14a   : > { %v6185_v62 = vpop.permute.xlu1 %2341  ;;  %v1629_v9 = vrot.slane %v1628_v59, 4  ;;  %v1645_v1 = vshll.u32 %v6131_v55, 16  ;;  %v1826_v36 = vsel %vm4635_vm5, %v1821_v8, %v1825_v40  ;;  %v1651_v45 = vrot.slane %v1649_v46, 4  ;;  %v3813_v57 = vld [vmem:[%s4546_s30 + $0x6c] sm:$0xe] }
 0x14b   : > { %v6188_v41 = vpop.permute.xlu0 %2325  ;;  %v1655_v38 = vshll.u32 %v6180_v2, 16  ;;  %v3964_v12 = vcombine.low %v1816_v7, %v1826_v36  ;;  %v1844_v63 = vor.u32 %v1843_v56, %v1839_v16  ;;  %v1849_v28 = vrot.slane %v1847_v14, 5 }
 0x14c   : > { %v1634_v23 = vsel %vm4635_vm5, %v1629_v9, %v1633_v18  ;;  %v1643_v0 = vrot.slane %v1642_v50, 4  ;;  %v1647_v29 = vrot.slane %v1645_v1, 5  ;;  %v1840_v3 = vsel %vm4635_vm5, %v1835_v51, %v1839_v16 }
 0x14d   : > { %v3956_v37 = vcombine.low %v1624_v44, %v1634_v23  ;;  %2679 = vrot.lane.b32.xlu1 %v3964_v12, %s4462_s10  ;;  %v1845_v46 = vrot.slane %v1844_v63, 4  ;;  %v3836_v61 = vrot.slane %v3820_v48, 9  ;;  %v1657_v40 = vrot.slane %v1655_v38, 5 }
 0x14e   : > { %v1652_v20 = vor.u32 %v1651_v45, %v1647_v29  ;;  %v2015_v53 = vrot.slane %v6097_v22, 5  ;;  %v2018_v60 = vrot.slane %v6137_v6, 5  ;;  %v1648_v17 = vsel %vm4635_vm5, %v1643_v0, %v1647_v29 }
 0x14f   : > { %2663 = vrot.lane.b32.xlu0 %v3956_v37, %s4462_s10  ;;  %v1850_v35 = vsel %vm4635_vm5, %v1845_v46, %v1849_v28  ;;  %v3828_v7 = vrot.slane %v3812_v49, 9  ;;  %v1959_v6 = vrot.slane %v6120_v25, 5  ;;  %v1962_v18 = vrot.slane %v6156_v4, 5 }
 0x150   : > { %v3965_v19 = vcombine.low %v1840_v3, %v1850_v35  ;;  %v1653_v44 = vrot.slane %v1652_v20, 4  ;;  %v2016_v59 = vsel %vm4577_vm2, %v3836_v61, %v2015_v53  ;;  %v2017_v22 = vrot.slane %v2015_v53, 4  ;;  %v4364_v53 = vld [vmem:[%s4546_s30 + $0x90] sm:$0xf] }
 0x151   : > { %v6203_v39 = vpop.permute.xlu1 %2419  ;;  %v3837_v56 = vrot.slane %v3821_v54, 9  ;;  %v2022_v14 = vrot.slane %v6125_v27, 5  ;;  %v1960_v50 = vsel %vm4577_vm2, %v3828_v7, %v1959_v6  ;;  %v1961_v25 = vrot.slane %v1959_v6, 4  ;;  %v4366_v7 = vld [vmem:[%s4546_s30 + $0x30] sm:$0xf] }
 0x152   : > { %v6210_v13 = vpop.permute.xlu0 %2403  ;;  %2681 = vrot.lane.b32.xlu1 %v3965_v19, %s4462_s10  ;;  %v1658_v8 = vsel %vm4635_vm5, %v1653_v44, %v1657_v40  ;;  %v2019_v51 = vsel %vm4577_vm2, %v2017_v22, %v2018_v60  ;;  %v2025_v36 = vrot.slane %v6169_v10, 5  ;;  %v3829_v30 = vrot.slane %v3813_v57, 9  ;;  %v4365_v60 = vld [vmem:[%s4546_s30 + $0x94] sm:$0xf] }
 0x153   : > { %v3957_v9 = vcombine.low %v1648_v17, %v1658_v8  ;;  %v3980_v16 = vcombine.low %v2016_v59, %v2019_v51  ;;  %v2023_v4 = vsel %vm4577_vm2, %v3837_v56, %v2022_v14  ;;  %v2024_v1 = vrot.slane %v2022_v14, 4  ;;  %v4367_v54 = vld [vmem:[%s4546_s30 + $0x34] sm:$0xf] }
 0x154   : > { %v1963_v27 = vsel %vm4577_vm2, %v1961_v25, %v1962_v18  ;;  %v1966_v38 = vrot.slane %v6131_v55, 5  ;;  %v1969_v48 = vrot.slane %v6180_v2, 5  ;;  %v3850_v35 = vcombine.low %v4364_v53, %v4365_v60 }
 0x155   : > { %2665 = vrot.lane.b32.xlu0 %v3957_v9, %s4462_s10  ;;  %v3972_v23 = vcombine.low %v1960_v50, %v1963_v27  ;;  %v2026_v10 = vsel %vm4577_vm2, %v2024_v1, %v2025_v36  ;;  %v3842_v19 = vcombine.low %v4366_v7, %v4367_v54  ;;  %v4369_v50 = vld [vmem:[%s4546_s30 + $0xa0] sm:$0xf]  ;;  %v4370_v36 = vld [vmem:[%s4546_s30 + $0x3c] sm:$0xf] }
 0x156   : > { %v6228_v45 = vpop.permute.xlu1 %2421  ;;  %2759 = vrot.lane.b32.xlu1 %v3980_v16, %s4463_s11  ;;  %v3981_v63 = vcombine.low %v2023_v4, %v2026_v10  ;;  %v1967_v28 = vsel %vm4577_vm2, %v3829_v30, %v1966_v38  ;;  %v1968_v37 = vrot.slane %v1966_v38, 4  ;;  %v2802_v21 = vsel %vm2763_vm6, %v3850_v35, %v6006_v43  ;;  %v4368_v16 = vld [vmem:[%s4546_s30 + $0x9c] sm:$0xf]  ;;  %v4371_v30 = vld [vmem:[%s4546_s30 + $0x40] sm:$0xf] }
 0x157   : > { %v6235_v12 = vpop.permute.xlu0 %2405  ;;  %v2838_v59 = vsel %vm2812_vm7, %v2802_v21, %v6090_v32  ;;  %v2778_v57 = vsel %vm2763_vm6, %v3842_v19, %v6016_v42  ;;  %v3843_v27 = vcombine.low %v4370_v36, %v4371_v30 }
 0x158   : > { %v1970_v55 = vsel %vm4577_vm2, %v1968_v37, %v1969_v48  ;;  %v2871_v22 = vsel %vm2845_vm8, %v2838_v59, %v6159_v5  ;;  %v2822_v8 = vsel %vm2812_vm7, %v2778_v57, %v6114_v24 }
 0x159   : > { %2743 = vrot.lane.b32.xlu0 %v3972_v23, %s4463_s11  ;;  %v3973_v29 = vcombine.low %v1967_v28, %v1970_v55  ;;  %v2904_v18 = vsel %vm2878_vm9, %v2871_v22, %v6203_v39  ;;  %v2855_v32 = vsel %vm2845_vm8, %v2822_v8, %v6162_v58  ;;  %v3851_v58 = vcombine.low %v4368_v16, %v4369_v50 }
 0x15a   : > { %v2500_v0 = vpop.permute.xlu1 %2499  ;;  %2761 = vrot.lane.b32.xlu1 %v3981_v63, %s4463_s11  ;;  %v2888_v39 = vsel %vm2878_vm9, %v2855_v32, %v6210_v13  ;;  %v2781_v63 = vsel %vm2763_vm6, %v3843_v27, %v6080_v11  ;;  %v4373_v32 = vld [vmem:[%s4546_s30 + $0xac] sm:$0xf]  ;;  %v3853_v16 = vcombine.low %v5809_v15, %v5819_v34  ;;  %v3845_v50 = vcombine.low %v5834_v31, %v5845_v26 }
 0x15b   : > { %v2484_v2 = vpop.permute.xlu0 %2483  ;;  %v2937_v43 = vsel %vm2911_vm10, %v2904_v18, %v2500_v0  ;;  %v2805_v13 = vsel %vm2763_vm6, %v3851_v58, %v6063_v33  ;;  %v2824_v33 = vsel %vm2812_vm7, %v2781_v63, %v6147_v47 }
 0x15c   : > { %v2921_v9 = vsel %vm2911_vm10, %v2888_v39, %v2484_v2  ;;  %v2840_v38 = vsel %vm2812_vm7, %v2805_v13, %v6139_v52  ;;  %v2857_v52 = vsel %vm2845_vm8, %v2824_v33, %v6188_v41  ;;  %v4375_v39 = vld [vmem:[%s4546_s30 + $0x4c] sm:$0xf]  ;;  %v6334_v33 = vld [vmem:[%s6469_s2] ss:$0 sm:$0xff] }
 0x15d   : > { %2745 = vrot.lane.b32.xlu0 %v3973_v29, %s4463_s11  ;;  %v2873_v48 = vsel %vm2845_vm8, %v2840_v38, %v6185_v62  ;;  %s6412_s11 = scalar_lea.hbm %s6470_s3, %s4071_s7 }
 0x15e   : > { %v2502_v49 = vpop.permute.xlu1 %2501  ;;  %v2906_v10 = vsel %vm2878_vm9, %v2873_v48, %v6228_v45  ;;  %v2890_v45 = vsel %vm2878_vm9, %v2857_v52, %v6235_v12 }
 0x15f   : > { %v2486_v3 = vpop.permute.xlu0 %2485  ;;  %v2939_v28 = vsel %vm2911_vm10, %v2906_v10, %v2502_v49 }
 0x160   : > { %v2923_v11 = vsel %vm2911_vm10, %v2890_v45, %v2486_v3 }
 0x162   : > { %v2596_v46 = vpop.permute.xlu1 %2595 }
 0x163   : > { %v2580_v61 = vpop.permute.xlu0 %2579  ;;  %v2970_v51 = vsel %vm2944_vm11, %v2937_v43, %v2596_v46 }
 0x164   : > { %v2954_v24 = vsel %vm2944_vm11, %v2921_v9, %v2580_v61 }
 0x166   : > { %v2598_v20 = vpop.permute.xlu1 %2597 }
 0x167   : > { %v2582_v40 = vpop.permute.xlu0 %2581  ;;  %v2972_v37 = vsel %vm2944_vm11, %v2939_v28, %v2598_v20 }
 0x168   : > { %v2956_v47 = vsel %vm2944_vm11, %v2923_v11, %v2582_v40 }
 0x16d   : > { %v2676_v17 = vpop.permute.xlu1 %2675 }
 0x16e   : > { %v2660_v44 = vpop.permute.xlu0 %2659  ;;  %v3003_v5 = vsel %vm2977_vm12, %v2970_v51, %v2676_v17  ;;  %v4372_v51 = vld [vmem:[%s4546_s30 + $0xa8] sm:$0xf] }
 0x16f   : > { %v2987_v25 = vsel %vm2977_vm12, %v2954_v24, %v2660_v44 }
 0x171   : > { %v2678_v6 = vpop.permute.xlu1 %2677 }
 0x172   : > { %v3005_v0 = vsel %vm2977_vm12, %v2972_v37, %v2678_v6 }
 0x175   : > { %v2662_v56 = vpop.permute.xlu0 %2661  ;;  %v2756_v14 = vpop.permute.xlu1 %2755 }
 0x176   : > { %v3036_v42 = vsel %vm3010_vm13, %v3003_v5, %v2756_v14  ;;  %v2989_v29 = vsel %vm2977_vm12, %v2956_v47, %v2662_v56  ;;  %v3852_v5 = vcombine.low %v4372_v51, %v4373_v32  ;;  %v4374_v14 = vld [vmem:[%s4546_s30 + $0x48] sm:$0xf]  ;;  %s175_s30 = sand.u32 1, %s4438_s13  }
 0x177   : > { %4216 = vmatprep.mubr.msk.bf16.mxu1 %vm3063_vm14, %v3036_v42  ;;  %v3844_v42 = vcombine.low %v4374_v14, %v4375_v39  ;;  %s3660_s4 = sshll.u32 %s175_s30, 7  ;;  %s6420_s15 = scalar_lea.sflag [#allocation4], %s175_s30 }
 0x178   : > { %s6367_s5 = scalar_lea.vmem [#allocation3], %s3660_s4 }
 0x179   : > { %v2740_v4 = vpop.permute.xlu0 %2739  ;;  %s3572_s8 = sshll.u32 %s6367_s5, 4  ;;  %s6414_s8 = int_to_ptr.vmem [resolvable:$true] %s3572_s8 }
 0x17a   : > { %v3020_v1 = vsel %vm3010_vm13, %v2987_v25, %v2740_v4  ;;  %s4376_s18 = scalar_lea.vmem %s6414_s8, 2048  ;;  %p4383_p1 = scmp.lt.s32.totalorder %s6414_s8, %s4381_s21 }
 0x17b   : > { %4200 = vmatprep.mubr.msk.bf16.mxu0 %vm3063_vm14, %v3020_v1  ;;  %p4377_p12 = scmp.ne.s32.totalorder %s6414_s8, %s4376_s18  ;;  %p4384_p2 = scmp.lt.s32.totalorder %s4382_s23, %s4376_s18 }
 0x17d   : > { %p4378_p13 = pnand %p4377_p12, %p4526_p4  ;;  %p4385_p3 = por %p4384_p2, %p4383_p1 }
 0x17f   : > { %v2168_v23 = vpop.permute.xlu1 %2167  ;;  %p4379_p0 = pneg %p4378_p13 }
 0x180   : > { %v2808_v24 = vsel %vm2763_vm6, %v3852_v5, %v2168_v23 }
 0x181   : > { %p4386_p5 = pnand %p4385_p3, %p4379_p0 }
 0x183   : > { %v2152_v62 = vpop.permute.xlu0 %2151  ;;  %v2758_v55 = vpop.permute.xlu1 %2757 }
 0x184   : > { %v3038_v2 = vsel %vm3010_vm13, %v3005_v0, %v2758_v55  ;;  %v2784_v1 = vsel %vm2763_vm6, %v3844_v42, %v2152_v62 }
 0x185   : > { %4217 = vmatmul.mubr.msk.bf16.gmra.mrb[8].mxu1 %vm3063_vm14, %v3038_v2 }
 0x187   : > { %v2742_v49 = vpop.permute.xlu0 %2741 }
 0x188   : > { %v3022_v41 = vsel %vm3010_vm13, %v2989_v29, %v2742_v49 }
 0x189   : > { %4201 = vmatmul.mubr.msk.bf16.gmra.mrb[8].mxu0 %vm3063_vm14, %v3022_v41 }
 0x18c   : > { %v2170_v46 = vpop.permute.xlu1 %2169 }
 0x18d   : > { %v2811_v36 = vsel %vm2763_vm6, %v3853_v16, %v2170_v46 }
 0x190   : > { %v2154_v61 = vpop.permute.xlu0 %2153  ;;  %v2248_v20 = vpop.permute.xlu1 %2247 }
 0x191   : > { %v2842_v58 = vsel %vm2812_vm7, %v2808_v24, %v2248_v20  ;;  %v2787_v15 = vsel %vm2763_vm6, %v3845_v50, %v2154_v61 }
 0x194   : > { %v2232_v53 = vpop.permute.xlu0 %2231  ;;  %v2250_v12 = vpop.permute.xlu1 %2249 }
 0x195   : > { %v2826_v30 = vsel %vm2812_vm7, %v2784_v1, %v2232_v53  ;;  %v2844_v34 = vsel %vm2812_vm7, %v2811_v36, %v2250_v12 }
 0x198   : > { %v2234_v60 = vpop.permute.xlu0 %2233  ;;  %v2344_v35 = vpop.permute.xlu1 %2343 }
 0x199   : > { %v2875_v25 = vsel %vm2845_vm8, %v2842_v58, %v2344_v35  ;;  %v2828_v48 = vsel %vm2812_vm7, %v2787_v15, %v2234_v60 }
 0x19c   : > { %v2328_v3 = vpop.permute.xlu0 %2327  ;;  %v2346_v17 = vpop.permute.xlu1 %2345 }
 0x19d   : > { %v2859_v31 = vsel %vm2845_vm8, %v2826_v30, %v2328_v3  ;;  %v2877_v23 = vsel %vm2845_vm8, %v2844_v34, %v2346_v17 }
 0x1a0   : > { %v2330_v21 = vpop.permute.xlu0 %2329 }
 0x1a1   : > { %v2861_v37 = vsel %vm2845_vm8, %v2828_v48, %v2330_v21 }
 0x1a4   : > { %v2424_v40 = vpop.permute.xlu1 %2423 }
 0x1a5   : > { %v2408_v7 = vpop.permute.xlu0 %2407  ;;  %v2908_v13 = vsel %vm2878_vm9, %v2875_v25, %v2424_v40 }
 0x1a6   : > { %v2892_v10 = vsel %vm2878_vm9, %v2859_v31, %v2408_v7 }
 0x1a8   : > { %v2426_v54 = vpop.permute.xlu1 %2425 }
 0x1a9   : > { %v2910_v52 = vsel %vm2878_vm9, %v2877_v23, %v2426_v54 }
 0x1aa   : > { %v2410_v19 = vpop.permute.xlu0 %2409 }
 0x1ab   : > { %v2894_v45 = vsel %vm2878_vm9, %v2861_v37, %v2410_v19 }
 0x1ac   : > { %v2504_v44 = vpop.permute.xlu1 %2503 }
 0x1ad   : > { %v2941_v27 = vsel %vm2911_vm10, %v2908_v13, %v2504_v44 }
 0x1ae   : > { %v2488_v59 = vpop.permute.xlu0 %2487 }
 0x1af   : > { %v2925_v0 = vsel %vm2911_vm10, %v2892_v10, %v2488_v59 }
 0x1b0   : > { %v2506_v22 = vpop.permute.xlu1 %2505 }
 0x1b1   : > { %v2943_v2 = vsel %vm2911_vm10, %v2910_v52, %v2506_v22 }
 0x1b2   : > { %v2490_v6 = vpop.permute.xlu0 %2489 }
 0x1b3   : > { %v2927_v12 = vsel %vm2911_vm10, %v2894_v45, %v2490_v6 }
 0x1b4   : > { %v2600_v18 = vpop.permute.xlu1 %2599 }
 0x1b5   : > { %v2974_v26 = vsel %vm2944_vm11, %v2941_v27, %v2600_v18 }
 0x1b6   : > { %v2584_v57 = vpop.permute.xlu0 %2583 }
 0x1b7   : > { %v2958_v11 = vsel %vm2944_vm11, %v2925_v0, %v2584_v57 }
 0x1b8   : > { %v2602_v43 = vpop.permute.xlu1 %2601 }
 0x1b9   : > { %v2976_v49 = vsel %vm2944_vm11, %v2943_v2, %v2602_v43 }
 0x1ba   : > { %v2586_v8 = vpop.permute.xlu0 %2585 }
 0x1bb   : > { %v2960_v40 = vsel %vm2944_vm11, %v2927_v12, %v2586_v8 }
 0x1bf   : > { %v2680_v56 = vpop.permute.xlu1 %2679 }
 0x1c0   : > { %v3007_v63 = vsel %vm2977_vm12, %v2974_v26, %v2680_v56 }
 0x1c1   : > { %v2664_v9 = vpop.permute.xlu0 %2663 }
 0x1c2   : > { %v2991_v41 = vsel %vm2977_vm12, %v2958_v11, %v2664_v9 }
 0x1c4   : > { %v2682_v4 = vpop.permute.xlu1 %2681 }
 0x1c5   : > { %v3009_v60 = vsel %vm2977_vm12, %v2976_v49, %v2682_v4 }
 0x1c7   : > { %v2666_v38 = vpop.permute.xlu0 %2665 }
 0x1c8   : > { %v2760_v28 = vpop.permute.xlu1 %2759  ;;  %v2993_v22 = vsel %vm2977_vm12, %v2960_v40, %v2666_v38 }
 0x1c9   : > { %v3040_v62 = vsel %vm3010_vm13, %v3007_v63, %v2760_v28 }
 0x1ca   : > { %v4194_v55 = vpop.f32.mrb[0].mxu0  ;;  %4220 = vmatprep.mubr.msk.bf16.mxu1 %vm3063_vm14, %v3040_v62 }
 0x1cb   : > { %v4210_v47 = vpop.f32.mrb[0].mxu1  ;;  %v3134_v29 = vpop.f32.mrb[1].mxu0  ;;  %v3334_v61 = vadd.f32 %v4194_v55, %v6334_v33 }
 0x1cc   : > { %v2744_v46 = vpop.permute.xlu0 %2743  ;;  %v3350_v20 = vadd.f32 %v4210_v47, %v6334_v33  ;;  %v3198_v53 = vpop.f32.mrb[1].mxu1  ;;  %v3332_v17 = vadd.f32 %v6334_v33, %v3134_v29 }
 0x1cd   : > { %v3024_v35 = vsel %vm3010_vm13, %v2991_v41, %v2744_v46  ;;  %v2762_v3 = vpop.permute.xlu1 %2761  ;;  %v4195_v21 = vpop.f32.mrb[2].mxu0  ;;  %v3348_v54 = vadd.f32 %v6334_v33, %v3198_v53  ;;  %v3366_v8 = vmax.f32 %v3334_v61, 0.0 }
 0x1ce   : > { %4204 = vmatprep.mubr.msk.bf16.mxu0 %vm3063_vm14, %v3024_v35  ;;  %v3042_v7 = vsel %vm3010_vm13, %v3009_v60, %v2762_v3  ;;  %v3335_v19 = vadd.f32 %v4195_v21, %v6334_v33  ;;  %v4211_v44 = vpop.f32.mrb[2].mxu1  ;;  %v3137_v59 = vpop.f32.mrb[3].mxu0  ;;  %v3382_v51 = vmax.f32 %v3350_v20, 0.0  ;;  %v3364_v14 = vmax.f32 %v3332_v17, 0.0 }
 0x1cf   : > { %4221 = vmatmul.mubr.msk.bf16.gmra.mrb[12].mxu1 %vm3063_vm14, %v3042_v7  ;;  %v3351_v6 = vadd.f32 %v4211_v44, %v6334_v33  ;;  %v3333_v18 = vadd.f32 %v6334_v33, %v3137_v59  ;;  %v3201_v57 = vpop.f32.mrb[3].mxu1  ;;  %v3380_v9 = vmax.f32 %v3348_v54, 0.0 }
 0x1d0   : > { %v2746_v43 = vpop.permute.xlu0 %2745  ;;  %v3367_v32 = vmax.f32 %v3335_v19, 0.0  ;;  %v3349_v5 = vadd.f32 %v6334_v33, %v3201_v57 }
 0x1d1   : > { %v3026_v56 = vsel %vm3010_vm13, %v2993_v22, %v2746_v43  ;;  %v3383_v39 = vmax.f32 %v3351_v6, 0.0  ;;  %v3365_v42 = vmax.f32 %v3333_v18, 0.0 }
 0x1d2   : > { %4205 = vmatmul.mubr.msk.bf16.gmra.mrb[12].mxu0 %vm3063_vm14, %v3026_v56  ;;  %v4080_v24 = vpack.c.bf16 %v3367_v32, %v3366_v8  ;;  %v3381_v16 = vmax.f32 %v3349_v5, 0.0 }
 0x1d3   : > { %v4120_v50 = vpack.c.bf16 %v3383_v39, %v3382_v51  ;;  %v4075_v58 = vpack.c.bf16 %v3365_v42, %v3364_v14 }
 0x1d4   : > { %4152 = vst [vmem:[%s6367_s5 + $0x8] sm:$0xff] %v4080_v24   ;;  %v4115_v25 = vpack.c.bf16 %v3381_v16, %v3380_v9 }
 0x1d5   : > { %4160 = vst [vmem:[%s6367_s5 + $0x48] sm:$0xff] %v4120_v50   ;;  %4076 = vst [vmem:[%s6367_s5] sm:$0xff] %v4075_v58  }
 0x1d6   : > { %4159 = vst [vmem:[%s6367_s5 + $0x40] sm:$0xff] %v4115_v25  }
 0x219   : > { %v4214_v4 = vpop.f32.mrb[4].mxu1 }
 0x21a   : > { %v3354_v13 = vadd.f32 %v4214_v4, %v6334_v33  ;;  %v3214_v36 = vpop.f32.mrb[5].mxu1 }
 0x21b   : > { %v4198_v1 = vpop.f32.mrb[4].mxu0  ;;  %v3352_v15 = vadd.f32 %v6334_v33, %v3214_v36  ;;  %v4215_v34 = vpop.f32.mrb[6].mxu1 }
 0x21c   : > { %v3338_v30 = vadd.f32 %v4198_v1, %v6334_v33  ;;  %v3150_v27 = vpop.f32.mrb[5].mxu0  ;;  %v3355_v38 = vadd.f32 %v4215_v34, %v6334_v33  ;;  %v3217_v48 = vpop.f32.mrb[7].mxu1  ;;  %v3386_v28 = vmax.f32 %v3354_v13, 0.0 }
 0x21d   : > { %v3336_v31 = vadd.f32 %v6334_v33, %v3150_v27  ;;  %v4199_v26 = vpop.f32.mrb[6].mxu0  ;;  %v3353_v63 = vadd.f32 %v6334_v33, %v3217_v48  ;;  %v3384_v62 = vmax.f32 %v3352_v15, 0.0 }
 0x21e   : > { %v3339_v23 = vadd.f32 %v4199_v26, %v6334_v33  ;;  %v3153_v10 = vpop.f32.mrb[7].mxu0  ;;  %v3387_v37 = vmax.f32 %v3355_v38, 0.0  ;;  %v3370_v0 = vmax.f32 %v3338_v30, 0.0 }
 0x21f   : > { %v3337_v52 = vadd.f32 %v6334_v33, %v3153_v10  ;;  %v3385_v45 = vmax.f32 %v3353_v63, 0.0  ;;  %v3368_v2 = vmax.f32 %v3336_v31, 0.0 }
 0x220   : > { %v3371_v55 = vmax.f32 %v3339_v23, 0.0  ;;  %v4130_v11 = vpack.c.bf16 %v3387_v37, %v3386_v28 }
 0x221   : > { %v3369_v47 = vmax.f32 %v3337_v52, 0.0  ;;  %v4125_v49 = vpack.c.bf16 %v3385_v45, %v3384_v62 }
 0x222   : > { %v4090_v29 = vpack.c.bf16 %v3371_v55, %v3370_v0  ;;  %4162 = vst [vmem:[%s6367_s5 + $0x58] sm:$0xff] %v4130_v11  }
 0x223   : > { %v4085_v41 = vpack.c.bf16 %v3369_v47, %v3368_v2  ;;  %4161 = vst [vmem:[%s6367_s5 + $0x50] sm:$0xff] %v4125_v49  }
 0x224   : > { %4154 = vst [vmem:[%s6367_s5 + $0x18] sm:$0xff] %v4090_v29  }
 0x225   : > { %4153 = vst [vmem:[%s6367_s5 + $0x10] sm:$0xff] %v4085_v41  }
 0x258   : > { %v4218_v46 = vpop.f32.mrb[8].mxu1 }
 0x259   : > { %v3358_v61 = vadd.f32 %v4218_v46, %v6334_v33  ;;  %v3230_v20 = vpop.f32.mrb[9].mxu1 }
 0x25a   : > { %v3356_v53 = vadd.f32 %v6334_v33, %v3230_v20  ;;  %v4219_v12 = vpop.f32.mrb[10].mxu1 }
 0x25b   : > { %v3359_v60 = vadd.f32 %v4219_v12, %v6334_v33  ;;  %v3233_v35 = vpop.f32.mrb[11].mxu1  ;;  %v3390_v40 = vmax.f32 %v3358_v61, 0.0 }
 0x25c   : > { %v4202_v3 = vpop.f32.mrb[8].mxu0  ;;  %v3357_v17 = vadd.f32 %v6334_v33, %v3233_v35  ;;  %v3388_v44 = vmax.f32 %v3356_v53, 0.0 }
 0x25d   : > { %v3342_v21 = vadd.f32 %v4202_v3, %v6334_v33  ;;  %v3166_v7 = vpop.f32.mrb[9].mxu0  ;;  %v3391_v54 = vmax.f32 %v3359_v60, 0.0 }
 0x25e   : > { %v3340_v19 = vadd.f32 %v6334_v33, %v3166_v7  ;;  %v4203_v59 = vpop.f32.mrb[10].mxu0  ;;  %v3389_v22 = vmax.f32 %v3357_v17, 0.0 }
 0x25f   : > { %v3343_v6 = vadd.f32 %v4203_v59, %v6334_v33  ;;  %v4140_v18 = vpack.c.bf16 %v3391_v54, %v3390_v40  ;;  %v3169_v57 = vpop.f32.mrb[11].mxu0  ;;  %v3374_v51 = vmax.f32 %v3342_v21, 0.0 }
 0x260   : > { %v3341_v43 = vadd.f32 %v6334_v33, %v3169_v57  ;;  %v4135_v8 = vpack.c.bf16 %v3389_v22, %v3388_v44  ;;  %v3372_v5 = vmax.f32 %v3340_v19, 0.0 }
 0x261   : > { %v3375_v32 = vmax.f32 %v3343_v6, 0.0  ;;  %4164 = vst [vmem:[%s6367_s5 + $0x68] sm:$0xff] %v4140_v18  }
 0x262   : > { %v3373_v56 = vmax.f32 %v3341_v43, 0.0  ;;  %4163 = vst [vmem:[%s6367_s5 + $0x60] sm:$0xff] %v4135_v8  }
 0x263   : > { %v4100_v14 = vpack.c.bf16 %v3375_v32, %v3374_v51 }
 0x264   : > { %v4095_v39 = vpack.c.bf16 %v3373_v56, %v3372_v5 }
 0x265   : > { %4156 = vst [vmem:[%s6367_s5 + $0x28] sm:$0xff] %v4100_v14  }
 0x266   : > { %4155 = vst [vmem:[%s6367_s5 + $0x20] sm:$0xff] %v4095_v39  }
 0x2a2   : > { %v4222_v42 = vpop.f32.mrb[12].mxu1 }
 0x2a3   : > { %v3362_v9 = vadd.f32 %v4222_v42, %v6334_v33  ;;  %v3246_v24 = vpop.f32.mrb[13].mxu1 }
 0x2a4   : > { %v3360_v16 = vadd.f32 %v6334_v33, %v3246_v24  ;;  %v4223_v50 = vpop.f32.mrb[14].mxu1 }
 0x2a5   : > { %v4206_v58 = vpop.f32.mrb[12].mxu0  ;;  %v3363_v25 = vadd.f32 %v4223_v50, %v6334_v33  ;;  %v3249_v4 = vpop.f32.mrb[15].mxu1  ;;  %v3394_v30 = vmax.f32 %v3362_v9, 0.0 }
 0x2a6   : > { %v3346_v1 = vadd.f32 %v4206_v58, %v6334_v33  ;;  %v3182_v13 = vpop.f32.mrb[13].mxu0  ;;  %v3361_v36 = vadd.f32 %v6334_v33, %v3249_v4  ;;  %v3392_v31 = vmax.f32 %v3360_v16, 0.0 }
 0x2a7   : > { %v3344_v27 = vadd.f32 %v6334_v33, %v3182_v13  ;;  %v4207_v15 = vpop.f32.mrb[14].mxu0  ;;  %v3395_v34 = vmax.f32 %v3363_v25, 0.0 }
 0x2a8   : > { %v3347_v26 = vadd.f32 %v4207_v15, %v6334_v33  ;;  %v3185_v38 = vpop.f32.mrb[15].mxu0  ;;  %v3393_v48 = vmax.f32 %v3361_v36, 0.0  ;;  %v3378_v63 = vmax.f32 %v3346_v1, 0.0 }
 0x2a9   : > { %v4150_v23 = vpack.c.bf16 %v3395_v34, %v3394_v30  ;;  %v3345_v10 = vadd.f32 %v6334_v33, %v3185_v38  ;;  %v3376_v52 = vmax.f32 %v3344_v27, 0.0 }
 0x2aa   : > { %v3379_v28 = vmax.f32 %v3347_v26, 0.0  ;;  %v4145_v37 = vpack.c.bf16 %v3393_v48, %v3392_v31 }
 0x2ab   : > { %4166 = vst [vmem:[%s6367_s5 + $0x78] sm:$0xff] %v4150_v23   ;;  %v3377_v0 = vmax.f32 %v3345_v10, 0.0 }
 0x2ac   : > { %v4110_v62 = vpack.c.bf16 %v3379_v28, %v3378_v63  ;;  %4165 = vst [vmem:[%s6367_s5 + $0x70] sm:$0xff] %v4145_v37  }
 0x2ad   : > { %v4105_v55 = vpack.c.bf16 %v3377_v0, %v3376_v52 }
 0x2ae   : > { %4158 = vst [vmem:[%s6367_s5 + $0x38] sm:$0xff] %v4110_v62  }
 0x2af   : > { %4157 = vst [vmem:[%s6367_s5 + $0x30] sm:$0xff] %v4105_v55  }
 0x2b0   : > { %4389 = shalt.err (!%p4386_p5)
}
 0x2b1   : > { %s4390_s26 = scalar_lea.hbm %s6412_s11, 2048  ;;  %s4394_s29 = scalar_lea.hbm %s6470_s3, 4096 }
 0x2b2   : > { %p4391_p6 = scmp.ne.s32.totalorder %s6412_s11, %s4390_s26  ;;  %p4395_p10 = scmp.lt.u32.totalorder %s6412_s11, %s6470_s3 }
 0x2b3   : > { %p4396_p11 = scmp.lt.u32.totalorder %s4394_s29, %s4390_s26  ;;  %p4398_p13 = scmp.lt.u32.totalorder %s4390_s26, %s6412_s11 }
 0x2b4   : > { %p4392_p7 = pnand %p4391_p6, %p4526_p4 }
 0x2b5   : > { %p4397_p12 = por %p4396_p11, %p4395_p10 }
 0x2b6   : > { %p4393_p9 = pneg %p4392_p7 }
 0x2b7   : > { %p4399_p0 = por %p4398_p13, %p4397_p12 }
 0x2b9   : > { %p4400_p1 = pnand %p4399_p0, %p4393_p9 }
 0x2bb   : > { %4403 = shalt.err (!%p4400_p1)
}
 0x2bc   : > { %s4465_s5 = smov 64  }
 0x2bd   : > { %4233 = dma.vmem_to_hbm [thread:$0]  (%p4526_p4), %s6414_s8, 2048, %s6412_s11, %s6420_s15, %s4465_s5, %s4465_s5, %s4458_s6  }
 0x2be PF: > { %p4239_p2 = scmp.ge.s32.totalorder %s4454_s17, 2  ;;  %s3587_s7 = sand.u32 1, %s4434_s12  }
 0x2bf   : > { %s3588_s9 = scalar_lea.sflag [#allocation4], %s3587_s7 }
 0x2c0   : > { %p4236_p3 = pnand %p4239_p2, %p4533_p8 }
 0x2c2   : > { %4429 = dma.done.wait (!%p4236_p3), %s3588_s9, 2048  }
 0x2c3   : > { %4431 = vsyncadd (!%p4236_p3), %s3588_s9, 4294965248  ;;  %s16_s17 = sadd.s32 1, %s4454_s17   ;;  %s6477_s12 = smov %s4438_s13 }
 0x2c4   : > { %p13_p5 = scmp.ge.s32.totalorder %s16_s17, 4   ;;  %s6478_s13 = smov %s4442_s14 }
 0x2c5   : > { %s6479_s14 = smov %s4539_s25  ;;  %s6480_s15 = smov %s4450_s16 }
 0x2c6   : > { %s6481_s16 = smov %s6483_s20  ;;  %15 = sbr.rel (!%p13_p5) target bundleno = 4 (0x4), region = 70 }
 0x2cd   :  { %3593 = vsyncpa [#allocation4], 1 }
 0x2ce   :  { %3595 = vsyncpa [#allocation4 + $0x1], 1 }

// kernel: tpu_custom_call.1
= control target key start
LH: loop header
LB: loop body
LE: loop exit
PB: predicated region body
PF: predicated region fallthrough
CT: control target
= control target key end

     0   :  { %8 = vsyncpa [#allocation4], 0  ;;  %s9227_s0 = inlined_call_operand.vmem [shape: bf16[2,18,18,4], index: 0, kind: input, shape index: {}]   ;;  %s9228_s1 = inlined_call_operand.vmem [shape: bf16[36,128], index: 1, kind: input, shape index: {}]   ;;  %s9229_s2 = inlined_call_operand.vmem [shape: f32[1,128], index: 2, kind: input, shape index: {}]   ;;  %s9230_s3 = inlined_call_operand.hbm [shape: bf16[2,256,128], index: 3, kind: output, shape index: {}]  }
   0x1   :  { %10 = vsyncpa [#allocation4 + $0x1], 0  ;;  %s7247_s12 = smov 0   ;;  %s7249_s13 = smov 0  }
   0x2   :  { %s7251_s14 = smov 0   ;;  %s7253_s15 = smov 0  }
   0x3   :  { %s7255_s16 = smov 0   ;;  %s7257_s17 = smov 0  }
   0x4 LB: > { %s5604_s18 = sadd.s32 4294967295, %s7222_s17   ;;  %s5605_s19 = sadd.s32 4294967294, %s7222_s17   ;;  %s7222_s17 = sphi %s7257_s17, %s16_s17   ;;  %s7218_s16 = sphi %s7255_s16, %s9380_s16   ;;  %s7214_s15 = sphi %s7253_s15, %s9379_s15   ;;  %s7210_s14 = sphi %s7251_s14, %s9378_s14   ;;  %s7206_s13 = sphi %s7249_s13, %s9377_s13   ;;  %s7202_s12 = sphi %s7247_s12, %s9376_s12  }
   0x5   : > { %s28_s20 = sadd.s32 1, %s7218_s16  ;;  %s105_s21 = sadd.s32 1, %s7210_s14 }
   0x6   : > { %p30_p0 = scmp.ge.s32.totalorder %s28_s20, 2  ;;  %p115_p1 = scmp.ne.s32.totalorder %s7210_s14, %s7206_s13 }
   0x7   : > { %p116_p2 = scmp.eq.s32.totalorder %s5604_s18, 1  ;;  %p121_p3 = scmp.ne.s32.totalorder %s7206_s13, %s7202_s12 }
   0x8   : > { %s9382_s20 = smov (%p30_p0, %s28_s20), 0  ;;  %p122_p5 = scmp.eq.s32.totalorder %s5605_s19, 1 }
   0x9   : > { %p7287_p4 = por %p116_p2, %p115_p1  ;;  %s100_s23 = ssub.s32 %s7218_s16, %s9382_s20 }
   0xa   : > { %p5608_p6 = scmp.ge.s32.totalorder %s7222_s17, 1  ;;  %p103_p7 = scmp.eq.s32.totalorder %s100_s23, 0 }
   0xb   : > { %p7294_p8 = por %p122_p5, %p121_p3  ;;  %p154_p9 = scmp.lt.s32.totalorder %s7222_s17, 3 }
   0xc   : > { %s7300_s25 = scalar_select %p103_p7, %s7210_s14, %s105_s21  }
   0xd   : > { %p155_p10 = pnand %p5608_p6, %p154_p9 }
   0xf   : > { %158 = sbr.rel (%p155_p10) target bundleno = 583 (0x247), region = 32 }
  0x16   : > { %v2027_v0 = vld [vmem:[%s9228_s1] sm:$0x3]  ;;  %vm2141_vm0 = vcmask 1041408   ;;  %p178_p11 = scmp.lt.s32.totalorder %s7214_s15, 1  ;;  %v3465_v2 = vld [vmem:[%s9228_s1 + $0x8] sm:$0x3] }
  0x17   : > { %6962 = vmatprep.subr.msk.bf16.mxu1 %vm2141_vm0, %v2027_v0  ;;  %v2143_v1 = vsel %vm2141_vm0, %v2027_v0, 0  ;;  %6966 = vmatprep.subr.msk.bf16.mxu0 %vm2141_vm0, %v3465_v2  ;;  %v7314_v3 = vsel %vm2141_vm0, %v3465_v2, 0  ;;  %v7034_v4 = vld [vmem:[%s9228_s1] ss:$0 sps:$4 sm:$0xcc]   ;;  %vm2092_vm1 = vcmask 31744  }
  0x18   : > { %6399 = vmatpush3.bf16.msra.mxu1 %v2143_v1  ;;  %s179_s30 = scalar_select %p178_p11, %s7214_s15, 1  ;;  %9266 = vst [vmem:[#allocation6_spill] sm:$0xff] %v7314_v3  ;;  %6535 = vmatpush3.bf16.msra.mxu0 %v7314_v3  ;;  %v2422_v5 = vrot.slane %v7034_v4, 2  ;;  %v7323_v6 = vld [vmem:[%s9228_s1 + $0x8] ss:$0 sps:$4 sm:$0xcc]  }
  0x19   : > { %v3874_v7 = vrot.slane %v7323_v6, 2  ;;  %v7347_v19 = vld [vmem:[%s9228_s1 + $0xc] sm:$0x3]  ;;  %v2731_v29 = vld [vmem:[%s9228_s1 + $0x4] sm:$0x3]  ;;  %vm688_vm5 = vcmask 1042432  }
  0x1a   : > { %s6972_s6 = smul.u32 216, %s179_s30  ;;  %6963 = vmatprep.subr.msk.bf16.mxu1 %vm2141_vm0, %v2422_v5  ;;  %v2472_v28 = vsel %vm2141_vm0, %v2422_v5, 0  ;;  %vm237_vm2 = vsmask.f32 3328  ;;  %vm238_vm3 = vsmask.f32 7440 }
  0x1b   : > { %6968 = vmatprep.subr.msk.bf16.mxu0 %vm2141_vm0, %v3874_v7  ;;  %v7373_v39 = vsel %vm2141_vm0, %v7347_v19, 0  ;;  %v7383_v44 = vsel %vm2141_vm0, %v2731_v29, 0  ;;  %vm7431_vm4 = vmor %vm237_vm2, %vm238_vm3  ;;  %vm689_vm6 = vcmask 1046532   ;;  %s175_s9 = sand.u32 1, %s7206_s13   ;;  %s6149_s18 = sshll.u32 %s7214_s15, 11 }
  0x1c   : > { %s7328_s11 = scalar_lea.vmem %s9227_s0, %s6972_s6  ;;  %vm7661_vm7 = vmor %vm688_vm5, %vm689_vm6  ;;  %s5609_s10 = sshll.u32 %s175_s9, 7 }
  0x1d   : > { %v189_v8 = vld [vmem:[%s7328_s11] sm:$0xf]  ;;  %v7334_v9 = vld [vmem:[%s7328_s11 + $0x4] sm:$0xf]  ;;  %v191_v14 = vld [vmem:[%s7328_s11 + $0xc] sm:$0xf]  ;;  %s9173_s26 = scalar_lea.hbm %s9230_s3, %s6149_s18 }
  0x1e   : > { %9267 = vst [vmem:[#allocation7_spill] sm:$0xff] %v7334_v9  ;;  %v241_v10 = vshrl.u32 %v189_v8, 16  ;;  %v244_v11 = vshll.u32 %v189_v8, 16  ;;  %v250_v12 = vshll.u32 %v7334_v9, 16  ;;  %v254_v13 = vshrl.u32 %v7334_v9, 16  ;;  %s9181_s15 = scalar_lea.sflag [#allocation4], %s175_s9 }
  0x1f   : > { %v9232_v15 = vrot.slane %v7334_v9, 5  ;;  %v5787_v16 = vcombine.low %v189_v8, %v7334_v9  ;;  %v265_v17 = vshrl.u32 %v191_v14, 16  ;;  %v268_v18 = vshll.u32 %v191_v14, 16  ;;  %v7352_v24 = vld [vmem:[%s7328_s11 + $0x10] sm:$0xf]  ;;  %s7224_s28 = smov [#allocation3]  }
  0x20   : > { %v243_v20 = vrot.slane %v241_v10, 4  ;;  %v246_v21 = vrot.slane %v244_v11, 5  ;;  %v7349_v22 = vrot.slane %v250_v12, 5  ;;  %v256_v23 = vrot.slane %v254_v13, 4  ;;  %9268 = vst [vmem:[#allocation8_spill] sm:$0xff] %v7352_v24  ;;  %s7148_s29 = sshll.u32 %s7224_s28, 4  ;;  %s7149_s29 = int_to_ptr.vmem [resolvable:$false] %s7148_s29 }
  0x21   : > { %6400 = vmatprep.mubr.msk.bf16.mxu1 %vm2092_vm1, %v5787_v16  ;;  %v267_v25 = vrot.slane %v265_v17, 4  ;;  %v270_v26 = vrot.slane %v268_v18, 5  ;;  %v274_v27 = vshll.u32 %v7352_v24, 16  ;;  %v278_v32 = vshrl.u32 %v7352_v24, 16  ;;  %v7364_v34 = vld [vmem:[%s7328_s11 + $0x18] sm:$0xf] }
  0x22   : > { %v247_v30 = vor.u32 %v246_v21, %v243_v20  ;;  %v257_v31 = vor.u32 %v256_v23, %v7349_v22  ;;  %v9231_v33 = vrot.slane %v7352_v24, 5  ;;  %v5788_v36 = vcombine.low %v191_v14, %v7352_v24  ;;  %v7368_v37 = vld [vmem:[%s7328_s11 + $0x1c] sm:$0xf]  ;;  %v5627_v43 = vld [vmem:[%s7328_s11 + $0xc] sm:$0xf]  ;;  %s7150_s30 = scalar_lea.vmem %s7149_s29, 4096 }
  0x23   : > { %v271_v35 = vor.u32 %v270_v26, %v267_v25  ;;  %v289_v38 = vshrl.u32 %v7364_v34, 16  ;;  %v7377_v40 = vrot.slane %v9232_v15, 4  ;;  %v7379_v41 = vrot.slane %v274_v27, 5  ;;  %v195_v45 = vld [vmem:[%s7328_s11 + $0x24] sm:$0xf] }
  0x24   : > { %v280_v42 = vrot.slane %v278_v32, 4  ;;  %6401 = vmatmul.mubr.msk.bf16.vlgmr.msra.gmra.mrb[0].mxu1 %vm2092_vm1, %v5788_v36  ;;  %v7388_v46 = vld [vmem:[%s7328_s11 + $0x28] sm:$0xf]  ;;  %v7391_v47 = vld [vmem:[%s7328_s11 + $0x10] sm:$0xf]  ;;  %v7393_v48 = vrot.slane %v247_v30, 4  ;;  %v5789_v51 = vcombine.low %v7364_v34, %v7368_v37 }
  0x25   : > { %9269 = vst [vmem:[#allocation9_spill] sm:$0xff] %v7377_v40  ;;  %v7395_v49 = vrot.slane %v257_v31, 4  ;;  %v7399_v50 = vrot.slane %v9231_v33, 4  ;;  %v7404_v52 = vld [vmem:[%s7328_s11 + $0x14] sm:$0x1]  ;;  %6433 = vmatpush3.bf16.msra.mxu1 %v2472_v28  ;;  %v7406_v53 = vrot.slane %v271_v35, 4  ;;  %v5790_v60 = vcombine.low %v195_v45, %v7388_v46 }
  0x26   : > { %v7408_v54 = vrot.slane %v289_v38, 4  ;;  %v292_v55 = vshll.u32 %v7364_v34, 16  ;;  %v856_v56 = vshrl.u32 %v5627_v43, 16  ;;  %v5629_v57 = vld [vmem:[%s7328_s11 + $0x18] sm:$0xf]  ;;  %6964 = vmatprep.subr.msk.bf16.mxu1 %vm2141_vm0, %v2731_v29  ;;  %v281_v58 = vor.u32 %v280_v42, %v7379_v41  ;;  %6404 = vmatprep.mubr.msk.bf16.mxu1 %vm2092_vm1, %v5789_v51 }
  0x27   : > { %9270 = vst [vmem:[#allocation10_spill] sm:$0xff] %v7399_v50  ;;  %v859_v61 = vshll.u32 %v5627_v43, 16  ;;  %v7418_v62 = vld [vmem:[%s7328_s11 + $0x1c] sm:$0xf]  ;;  %v865_v0 = vshll.u32 %v7391_v47, 16  ;;  %v869_v1 = vshrl.u32 %v7391_v47, 16 }
  0x28   : > { %v858_v63 = vrot.slane %v856_v56, 4  ;;  %v875_v2 = vshll.u32 %v7404_v52, 16  ;;  %v313_v4 = vshrl.u32 %v195_v45, 16  ;;  %v7424_v8 = vld [vmem:[%s7328_s11 + $0x20] sm:$0x1]  ;;  %v880_v10 = vshrl.u32 %v5629_v57, 16 }
  0x29   : > { %v861_v5 = vrot.slane %v859_v61, 5  ;;  %v883_v11 = vshll.u32 %v5629_v57, 16  ;;  %v316_v12 = vshll.u32 %v195_v45, 16  ;;  %v867_v13 = vrot.slane %v865_v0, 5  ;;  %v7437_v32 = vld [vmem:[%s7328_s11 + $0x30] sm:$0xf] }
  0x2a   : > { %v871_v14 = vrot.slane %v869_v1, 4  ;;  %v889_v16 = vshll.u32 %v7418_v62, 16  ;;  %v882_v18 = vrot.slane %v880_v10, 4  ;;  %v893_v21 = vshrl.u32 %v7418_v62, 16  ;;  %v7440_v34 = vld [vmem:[%s7328_s11 + $0x34] sm:$0xf] }
  0x2b   : > { %v862_v17 = vor.u32 %v861_v5, %v858_v63  ;;  %v885_v20 = vrot.slane %v883_v11, 5  ;;  %v877_v26 = vrot.slane %v875_v2, 5  ;;  %v899_v28 = vshll.u32 %v7424_v8, 16  ;;  %v7450_v57 = vld [vmem:[%s7328_s11 + $0x3c] sm:$0xf] }
  0x2c   : > { %6405 = vmatmul.mubr.msk.bf16.gmra.mrb[4].mxu1 %vm2092_vm1, %v5790_v60  ;;  %v872_v25 = vor.u32 %v871_v14, %v867_v13  ;;  %v891_v27 = vrot.slane %v889_v16, 5  ;;  %v895_v31 = vrot.slane %v893_v21, 4  ;;  %v7442_v35 = vrot.slane %v281_v58, 4  ;;  %v7453_v60 = vld [vmem:[%s7328_s11 + $0x40] sm:$0xf] }
  0x2d   : > { %v863_v29 = vrot.slane %v862_v17, 4  ;;  %v886_v30 = vor.u32 %v885_v20, %v882_v18  ;;  %v7444_v36 = vrot.slane %v292_v55, 5  ;;  %v901_v56 = vrot.slane %v899_v28, 5  ;;  %9273 = vst [vmem:[#allocation11_spill] sm:$0xff] %v7453_v60  ;;  %v5631_v0 = vld [vmem:[%s7328_s11 + $0x24] sm:$0xf] }
  0x2e   : > { %v873_v42 = vrot.slane %v872_v25, 4  ;;  %v896_v51 = vor.u32 %v895_v31, %v891_v27  ;;  %v7455_v61 = vrot.slane %v313_v4, 4  ;;  %v7457_v58 = vrot.slane %v316_v12, 5  ;;  %v7465_v1 = vld [vmem:[%s7328_s11 + $0x28] sm:$0xf] }
  0x2f   : > { %v868_v43 = vsel %vm7431_vm4, %v863_v29, %v867_v13  ;;  %v887_v45 = vrot.slane %v886_v30, 4  ;;  %v5791_v63 = vcombine.low %v7437_v32, %v7440_v34  ;;  %v7471_v11 = vld [vmem:[%s7328_s11 + $0x2c] sm:$0x1]  ;;  %v3924_v14 = vsel %vm2141_vm0, %v3874_v7, 0  ;;  %v5633_v17 = vld [vmem:[%s7328_s11 + $0x30] sm:$0xf] }
  0x30   : > { %v878_v55 = vsel %vm7431_vm4, %v873_v42, %v877_v26  ;;  %v897_v10 = vrot.slane %v896_v51, 4  ;;  %v5792_v16 = vcombine.low %v7450_v57, %v7453_v60  ;;  %v904_v20 = vshrl.u32 %v5631_v0, 16  ;;  %v7487_v26 = vld [vmem:[%s7328_s11 + $0x34] sm:$0xf]  ;;  %v7494_v29 = vld [vmem:[%s7328_s11 + $0x38] sm:$0x1] }
  0x31   : > { %v5917_v5 = vcombine.low %v868_v43, %v878_v55  ;;  %v892_v4 = vsel %vm7431_vm4, %v887_v45, %v891_v27  ;;  %6408 = vmatprep.mubr.msk.bf16.mxu1 %vm2092_vm1, %v5791_v63  ;;  %v907_v21 = vshll.u32 %v5631_v0, 16  ;;  %v913_v25 = vshll.u32 %v7465_v1, 16  ;;  %v7539_v33 = vld [vmem:[%s7328_s11 + $0x44] sm:$0x1] }
  0x32   : > { %v902_v18 = vsel %vm7431_vm4, %v897_v10, %v901_v56  ;;  %v337_v7 = vshrl.u32 %v7437_v32, 16  ;;  %v340_v27 = vshll.u32 %v7437_v32, 16  ;;  %v917_v28 = vshrl.u32 %v7465_v1, 16  ;;  %v7570_v12 = vld [vmem:[%s7328_s11 + $0x64] sm:$0xf] }
  0x33   : > { %6536 = vmatprep.mubr.msk.bf16.mxu0 %vm2092_vm1, %v5917_v5  ;;  %v5918_v6 = vcombine.low %v892_v4, %v902_v18  ;;  %v906_v30 = vrot.slane %v904_v20, 4  ;;  %v909_v31 = vrot.slane %v907_v21, 5  ;;  %v915_v42 = vrot.slane %v913_v25, 5  ;;  %v7502_v4 = vld [vmem:[%s7328_s11 + $0x48] sm:$0xf]  ;;  %9276 = vst [vmem:[#allocation14_spill] sm:$0xff] %v7570_v12 }
  0x34   : > { %6409 = vmatmul.mubr.msk.bf16.gmra.mrb[8].mxu1 %vm2092_vm1, %v5792_v16  ;;  %v923_v43 = vshll.u32 %v7471_v11, 16  ;;  %v919_v45 = vrot.slane %v917_v28, 4  ;;  %v928_v51 = vshrl.u32 %v5633_v17, 16  ;;  %v931_v56 = vshll.u32 %v5633_v17, 16  ;;  %v7505_v21 = vld [vmem:[%s7328_s11 + $0x4c] sm:$0xf] }
  0x35   : > { %6537 = vmatmul.mubr.msk.bf16.vlgmr.msra.gmra.mrb[0].mxu0 %vm2092_vm1, %v5918_v6  ;;  %v937_v32 = vshll.u32 %v7487_v26, 16  ;;  %v910_v55 = vor.u32 %v909_v31, %v906_v30  ;;  %v941_v0 = vshrl.u32 %v7487_v26, 16  ;;  %v947_v5 = vshll.u32 %v7494_v29, 16  ;;  %9274 = vst [vmem:[#allocation12_spill] sm:$0xff] %v7505_v21 }
  0x36   : > { %6569 = vmatpush3.bf16.msra.mxu0 %v3924_v14  ;;  %v925_v63 = vrot.slane %v923_v43, 5  ;;  %v920_v10 = vor.u32 %v919_v45, %v915_v42  ;;  %v930_v16 = vrot.slane %v928_v51, 4  ;;  %v933_v18 = vrot.slane %v931_v56, 5  ;;  %v7515_v45 = vld [vmem:[%s7328_s11 + $0x54] sm:$0xf] }
  0x37   : > { %v939_v20 = vrot.slane %v937_v32, 5  ;;  %6969 = vmatprep.subr.msk.bf16.mxu0 %vm2141_vm0, %v7347_v19  ;;  %v361_v14 = vshrl.u32 %v7450_v57, 16  ;;  %v364_v17 = vshll.u32 %v7450_v57, 16  ;;  %v911_v25 = vrot.slane %v910_v55, 4  ;;  %v7522_v32 = vld [vmem:[%s7328_s11 + $0x58] sm:$0xf] }
  0x38   : > { %v943_v6 = vrot.slane %v941_v0, 4  ;;  %v7511_v28 = vrot.slane %v337_v7, 4  ;;  %v921_v31 = vrot.slane %v920_v10, 4  ;;  %v934_v43 = vor.u32 %v933_v18, %v930_v16  ;;  %9275 = vst [vmem:[#allocation13_spill] sm:$0xff] %v7522_v32  ;;  %v5635_v55 = vld [vmem:[%s7328_s11 + $0x3c] sm:$0xf] }
  0x39   : > { %v916_v51 = vsel %vm7431_vm4, %v911_v25, %v915_v42  ;;  %v949_v56 = vrot.slane %v947_v5, 5  ;;  %v5793_v57 = vcombine.low %v7502_v4, %v7505_v21  ;;  %v7525_v7 = vrot.slane %v340_v27, 5  ;;  %v7531_v18 = vld [vmem:[%s7328_s11 + $0x40] sm:$0xf] }
  0x3a   : > { %v944_v19 = vor.u32 %v943_v6, %v939_v20  ;;  %v926_v10 = vsel %vm7431_vm4, %v921_v31, %v925_v63  ;;  %v935_v16 = vrot.slane %v934_v43, 4  ;;  %v7533_v42 = vrot.slane %v361_v14, 4  ;;  %v5637_v43 = vld [vmem:[%s7328_s11 + $0x48] sm:$0xf] }
  0x3b   : > { %v7535_v5 = vrot.slane %v364_v17, 5  ;;  %v5919_v25 = vcombine.low %v916_v51, %v926_v10  ;;  %6412 = vmatprep.mubr.msk.bf16.mxu1 %vm2092_vm1, %v5793_v57  ;;  %v385_v63 = vshrl.u32 %v7502_v4, 16  ;;  %v5794_v31 = vcombine.low %v7515_v45, %v7522_v32  ;;  %v7553_v10 = vld [vmem:[%s7328_s11 + $0x4c] sm:$0xf] }
  0x3c   : > { %v945_v6 = vrot.slane %v944_v19, 4  ;;  %v940_v27 = vsel %vm7431_vm4, %v935_v16, %v939_v20  ;;  %v952_v14 = vshrl.u32 %v5635_v55, 16  ;;  %v388_v51 = vshll.u32 %v7502_v4, 16 }
  0x3d   : > { %6540 = vmatprep.mubr.msk.bf16.mxu0 %vm2092_vm1, %v5919_v25  ;;  %v955_v19 = vshll.u32 %v5635_v55, 16  ;;  %v961_v57 = vshll.u32 %v7531_v18, 16  ;;  %6413 = vmatmul.mubr.msk.bf16.gmra.mrb[12].mxu1 %vm2092_vm1, %v5794_v31  ;;  %v965_v15 = vshrl.u32 %v7531_v18, 16  ;;  %v971_v0 = vshll.u32 %v7539_v33, 16  ;;  %v7559_v25 = vld [vmem:[%s7328_s11 + $0x50] sm:$0x1] }
  0x3e   : > { %v950_v17 = vsel %vm7431_vm4, %v945_v6, %v949_v56  ;;  %v954_v16 = vrot.slane %v952_v14, 4  ;;  %v976_v6 = vshrl.u32 %v5637_v43, 16  ;;  %v979_v4 = vshll.u32 %v5637_v43, 16 }
  0x3f   : > { %v5920_v20 = vcombine.low %v940_v27, %v950_v17  ;;  %v957_v30 = vrot.slane %v955_v19, 5  ;;  %v963_v56 = vrot.slane %v961_v57, 5  ;;  %v409_v55 = vshrl.u32 %v7515_v45, 16  ;;  %v7567_v19 = vld [vmem:[%s7328_s11 + $0x60] sm:$0xf] }
  0x40   : > { %v967_v27 = vrot.slane %v965_v15, 4  ;;  %v985_v31 = vshll.u32 %v7553_v10, 16  ;;  %v989_v14 = vshrl.u32 %v7553_v10, 16  ;;  %v978_v38 = vrot.slane %v976_v6, 4 }
  0x41   : > { %6541 = vmatmul.mubr.msk.bf16.gmra.mrb[4].mxu0 %vm2092_vm1, %v5920_v20  ;;  %v958_v17 = vor.u32 %v957_v30, %v954_v16  ;;  %v981_v59 = vrot.slane %v979_v4, 5  ;;  %v995_v13 = vshll.u32 %v7559_v25, 16  ;;  %v973_v43 = vrot.slane %v971_v0, 5  ;;  %v7575_v16 = vld [vmem:[%s7328_s11 + $0x6c] sm:$0xf] }
  0x42   : > { %v968_v57 = vor.u32 %v967_v27, %v963_v56  ;;  %v987_v2 = vrot.slane %v985_v31, 5  ;;  %v991_v20 = vrot.slane %v989_v14, 4  ;;  %v412_v3 = vshll.u32 %v7515_v45, 16  ;;  %v7580_v0 = vld [vmem:[%s7328_s11 + $0x70] sm:$0xf] }
  0x43   : > { %v959_v50 = vrot.slane %v958_v17, 4  ;;  %v982_v30 = vor.u32 %v981_v59, %v978_v38  ;;  %v7577_v6 = vrot.slane %v385_v63, 4  ;;  %v997_v27 = vrot.slane %v995_v13, 5  ;;  %9278 = vst [vmem:[#allocation16_spill] sm:$0xff] %v7580_v0  ;;  %v5639_v38 = vld [vmem:[%s7328_s11 + $0x54] sm:$0xf] }
  0x44   : > { %v969_v4 = vrot.slane %v968_v57, 4  ;;  %v992_v24 = vor.u32 %v991_v20, %v987_v2  ;;  %v7582_v31 = vrot.slane %v388_v51, 5  ;;  %v5795_v59 = vcombine.low %v7567_v19, %v7570_v12  ;;  %v7595_v51 = vld [vmem:[%s7328_s11 + $0x58] sm:$0xf]  ;;  %v7621_v63 = vld [vmem:[%s7328_s11 + $0x68] sm:$0x1] }
  0x45   : > { %9277 = vst [vmem:[#allocation15_spill] sm:$0xff] %v7577_v6  ;;  %v964_v14 = vsel %vm7431_vm4, %v959_v50, %v963_v56  ;;  %v983_v45 = vrot.slane %v982_v30, 4  ;;  %v7589_v17 = vrot.slane %v409_v55, 4  ;;  %v7597_v20 = vrot.slane %v412_v3, 5  ;;  %v7605_v55 = vld [vmem:[%s7328_s11 + $0x5c] sm:$0x1] }
  0x46   : > { %9279 = vst [vmem:[#allocation17_spill] sm:$0xff] %v7582_v31  ;;  %v974_v13 = vsel %vm7431_vm4, %v969_v4, %v973_v43  ;;  %v993_v57 = vrot.slane %v992_v24, 4  ;;  %6416 = vmatprep.mubr.msk.bf16.mxu1 %vm2092_vm1, %v5795_v59  ;;  %v5796_v56 = vcombine.low %v7575_v16, %v7580_v0  ;;  %v5641_v30 = vld [vmem:[%s7328_s11 + $0x60] sm:$0xf]  ;;  %v433_v43 = vshrl.u32 %v7567_v19, 16 }
  0x47   : > { %9280 = vst [vmem:[#allocation18_spill] sm:$0xff] %v7589_v17  ;;  %9281 = vst [vmem:[#allocation19_spill] sm:$0xff] %v7597_v20  ;;  %v5921_v15 = vcombine.low %v964_v14, %v974_v13  ;;  %v988_v50 = vsel %vm7431_vm4, %v983_v45, %v987_v2  ;;  %v436_v3 = vshll.u32 %v7567_v19, 16  ;;  %v1000_v4 = vshrl.u32 %v5639_v38, 16  ;;  %v7613_v14 = vld [vmem:[%s7328_s11 + $0x64] sm:$0xf] }
  0x48   : > { %v998_v24 = vsel %vm7431_vm4, %v993_v57, %v997_v27  ;;  %6417 = vmatmul.mubr.msk.bf16.gmra.mrb[16].mxu1 %vm2092_vm1, %v5796_v56  ;;  %v1003_v45 = vshll.u32 %v5639_v38, 16  ;;  %v1009_v59 = vshll.u32 %v7595_v51, 16  ;;  %v1013_v13 = vshrl.u32 %v7595_v51, 16 }
  0x49   : > { %6544 = vmatprep.mubr.msk.bf16.mxu0 %vm2092_vm1, %v5921_v15  ;;  %v5922_v2 = vcombine.low %v988_v50, %v998_v24  ;;  %v1002_v27 = vrot.slane %v1000_v4, 4  ;;  %v1019_v57 = vshll.u32 %v7605_v55, 16  ;;  %v1024_v19 = vshrl.u32 %v5641_v30, 16 }
  0x4a   : > { %v1027_v40 = vshll.u32 %v5641_v30, 16  ;;  %v1005_v15 = vrot.slane %v1003_v45, 5  ;;  %v1011_v50 = vrot.slane %v1009_v59, 5  ;;  %v1015_v24 = vrot.slane %v1013_v13, 4  ;;  %v209_v30 = vld [vmem:[%s7328_s11 + $0x78] sm:$0xf] }
  0x4b   : > { %6545 = vmatmul.mubr.msk.bf16.gmra.mrb[8].mxu0 %vm2092_vm1, %v5922_v2  ;;  %v1033_v38 = vshll.u32 %v7613_v14, 16  ;;  %v1021_v56 = vrot.slane %v1019_v57, 5  ;;  %v1026_v9 = vrot.slane %v1024_v19, 4  ;;  %v1037_v4 = vshrl.u32 %v7613_v14, 16  ;;  %v7629_v2 = vld [vmem:[%s7328_s11 + $0x7c] sm:$0xf] }
  0x4c   : > { %v1029_v32 = vrot.slane %v1027_v40, 5  ;;  %v1006_v20 = vor.u32 %v1005_v15, %v1002_v27  ;;  %v1016_v17 = vor.u32 %v1015_v24, %v1011_v50  ;;  %v1043_v31 = vshll.u32 %v7621_v63, 16  ;;  %v7635_v40 = vld [vmem:[%s7328_s11 + $0x84] sm:$0xf]  ;;  %v5675_v59 = vld [vmem:[%s7328_s11 + $0xc] sm:$0xe] }
  0x4d   : > { %v1035_v21 = vrot.slane %v1033_v38, 5  ;;  %v7631_v45 = vrot.slane %v433_v43, 4  ;;  %v1039_v57 = vrot.slane %v1037_v4, 4  ;;  %v7637_v19 = vrot.slane %v436_v3, 5  ;;  %v7641_v38 = vld [vmem:[%s7328_s11 + $0x88] sm:$0xf] }
  0x4e   : > { %v1030_v13 = vor.u32 %v1029_v32, %v1026_v9  ;;  %v457_v27 = vshrl.u32 %v7575_v16, 16  ;;  %v1007_v15 = vrot.slane %v1006_v20, 4  ;;  %v1017_v24 = vrot.slane %v1016_v17, 4  ;;  %v5676_v17 = vld [vmem:[%s7328_s11 + $0x18] sm:$0xe] }
  0x4f   : > { %9282 = vst [vmem:[#allocation20_spill] sm:$0xff] %v7631_v45  ;;  %9283 = vst [vmem:[#allocation21_spill] sm:$0xff] %v7637_v19  ;;  %v460_v6 = vshll.u32 %v7575_v16, 16  ;;  %v1040_v45 = vor.u32 %v1039_v57, %v1035_v21  ;;  %v1045_v60 = vrot.slane %v1043_v31, 5  ;;  %v481_v3 = vshrl.u32 %v209_v30, 16 }
  0x50   : > { %v1031_v43 = vrot.slane %v1030_v13, 4  ;;  %v1012_v9 = vsel %vm7431_vm4, %v1007_v15, %v1011_v50  ;;  %v1022_v32 = vsel %vm7431_vm4, %v1017_v24, %v1021_v56  ;;  %v5797_v20 = vcombine.low %v209_v30, %v7629_v2  ;;  %v213_v31 = vld [vmem:[%s7328_s11 + $0x90] sm:$0xf] }
  0x51   : > { %v5923_v4 = vcombine.low %v1012_v9, %v1022_v32  ;;  %v1041_v16 = vrot.slane %v1040_v45, 4  ;;  %v484_v13 = vshll.u32 %v209_v30, 16  ;;  %v505_v50 = vshrl.u32 %v7635_v40, 16  ;;  %v7666_v45 = vld [vmem:[%s7328_s11 + $0x94] sm:$0xf] }
  0x52   : > { %v1036_v12 = vsel %vm7431_vm4, %v1031_v43, %v1035_v21  ;;  %6420 = vmatprep.mubr.msk.bf16.mxu1 %vm2092_vm1, %v5797_v20  ;;  %v5798_v56 = vcombine.low %v7635_v40, %v7641_v38  ;;  %v5691_v21 = vrot.slane %v5675_v59, 9  ;;  %9286 = vst [vmem:[#allocation22_spill] sm:$0xff] %v7666_v45  ;;  %v7668_v30 = vrot.slane %v457_v27, 4  ;;  %v215_v32 = vld [vmem:[%s7328_s11 + $0x9c] sm:$0xf] }
  0x53   : > { %6548 = vmatprep.mubr.msk.bf16.mxu0 %vm2092_vm1, %v5923_v4  ;;  %v1046_v24 = vsel %vm7431_vm4, %v1041_v16, %v1045_v60  ;;  %v1305_v43 = vrot.slane %v7391_v47, 5  ;;  %v5692_v9 = vrot.slane %v5676_v17, 9  ;;  %v7675_v20 = vrot.slane %v460_v6, 5  ;;  %v5677_v6 = vld [vmem:[%s7328_s11 + $0x24] sm:$0xe] }
  0x54   : > { %9287 = vst [vmem:[#allocation23_spill] sm:$0xff] %v7668_v30  ;;  %v5924_v57 = vcombine.low %v1036_v12, %v1046_v24  ;;  %6421 = vmatmul.mubr.msk.bf16.gmra.mrb[20].mxu1 %vm2092_vm1, %v5798_v56  ;;  %v9288_v59 = vrot.slane %v7418_v62, 5  ;;  %v7682_v30 = vld [vmem:[%s7328_s11 + $0xa0] sm:$0xf]  ;;  %v7684_v4 = vrot.slane %v481_v3, 4  ;;  %v7686_v19 = vrot.slane %v484_v13, 5 }
  0x55   : > { %v1306_v47 = vsel %vm7661_vm7, %v5691_v21, %v1305_v43  ;;  %v1307_v60 = vrot.slane %v1305_v43, 4  ;;  %v7692_v12 = vrot.slane %v505_v50, 4  ;;  %v508_v17 = vshll.u32 %v7635_v40, 16 }
  0x56   : > { %v1314_v27 = vrot.slane %v9288_v59, 4  ;;  %6549 = vmatmul.mubr.msk.bf16.gmra.mrb[12].mxu0 %vm2092_vm1, %v5924_v57  ;;  %v5799_v3 = vcombine.low %v213_v31, %v7666_v45  ;;  %v9289_v13 = vrot.slane %v7404_v52, 5  ;;  %v9290_v21 = vmov %v9288_v59 }
  0x57   : > { %v1313_v24 = vsel %vm7661_vm7, %v5692_v9, %v9290_v21  ;;  %v9291_v57 = vrot.slane %v7424_v8, 5  ;;  %v529_v50 = vshrl.u32 %v213_v31, 16  ;;  %v532_v59 = vshll.u32 %v213_v31, 16 }
  0x58   : > { %v1309_v56 = vsel %vm7661_vm7, %v1307_v60, %v9289_v13  ;;  %6424 = vmatprep.mubr.msk.bf16.mxu1 %vm2092_vm1, %v5799_v3  ;;  %v5800_v52 = vcombine.low %v215_v32, %v7682_v30  ;;  %v5693_v16 = vrot.slane %v5677_v6, 9  ;;  %v5678_v60 = vld [vmem:[%s7328_s11 + $0x30] sm:$0xe]  ;;  %v7713_v13 = vld [vmem:[%s7328_s11 + $0xa8] sm:$0xf]  ;;  %v553_v62 = vshrl.u32 %v215_v32, 16 }
  0x59   : > { %v1316_v40 = vsel %vm7661_vm7, %v1314_v27, %v9291_v57  ;;  %v5949_v43 = vcombine.low %v1306_v47, %v1309_v56  ;;  %v556_v9 = vshll.u32 %v215_v32, 16  ;;  %v1319_v8 = vrot.slane %v7465_v1, 5  ;;  %v7718_v27 = vld [vmem:[%s7328_s11 + $0xac] sm:$0xf]  ;;  %v7726_v56 = vld [vmem:[%s7328_s11 + $0xb4] sm:$0xf] }
  0x5a   : > { %v1322_v21 = vrot.slane %v7471_v11, 5  ;;  %v7720_v47 = vrot.slane %v508_v17, 5  ;;  %v5950_v31 = vcombine.low %v1313_v24, %v1316_v40  ;;  %v1326_v3 = vrot.slane %v7487_v26, 5  ;;  %v7732_v17 = vld [vmem:[%s7328_s11 + $0xb8] sm:$0xf] }
  0x5b   : > { %6570 = vmatprep.mubr.msk.bf16.mxu0 %vm2092_vm1, %v5949_v43  ;;  %v1320_v1 = vsel %vm7661_vm7, %v5693_v16, %v1319_v8  ;;  %v1321_v32 = vrot.slane %v1319_v8, 4  ;;  %v5694_v11 = vrot.slane %v5678_v60, 9  ;;  %v1329_v57 = vrot.slane %v7494_v29, 5  ;;  %v5679_v40 = vld [vmem:[%s7328_s11 + $0x3c] sm:$0xe] }
  0x5c   : > { %v7734_v0 = vrot.slane %v529_v50, 4  ;;  %v7736_v43 = vrot.slane %v532_v59, 5  ;;  %6425 = vmatmul.mubr.msk.bf16.gmra.mrb[24].mxu1 %vm2092_vm1, %v5800_v52  ;;  %v1328_v26 = vrot.slane %v1326_v3, 4  ;;  %v5801_v24 = vcombine.low %v7713_v13, %v7718_v27  ;;  %v5680_v60 = vld [vmem:[%s7328_s11 + $0x48] sm:$0xe] }
  0x5d   : > { %v7742_v6 = vrot.slane %v553_v62, 4  ;;  %v7744_v16 = vrot.slane %v556_v9, 5  ;;  %v566_v29 = vshrl.u32 %v7682_v30, 16  ;;  %v1323_v50 = vsel %vm7661_vm7, %v1321_v32, %v1322_v21  ;;  %v7756_v62 = vld [vmem:[%s7328_s11 + $0x8] sm:$0x1] }
  0x5e   : > { %6571 = vmatmul.mubr.msk.bf16.vlgmr.msra.gmra.mrb[0].mxu0 %vm2092_vm1, %v5950_v31  ;;  %v5951_v59 = vcombine.low %v1320_v1, %v1323_v50  ;;  %v577_v52 = vshrl.u32 %v7713_v13, 16  ;;  %v580_v8 = vshll.u32 %v7713_v13, 16  ;;  %6428 = vmatprep.mubr.msk.bf16.mxu1 %vm2092_vm1, %v5801_v24  ;;  %v1327_v9 = vsel %vm7661_vm7, %v5694_v11, %v1326_v3 }
  0x5f   : > { %6603 = vmatpush3.bf16.msra.mxu0 %v7373_v39  ;;  %v1330_v21 = vsel %vm7661_vm7, %v1328_v26, %v1329_v57  ;;  %v5802_v31 = vcombine.low %v7726_v56, %v7732_v17  ;;  %v5695_v1 = vrot.slane %v5679_v40, 9  ;;  %v1333_v13 = vrot.slane %v7531_v18, 5  ;;  %v7770_v39 = vld [vmem:[%s7328_s11 + $0x14] sm:$0x1]  ;;  %v5681_v18 = vld [vmem:[%s7328_s11 + $0x54] sm:$0xe] }
  0x60   : > { %6574 = vmatprep.mubr.msk.bf16.mxu0 %vm2092_vm1, %v5951_v59  ;;  %v1336_v32 = vrot.slane %v7539_v33, 5  ;;  %v5696_v24 = vrot.slane %v5680_v60, 9  ;;  %v1340_v50 = vrot.slane %v7553_v10, 5  ;;  %v1343_v3 = vrot.slane %v7559_v25, 5 }
  0x61   : > { %v253_v11 = vsel %vm7431_vm4, %v7393_v48, %v7349_v22  ;;  %v260_v57 = vshll.u32 %v7756_v62, 16  ;;  %v277_v33 = vsel %vm7431_vm4, %v7406_v53, %v7379_v41  ;;  %v5952_v26 = vcombine.low %v1327_v9, %v1330_v21  ;;  %v5682_v21 = vld [vmem:[%s7328_s11 + $0x60] sm:$0xe] }
  0x62   : > { %v1334_v10 = vsel %vm7661_vm7, %v5695_v1, %v1333_v13  ;;  %v1335_v40 = vrot.slane %v1333_v13, 4  ;;  %v1342_v25 = vrot.slane %v1340_v50, 4  ;;  %v7785_v60 = vrot.slane %v577_v52, 4 }
  0x63   : > { %v262_v59 = vrot.slane %v260_v57, 5  ;;  %v284_v22 = vshll.u32 %v7770_v39, 16  ;;  %v1347_v48 = vrot.slane %v7595_v51, 5  ;;  %v1341_v41 = vsel %vm7661_vm7, %v5696_v24, %v1340_v50 }
  0x64   : > { %6429 = vmatmul.mubr.msk.bf16.gmra.mrb[28].mxu1 %vm2092_vm1, %v5802_v31  ;;  %v1337_v45 = vsel %vm7661_vm7, %v1335_v40, %v1336_v32  ;;  %v5697_v53 = vrot.slane %v5681_v18, 9  ;;  %v1350_v9 = vrot.slane %v7605_v55, 5  ;;  %v1344_v1 = vsel %vm7661_vm7, %v1342_v25, %v1343_v3  ;;  %v7821_v18 = vld [vmem:[%s7328_s11 + $0x2c] sm:$0x1] }
  0x65   : > { %v5953_v52 = vcombine.low %v1334_v10, %v1337_v45  ;;  %v263_v51 = vsel %vm7431_vm4, %v7395_v49, %v262_v59  ;;  %v286_v31 = vrot.slane %v284_v22, 5  ;;  %v7802_v13 = vrot.slane %v580_v8, 5  ;;  %v7810_v49 = vld [vmem:[%s7328_s11 + $0x20] sm:$0x1]  ;;  %v5667_v59 = vld [vmem:[%s7328_s11 + $0x74] sm:$0x1] }
  0x66   : > { %6575 = vmatmul.mubr.msk.bf16.gmra.mrb[4].mxu0 %vm2092_vm1, %v5952_v26  ;;  %v5819_v32 = vcombine.low %v253_v11, %v263_v51  ;;  %v1349_v24 = vrot.slane %v1347_v48, 4  ;;  %v1354_v55 = vrot.slane %v7613_v14, 5  ;;  %v5698_v50 = vrot.slane %v5682_v21, 9  ;;  %v5644_v26 = vld [vmem:[%s7328_s11 + $0x70] sm:$0xf] }
  0x67   : > { %6578 = vmatprep.mubr.msk.bf16.mxu0 %vm2092_vm1, %v5953_v52  ;;  %v287_v45 = vsel %vm7431_vm4, %v7442_v35, %v286_v31  ;;  %v295_v3 = vor.u32 %v7444_v36, %v7408_v54  ;;  %v298_v8 = vshll.u32 %v7368_v37, 16  ;;  %v5954_v57 = vcombine.low %v1341_v41, %v1344_v1 }
  0x68   : > { %6434 = vmatprep.mubr.msk.bf16.mxu1 %vm2092_vm1, %v5819_v32  ;;  %v5820_v14 = vcombine.low %v277_v33, %v287_v45  ;;  %v1348_v11 = vsel %vm7661_vm7, %v5697_v53, %v1347_v48  ;;  %v1351_v35 = vsel %vm7661_vm7, %v1349_v24, %v1350_v9  ;;  %v1357_v10 = vrot.slane %v7621_v63, 5  ;;  %v5683_v53 = vld [vmem:[%s7328_s11 + $0x6c] sm:$0xe] }
  0x69   : > { %v296_v40 = vrot.slane %v295_v3, 4  ;;  %v300_v54 = vrot.slane %v298_v8, 5  ;;  %v9292_v36 = vshrl.u32 %v7368_v37, 16  ;;  %v1356_v22 = vrot.slane %v1354_v55, 4 }
  0x6a   : > { %v308_v33 = vshll.u32 %v7810_v49, 16  ;;  %v319_v48 = vor.u32 %v7457_v58, %v7455_v61  ;;  %v322_v41 = vshll.u32 %v7388_v46, 16  ;;  %v5955_v9 = vcombine.low %v1348_v11, %v1351_v35  ;;  %v7846_v11 = vld [vmem:[%s7328_s11 + $0x7c] sm:$0xf]  ;;  %v5684_v35 = vld [vmem:[%s7328_s11 + $0x78] sm:$0xe] }
  0x6b   : > { %v304_v25 = vrot.slane %v9292_v36, 4  ;;  %v301_v21 = vsel %vm7431_vm4, %v296_v40, %v300_v54  ;;  %v9293_v52 = vshrl.u32 %v7388_v46, 16  ;;  %v332_v61 = vshll.u32 %v7821_v18, 16 }
  0x6c   : > { %6435 = vmatmul.mubr.msk.bf16.vlgmr.msra.gmra.mrb[0].mxu1 %vm2092_vm1, %v5820_v14  ;;  %v310_v37 = vrot.slane %v308_v33, 5  ;;  %v320_v51 = vrot.slane %v319_v48, 4  ;;  %v324_v31 = vrot.slane %v322_v41, 5  ;;  %v5699_v32 = vrot.slane %v5683_v53, 9  ;;  %v7865_v48 = vld [vmem:[%s7328_s11 + $0x38] sm:$0x1] }
  0x6d   : > { %v305_v63 = vor.u32 %v304_v25, %v300_v54  ;;  %v328_v1 = vrot.slane %v9293_v52, 4  ;;  %v1361_v24 = vrot.slane %v5644_v26, 5  ;;  %v1364_v45 = vrot.slane %v5667_v59, 5  ;;  %6467 = vmatpush3.bf16.msra.mxu1 %v7383_v44 }
  0x6e   : > { %6579 = vmatmul.mubr.msk.bf16.gmra.mrb[8].mxu0 %vm2092_vm1, %v5954_v57  ;;  %v1355_v46 = vsel %vm7661_vm7, %v5698_v50, %v1354_v55  ;;  %v1358_v3 = vsel %vm7661_vm7, %v1356_v22, %v1357_v10  ;;  %v334_v14 = vrot.slane %v332_v61, 5  ;;  %v601_v40 = vshrl.u32 %v7726_v56, 16  ;;  %v7856_v50 = vld [vmem:[%s7328_s11 + $0x80] sm:$0x1]  ;;  %v5669_v61 = vld [vmem:[%s7328_s11 + $0x8c] sm:$0x1] }
  0x6f   : > { %v306_v58 = vrot.slane %v305_v63, 4  ;;  %v329_v8 = vor.u32 %v328_v1, %v324_v31  ;;  %6582 = vmatprep.mubr.msk.bf16.mxu0 %vm2092_vm1, %v5955_v9  ;;  %v1362_v57 = vsel %vm7661_vm7, %v5699_v32, %v1361_v24  ;;  %v1363_v55 = vrot.slane %v1361_v24, 4  ;;  %v7873_v63 = vld [vmem:[%s7328_s11 + $0x44] sm:$0x1] }
  0x70   : > { %v604_v26 = vshll.u32 %v7726_v56, 16  ;;  %v325_v54 = vsel %vm7431_vm4, %v320_v51, %v324_v31  ;;  %v5956_v25 = vcombine.low %v1355_v46, %v1358_v3  ;;  %v5700_v22 = vrot.slane %v5684_v35, 9  ;;  %v5648_v31 = vld [vmem:[%s7328_s11 + $0x88] sm:$0xf]  ;;  %v5685_v3 = vld [vmem:[%s7328_s11 + $0x84] sm:$0xe] }
  0x71   : > { %v311_v44 = vsel %vm7431_vm4, %v306_v58, %v310_v37  ;;  %v330_v36 = vrot.slane %v329_v8, 4  ;;  %v1365_v59 = vsel %vm7661_vm7, %v1363_v55, %v1364_v45  ;;  %v1368_v33 = vrot.slane %v7846_v11, 5  ;;  %v8055_v56 = vld [vmem:[%s7328_s11 + $0x28] sm:$0xf] }
  0x72   : > { %v5821_v10 = vcombine.low %v301_v21, %v311_v44  ;;  %v5957_v53 = vcombine.low %v1362_v57, %v1365_v59  ;;  %v1081_v9 = vshll.u32 %v7846_v11, 16  ;;  %v1371_v21 = vrot.slane %v7856_v50, 5  ;;  %v5686_v44 = vld [vmem:[%s7328_s11 + $0x90] sm:$0xe] }
  0x73   : > { %v335_v41 = vsel %vm7431_vm4, %v330_v36, %v334_v14  ;;  %v1369_v1 = vsel %vm7661_vm7, %v5700_v22, %v1368_v33  ;;  %v1370_v37 = vrot.slane %v1368_v33, 4  ;;  %v343_v51 = vor.u32 %v7525_v7, %v7511_v28  ;;  %v9295_v7 = vld [vmem:[#allocation11_spill] sm:$0xff] }
  0x74   : > { %6438 = vmatprep.mubr.msk.bf16.mxu1 %vm2092_vm1, %v5821_v10  ;;  %v5822_v52 = vcombine.low %v325_v54, %v335_v41  ;;  %v346_v58 = vshll.u32 %v7440_v34, 16  ;;  %v9294_v32 = vshrl.u32 %v7440_v34, 16  ;;  %v356_v45 = vshll.u32 %v7865_v48, 16  ;;  %v5670_v33 = vld [vmem:[%s7328_s11 + $0x98] sm:$0x1] }
  0x75   : > { %v367_v46 = vor.u32 %v7535_v5, %v7533_v42  ;;  %v1372_v8 = vsel %vm7661_vm7, %v1370_v37, %v1371_v21  ;;  %v344_v28 = vrot.slane %v343_v51, 4  ;;  %v370_v14 = vshll.u32 %v9295_v7, 16  ;;  %v5650_v5 = vld [vmem:[%s7328_s11 + $0x94] sm:$0xf] }
  0x76   : > { %v352_v24 = vrot.slane %v9294_v32, 4  ;;  %6439 = vmatmul.mubr.msk.bf16.gmra.mrb[4].mxu1 %vm2092_vm1, %v5822_v52  ;;  %v9296_v35 = vshrl.u32 %v9295_v7, 16  ;;  %6583 = vmatmul.mubr.msk.bf16.gmra.mrb[12].mxu0 %vm2092_vm1, %v5956_v25  ;;  %v5958_v57 = vcombine.low %v1369_v1, %v1372_v8  ;;  %v348_v55 = vrot.slane %v346_v58, 5  ;;  %v9297_v8 = vld [vmem:[#allocation15_spill] sm:$0xff] }
  0x77   : > { %v358_v10 = vrot.slane %v356_v45, 5  ;;  %v368_v42 = vrot.slane %v367_v46, 4  ;;  %6586 = vmatprep.mubr.msk.bf16.mxu0 %vm2092_vm1, %v5957_v53  ;;  %v372_v54 = vrot.slane %v370_v14, 5  ;;  %v380_v36 = vshll.u32 %v7873_v63, 16 }
  0x78   : > { %v376_v34 = vrot.slane %v9296_v35, 4  ;;  %v5701_v59 = vrot.slane %v5685_v3, 9  ;;  %v1375_v22 = vrot.slane %v5648_v31, 5  ;;  %v349_v41 = vsel %vm7431_vm4, %v344_v28, %v348_v55  ;;  %v7907_v3 = vld [vmem:[%s7328_s11 + $0x50] sm:$0x1]  ;;  %v9299_v28 = vld [vmem:[#allocation12_spill] sm:$0xff] }
  0x79   : > { %v353_v21 = vor.u32 %v352_v24, %v348_v55  ;;  %v1378_v52 = vrot.slane %v5669_v61, 5  ;;  %v5702_v25 = vrot.slane %v5686_v44, 9  ;;  %v373_v1 = vsel %vm7431_vm4, %v368_v42, %v372_v54  ;;  %v9298_v24 = vld [vmem:[#allocation17_spill] sm:$0xff] }
  0x7a   : > { %v377_v37 = vor.u32 %v376_v34, %v372_v54  ;;  %v382_v51 = vrot.slane %v380_v36, 5  ;;  %v1376_v53 = vsel %vm7661_vm7, %v5701_v59, %v1375_v22  ;;  %v1377_v32 = vrot.slane %v1375_v22, 4  ;;  %v7923_v22 = vld [vmem:[%s7328_s11 + $0x5c] sm:$0x1] }
  0x7b   : > { %v354_v58 = vrot.slane %v353_v21, 4  ;;  %v1382_v45 = vrot.slane %v5650_v5, 5  ;;  %v1385_v31 = vrot.slane %v5670_v33, 5  ;;  %v391_v61 = vor.u32 %v9298_v24, %v9297_v8 }
  0x7c   : > { %v378_v46 = vrot.slane %v377_v37, 4  ;;  %v394_v7 = vshll.u32 %v9299_v28, 16  ;;  %v9300_v14 = vshrl.u32 %v9299_v28, 16  ;;  %v1379_v44 = vsel %vm7661_vm7, %v1377_v32, %v1378_v52 }
  0x7d   : > { %v359_v34 = vsel %vm7431_vm4, %v354_v58, %v358_v10  ;;  %v1383_v55 = vsel %vm7661_vm7, %v5702_v25, %v1382_v45  ;;  %v1384_v42 = vrot.slane %v1382_v45, 4  ;;  %v5959_v36 = vcombine.low %v1376_v53, %v1379_v44  ;;  %v5687_v25 = vld [vmem:[%s7328_s11 + $0x9c] sm:$0xe] }
  0x7e   : > { %v400_v35 = vrot.slane %v9300_v14, 4  ;;  %v5823_v5 = vcombine.low %v349_v41, %v359_v34  ;;  %v383_v54 = vsel %vm7431_vm4, %v378_v46, %v382_v51  ;;  %v392_v59 = vrot.slane %v391_v61, 4  ;;  %6587 = vmatmul.mubr.msk.bf16.gmra.mrb[16].mxu0 %vm2092_vm1, %v5958_v57  ;;  %v5652_v41 = vld [vmem:[%s7328_s11 + $0xa0] sm:$0xf]  ;;  %v9301_v51 = vld [vmem:[#allocation18_spill] sm:$0xff]  ;;  %v9302_v53 = vld [vmem:[#allocation19_spill] sm:$0xff] }
  0x7f   : > { %v5824_v10 = vcombine.low %v373_v1, %v383_v54  ;;  %v1386_v33 = vsel %vm7661_vm7, %v1384_v42, %v1385_v31  ;;  %v396_v21 = vrot.slane %v394_v7, 5  ;;  %v404_v52 = vshll.u32 %v7907_v3, 16  ;;  %6590 = vmatprep.mubr.msk.bf16.mxu0 %vm2092_vm1, %v5959_v36  ;;  %v9303_v57 = vld [vmem:[#allocation13_spill] sm:$0xff]  ;;  %v5671_v31 = vld [vmem:[%s7328_s11 + $0xa4] sm:$0x1] }
  0x80   : > { %6442 = vmatprep.mubr.msk.bf16.mxu1 %vm2092_vm1, %v5823_v5  ;;  %v5960_v37 = vcombine.low %v1383_v55, %v1386_v33  ;;  %v415_v58 = vor.u32 %v9302_v53, %v9301_v51  ;;  %v418_v1 = vshll.u32 %v9303_v57, 16  ;;  %v9304_v32 = vshrl.u32 %v9303_v57, 16  ;;  %v5688_v46 = vld [vmem:[%s7328_s11 + $0xa8] sm:$0xe]  ;;  %v5654_v7 = vld [vmem:[%s7328_s11 + $0xac] sm:$0xf] }
  0x81   : > { %6443 = vmatmul.mubr.msk.bf16.gmra.mrb[8].mxu1 %vm2092_vm1, %v5824_v10  ;;  %v397_v8 = vsel %vm7431_vm4, %v392_v59, %v396_v21  ;;  %v401_v24 = vor.u32 %v400_v35, %v396_v21  ;;  %v406_v61 = vrot.slane %v404_v52, 5  ;;  %v428_v28 = vshll.u32 %v7923_v22, 16  ;;  %v5672_v42 = vld [vmem:[%s7328_s11 + $0xb0] sm:$0x1]  ;;  %v9305_v53 = vld [vmem:[#allocation20_spill] sm:$0xff] }
  0x82   : > { %v424_v45 = vrot.slane %v9304_v32, 4  ;;  %v416_v14 = vrot.slane %v415_v58, 4  ;;  %v420_v34 = vrot.slane %v418_v1, 5  ;;  %v5703_v44 = vrot.slane %v5687_v25, 9  ;;  %v9306_v58 = vld [vmem:[#allocation21_spill] sm:$0xff] }
  0x83   : > { %v1389_v55 = vrot.slane %v5652_v41, 5  ;;  %v402_v5 = vrot.slane %v401_v24, 4  ;;  %v430_v54 = vrot.slane %v428_v28, 5  ;;  %v1392_v36 = vrot.slane %v5671_v31, 5  ;;  %v7953_v41 = vld [vmem:[%s7328_s11 + $0x68] sm:$0x1] }
  0x84   : > { %v5704_v33 = vrot.slane %v5688_v46, 9  ;;  %v421_v10 = vsel %vm7431_vm4, %v416_v14, %v420_v34  ;;  %v425_v51 = vor.u32 %v424_v45, %v420_v34  ;;  %v1396_v52 = vrot.slane %v5654_v7, 5  ;;  %v9307_v31 = vld [vmem:[#allocation14_spill] sm:$0xff] }
  0x85   : > { %v1390_v35 = vsel %vm7661_vm7, %v5703_v44, %v1389_v55  ;;  %v1391_v59 = vrot.slane %v1389_v55, 4  ;;  %v407_v21 = vsel %vm7431_vm4, %v402_v5, %v406_v61  ;;  %v1399_v25 = vrot.slane %v5672_v42, 5  ;;  %v7964_v14 = vld [vmem:[%s7328_s11 + $0x74] sm:$0x1]  ;;  %v5656_v42 = vld [vmem:[%s7328_s11 + $0xb8] sm:$0xf] }
  0x86   : > { %v439_v57 = vor.u32 %v9306_v58, %v9305_v53  ;;  %v5825_v1 = vcombine.low %v397_v8, %v407_v21  ;;  %v426_v32 = vrot.slane %v425_v51, 4  ;;  %v442_v46 = vshll.u32 %v9307_v31, 16  ;;  %6591 = vmatmul.mubr.msk.bf16.gmra.mrb[20].mxu0 %vm2092_vm1, %v5960_v37  ;;  %v5689_v21 = vld [vmem:[%s7328_s11 + $0xb4] sm:$0xe] }
  0x87   : > { %v1393_v45 = vsel %vm7661_vm7, %v1391_v59, %v1392_v36  ;;  %v1397_v61 = vsel %vm7661_vm7, %v5704_v33, %v1396_v52  ;;  %v1398_v28 = vrot.slane %v1396_v52, 4  ;;  %v9308_v44 = vshrl.u32 %v9307_v31, 16  ;;  %v9309_v33 = vld [vmem:[#allocation23_spill] sm:$0xff]  ;;  %v5658_v31 = vld [vmem:[%s7328_s11 + $0xc4] sm:$0xf] }
  0x88   : > { %v5961_v24 = vcombine.low %v1390_v35, %v1393_v45  ;;  %v440_v7 = vrot.slane %v439_v57, 4  ;;  %6446 = vmatprep.mubr.msk.bf16.mxu1 %vm2092_vm1, %v5825_v1  ;;  %v431_v8 = vsel %vm7431_vm4, %v426_v32, %v430_v54  ;;  %v444_v34 = vrot.slane %v442_v46, 5  ;;  %v9310_v35 = vld [vmem:[#allocation16_spill] sm:$0xff]  ;;  %v5673_v59 = vld [vmem:[%s7328_s11 + $0xbc] sm:$0x1] }
  0x89   : > { %v448_v37 = vrot.slane %v9308_v44, 4  ;;  %v452_v55 = vshll.u32 %v7953_v41, 16  ;;  %v5826_v5 = vcombine.low %v421_v10, %v431_v8  ;;  %v1400_v36 = vsel %vm7661_vm7, %v1398_v28, %v1399_v25  ;;  %v5690_v57 = vld [vmem:[%s7328_s11 + $0xc0] sm:$0xe]  ;;  %v5674_v8 = vld [vmem:[%s7328_s11 + $0xc8] sm:$0x1] }
  0x8a   : > { %6594 = vmatprep.mubr.msk.bf16.mxu0 %vm2092_vm1, %v5961_v24  ;;  %v463_v51 = vor.u32 %v7675_v20, %v9309_v33  ;;  %v466_v54 = vshll.u32 %v9310_v35, 16  ;;  %v5962_v52 = vcombine.low %v1397_v61, %v1400_v36  ;;  %v445_v53 = vsel %vm7431_vm4, %v440_v7, %v444_v34 }
  0x8b   : > { %v449_v58 = vor.u32 %v448_v37, %v444_v34  ;;  %v454_v10 = vrot.slane %v452_v55, 5  ;;  %6447 = vmatmul.mubr.msk.bf16.gmra.mrb[12].mxu1 %vm2092_vm1, %v5826_v5  ;;  %v9311_v25 = vshrl.u32 %v9310_v35, 16  ;;  %v476_v20 = vshll.u32 %v7964_v14, 16 }
  0x8c   : > { %v464_v1 = vrot.slane %v463_v51, 4  ;;  %v468_v32 = vrot.slane %v466_v54, 5  ;;  %v5705_v24 = vrot.slane %v5689_v21, 9  ;;  %v1403_v61 = vrot.slane %v5656_v42, 5  ;;  %v7998_v54 = vld [vmem:[%s7328_s11 + $0x80] sm:$0x1] }
  0x8d   : > { %v472_v45 = vrot.slane %v9311_v25, 4  ;;  %v450_v46 = vrot.slane %v449_v58, 4  ;;  %v1406_v28 = vrot.slane %v5673_v59, 5  ;;  %v478_v44 = vrot.slane %v476_v20, 5 }
  0x8e   : > { %v469_v7 = vsel %vm7431_vm4, %v464_v1, %v468_v32  ;;  %v5706_v37 = vrot.slane %v5690_v57, 9  ;;  %v1404_v5 = vsel %vm7661_vm7, %v5705_v24, %v1403_v61  ;;  %v1405_v36 = vrot.slane %v1403_v61, 4  ;;  %6595 = vmatmul.mubr.msk.bf16.gmra.mrb[24].mxu0 %vm2092_vm1, %v5962_v52 }
  0x8f   : > { %v473_v34 = vor.u32 %v472_v45, %v468_v32  ;;  %v455_v55 = vsel %vm7431_vm4, %v450_v46, %v454_v10  ;;  %v1410_v33 = vrot.slane %v5658_v31, 5  ;;  %v1413_v35 = vrot.slane %v5674_v8, 5  ;;  %v8013_v32 = vld [vmem:[%s7328_s11 + $0x8c] sm:$0x1]  ;;  %v5707_v8 = vld [vmem:[%s7328_s11 + $0x18] sm:$0xf] }
  0x90   : > { %v5827_v42 = vcombine.low %v445_v53, %v455_v55  ;;  %v487_v59 = vor.u32 %v7686_v19, %v7684_v4  ;;  %v1407_v21 = vsel %vm7661_vm7, %v1405_v36, %v1406_v28  ;;  %v490_v57 = vshll.u32 %v7629_v2, 16 }
  0x91   : > { %v474_v51 = vrot.slane %v473_v34, 4  ;;  %v1411_v58 = vsel %vm7661_vm7, %v5706_v37, %v1410_v33  ;;  %v1412_v10 = vrot.slane %v1410_v33, 4  ;;  %v5963_v53 = vcombine.low %v1404_v5, %v1407_v21  ;;  %v8026_v34 = vld [vmem:[%s7328_s11 + $0x1c] sm:$0xf] }
  0x92   : > { %6450 = vmatprep.mubr.msk.bf16.mxu1 %vm2092_vm1, %v5827_v42  ;;  %v488_v1 = vrot.slane %v487_v59, 4  ;;  %v9312_v19 = vshrl.u32 %v7629_v2, 16  ;;  %v492_v20 = vrot.slane %v490_v57, 5  ;;  %v500_v31 = vshll.u32 %v7998_v54, 16 }
  0x93   : > { %v479_v52 = vsel %vm7431_vm4, %v474_v51, %v478_v44  ;;  %v1414_v45 = vsel %vm7661_vm7, %v1412_v10, %v1413_v35  ;;  %6598 = vmatprep.mubr.msk.bf16.mxu0 %vm2092_vm1, %v5963_v53  ;;  %v511_v24 = vor.u32 %v7720_v47, %v7692_v12  ;;  %v514_v61 = vshll.u32 %v7641_v38, 16  ;;  %v7049_v12 = vld [vmem:[%s9228_s1 + $0xc] ss:$0 sps:$4 sm:$0xcc]  }
  0x94   : > { %v496_v4 = vrot.slane %v9312_v19, 4  ;;  %v5828_v25 = vcombine.low %v469_v7, %v479_v52  ;;  %v5964_v46 = vcombine.low %v1411_v58, %v1414_v45  ;;  %v9313_v2 = vshrl.u32 %v7641_v38, 16  ;;  %v8052_v58 = vld [vmem:[%s7328_s11 + $0x24] sm:$0xf] }
  0x95   : > { %v1085_v7 = vshrl.u32 %v7846_v11, 16  ;;  %v502_v37 = vrot.slane %v500_v31, 5  ;;  %v524_v55 = vshll.u32 %v8013_v32, 16  ;;  %v8036_v38 = vrot.slane %v601_v40, 4 }
  0x96   : > { %v520_v28 = vrot.slane %v9313_v2, 4  ;;  %6451 = vmatmul.mubr.msk.bf16.gmra.mrb[16].mxu1 %vm2092_vm1, %v5828_v25  ;;  %v497_v44 = vor.u32 %v496_v4, %v492_v20  ;;  %v614_v47 = vshrl.u32 %v7732_v17, 16  ;;  %v512_v5 = vrot.slane %v511_v24, 4  ;;  %6599 = vmatmul.mubr.msk.bf16.gmra.mrb[28].mxu0 %vm2092_vm1, %v5964_v46  ;;  %v9316_v46 = vld [vmem:[#allocation22_spill] sm:$0xff] }
  0x97   : > { %v516_v36 = vrot.slane %v514_v61, 5  ;;  %v8041_v33 = vrot.slane %v604_v26, 5  ;;  %v493_v42 = vsel %vm7431_vm4, %v488_v1, %v492_v20  ;;  %v5982_v35 = vcombine.low %v5707_v8, %v8026_v34  ;;  %v8075_v20 = vld [vmem:[%s7328_s11 + $0xa4] sm:$0x1] }
  0x98   : > { %v498_v51 = vrot.slane %v497_v44, 4  ;;  %v8048_v59 = vrot.slane %v1081_v9, 5  ;;  %v526_v21 = vrot.slane %v524_v55, 5  ;;  %v8057_v26 = vrot.slane %v1085_v7, 4  ;;  %v8064_v9 = vld [vmem:[%s7328_s11 + $0x98] sm:$0x1] }
  0x99   : > { %v521_v40 = vor.u32 %v520_v28, %v516_v36  ;;  %v1091_v10 = vshll.u32 %v7856_v50, 16  ;;  %6604 = vmatprep.mubr.msk.bf16.mxu0 %vm2092_vm1, %v5982_v35  ;;  %v4608_v11 = vrot.slane %v7049_v12, 2  ;;  %v517_v53 = vsel %vm7431_vm4, %v512_v5, %v516_v36  ;;  %v5711_v44 = vld [vmem:[%s7328_s11 + $0x30] sm:$0xf]  ;;  %v8093_v36 = vld [vmem:[%s7328_s11 + $0x34] sm:$0xf] }
  0x9a   : > { %9314 = vst [vmem:[#allocation11_spill] sm:$0xff] %v8048_v59  ;;  %9315 = vst [vmem:[#allocation15_spill] sm:$0xff] %v8057_v26  ;;  %v503_v57 = vsel %vm7431_vm4, %v498_v51, %v502_v37  ;;  %v1468_v19 = vshrl.u32 %v5707_v8, 16  ;;  %v1471_v4 = vshll.u32 %v5707_v8, 16  ;;  %v1492_v50 = vshrl.u32 %v8052_v58, 16 }
  0x9b   : > { %v5829_v52 = vcombine.low %v493_v42, %v503_v57  ;;  %v522_v1 = vrot.slane %v521_v40, 4  ;;  %6970 = vmatprep.subr.msk.bf16.mxu0 %vm2141_vm0, %v4608_v11  ;;  %v5983_v25 = vcombine.low %v8052_v58, %v8055_v56  ;;  %v535_v45 = vor.u32 %v7736_v43, %v7734_v0  ;;  %v8102_v35 = vld [vmem:[%s9228_s1 + $0x10] sm:$0x3]  ;;  %v8284_v59 = vld [vmem:[%s7328_s11 + $0x94] sm:$0xf] }
  0x9c   : > { %v538_v24 = vshll.u32 %v9316_v46, 16  ;;  %v9317_v61 = vshrl.u32 %v9316_v46, 16  ;;  %v548_v28 = vshll.u32 %v8064_v9, 16  ;;  %v4658_v7 = vsel %vm2141_vm0, %v4608_v11, 0  ;;  %9329 = vst [vmem:[#allocation13_spill] sm:$0xff] %v8284_v59 }
  0x9d   : > { %6454 = vmatprep.mubr.msk.bf16.mxu1 %vm2092_vm1, %v5829_v52  ;;  %v527_v31 = vsel %vm7431_vm4, %v522_v1, %v526_v21  ;;  %v559_v0 = vor.u32 %v7744_v16, %v7742_v6  ;;  %v562_v43 = vshll.u32 %v7682_v30, 16  ;;  %v536_v37 = vrot.slane %v535_v45, 4  ;;  %v8115_v1 = vld [vmem:[%s7328_s11 + $0x40] sm:$0xf] }
  0x9e   : > { %v544_v2 = vrot.slane %v9317_v61, 4  ;;  %v5830_v8 = vcombine.low %v517_v53, %v527_v31  ;;  %v540_v55 = vrot.slane %v538_v24, 5  ;;  %v568_v12 = vrot.slane %v566_v29, 4  ;;  %6605 = vmatmul.mubr.msk.bf16.vlgmr.msra.gmra.mrb[0].mxu0 %vm2092_vm1, %v5983_v25  ;;  %v8127_v24 = vld [vmem:[%s7328_s11 + $0xb0] sm:$0x1] }
  0x9f   : > { %v572_v5 = vshll.u32 %v8075_v20, 16  ;;  %v8095_v42 = vrot.slane %v1091_v10, 5  ;;  %v560_v16 = vrot.slane %v559_v0, 4  ;;  %v564_v51 = vrot.slane %v562_v43, 5  ;;  %v8110_v10 = vld [vmem:[%s7328_s11 + $0x3c] sm:$0xf]  ;;  %6637 = vmatpush3.bf16.msra.mxu0 %v4658_v7 }
  0xa0   : > { %6455 = vmatmul.mubr.msk.bf16.gmra.mrb[20].mxu1 %vm2092_vm1, %v5830_v8  ;;  %v8104_v30 = vrot.slane %v1468_v19, 4  ;;  %v8106_v29 = vrot.slane %v1471_v4, 5  ;;  %v545_v40 = vor.u32 %v544_v2, %v540_v55  ;;  %v550_v21 = vrot.slane %v548_v28, 5  ;;  %6971 = vmatprep.subr.msk.bf16.mxu0 %vm2141_vm0, %v8102_v35  ;;  %v8138_v7 = vld [vmem:[%s7328_s11 + $0xbc] sm:$0x1] }
  0xa1   : > { %9318 = vst [vmem:[#allocation17_spill] sm:$0xff] %v8095_v42  ;;  %v1495_v57 = vshll.u32 %v8052_v58, 16  ;;  %v569_v52 = vor.u32 %v568_v12, %v564_v51  ;;  %v574_v53 = vrot.slane %v572_v5, 5  ;;  %v8117_v19 = vrot.slane %v1492_v50, 4 }
  0xa2   : > { %v541_v4 = vsel %vm7431_vm4, %v536_v37, %v540_v55  ;;  %v546_v25 = vrot.slane %v545_v40, 4  ;;  %v5984_v45 = vcombine.low %v5711_v44, %v8093_v36  ;;  %v565_v58 = vsel %vm7431_vm4, %v560_v16, %v564_v51  ;;  %v5715_v16 = vld [vmem:[%s7328_s11 + $0x48] sm:$0xf] }
  0xa3   : > { %v570_v31 = vrot.slane %v569_v52, 4  ;;  %v1516_v46 = vshrl.u32 %v5711_v44, 16  ;;  %v583_v50 = vor.u32 %v7802_v13, %v7785_v60  ;;  %v1519_v2 = vshll.u32 %v5711_v44, 16  ;;  %v8156_v52 = vld [vmem:[%s7328_s11 + $0x4c] sm:$0xf] }
  0xa4   : > { %v551_v61 = vsel %vm7431_vm4, %v546_v25, %v550_v21  ;;  %6608 = vmatprep.mubr.msk.bf16.mxu0 %vm2092_vm1, %v5984_v45  ;;  %v5985_v28 = vcombine.low %v8110_v10, %v8115_v1  ;;  %v586_v8 = vshll.u32 %v7718_v27, 16  ;;  %v9319_v60 = vshrl.u32 %v7718_v27, 16 }
  0xa5   : > { %v5831_v0 = vcombine.low %v541_v4, %v551_v61  ;;  %v575_v43 = vsel %vm7431_vm4, %v570_v31, %v574_v53  ;;  %v584_v37 = vrot.slane %v583_v50, 4  ;;  %v596_v12 = vshll.u32 %v8127_v24, 16  ;;  %v8164_v4 = vld [vmem:[%s7328_s11 + $0x54] sm:$0xf] }
  0xa6   : > { %v592_v13 = vrot.slane %v9319_v60, 4  ;;  %v5832_v55 = vcombine.low %v565_v58, %v575_v43  ;;  %v588_v44 = vrot.slane %v586_v8, 5  ;;  %v607_v5 = vor.u32 %v8041_v33, %v8036_v38  ;;  %6609 = vmatmul.mubr.msk.bf16.gmra.mrb[4].mxu0 %vm2092_vm1, %v5985_v28  ;;  %v8170_v58 = vld [vmem:[%s7328_s11 + $0x58] sm:$0xf]  ;;  %v624_v28 = vld [vmem:[%s7328_s11] sm:$0xe] }
  0xa7   : > { %v8148_v51 = vrot.slane %v1495_v57, 5  ;;  %6458 = vmatprep.mubr.msk.bf16.mxu1 %vm2092_vm1, %v5831_v0  ;;  %v610_v40 = vshll.u32 %v7732_v17, 16  ;;  %v616_v27 = vrot.slane %v614_v47, 4  ;;  %v620_v21 = vshll.u32 %v8138_v7, 16  ;;  %v625_v60 = vld [vmem:[%s7328_s11 + $0xc] sm:$0xe] }
  0xa8   : > { %6459 = vmatmul.mubr.msk.bf16.gmra.mrb[24].mxu1 %vm2092_vm1, %v5832_v55  ;;  %v8159_v53 = vrot.slane %v1516_v46, 4  ;;  %v593_v33 = vor.u32 %v592_v13, %v588_v44  ;;  %v598_v57 = vrot.slane %v596_v12, 5  ;;  %v8166_v17 = vrot.slane %v1519_v2, 5 }
  0xa9   : > { %v1540_v47 = vshrl.u32 %v8110_v10, 16  ;;  %v608_v25 = vrot.slane %v607_v5, 4  ;;  %v612_v45 = vrot.slane %v610_v40, 5  ;;  %v1543_v31 = vshll.u32 %v8110_v10, 16 }
  0xaa   : > { %v589_v46 = vsel %vm7431_vm4, %v584_v37, %v588_v44  ;;  %v594_v50 = vrot.slane %v593_v33, 4  ;;  %v5986_v61 = vcombine.low %v5715_v16, %v8156_v52  ;;  %v622_v2 = vrot.slane %v620_v21, 5 }
  0xab   : > { %v617_v0 = vor.u32 %v616_v27, %v612_v45  ;;  %v1564_v43 = vshrl.u32 %v5715_v16, 16  ;;  %v1567_v55 = vshll.u32 %v5715_v16, 16  ;;  %v1588_v10 = vshrl.u32 %v8164_v4, 16 }
  0xac   : > { %v599_v13 = vsel %vm7431_vm4, %v594_v50, %v598_v57  ;;  %6612 = vmatprep.mubr.msk.bf16.mxu0 %vm2092_vm1, %v5986_v61  ;;  %v5987_v37 = vcombine.low %v8164_v4, %v8170_v58  ;;  %v613_v12 = vsel %vm7431_vm4, %v608_v25, %v612_v45  ;;  %v5611_v40 = vrot.slane %v624_v28, 9  ;;  %v5719_v57 = vld [vmem:[%s7328_s11 + $0x60] sm:$0xf]  ;;  %v9320_v25 = vld [vmem:[#allocation7_spill] sm:$0xff]  ;;  %v8204_v61 = vld [vmem:[%s7328_s11 + $0x64] sm:$0xf] }
  0xad   : > { %v5833_v44 = vcombine.low %v589_v46, %v599_v13  ;;  %v618_v5 = vrot.slane %v617_v0, 4  ;;  %v8187_v27 = vrot.slane %v1540_v47, 4  ;;  %v8189_v21 = vrot.slane %v1543_v31, 5  ;;  %v8215_v13 = vld [vmem:[%s7328_s11 + $0x70] sm:$0xf] }
  0xae   : > { %v696_v16 = vrot.slane %v7756_v62, 5  ;;  %v5612_v33 = vrot.slane %v625_v60, 9  ;;  %v8196_v50 = vrot.slane %v1564_v43, 4  ;;  %v9321_v45 = vrot.slane %v9320_v25, 5  ;;  %v5721_v62 = vld [vmem:[%s7328_s11 + $0x6c] sm:$0xf]  ;;  %6613 = vmatmul.mubr.msk.bf16.gmra.mrb[8].mxu0 %vm2092_vm1, %v5987_v37 }
  0xaf   : > { %6462 = vmatprep.mubr.msk.bf16.mxu1 %vm2092_vm1, %v5833_v44  ;;  %v623_v46 = vsel %vm7431_vm4, %v618_v5, %v622_v2  ;;  %v703_v31 = vrot.slane %v7770_v39, 5  ;;  %v8207_v0 = vrot.slane %v1567_v55, 5  ;;  %v9322_v2 = vld [vmem:[#allocation9_spill] sm:$0xff]  ;;  %9323 = vst [vmem:[#allocation12_spill] sm:$0xff] %v8215_v13  ;;  %v626_v44 = vld [vmem:[%s7328_s11 + $0x18] sm:$0xe]  ;;  %v5989_v8 = vcombine.low %v5721_v62, %v8215_v13 }
  0xb0   : > { %v694_v47 = vsel %vm7661_vm7, %v5611_v40, %v9321_v45  ;;  %v5834_v28 = vcombine.low %v613_v12, %v623_v46  ;;  %v697_v43 = vsel %vm7661_vm7, %v9322_v2, %v696_v16  ;;  %v8218_v39 = vrot.slane %v1588_v10, 4  ;;  %v7057_v37 = vld [vmem:[%s9228_s1 + $0x4] ss:$0 sps:$4 sm:$0xcc]   ;;  %v627_v45 = vld [vmem:[%s7328_s11 + $0x24] sm:$0xe] }
  0xb1   : > { %v1591_v5 = vshll.u32 %v8164_v4, 16  ;;  %v5852_v12 = vcombine.low %v694_v47, %v697_v43  ;;  %v9324_v40 = vld [vmem:[#allocation8_spill] sm:$0xff]  ;;  %v1612_v10 = vshrl.u32 %v5719_v57, 16  ;;  %v1615_v25 = vshll.u32 %v5719_v57, 16  ;;  %v9326_v47 = vld [vmem:[#allocation10_spill] sm:$0xff] }
  0xb2   : > { %6463 = vmatmul.mubr.msk.bf16.gmra.mrb[28].mxu1 %vm2092_vm1, %v5834_v28  ;;  %v9325_v16 = vrot.slane %v9324_v40, 5  ;;  %v5988_v4 = vcombine.low %v5719_v57, %v8204_v61  ;;  %v704_v2 = vsel %vm7661_vm7, %v9326_v47, %v703_v31  ;;  %v5613_v43 = vrot.slane %v626_v44, 9  ;;  %v7082_v28 = vld [vmem:[%s7328_s11 + $0x1c] sm:$0xf]  ;;  %v5723_v60 = vld [vmem:[%s7328_s11 + $0x78] sm:$0xf] }
  0xb3   : > { %6468 = vmatprep.mubr.msk.bf16.mxu1 %vm2092_vm1, %v5852_v12  ;;  %v707_v55 = vrot.slane %v7082_v28, 5  ;;  %v710_v40 = vrot.slane %v7810_v49, 5  ;;  %v7083_v57 = vld [vmem:[%s7328_s11 + $0x28] sm:$0xf]  ;;  %v8243_v12 = vld [vmem:[%s7328_s11 + $0x7c] sm:$0xf] }
  0xb4   : > { %v701_v46 = vsel %vm7661_vm7, %v5612_v33, %v9325_v16  ;;  %6616 = vmatprep.mubr.msk.bf16.mxu0 %vm2092_vm1, %v5988_v4  ;;  %v1636_v33 = vshrl.u32 %v5721_v62, 16  ;;  %v1639_v16 = vshll.u32 %v5721_v62, 16  ;;  %v714_v38 = vrot.slane %v7083_v57, 5  ;;  %9327 = vst [vmem:[#allocation18_spill] sm:$0xff] %v8243_v12  ;;  %v5727_v62 = vld [vmem:[%s7328_s11 + $0x90] sm:$0xf] }
  0xb5   : > { %v708_v31 = vsel %vm7661_vm7, %v5613_v43, %v707_v55  ;;  %v709_v44 = vrot.slane %v707_v55, 4  ;;  %v5614_v47 = vrot.slane %v627_v45, 9  ;;  %v3156_v28 = vrot.slane %v7057_v37, 2  ;;  %v5725_v37 = vld [vmem:[%s7328_s11 + $0x84] sm:$0xf] }
  0xb6   : > { %v8247_v49 = vrot.slane %v1591_v5, 5  ;;  %v5853_v4 = vcombine.low %v701_v46, %v704_v2  ;;  %v8249_v11 = vrot.slane %v1612_v10, 4  ;;  %v716_v6 = vrot.slane %v714_v38, 4  ;;  %v628_v5 = vld [vmem:[%s7328_s11 + $0x30] sm:$0xe]  ;;  %6617 = vmatmul.mubr.msk.bf16.gmra.mrb[12].mxu0 %vm2092_vm1, %v5989_v8 }
  0xb7   : > { %v711_v57 = vsel %vm7661_vm7, %v709_v44, %v710_v40  ;;  %v717_v42 = vrot.slane %v7821_v18, 5  ;;  %6965 = vmatprep.subr.msk.bf16.mxu1 %vm2141_vm0, %v3156_v28  ;;  %v5990_v55 = vcombine.low %v5723_v60, %v8243_v12  ;;  %v8259_v45 = vrot.slane %v1615_v25, 5  ;;  %v8265_v43 = vld [vmem:[%s7328_s11 + $0x88] sm:$0xf]  ;;  %v629_v46 = vld [vmem:[%s7328_s11 + $0x3c] sm:$0xe] }
  0xb8   : > { %v5854_v10 = vcombine.low %v708_v31, %v711_v57  ;;  %v3206_v2 = vsel %vm2141_vm0, %v3156_v28, 0  ;;  %9328 = vst [vmem:[#allocation19_spill] sm:$0xff] %v8265_v43  ;;  %v8267_v18 = vrot.slane %v1636_v33, 4  ;;  %v8269_v40 = vrot.slane %v1639_v16, 5  ;;  %v7084_v28 = vld [vmem:[%s7328_s11 + $0x34] sm:$0xf] }
  0xb9   : > { %v715_v44 = vsel %vm7661_vm7, %v5614_v47, %v714_v38  ;;  %v1660_v25 = vshrl.u32 %v5723_v60, 16  ;;  %6620 = vmatprep.mubr.msk.bf16.mxu0 %vm2092_vm1, %v5990_v55  ;;  %v1663_v8 = vshll.u32 %v5723_v60, 16  ;;  %v5615_v31 = vrot.slane %v628_v5, 9  ;;  %v7085_v55 = vld [vmem:[%s7328_s11 + $0x40] sm:$0xf] }
  0xba   : > { %6469 = vmatmul.mubr.msk.bf16.vlgmr.msra.gmra.mrb[0].mxu1 %vm2092_vm1, %v5853_v4  ;;  %v721_v57 = vrot.slane %v7084_v28, 5  ;;  %v724_v33 = vrot.slane %v7865_v48, 5  ;;  %v718_v38 = vsel %vm7661_vm7, %v716_v6, %v717_v42  ;;  %v1684_v16 = vshrl.u32 %v5725_v37, 16  ;;  %v7086_v42 = vld [vmem:[%s9228_s1 + $0x8] sm:$0x3] }
  0xbb   : > { %6472 = vmatprep.mubr.msk.bf16.mxu1 %vm2092_vm1, %v5854_v10  ;;  %6501 = vmatpush3.bf16.msra.mxu1 %v3206_v2  ;;  %v1687_v47 = vshll.u32 %v5725_v37, 16  ;;  %v728_v26 = vrot.slane %v7085_v55, 5  ;;  %v5991_v60 = vcombine.low %v5725_v37, %v8265_v43  ;;  %v5616_v5 = vrot.slane %v629_v46, 9  ;;  %v630_v13 = vld [vmem:[%s7328_s11 + $0x48] sm:$0xe] }
  0xbc   : > { %v722_v48 = vsel %vm7661_vm7, %v5615_v31, %v721_v57  ;;  %v723_v4 = vrot.slane %v721_v57, 4  ;;  %6967 = vmatprep.subr.msk.bf16.mxu1 %vm2141_vm0, %v7086_v42  ;;  %v8293_v6 = vrot.slane %v1660_v25, 4  ;;  %v731_v28 = vrot.slane %v7873_v63, 5  ;;  %v5729_v57 = vld [vmem:[%s7328_s11 + $0x9c] sm:$0xf] }
  0xbd   : > { %v730_v2 = vrot.slane %v728_v26, 4  ;;  %v5855_v37 = vcombine.low %v715_v44, %v718_v38  ;;  %v8297_v55 = vrot.slane %v1663_v8, 5  ;;  %v5992_v31 = vcombine.low %v5727_v62, %v8284_v59  ;;  %v7088_v25 = vld [vmem:[%s7328_s11 + $0x58] sm:$0xf]  ;;  %v632_v59 = vld [vmem:[%s7328_s11 + $0x60] sm:$0xe] }
  0xbe   : > { %9330 = vst [vmem:[#allocation20_spill] sm:$0xff] %v8293_v6  ;;  %v725_v46 = vsel %vm7661_vm7, %v723_v4, %v724_v33  ;;  %v1708_v10 = vshrl.u32 %v5727_v62, 16  ;;  %v1711_v12 = vshll.u32 %v5727_v62, 16  ;;  %v631_v6 = vld [vmem:[%s7328_s11 + $0x54] sm:$0xe]  ;;  %v8306_v63 = vrot.slane %v1684_v16, 4  ;;  %6621 = vmatmul.mubr.msk.bf16.gmra.mrb[16].mxu0 %vm2092_vm1, %v5991_v60 }
  0xbf   : > { %v5856_v42 = vcombine.low %v722_v48, %v725_v46  ;;  %v8308_v44 = vrot.slane %v1687_v47, 5  ;;  %v729_v8 = vsel %vm7661_vm7, %v5616_v5, %v728_v26  ;;  %v8314_v33 = vld [vmem:[%s7328_s11 + $0xa0] sm:$0xf]  ;;  %v1732_v38 = vshrl.u32 %v5729_v57, 16  ;;  %6624 = vmatprep.mubr.msk.bf16.mxu0 %vm2092_vm1, %v5992_v31  ;;  %v7087_v16 = vld [vmem:[%s7328_s11 + $0x4c] sm:$0xf] }
  0xc0   : > { %9332 = vst [vmem:[#allocation14_spill] sm:$0xff] %v8314_v33  ;;  %v732_v48 = vsel %vm7661_vm7, %v730_v2, %v731_v28  ;;  %v5617_v62 = vrot.slane %v630_v13, 9  ;;  %v735_v4 = vrot.slane %v7087_v16, 5  ;;  %v738_v47 = vrot.slane %v7907_v3, 5  ;;  %v5731_v46 = vld [vmem:[%s7328_s11 + $0xa8] sm:$0xf] }
  0xc1   : > { %9331 = vst [vmem:[#allocation21_spill] sm:$0xff] %v8308_v44  ;;  %v1735_v26 = vshll.u32 %v5729_v57, 16  ;;  %v5618_v5 = vrot.slane %v631_v6, 9  ;;  %v742_v43 = vrot.slane %v7088_v25, 5  ;;  %v8326_v44 = vld [vmem:[%s7328_s11 + $0xac] sm:$0xf]  ;;  %v5993_v31 = vcombine.low %v5729_v57, %v8314_v33 }
  0xc2   : > { %6473 = vmatmul.mubr.msk.bf16.gmra.mrb[4].mxu1 %vm2092_vm1, %v5855_v37  ;;  %v8329_v13 = vrot.slane %v1708_v10, 4  ;;  %v8331_v2 = vrot.slane %v1711_v12, 5  ;;  %v737_v3 = vrot.slane %v735_v4, 4  ;;  %v745_v28 = vrot.slane %v7923_v22, 5  ;;  %v5733_v60 = vld [vmem:[%s7328_s11 + $0xb4] sm:$0xf] }
  0xc3   : > { %6476 = vmatprep.mubr.msk.bf16.mxu1 %vm2092_vm1, %v5856_v42  ;;  %v5857_v37 = vcombine.low %v729_v8, %v732_v48  ;;  %v736_v6 = vsel %vm7661_vm7, %v5617_v62, %v735_v4  ;;  %v744_v25 = vrot.slane %v742_v43, 4  ;;  %v8337_v16 = vrot.slane %v1732_v38, 4  ;;  %v633_v48 = vld [vmem:[%s7328_s11 + $0x6c] sm:$0xe] }
  0xc4   : > { %v739_v10 = vsel %vm7661_vm7, %v737_v3, %v738_v47  ;;  %v1756_v42 = vshrl.u32 %v5731_v46, 16  ;;  %v5994_v12 = vcombine.low %v5731_v46, %v8326_v44  ;;  %v8344_v22 = vrot.slane %v1735_v26, 5  ;;  %v8355_v47 = vld [vmem:[%s7328_s11 + $0xb8] sm:$0xf] }
  0xc5   : > { %9333 = vst [vmem:[#allocation23_spill] sm:$0xff] %v8337_v16  ;;  %v8349_v8 = vsel %vm7661_vm7, %v5618_v5, %v742_v43  ;;  %v1759_v38 = vshll.u32 %v5731_v46, 16  ;;  %v5858_v62 = vcombine.low %v736_v6, %v739_v10  ;;  %v746_v4 = vsel %vm7661_vm7, %v744_v25, %v745_v28  ;;  %v7090_v43 = vld [vmem:[%s7328_s11 + $0x70] sm:$0xf]  ;;  %v8362_v46 = vld [vmem:[%s7328_s11 + $0xc0] sm:$0xf] }
  0xc6   : > { %9334 = vst [vmem:[#allocation16_spill] sm:$0xff] %v8344_v22  ;;  %v1780_v3 = vshrl.u32 %v5733_v60, 16  ;;  %v1783_v16 = vshll.u32 %v5733_v60, 16  ;;  %6625 = vmatmul.mubr.msk.bf16.gmra.mrb[20].mxu0 %vm2092_vm1, %v5993_v31  ;;  %v5619_v26 = vrot.slane %v632_v59, 9  ;;  %v7089_v22 = vld [vmem:[%s7328_s11 + $0x64] sm:$0xf] }
  0xc7   : > { %v749_v57 = vrot.slane %v7089_v22, 5  ;;  %v752_v33 = vrot.slane %v7953_v41, 5  ;;  %v756_v5 = vrot.slane %v7090_v43, 5  ;;  %v8364_v6 = vrot.slane %v1756_v42, 4  ;;  %6628 = vmatprep.mubr.msk.bf16.mxu0 %vm2092_vm1, %v5994_v12  ;;  %v8374_v43 = vld [vmem:[%s7328_s11 + $0xc4] sm:$0xf] }
  0xc8   : > { %v5620_v25 = vrot.slane %v633_v48, 9  ;;  %v1804_v31 = vshrl.u32 %v8362_v46, 16  ;;  %v8370_v59 = vrot.slane %v1759_v38, 5  ;;  %v759_v22 = vrot.slane %v7964_v14, 5  ;;  %9335 = vst [vmem:[#allocation22_spill] sm:$0xff] %v8374_v43 }
  0xc9   : > { %v751_v41 = vrot.slane %v749_v57, 4  ;;  %v758_v10 = vrot.slane %v756_v5, 4  ;;  %v5859_v42 = vcombine.low %v8349_v8, %v746_v4  ;;  %v8378_v12 = vrot.slane %v1780_v3, 4  ;;  %v634_v38 = vld [vmem:[%s7328_s11 + $0x78] sm:$0xe] }
  0xca   : > { %6477 = vmatmul.mubr.msk.bf16.gmra.mrb[8].mxu1 %vm2092_vm1, %v5857_v37  ;;  %v5995_v37 = vcombine.low %v5733_v60, %v8355_v47  ;;  %v8383_v28 = vrot.slane %v1783_v16, 5  ;;  %v750_v14 = vsel %vm7661_vm7, %v5619_v26, %v749_v57  ;;  %v635_v4 = vld [vmem:[%s7328_s11 + $0x84] sm:$0xe]  ;;  %v8393_v3 = vsel %vm7661_vm7, %v5620_v25, %v756_v5  ;;  %v7091_v26 = vld [vmem:[%s7328_s11 + $0x7c] sm:$0xf] }
  0xcb   : > { %6480 = vmatprep.mubr.msk.bf16.mxu1 %vm2092_vm1, %v5858_v62  ;;  %9336 = vst [vmem:[#allocation7_spill] sm:$0xff] %v8378_v12  ;;  %v753_v62 = vsel %vm7661_vm7, %v751_v41, %v752_v33  ;;  %v8395_v60 = vrot.slane %v1804_v31, 4  ;;  %v5996_v48 = vcombine.low %v8362_v46, %v8374_v43  ;;  %v8402_v57 = vsel %vm7661_vm7, %v758_v10, %v759_v22  ;;  %v8410_v25 = vld [vmem:[%s7328_s11 + $0xcc] sm:$0xf]  ;;  %v8417_v10 = vld [vmem:[%s7328_s11 + $0xd0] sm:$0xf] }
  0xcc   : > { %9337 = vst [vmem:[#allocation9_spill] sm:$0xff] %v8383_v28  ;;  %v5621_v33 = vrot.slane %v634_v38, 9  ;;  %v763_v41 = vrot.slane %v7091_v26, 5  ;;  %v766_v8 = vrot.slane %v7998_v54, 5  ;;  %v8407_v28 = vld [vmem:[%s7328_s11 + $0x20] sm:$0x1]  ;;  %v5860_v5 = vcombine.low %v750_v14, %v753_v62 }
  0xcd   : > { %9338 = vst [vmem:[#allocation8_spill] sm:$0xff] %v8395_v60  ;;  %9339 = vst [vmem:[#allocation10_spill] sm:$0xff] %v8407_v28  ;;  %v5622_v31 = vrot.slane %v635_v4, 9  ;;  %v7092_v60 = vld [vmem:[%s7328_s11 + $0x88] sm:$0xf]  ;;  %v1474_v43 = vor.u32 %v8106_v29, %v8104_v30  ;;  %v773_v54 = vrot.slane %v8013_v32, 5 }
  0xce   : > { %v770_v16 = vrot.slane %v7092_v60, 5  ;;  %6629 = vmatmul.mubr.msk.bf16.gmra.mrb[24].mxu0 %vm2092_vm1, %v5995_v37  ;;  %9340 = vst [vmem:[#allocation24_spill] sm:$0xff] %v8417_v10  ;;  %v765_v22 = vrot.slane %v763_v41, 4  ;;  %v1477_v38 = vshll.u32 %v8026_v34, 16  ;;  %v9341_v14 = vshrl.u32 %v8026_v34, 16 }
  0xcf   : > { %6632 = vmatprep.mubr.msk.bf16.mxu0 %vm2092_vm1, %v5996_v48  ;;  %v764_v4 = vsel %vm7661_vm7, %v5621_v33, %v763_v41  ;;  %v1475_v30 = vrot.slane %v1474_v43, 4  ;;  %v1487_v29 = vshll.u32 %v8407_v28, 16  ;;  %v8431_v26 = vld [vmem:[%s7328_s11 + $0x2c] sm:$0x1]  ;;  %v1498_v34 = vor.u32 %v8148_v51, %v8117_v19 }
  0xd0   : > { %v1483_v62 = vrot.slane %v9341_v14, 4  ;;  %v772_v60 = vrot.slane %v770_v16, 4  ;;  %v767_v32 = vsel %vm7661_vm7, %v765_v22, %v766_v8  ;;  %v1479_v37 = vrot.slane %v1477_v38, 5  ;;  %v636_v14 = vld [vmem:[%s7328_s11 + $0x90] sm:$0xe] }
  0xd1   : > { %v1501_v48 = vshll.u32 %v8055_v56, 16  ;;  %v5861_v43 = vcombine.low %v8393_v3, %v8402_v57  ;;  %v8444_v8 = vsel %vm7661_vm7, %v5622_v31, %v770_v16  ;;  %v9342_v33 = vshrl.u32 %v8055_v56, 16  ;;  %v7093_v31 = vld [vmem:[%s7328_s11 + $0x94] sm:$0xf] }
  0xd2   : > { %6481 = vmatmul.mubr.msk.bf16.gmra.mrb[12].mxu1 %vm2092_vm1, %v5859_v42  ;;  %v5997_v42 = vcombine.low %v8410_v25, %v8417_v10  ;;  %v5862_v19 = vcombine.low %v764_v4, %v767_v32  ;;  %v1484_v51 = vor.u32 %v1483_v62, %v1479_v37  ;;  %v1489_v22 = vrot.slane %v1487_v29, 5 }
  0xd3   : > { %6484 = vmatprep.mubr.msk.bf16.mxu1 %vm2092_vm1, %v5860_v5  ;;  %v1507_v41 = vrot.slane %v9342_v33, 4  ;;  %v1499_v38 = vrot.slane %v1498_v34, 4  ;;  %v637_v5 = vld [vmem:[%s7328_s11 + $0x9c] sm:$0xe]  ;;  %v8451_v28 = vsel %vm7661_vm7, %v772_v60, %v773_v54  ;;  %v1503_v3 = vrot.slane %v1501_v48, 5 }
  0xd4   : > { %v1511_v57 = vshll.u32 %v8431_v26, 16  ;;  %v5623_v12 = vrot.slane %v636_v14, 9  ;;  %v1480_v16 = vsel %vm7431_vm4, %v1475_v30, %v1479_v37  ;;  %v1485_v56 = vrot.slane %v1484_v51, 4  ;;  %v7094_v33 = vld [vmem:[%s7328_s11 + $0xa0] sm:$0xf] }
  0xd5   : > { %v777_v4 = vrot.slane %v7093_v31, 5  ;;  %v780_v62 = vrot.slane %v8064_v9, 5  ;;  %v1508_v29 = vor.u32 %v1507_v41, %v1503_v3  ;;  %v5624_v34 = vrot.slane %v637_v5, 9  ;;  %v8467_v48 = vld [vmem:[%s7328_s11 + $0x38] sm:$0x1] }
  0xd6   : > { %v1513_v32 = vrot.slane %v1511_v57, 5  ;;  %v784_v10 = vrot.slane %v7094_v33, 5  ;;  %6633 = vmatmul.mubr.msk.bf16.gmra.mrb[28].mxu0 %vm2092_vm1, %v5997_v42  ;;  %v1490_v54 = vsel %vm7431_vm4, %v1485_v56, %v1489_v22  ;;  %v1504_v60 = vsel %vm7431_vm4, %v1499_v38, %v1503_v3 }
  0xd7   : > { %v778_v30 = vsel %vm7661_vm7, %v5623_v12, %v777_v4  ;;  %v779_v37 = vrot.slane %v777_v4, 4  ;;  %v6014_v9 = vcombine.low %v1480_v16, %v1490_v54  ;;  %v1509_v14 = vrot.slane %v1508_v29, 4  ;;  %v638_v4 = vld [vmem:[%s7328_s11 + $0xa8] sm:$0xe] }
  0xd8   : > { %v786_v41 = vrot.slane %v784_v10, 4  ;;  %v787_v51 = vrot.slane %v8075_v20, 5  ;;  %v1522_v22 = vor.u32 %v8166_v17, %v8159_v53  ;;  %v1525_v38 = vshll.u32 %v8093_v36, 16  ;;  %v8488_v17 = vld [vmem:[%s7328_s11 + $0x44] sm:$0x1] }
  0xd9   : > { %v781_v42 = vsel %vm7661_vm7, %v779_v37, %v780_v62  ;;  %v9343_v12 = vshrl.u32 %v8093_v36, 16  ;;  %v5863_v3 = vcombine.low %v8444_v8, %v8451_v28  ;;  %6638 = vmatprep.mubr.msk.bf16.mxu0 %vm2092_vm1, %v6014_v9  ;;  %v1514_v20 = vsel %vm7431_vm4, %v1509_v14, %v1513_v32  ;;  %v7096_v9 = vld [vmem:[%s7328_s11 + $0xb8] sm:$0xf] }
  0xda   : > { %6485 = vmatmul.mubr.msk.bf16.gmra.mrb[16].mxu1 %vm2092_vm1, %v5861_v43  ;;  %v5015_v43 = vsel %vm2141_vm0, %v8102_v35, 0  ;;  %v1535_v53 = vshll.u32 %v8467_v48, 16  ;;  %v6015_v36 = vcombine.low %v1504_v60, %v1514_v20  ;;  %v1523_v28 = vrot.slane %v1522_v22, 4 }
  0xdb   : > { %v1531_v5 = vrot.slane %v9343_v12, 4  ;;  %6488 = vmatprep.mubr.msk.bf16.mxu1 %vm2092_vm1, %v5862_v19  ;;  %v8492_v19 = vsel %vm7661_vm7, %v5624_v34, %v784_v10  ;;  %v1527_v8 = vrot.slane %v1525_v38, 5  ;;  %v5864_v57 = vcombine.low %v778_v30, %v781_v42  ;;  %v639_v34 = vld [vmem:[%s7328_s11 + $0xb4] sm:$0xe] }
  0xdc   : > { %v1546_v16 = vor.u32 %v8189_v21, %v8187_v27  ;;  %v1549_v56 = vshll.u32 %v8115_v1, 16  ;;  %v9344_v35 = vshrl.u32 %v8115_v1, 16  ;;  %v788_v62 = vsel %vm7661_vm7, %v786_v41, %v787_v51  ;;  %v7095_v21 = vld [vmem:[%s7328_s11 + $0xac] sm:$0xf] }
  0xdd   : > { %v1532_v29 = vor.u32 %v1531_v5, %v1527_v8  ;;  %v1537_v10 = vrot.slane %v1535_v53, 5  ;;  %v1559_v32 = vshll.u32 %v8488_v17, 16  ;;  %v1528_v33 = vsel %vm7431_vm4, %v1523_v28, %v1527_v8 }
  0xde   : > { %v1555_v31 = vrot.slane %v9344_v35, 4  ;;  %v1547_v54 = vrot.slane %v1546_v16, 4  ;;  %v1551_v27 = vrot.slane %v1549_v56, 5  ;;  %v791_v60 = vrot.slane %v7095_v21, 5  ;;  %6639 = vmatmul.mubr.msk.bf16.vlgmr.msra.gmra.mrb[0].mxu0 %vm2092_vm1, %v6015_v36  ;;  %v8531_v35 = vld [vmem:[%s7328_s11 + $0x5c] sm:$0x1] }
  0xdf   : > { %v1533_v1 = vrot.slane %v1532_v29, 4  ;;  %v5625_v30 = vrot.slane %v638_v4, 9  ;;  %v794_v37 = vrot.slane %v8127_v24, 5  ;;  %v798_v14 = vrot.slane %v7096_v9, 5  ;;  %6671 = vmatpush3.bf16.msra.mxu0 %v5015_v43  ;;  %v8517_v24 = vld [vmem:[%s7328_s11 + $0x50] sm:$0x1] }
  0xe0   : > { %v1556_v41 = vor.u32 %v1555_v31, %v1551_v27  ;;  %v1561_v51 = vrot.slane %v1559_v32, 5  ;;  %v793_v42 = vrot.slane %v791_v60, 4  ;;  %v5626_v22 = vrot.slane %v639_v34, 9 }
  0xe1   : > { %v5865_v38 = vcombine.low %v8492_v19, %v788_v62  ;;  %v1538_v12 = vsel %vm7431_vm4, %v1533_v1, %v1537_v10  ;;  %v1552_v5 = vsel %vm7431_vm4, %v1547_v54, %v1551_v27  ;;  %v800_v20 = vrot.slane %v798_v14, 4  ;;  %v8551_v1 = vld [vmem:[%s7328_s11 + $0x68] sm:$0x1] }
  0xe2   : > { %6489 = vmatmul.mubr.msk.bf16.gmra.mrb[20].mxu1 %vm2092_vm1, %v5863_v3  ;;  %v6016_v43 = vcombine.low %v1528_v33, %v1538_v12  ;;  %v1557_v53 = vrot.slane %v1556_v41, 4  ;;  %v801_v36 = vrot.slane %v8138_v7, 5  ;;  %v1570_v3 = vor.u32 %v8207_v0, %v8196_v50 }
  0xe3   : > { %6492 = vmatprep.mubr.msk.bf16.mxu1 %vm2092_vm1, %v5864_v57  ;;  %v792_v19 = vsel %vm7661_vm7, %v5625_v30, %v791_v60  ;;  %v795_v28 = vsel %vm7661_vm7, %v793_v42, %v794_v37  ;;  %v1573_v8 = vshll.u32 %v8156_v52, 16  ;;  %v9345_v16 = vshrl.u32 %v8156_v52, 16 }
  0xe4   : > { %6642 = vmatprep.mubr.msk.bf16.mxu0 %vm2092_vm1, %v6016_v43  ;;  %v1562_v7 = vsel %vm7431_vm4, %v1557_v53, %v1561_v51  ;;  %v8538_v50 = vsel %vm7661_vm7, %v5626_v22, %v798_v14  ;;  %v1571_v0 = vrot.slane %v1570_v3, 4  ;;  %v1583_v57 = vshll.u32 %v8517_v24, 16 }
  0xe5   : > { %v1579_v56 = vrot.slane %v9345_v16, 4  ;;  %v6017_v31 = vcombine.low %v1552_v5, %v1562_v7  ;;  %v1575_v4 = vrot.slane %v1573_v8, 5  ;;  %v1594_v52 = vor.u32 %v8247_v49, %v8218_v39 }
  0xe6   : > { %v1597_v62 = vshll.u32 %v8170_v58, 16  ;;  %v5866_v29 = vcombine.low %v792_v19, %v795_v28  ;;  %v802_v10 = vsel %vm7661_vm7, %v800_v20, %v801_v36  ;;  %v9346_v32 = vshrl.u32 %v8170_v58, 16 }
  0xe7   : > { %v1607_v33 = vshll.u32 %v8531_v35, 16  ;;  %6643 = vmatmul.mubr.msk.bf16.gmra.mrb[4].mxu0 %vm2092_vm1, %v6017_v31  ;;  %v1580_v54 = vor.u32 %v1579_v56, %v1575_v4  ;;  %v1585_v27 = vrot.slane %v1583_v57, 5  ;;  %v1595_v21 = vrot.slane %v1594_v52, 4  ;;  %v8580_v56 = vld [vmem:[%s7328_s11 + $0x80] sm:$0x1] }
  0xe8   : > { %v1603_v34 = vrot.slane %v9346_v32, 4  ;;  %v1599_v60 = vrot.slane %v1597_v62, 5  ;;  %v1576_v39 = vsel %vm7431_vm4, %v1571_v0, %v1575_v4  ;;  %v1618_v30 = vor.u32 %v8259_v45, %v8249_v11  ;;  %v8566_v11 = vld [vmem:[%s7328_s11 + $0x74] sm:$0x1]  ;;  %v7097_v0 = vld [vmem:[%s7328_s11 + $0xc] sm:$0xf] }
  0xe9   : > { %v1609_v49 = vrot.slane %v1607_v33, 5  ;;  %v1621_v58 = vshll.u32 %v8204_v61, 16  ;;  %v1581_v37 = vrot.slane %v1580_v54, 4  ;;  %v9347_v41 = vshrl.u32 %v8204_v61, 16  ;;  %v9348_v61 = vld [vmem:[#allocation12_spill] sm:$0xff]  ;;  %v9351_v33 = vld [vmem:[#allocation18_spill] sm:$0xff] }
  0xea   : > { %6493 = vmatmul.mubr.msk.bf16.gmra.mrb[24].mxu1 %vm2092_vm1, %v5865_v38  ;;  %v1600_v9 = vsel %vm7431_vm4, %v1595_v21, %v1599_v60  ;;  %v1604_v14 = vor.u32 %v1603_v34, %v1599_v60  ;;  %v1619_v42 = vrot.slane %v1618_v30, 4  ;;  %v1631_v12 = vshll.u32 %v8551_v1, 16  ;;  %v7098_v57 = vld [vmem:[%s7328_s11 + $0x10] sm:$0xf] }
  0xeb   : > { %v1627_v51 = vrot.slane %v9347_v41, 4  ;;  %6496 = vmatprep.mubr.msk.bf16.mxu1 %vm2092_vm1, %v5866_v29  ;;  %v1623_v22 = vrot.slane %v1621_v58, 5  ;;  %v1642_v45 = vor.u32 %v8269_v40, %v8267_v18  ;;  %v1586_v38 = vsel %vm7431_vm4, %v1581_v37, %v1585_v27  ;;  %v9353_v58 = vld [vmem:[#allocation21_spill] sm:$0xff] }
  0xec   : > { %v1605_v5 = vrot.slane %v1604_v14, 4  ;;  %v1645_v20 = vshll.u32 %v9348_v61, 16  ;;  %v9349_v43 = vshrl.u32 %v9348_v61, 16  ;;  %v5867_v36 = vcombine.low %v8538_v50, %v802_v10  ;;  %v9350_v10 = vld [vmem:[#allocation20_spill] sm:$0xff]  ;;  %v7102_v61 = vld [vmem:[%s7328_s11 + $0x28] sm:$0xf] }
  0xed   : > { %v6018_v3 = vcombine.low %v1576_v39, %v1586_v38  ;;  %v1628_v19 = vor.u32 %v1627_v51, %v1623_v22  ;;  %v1633_v28 = vrot.slane %v1631_v12, 5  ;;  %v1643_v18 = vrot.slane %v1642_v45, 4  ;;  %v8599_v39 = vld [vmem:[%s7328_s11 + $0x8c] sm:$0x1]  ;;  %v9355_v51 = vld [vmem:[#allocation19_spill] sm:$0xff] }
  0xee   : > { %v1651_v53 = vrot.slane %v9349_v43, 4  ;;  %v1610_v8 = vsel %vm7431_vm4, %v1605_v5, %v1609_v49  ;;  %v1647_v40 = vrot.slane %v1645_v20, 5  ;;  %v1655_v16 = vshll.u32 %v8566_v11, 16  ;;  %v7099_v45 = vld [vmem:[%s7328_s11 + $0x18] sm:$0xf] }
  0xef   : > { %6646 = vmatprep.mubr.msk.bf16.mxu0 %vm2092_vm1, %v6018_v3  ;;  %v6019_v7 = vcombine.low %v1600_v9, %v1610_v8  ;;  %v5884_v31 = vcombine.low %v7097_v0, %v7098_v57  ;;  %v1624_v50 = vsel %vm7431_vm4, %v1619_v42, %v1623_v22  ;;  %v1629_v4 = vrot.slane %v1628_v19, 4  ;;  %v7100_v38 = vld [vmem:[%s7328_s11 + $0x1c] sm:$0xf] }
  0xf0   : > { %v1648_v52 = vsel %vm7431_vm4, %v1643_v18, %v1647_v40  ;;  %v1652_v62 = vor.u32 %v1651_v53, %v1647_v40  ;;  %v1657_v29 = vrot.slane %v1655_v16, 5  ;;  %v1666_v32 = vor.u32 %v8297_v55, %v9350_v10  ;;  %v9357_v16 = vld [vmem:[#allocation13_spill] sm:$0xff]  ;;  %v8632_v10 = vld [vmem:[%s7328_s11 + $0xa4] sm:$0x1] }
  0xf1   : > { %6647 = vmatmul.mubr.msk.bf16.gmra.mrb[8].mxu0 %vm2092_vm1, %v6019_v7  ;;  %v1634_v34 = vsel %vm7431_vm4, %v1629_v4, %v1633_v28  ;;  %v1669_v54 = vshll.u32 %v9351_v33, 16  ;;  %v9352_v27 = vshrl.u32 %v9351_v33, 16  ;;  %v1679_v60 = vshll.u32 %v8580_v56, 16  ;;  %v8621_v28 = vld [vmem:[%s7328_s11 + $0x98] sm:$0x1] }
  0xf2   : > { %6497 = vmatmul.mubr.msk.bf16.gmra.mrb[28].mxu1 %vm2092_vm1, %v5867_v36  ;;  %v6020_v55 = vcombine.low %v1624_v50, %v1634_v34  ;;  %v1653_v49 = vrot.slane %v1652_v62, 4  ;;  %v1667_v30 = vrot.slane %v1666_v32, 4  ;;  %v1690_v37 = vor.u32 %v9353_v58, %v8306_v63  ;;  %v9359_v32 = vld [vmem:[#allocation23_spill] sm:$0xff]  ;;  %v9360_v34 = vld [vmem:[#allocation16_spill] sm:$0xff] }
  0xf3   : > { %v1675_v21 = vrot.slane %v9352_v27, 4  ;;  %v9354_v9 = vshll.u32 %v8362_v46, 16  ;;  %6502 = vmatprep.mubr.msk.bf16.mxu1 %vm2092_vm1, %v5884_v31  ;;  %v1671_v41 = vrot.slane %v1669_v54, 5  ;;  %v1693_v42 = vshll.u32 %v9355_v51, 16  ;;  %v7101_v46 = vld [vmem:[%s7328_s11 + $0x24] sm:$0xf] }
  0xf4   : > { %v9356_v22 = vshrl.u32 %v9355_v51, 16  ;;  %v5885_v5 = vcombine.low %v7099_v45, %v7100_v38  ;;  %6650 = vmatprep.mubr.msk.bf16.mxu0 %vm2092_vm1, %v6020_v55  ;;  %v1658_v63 = vsel %vm7431_vm4, %v1653_v49, %v1657_v29  ;;  %v5886_v20 = vcombine.low %v7101_v46, %v7102_v61  ;;  %v9361_v54 = vld [vmem:[#allocation14_spill] sm:$0xff] }
  0xf5   : > { %v8606_v14 = vrot.slane %v9354_v9, 5  ;;  %v1703_v43 = vshll.u32 %v8599_v39, 16  ;;  %v6021_v53 = vcombine.low %v1648_v52, %v1658_v63  ;;  %v1676_v36 = vor.u32 %v1675_v21, %v1671_v41  ;;  %v9363_v9 = vld [vmem:[#allocation6_spill] sm:$0xff] }
  0xf6   : > { %v1699_v12 = vrot.slane %v9356_v22, 4  ;;  %v1681_v3 = vrot.slane %v1679_v60, 5  ;;  %v1695_v19 = vrot.slane %v1693_v42, 5  ;;  %v1672_v8 = vsel %vm7431_vm4, %v1667_v30, %v1671_v41  ;;  %v8652_v22 = vld [vmem:[%s7328_s11 + $0xb0] sm:$0x1] }
  0xf7   : > { %v1691_v18 = vrot.slane %v1690_v37, 4  ;;  %v1714_v40 = vor.u32 %v8331_v2, %v8329_v13  ;;  %v1717_v7 = vshll.u32 %v9357_v16, 16  ;;  %v1677_v0 = vrot.slane %v1676_v36, 4  ;;  %v7104_v45 = vld [vmem:[%s7328_s11 + $0x34] sm:$0xf] }
  0xf8   : > { %v1700_v57 = vor.u32 %v1699_v12, %v1695_v19  ;;  %v1705_v31 = vrot.slane %v1703_v43, 5  ;;  %v9358_v50 = vshrl.u32 %v9357_v16, 16  ;;  %v1727_v29 = vshll.u32 %v8621_v28, 16  ;;  %v7103_v12 = vld [vmem:[%s7328_s11 + $0x30] sm:$0xf] }
  0xf9   : > { %v1715_v52 = vrot.slane %v1714_v40, 4  ;;  %v1719_v62 = vrot.slane %v1717_v7, 5  ;;  %v1738_v33 = vor.u32 %v9360_v34, %v9359_v32  ;;  %6651 = vmatmul.mubr.msk.bf16.gmra.mrb[12].mxu0 %vm2092_vm1, %v6021_v53  ;;  %v1682_v13 = vsel %vm7431_vm4, %v1677_v0, %v1681_v3  ;;  %v7105_v16 = vld [vmem:[%s7328_s11 + $0x3c] sm:$0xf]  ;;  %v7106_v7 = vld [vmem:[%s7328_s11 + $0x40] sm:$0xf] }
  0xfa   : > { %v1723_v4 = vrot.slane %v9358_v50, 4  ;;  %v1701_v2 = vrot.slane %v1700_v57, 4  ;;  %v1741_v27 = vshll.u32 %v9361_v54, 16  ;;  %v9362_v21 = vshrl.u32 %v9361_v54, 16  ;;  %6503 = vmatmul.mubr.msk.bf16.vlgmr.msra.gmra.mrb[0].mxu1 %vm2092_vm1, %v5885_v5  ;;  %v8671_v50 = vld [vmem:[%s7328_s11 + $0xbc] sm:$0x1] }
  0xfb   : > { %v6022_v55 = vcombine.low %v1672_v8, %v1682_v13  ;;  %v1696_v49 = vsel %vm7431_vm4, %v1691_v18, %v1695_v19  ;;  %v1729_v58 = vrot.slane %v1727_v29, 5  ;;  %v1828_v37 = vshrl.u32 %v8410_v25, 16  ;;  %6506 = vmatprep.mubr.msk.bf16.mxu1 %vm2092_vm1, %v5886_v20  ;;  %6705 = vmatpush3.bf16.msra.mxu1 %v9363_v9  ;;  %v9367_v34 = vld [vmem:[#allocation7_spill] sm:$0xff] }
  0xfc   : > { %v1747_v60 = vrot.slane %v9362_v21, 4  ;;  %v1724_v30 = vor.u32 %v1723_v4, %v1719_v62  ;;  %v1706_v41 = vsel %vm7431_vm4, %v1701_v2, %v1705_v31  ;;  %v1743_v51 = vrot.slane %v1741_v27, 5  ;;  %v7110_v9 = vld [vmem:[%s7328_s11 + $0x58] sm:$0xf] }
  0xfd   : > { %v1751_v42 = vshll.u32 %v8632_v10, 16  ;;  %v5887_v38 = vcombine.low %v7103_v12, %v7104_v45  ;;  %6654 = vmatprep.mubr.msk.bf16.mxu0 %vm2092_vm1, %v6022_v55  ;;  %v1720_v5 = vsel %vm7431_vm4, %v1715_v52, %v1719_v62  ;;  %v1739_v46 = vrot.slane %v1738_v33, 4  ;;  %v9366_v62 = vld [vmem:[#allocation24_spill] sm:$0xff]  ;;  %v9368_v33 = vld [vmem:[#allocation9_spill] sm:$0xff] }
  0xfe   : > { %v1725_v63 = vrot.slane %v1724_v30, 4  ;;  %v6023_v61 = vcombine.low %v1696_v49, %v1706_v41  ;;  %v1748_v20 = vor.u32 %v1747_v60, %v1743_v51  ;;  %v1762_v53 = vor.u32 %v8370_v59, %v8364_v6  ;;  %v7107_v55 = vld [vmem:[%s7328_s11 + $0x48] sm:$0xf]  ;;  %v7108_v49 = vld [vmem:[%s7328_s11 + $0x4c] sm:$0xf] }
  0xff   : > { %v1753_v43 = vrot.slane %v1751_v42, 5  ;;  %v1765_v3 = vshll.u32 %v8326_v44, 16  ;;  %v9364_v19 = vshrl.u32 %v8326_v44, 16  ;;  %v1775_v18 = vshll.u32 %v8652_v22, 16 }
 0x100   : > { %v1730_v36 = vsel %vm7431_vm4, %v1725_v63, %v1729_v58  ;;  %v1831_v40 = vshll.u32 %v8410_v25, 16  ;;  %v5888_v0 = vcombine.low %v7105_v16, %v7106_v7  ;;  %v1749_v31 = vrot.slane %v1748_v20, 4  ;;  %v7109_v58 = vld [vmem:[%s7328_s11 + $0x54] sm:$0xf] }
 0x101   : > { %v1771_v8 = vrot.slane %v9364_v19, 4  ;;  %v6024_v57 = vcombine.low %v1720_v5, %v1730_v36  ;;  %v1763_v6 = vrot.slane %v1762_v53, 4  ;;  %v1767_v59 = vrot.slane %v1765_v3, 5  ;;  %6655 = vmatmul.mubr.msk.bf16.gmra.mrb[16].mxu0 %vm2092_vm1, %v6023_v61  ;;  %v9369_v61 = vld [vmem:[#allocation8_spill] sm:$0xff]  ;;  %v8707_v3 = vld [vmem:[%s7328_s11 + $0x6c] sm:$0xf] }
 0x102   : > { %v1789_v4 = vshll.u32 %v8355_v47, 16  ;;  %v9365_v52 = vshrl.u32 %v8355_v47, 16  ;;  %v1841_v29 = vshrl.u32 %v9366_v62, 16  ;;  %v1744_v25 = vsel %vm7431_vm4, %v1739_v46, %v1743_v51  ;;  %6507 = vmatmul.mubr.msk.bf16.gmra.mrb[4].mxu1 %vm2092_vm1, %v5887_v38  ;;  %v8693_v51 = vld [vmem:[%s7328_s11 + $0x78] sm:$0xf]  ;;  %v9370_v19 = vld [vmem:[#allocation22_spill] sm:$0xff] }
 0x103   : > { %v1777_v32 = vrot.slane %v1775_v18, 5  ;;  %v1786_v13 = vor.u32 %v9368_v33, %v9367_v34  ;;  %6658 = vmatprep.mubr.msk.bf16.mxu0 %vm2092_vm1, %v6024_v57  ;;  %v1754_v47 = vsel %vm7431_vm4, %v1749_v31, %v1753_v43  ;;  %v1772_v2 = vor.u32 %v1771_v8, %v1767_v59  ;;  %6510 = vmatprep.mubr.msk.bf16.mxu1 %vm2092_vm1, %v5888_v0  ;;  %v8700_v46 = vld [vmem:[%s7328_s11 + $0xc8] sm:$0x1] }
 0x104   : > { %v1795_v44 = vrot.slane %v9365_v52, 4  ;;  %v1791_v54 = vrot.slane %v1789_v4, 5  ;;  %v1799_v27 = vshll.u32 %v8671_v50, 16  ;;  %v1830_v21 = vrot.slane %v1828_v37, 4 }
 0x105   : > { %v1833_v60 = vrot.slane %v1831_v40, 5  ;;  %v5889_v30 = vcombine.low %v7107_v55, %v7108_v49  ;;  %v5890_v41 = vcombine.low %v7109_v58, %v7110_v9  ;;  %v1768_v42 = vsel %vm7431_vm4, %v1763_v6, %v1767_v59  ;;  %v8715_v59 = vld [vmem:[%s7328_s11 + $0xd4] sm:$0x1]  ;;  %v5755_v58 = vld [vmem:[%s7328_s11 + $0x18] sm:$0xe] }
 0x106   : > { %v1773_v12 = vrot.slane %v1772_v2, 4  ;;  %v1796_v45 = vor.u32 %v1795_v44, %v1791_v54  ;;  %v1072_v37 = vshrl.u32 %v8693_v51, 16  ;;  %v6025_v38 = vcombine.low %v1744_v25, %v1754_v47  ;;  %v7111_v47 = vld [vmem:[%s7328_s11 + $0x60] sm:$0xf]  ;;  %v7112_v2 = vld [vmem:[%s7328_s11 + $0x64] sm:$0xf] }
 0x107   : > { %v1787_v5 = vrot.slane %v1786_v13, 4  ;;  %v1075_v63 = vshll.u32 %v8693_v51, 16  ;;  %v1810_v20 = vor.u32 %v8606_v14, %v9369_v61  ;;  %v1801_v36 = vrot.slane %v1799_v27, 5 }
 0x108   : > { %v1778_v43 = vsel %vm7431_vm4, %v1773_v12, %v1777_v32  ;;  %v1797_v53 = vrot.slane %v1796_v45, 4  ;;  %v1813_v8 = vshll.u32 %v9370_v19, 16  ;;  %v1048_v40 = vshrl.u32 %v8707_v3, 16  ;;  %v8743_v45 = vld [vmem:[%s7328_s11 + $0x84] sm:$0xf] }
 0x109   : > { %v6026_v18 = vcombine.low %v1768_v42, %v1778_v43  ;;  %v1074_v16 = vrot.slane %v1072_v37, 4  ;;  %v9371_v7 = vshrl.u32 %v9370_v19, 16  ;;  %v1077_v57 = vrot.slane %v1075_v63, 5  ;;  %6659 = vmatmul.mubr.msk.bf16.gmra.mrb[20].mxu0 %vm2092_vm1, %v6025_v38  ;;  %v8746_v37 = vld [vmem:[%s7328_s11 + $0x90] sm:$0xf] }
 0x10a   : > { %v1811_v31 = vrot.slane %v1810_v20, 4  ;;  %v1815_v14 = vrot.slane %v1813_v8, 5  ;;  %v1823_v6 = vshll.u32 %v8700_v46, 16  ;;  %v1051_v4 = vshll.u32 %v8707_v3, 16  ;;  %6511 = vmatmul.mubr.msk.bf16.gmra.mrb[8].mxu1 %vm2092_vm1, %v5889_v30  ;;  %v5756_v20 = vld [vmem:[%s7328_s11 + $0x24] sm:$0xe] }
 0x10b   : > { %v1819_v0 = vrot.slane %v9371_v7, 4  ;;  %v1834_v52 = vor.u32 %v1833_v60, %v1830_v21  ;;  %v1837_v44 = vshll.u32 %v9366_v62, 16  ;;  %v1843_v25 = vrot.slane %v1841_v29, 4  ;;  %6662 = vmatprep.mubr.msk.bf16.mxu0 %vm2092_vm1, %v6026_v18  ;;  %6514 = vmatprep.mubr.msk.bf16.mxu1 %vm2092_vm1, %v5890_v41  ;;  %v8733_v60 = vld [vmem:[%s7328_s11 + $0x70] sm:$0xf] }
 0x10c   : > { %v1792_v32 = vsel %vm7431_vm4, %v1787_v5, %v1791_v54  ;;  %v1802_v34 = vsel %vm7431_vm4, %v1797_v53, %v1801_v36  ;;  %v1825_v13 = vrot.slane %v1823_v6, 5  ;;  %v5891_v62 = vcombine.low %v7111_v47, %v7112_v2  ;;  %v7114_v8 = vld [vmem:[%s7328_s11 + $0x7c] sm:$0xf]  ;;  %v9372_v7 = vld [vmem:[#allocation10_spill] sm:$0xff] }
 0x10d   : > { %v1820_v33 = vor.u32 %v1819_v0, %v1815_v14  ;;  %v8729_v29 = vrot.slane %v1048_v40, 4  ;;  %v1839_v27 = vrot.slane %v1837_v44, 5  ;;  %v1847_v21 = vshll.u32 %v8715_v59, 16  ;;  %v7115_v40 = vld [vmem:[%s7328_s11 + $0x1c] sm:$0xf] }
 0x10e   : > { %v5892_v54 = vcombine.low %v8707_v3, %v8733_v60  ;;  %v1078_v55 = vor.u32 %v1077_v57, %v1074_v16  ;;  %v1816_v49 = vsel %vm7431_vm4, %v1811_v31, %v1815_v14  ;;  %v6027_v9 = vcombine.low %v1792_v32, %v1802_v34  ;;  %v8764_v31 = vld [vmem:[%s7328_s11 + $0x88] sm:$0xf]  ;;  %v8778_v34 = vld [vmem:[%s7328_s11 + $0x9c] sm:$0xf] }
 0x10f   : > { %v1821_v30 = vrot.slane %v1820_v33, 4  ;;  %v8740_v41 = vrot.slane %v1051_v4, 5  ;;  %v1835_v42 = vrot.slane %v1834_v52, 4  ;;  %v1844_v12 = vor.u32 %v1843_v25, %v1839_v27  ;;  %v7117_v4 = vld [vmem:[%s7328_s11 + $0x28] sm:$0xf] }
 0x110   : > { %v1849_v5 = vrot.slane %v1847_v21, 5  ;;  %v1096_v63 = vshrl.u32 %v8743_v45, 16  ;;  %v1099_v61 = vshll.u32 %v8743_v45, 16  ;;  %v1120_v36 = vshrl.u32 %v8746_v37, 16  ;;  %v8789_v21 = vld [vmem:[%s7328_s11 + $0x94] sm:$0xf] }
 0x111   : > { %v1826_v38 = vsel %vm7431_vm4, %v1821_v30, %v1825_v13  ;;  %v1845_v53 = vrot.slane %v1844_v12, 4  ;;  %v5771_v3 = vrot.slane %v5755_v58, 9  ;;  %v8754_v19 = vrot.slane %v1078_v55, 4  ;;  %6663 = vmatmul.mubr.msk.bf16.gmra.mrb[24].mxu0 %vm2092_vm1, %v6027_v9  ;;  %v8797_v30 = vld [vmem:[%s7328_s11 + $0xa8] sm:$0xf] }
 0x112   : > { %v6028_v43 = vcombine.low %v1816_v49, %v1826_v38  ;;  %v5893_v18 = vcombine.low %v8693_v51, %v7114_v8  ;;  %v1917_v16 = vrot.slane %v7115_v40, 5  ;;  %v1920_v0 = vrot.slane %v9372_v7, 5  ;;  %6515 = vmatmul.mubr.msk.bf16.gmra.mrb[12].mxu1 %vm2092_vm1, %v5891_v62  ;;  %v5757_v62 = vld [vmem:[%s7328_s11 + $0x30] sm:$0xe]  ;;  %v5758_v58 = vld [vmem:[%s7328_s11 + $0x3c] sm:$0xe] }
 0x113   : > { %v1840_v57 = vsel %vm7431_vm4, %v1835_v42, %v1839_v27  ;;  %v5894_v14 = vcombine.low %v8743_v45, %v8764_v31  ;;  %v5772_v6 = vrot.slane %v5756_v20, 9  ;;  %v1924_v51 = vrot.slane %v7117_v4, 5  ;;  %6518 = vmatprep.mubr.msk.bf16.mxu1 %vm2092_vm1, %v5892_v54  ;;  %v8813_v8 = vld [vmem:[%s7328_s11 + $0xb4] sm:$0xf] }
 0x114   : > { %6666 = vmatprep.mubr.msk.bf16.mxu0 %vm2092_vm1, %v6028_v43  ;;  %v1850_v52 = vsel %vm7431_vm4, %v1845_v53, %v1849_v5  ;;  %v8773_v44 = vrot.slane %v1096_v63, 4  ;;  %v8775_v25 = vrot.slane %v1099_v61, 5  ;;  %v1919_v32 = vrot.slane %v1917_v16, 4  ;;  %v7119_v63 = vld [vmem:[%s7328_s11 + $0x34] sm:$0xf] }
 0x115   : > { %v8781_v33 = vrot.slane %v1120_v36, 4  ;;  %v1918_v13 = vsel %vm7661_vm7, %v5771_v3, %v1917_v16  ;;  %v1926_v47 = vrot.slane %v1924_v51, 4  ;;  %v1927_v2 = vrot.slane %v8431_v26, 5  ;;  %v7120_v36 = vld [vmem:[%s7328_s11 + $0x40] sm:$0xf] }
 0x116   : > { %v1123_v27 = vshll.u32 %v8746_v37, 16  ;;  %v5895_v55 = vcombine.low %v8746_v37, %v8789_v21  ;;  %v1921_v54 = vsel %vm7661_vm7, %v1919_v32, %v1920_v0  ;;  %v1144_v49 = vshrl.u32 %v8778_v34, 16 }
 0x117   : > { %v6029_v26 = vcombine.low %v1840_v57, %v1850_v52  ;;  %v8802_v9 = vsel %vm7661_vm7, %v5772_v6, %v1924_v51  ;;  %v1147_v42 = vshll.u32 %v8778_v34, 16  ;;  %v1168_v12 = vshrl.u32 %v8797_v30, 16  ;;  %v8822_v57 = vld [vmem:[%s7328_s11 + $0xa0] sm:$0xf]  ;;  %v8827_v6 = vld [vmem:[%s7328_s11 + $0xac] sm:$0xf] }
 0x118   : > { %v6047_v45 = vcombine.low %v1918_v13, %v1921_v54  ;;  %v1171_v38 = vshll.u32 %v8797_v30, 16  ;;  %v5773_v5 = vrot.slane %v5757_v62, 9  ;;  %v1931_v61 = vrot.slane %v7119_v63, 5  ;;  %v5759_v62 = vld [vmem:[%s7328_s11 + $0x48] sm:$0xe] }
 0x119   : > { %v1928_v20 = vsel %vm7661_vm7, %v1926_v47, %v1927_v2  ;;  %v1934_v43 = vrot.slane %v8467_v48, 5  ;;  %v5774_v53 = vrot.slane %v5758_v58, 9  ;;  %v1938_v3 = vrot.slane %v7120_v36, 5  ;;  %6667 = vmatmul.mubr.msk.bf16.gmra.mrb[28].mxu0 %vm2092_vm1, %v6029_v26  ;;  %v8842_v2 = vld [vmem:[%s7328_s11 + $0xc0] sm:$0xf] }
 0x11a   : > { %v8815_v40 = vrot.slane %v1123_v27, 5  ;;  %v8817_v16 = vrot.slane %v1144_v49, 4  ;;  %v1933_v7 = vrot.slane %v1931_v61, 4  ;;  %v1192_v0 = vshrl.u32 %v8813_v8, 16  ;;  %6519 = vmatmul.mubr.msk.bf16.gmra.mrb[16].mxu1 %vm2092_vm1, %v5893_v18  ;;  %6672 = vmatprep.mubr.msk.bf16.mxu0 %vm2092_vm1, %v6047_v45  ;;  %v5760_v49 = vld [vmem:[%s7328_s11 + $0x54] sm:$0xe] }
 0x11b   : > { %v5896_v48 = vcombine.low %v8778_v34, %v8822_v57  ;;  %v5897_v4 = vcombine.low %v8797_v30, %v8827_v6  ;;  %v1940_v51 = vrot.slane %v1938_v3, 4  ;;  %v1941_v52 = vrot.slane %v8488_v17, 5  ;;  %6522 = vmatprep.mubr.msk.bf16.mxu1 %vm2092_vm1, %v5894_v14  ;;  %v8859_v26 = vld [vmem:[%s7328_s11 + $0xb8] sm:$0xf] }
 0x11c   : > { %v6048_v32 = vcombine.low %v8802_v9, %v1928_v20  ;;  %v8835_v13 = vrot.slane %v1147_v42, 5  ;;  %v1932_v34 = vsel %vm7661_vm7, %v5773_v5, %v1931_v61  ;;  %v1935_v47 = vsel %vm7661_vm7, %v1933_v7, %v1934_v43  ;;  %v7124_v42 = vld [vmem:[%s7328_s11 + $0x4c] sm:$0xf]  ;;  %v7125_v63 = vld [vmem:[%s7328_s11 + $0x58] sm:$0xf] }
 0x11d   : > { %v8846_v17 = vrot.slane %v1168_v12, 4  ;;  %v8848_v18 = vrot.slane %v1171_v38, 5  ;;  %v8852_v27 = vsel %vm7661_vm7, %v5774_v53, %v1938_v3  ;;  %v1195_v54 = vshll.u32 %v8813_v8, 16 }
 0x11e   : > { %v8856_v58 = vrot.slane %v1192_v0, 4  ;;  %v5898_v9 = vcombine.low %v8813_v8, %v8859_v26  ;;  %v1216_v14 = vshrl.u32 %v8842_v2, 16  ;;  %v1945_v12 = vrot.slane %v7124_v42, 5  ;;  %v9373_v42 = vld [vmem:[#allocation11_spill] sm:$0xff] }
 0x11f   : > { %v6049_v45 = vcombine.low %v1932_v34, %v1935_v47  ;;  %v1942_v38 = vsel %vm7661_vm7, %v1940_v51, %v1941_v52  ;;  %v5775_v5 = vrot.slane %v5759_v62, 9  ;;  %v1952_v61 = vrot.slane %v7125_v63, 5  ;;  %v7128_v63 = vld [vmem:[%s7328_s11 + $0x64] sm:$0xf]  ;;  %v7132_v8 = vld [vmem:[%s7328_s11 + $0x98] sm:$0x1] }
 0x120   : > { %v1947_v20 = vrot.slane %v1945_v12, 4  ;;  %v1948_v43 = vrot.slane %v8517_v24, 5  ;;  %v5776_v53 = vrot.slane %v5760_v49, 9  ;;  %v1057_v36 = vshll.u32 %v8733_v60, 16  ;;  %v7127_v49 = vld [vmem:[%s7328_s11 + $0x74] sm:$0x1] }
 0x121   : > { %v1954_v3 = vrot.slane %v1952_v61, 4  ;;  %v1955_v7 = vrot.slane %v8531_v35, 5  ;;  %v1054_v0 = vor.u32 %v8740_v41, %v8729_v29  ;;  %v1061_v34 = vshrl.u32 %v8733_v60, 16  ;;  %6673 = vmatmul.mubr.msk.bf16.vlgmr.msra.gmra.mrb[0].mxu0 %vm2092_vm1, %v6048_v32  ;;  %v8884_v35 = vld [vmem:[%s7328_s11 + $0xc4] sm:$0xf] }
 0x122   : > { %v8874_v51 = vrot.slane %v1195_v54, 5  ;;  %v8876_v52 = vrot.slane %v1216_v14, 4  ;;  %v1219_v47 = vshll.u32 %v8842_v2, 16  ;;  %v8879_v24 = vrot.slane %v1057_v36, 5  ;;  %v5761_v54 = vld [vmem:[%s7328_s11 + $0x60] sm:$0xe]  ;;  %6523 = vmatmul.mubr.msk.bf16.gmra.mrb[20].mxu1 %vm2092_vm1, %v5895_v55  ;;  %6676 = vmatprep.mubr.msk.bf16.mxu0 %vm2092_vm1, %v6049_v45 }
 0x123   : > { %v6050_v62 = vcombine.low %v8852_v27, %v1942_v38  ;;  %v5899_v29 = vcombine.low %v8842_v2, %v8884_v35  ;;  %v1946_v60 = vsel %vm7661_vm7, %v5775_v5, %v1945_v12  ;;  %v1063_v41 = vrot.slane %v1061_v34, 4  ;;  %v9374_v12 = vld [vmem:[#allocation15_spill] sm:$0xff]  ;;  %v5762_v5 = vld [vmem:[%s7328_s11 + $0x6c] sm:$0xe]  ;;  %6526 = vmatprep.mubr.msk.bf16.mxu1 %vm2092_vm1, %v5896_v48  ;;  %v7129_v48 = vld [vmem:[%s7328_s11 + $0x70] sm:$0xf] }
 0x124   : > { %v1949_v32 = vsel %vm7661_vm7, %v1947_v20, %v1948_v43  ;;  %v8900_v27 = vsel %vm7661_vm7, %v5776_v53, %v1952_v61  ;;  %v1067_v14 = vshll.u32 %v7127_v49, 16  ;;  %v1088_v38 = vor.u32 %v9374_v12, %v9373_v42 }
 0x125   : > { %v8909_v37 = vsel %vm7661_vm7, %v1954_v3, %v1955_v7  ;;  %v1055_v55 = vrot.slane %v1054_v0, 4  ;;  %v1064_v45 = vor.u32 %v1063_v41, %v8879_v24  ;;  %v1959_v20 = vrot.slane %v7128_v63, 5 }
 0x126   : > { %v8913_v61 = vrot.slane %v1219_v47, 5  ;;  %v1084_v43 = vsel %vm7431_vm4, %v8754_v19, %v9373_v42  ;;  %v1089_v53 = vrot.slane %v1088_v38, 4  ;;  %v5777_v36 = vrot.slane %v5761_v54, 9 }
 0x127   : > { %v5778_v34 = vrot.slane %v5762_v5, 9  ;;  %v1966_v49 = vrot.slane %v7129_v48, 5  ;;  %v1102_v3 = vor.u32 %v8775_v25, %v8773_v44  ;;  %v1105_v7 = vshll.u32 %v8764_v31, 16  ;;  %v9375_v44 = vld [vmem:[#allocation17_spill] sm:$0xff] }
 0x128   : > { %v6051_v0 = vcombine.low %v1946_v60, %v1949_v32  ;;  %v6052_v47 = vcombine.low %v8900_v27, %v8909_v37  ;;  %v1065_v41 = vrot.slane %v1064_v45, 4  ;;  %v1069_v12 = vrot.slane %v1067_v14, 5  ;;  %v5763_v37 = vld [vmem:[%s7328_s11 + $0x78] sm:$0xe] }
 0x129   : > { %v1060_v19 = vsel %vm7431_vm4, %v1055_v55, %v8879_v24  ;;  %v1961_v54 = vrot.slane %v1959_v20, 4  ;;  %v1962_v42 = vrot.slane %v8551_v1, 5  ;;  %v1969_v38 = vrot.slane %v8566_v11, 5  ;;  %6677 = vmatmul.mubr.msk.bf16.gmra.mrb[4].mxu0 %vm2092_vm1, %v6050_v62  ;;  %v7130_v11 = vld [vmem:[%s7328_s11 + $0x8c] sm:$0x1] }
 0x12a   : > { %v1094_v25 = vsel %vm7431_vm4, %v1089_v53, %v9375_v44  ;;  %v1960_v60 = vsel %vm7661_vm7, %v5777_v36, %v1959_v20  ;;  %v1107_v32 = vrot.slane %v1105_v7, 5  ;;  %v1109_v27 = vshrl.u32 %v8764_v31, 16  ;;  %6527 = vmatmul.mubr.msk.bf16.gmra.mrb[24].mxu1 %vm2092_vm1, %v5897_v4  ;;  %6680 = vmatprep.mubr.msk.bf16.mxu0 %vm2092_vm1, %v6051_v0  ;;  %v7131_v20 = vld [vmem:[%s7328_s11 + $0x7c] sm:$0xf] }
 0x12b   : > { %v8939_v24 = vsel %vm7661_vm7, %v5778_v34, %v1966_v49  ;;  %v1968_v1 = vrot.slane %v1966_v49, 4  ;;  %v1103_v14 = vrot.slane %v1102_v3, 4  ;;  %v1115_v5 = vshll.u32 %v7130_v11, 16  ;;  %6530 = vmatprep.mubr.msk.bf16.mxu1 %vm2092_vm1, %v5898_v9 }
 0x12c   : > { %v1070_v31 = vsel %vm7431_vm4, %v1065_v41, %v1069_v12  ;;  %v1111_v62 = vrot.slane %v1109_v27, 4  ;;  %v1129_v55 = vshll.u32 %v8789_v21, 16  ;;  %v1133_v45 = vshrl.u32 %v8789_v21, 16 }
 0x12d   : > { %v8956_v30 = vcombine.low %v1084_v43, %v1094_v25  ;;  %v1963_v4 = vsel %vm7661_vm7, %v1961_v54, %v1962_v42  ;;  %v1126_v63 = vor.u32 %v8815_v40, %v8781_v33  ;;  %v1973_v53 = vrot.slane %v7131_v20, 5  ;;  %v5764_v43 = vld [vmem:[%s7328_s11 + $0x84] sm:$0xe]  ;;  %v7133_v54 = vld [vmem:[%s7328_s11 + $0x88] sm:$0xf] }
 0x12e   : > { %v1112_v36 = vor.u32 %v1111_v62, %v1107_v32  ;;  %v1131_v34 = vrot.slane %v1129_v55, 5  ;;  %v1135_v21 = vrot.slane %v1133_v45, 4  ;;  %v5779_v48 = vrot.slane %v5763_v37, 9  ;;  %v7134_v55 = vld [vmem:[%s7328_s11 + $0xa4] sm:$0x1] }
 0x12f   : > { %v1117_v49 = vrot.slane %v1115_v5, 5  ;;  %v1139_v3 = vshll.u32 %v7132_v8, 16  ;;  %v1975_v7 = vrot.slane %v1973_v53, 4  ;;  %v1976_v9 = vrot.slane %v8580_v56, 5  ;;  %v5765_v45 = vld [vmem:[%s7328_s11 + $0x90] sm:$0xe] }
 0x130   : > { %v6053_v0 = vcombine.low %v1960_v60, %v1963_v4  ;;  %v1113_v41 = vrot.slane %v1112_v36, 4  ;;  %v1136_v12 = vor.u32 %v1135_v21, %v1131_v34  ;;  %v1980_v42 = vrot.slane %v7133_v54, 5  ;;  %v7135_v21 = vld [vmem:[%s7328_s11 + $0x94] sm:$0xf]  ;;  %v7136_v8 = vld [vmem:[%s7328_s11 + $0xb0] sm:$0x1] }
 0x131   : > { %v5925_v33 = vcombine.low %v1060_v19, %v1070_v31  ;;  %v1970_v40 = vsel %vm7661_vm7, %v1968_v1, %v1969_v38  ;;  %v1127_v44 = vrot.slane %v1126_v63, 4  ;;  %v1153_v25 = vshll.u32 %v8822_v57, 16  ;;  %6681 = vmatmul.mubr.msk.bf16.gmra.mrb[8].mxu0 %vm2092_vm1, %v6052_v47 }
 0x132   : > { %v1108_v27 = vsel %vm7431_vm4, %v1103_v14, %v1107_v32  ;;  %v1974_v11 = vsel %vm7661_vm7, %v5779_v48, %v1973_v53  ;;  %v1977_v56 = vsel %vm7661_vm7, %v1975_v7, %v1976_v9  ;;  %v5780_v60 = vrot.slane %v5764_v43, 9  ;;  %6531 = vmatmul.mubr.msk.bf16.gmra.mrb[28].mxu1 %vm2092_vm1, %v5899_v29  ;;  %6684 = vmatprep.mubr.msk.bf16.mxu0 %vm2092_vm1, %v6053_v0 }
 0x133   : > { %v1118_v19 = vsel %vm7431_vm4, %v1113_v41, %v1117_v49  ;;  %v1137_v5 = vrot.slane %v1136_v12, 4  ;;  %v1141_v38 = vrot.slane %v1139_v3, 5  ;;  %v1150_v1 = vor.u32 %v8835_v13, %v8817_v16  ;;  %6552 = vmatprep.mubr.msk.bf16.mxu1 %vm2092_vm1, %v5925_v33  ;;  %v5766_v12 = vld [vmem:[%s7328_s11 + $0x9c] sm:$0xe] }
 0x134   : > { %v1982_v32 = vrot.slane %v1980_v42, 4  ;;  %v1983_v47 = vrot.slane %v8599_v39, 5  ;;  %v8987_v14 = vrot.slane %v1153_v25, 5  ;;  %v1157_v37 = vshrl.u32 %v8822_v57, 16 }
 0x135   : > { %v6054_v31 = vcombine.low %v8939_v24, %v1970_v40  ;;  %v1132_v16 = vsel %vm7431_vm4, %v1127_v44, %v1131_v34  ;;  %v6055_v13 = vcombine.low %v1974_v11, %v1977_v56  ;;  %v1177_v2 = vshll.u32 %v8827_v6, 16 }
 0x136   : > { %v5927_v29 = vcombine.low %v1108_v27, %v1118_v19  ;;  %v8997_v39 = vsel %vm7661_vm7, %v5780_v60, %v1980_v42  ;;  %v1159_v62 = vrot.slane %v1157_v37, 4  ;;  %v1163_v57 = vshll.u32 %v7134_v55, 16  ;;  %v7137_v42 = vld [vmem:[%s7328_s11 + $0xa0] sm:$0xf] }
 0x137   : > { %v1142_v24 = vsel %vm7431_vm4, %v1137_v5, %v1141_v38  ;;  %v1151_v4 = vrot.slane %v1150_v1, 4  ;;  %v9003_v63 = vrot.slane %v1177_v2, 5  ;;  %v1181_v20 = vshrl.u32 %v8827_v6, 16 }
 0x138   : > { %v1984_v53 = vsel %vm7661_vm7, %v1982_v32, %v1983_v47  ;;  %v1160_v36 = vor.u32 %v1159_v62, %v8987_v14  ;;  %v1174_v34 = vor.u32 %v8848_v18, %v8846_v17  ;;  %v1987_v48 = vrot.slane %v7135_v21, 5  ;;  %v5767_v47 = vld [vmem:[%s7328_s11 + $0xa8] sm:$0xe]  ;;  %v5768_v21 = vld [vmem:[%s7328_s11 + $0xb4] sm:$0xe] }
 0x139   : > { %v1183_v49 = vrot.slane %v1181_v20, 4  ;;  %v1187_v3 = vshll.u32 %v7136_v8, 16  ;;  %v5781_v7 = vrot.slane %v5765_v45, 9  ;;  %v1990_v9 = vrot.slane %v8621_v28, 5  ;;  %6685 = vmatmul.mubr.msk.bf16.gmra.mrb[12].mxu0 %vm2092_vm1, %v6054_v31 }
 0x13a   : > { %v5928_v43 = vcombine.low %v1132_v16, %v1142_v24  ;;  %v1161_v0 = vrot.slane %v1160_v36, 4  ;;  %v1165_v6 = vrot.slane %v1163_v57, 5  ;;  %v1989_v41 = vrot.slane %v1987_v48, 4  ;;  %6553 = vmatmul.mubr.msk.bf16.vlgmr.msra.gmra.mrb[16].mxu1 %vm2092_vm1, %v8956_v30  ;;  %6688 = vmatprep.mubr.msk.bf16.mxu0 %vm2092_vm1, %v6055_v13  ;;  %v7139_v57 = vld [vmem:[%s7328_s11 + $0xac] sm:$0xf] }
 0x13b   : > { %v6056_v54 = vcombine.low %v8997_v39, %v1984_v53  ;;  %v1156_v17 = vsel %vm7431_vm4, %v1151_v4, %v8987_v14  ;;  %v1184_v18 = vor.u32 %v1183_v49, %v9003_v63  ;;  %v1994_v33 = vrot.slane %v7137_v42, 5  ;;  %6556 = vmatprep.mubr.msk.bf16.mxu1 %vm2092_vm1, %v5927_v29  ;;  %v7140_v4 = vld [vmem:[%s7328_s11 + $0xc8] sm:$0x1] }
 0x13c   : > { %v1175_v28 = vrot.slane %v1174_v34, 4  ;;  %v1198_v40 = vor.u32 %v8874_v51, %v8856_v58  ;;  %v1201_v44 = vshll.u32 %v8859_v26, 16  ;;  %v1205_v25 = vshrl.u32 %v8859_v26, 16  ;;  %v7138_v26 = vld [vmem:[%s7328_s11 + $0xbc] sm:$0x1] }
 0x13d   : > { %v1189_v27 = vrot.slane %v1187_v3, 5  ;;  %v1988_v11 = vsel %vm7661_vm7, %v5781_v7, %v1987_v48  ;;  %v1991_v30 = vsel %vm7661_vm7, %v1989_v41, %v1990_v9  ;;  %v5782_v56 = vrot.slane %v5766_v12, 9  ;;  %v5769_v9 = vld [vmem:[%s7328_s11 + $0xc0] sm:$0xe] }
 0x13e   : > { %v1166_v60 = vsel %vm7431_vm4, %v1161_v0, %v1165_v6  ;;  %v1997_v58 = vrot.slane %v8632_v10, 5  ;;  %v1203_v51 = vrot.slane %v1201_v44, 5  ;;  %v1207_v19 = vrot.slane %v1205_v25, 4 }
 0x13f   : > { %v1185_v5 = vrot.slane %v1184_v18, 4  ;;  %v1996_v38 = vrot.slane %v1994_v33, 4  ;;  %v1211_v1 = vshll.u32 %v7138_v26, 16  ;;  %v1225_v32 = vshll.u32 %v8884_v35, 16 }
 0x140   : > { %v6057_v14 = vcombine.low %v1988_v11, %v1991_v30  ;;  %v1199_v37 = vrot.slane %v1198_v40, 4  ;;  %v1208_v31 = vor.u32 %v1207_v19, %v1203_v51  ;;  %v1229_v16 = vshrl.u32 %v8884_v35, 16  ;;  %v5770_v30 = vld [vmem:[%s7328_s11 + $0xcc] sm:$0xe] }
 0x141   : > { %v5929_v13 = vcombine.low %v1156_v17, %v1166_v60  ;;  %v1995_v10 = vsel %vm7661_vm7, %v5782_v56, %v1994_v33  ;;  %v1213_v2 = vrot.slane %v1211_v1, 5  ;;  %v1227_v29 = vrot.slane %v1225_v32, 5  ;;  %6689 = vmatmul.mubr.msk.bf16.gmra.mrb[16].mxu0 %vm2092_vm1, %v6056_v54  ;;  %v7143_v56 = vld [vmem:[%s7328_s11 + $0xd0] sm:$0xf] }
 0x142   : > { %v1209_v39 = vrot.slane %v1208_v31, 4  ;;  %v1231_v62 = vrot.slane %v1229_v16, 4  ;;  %v5783_v55 = vrot.slane %v5767_v47, 9  ;;  %v2001_v45 = vrot.slane %v7139_v57, 5  ;;  %6557 = vmatmul.mubr.msk.bf16.gmra.mrb[20].mxu1 %vm2092_vm1, %v5928_v43  ;;  %6692 = vmatprep.mubr.msk.bf16.mxu0 %vm2092_vm1, %v6057_v14  ;;  %v7142_v43 = vld [vmem:[%s7328_s11 + $0xc4] sm:$0xf] }
 0x143   : > { %v1998_v24 = vsel %vm7661_vm7, %v1996_v38, %v1997_v58  ;;  %v1222_v35 = vor.u32 %v8913_v61, %v8876_v52  ;;  %v1235_v20 = vshll.u32 %v7140_v4, 16  ;;  %v2004_v53 = vrot.slane %v8652_v22, 5  ;;  %6560 = vmatprep.mubr.msk.bf16.mxu1 %vm2092_vm1, %v5929_v13 }
 0x144   : > { %v1180_v36 = vsel %vm7431_vm4, %v1175_v28, %v9003_v63  ;;  %v1190_v34 = vsel %vm7431_vm4, %v1185_v5, %v1189_v27  ;;  %v1204_v52 = vsel %vm7431_vm4, %v1199_v37, %v1203_v51  ;;  %v2003_v61 = vrot.slane %v2001_v45, 4  ;;  %v7141_v63 = vld [vmem:[%s7328_s11 + $0xb8] sm:$0xf]  ;;  %s9120_s11 = scalar_lea.vmem [#allocation3], %s5609_s10 }
 0x145   : > { %v1214_v22 = vsel %vm7431_vm4, %v1209_v39, %v1213_v2  ;;  %v1232_v48 = vor.u32 %v1231_v62, %v1227_v29  ;;  %v2002_v49 = vsel %vm7661_vm7, %v5783_v55, %v2001_v45  ;;  %v2008_v8 = vrot.slane %v7141_v63, 5  ;;  %s5521_s19 = sshll.u32 %s9120_s11, 4  ;;  %s9175_s19 = int_to_ptr.vmem [resolvable:$true] %s5521_s19 }
 0x146   : > { %v6058_v3 = vcombine.low %v1995_v10, %v1998_v24  ;;  %v2005_v7 = vsel %vm7661_vm7, %v2003_v61, %v2004_v53  ;;  %v2015_v0 = vrot.slane %v7142_v43, 5  ;;  %v5930_v6 = vcombine.low %v1180_v36, %v1190_v34  ;;  %s7144_s27 = scalar_lea.vmem %s9175_s19, 2048  ;;  %p7151_p1 = scmp.lt.s32.totalorder %s9175_s19, %s7149_s29 }
 0x147   : > { %v1223_v41 = vrot.slane %v1222_v35, 4  ;;  %v1237_v12 = vrot.slane %v1235_v20, 5  ;;  %v5784_v54 = vrot.slane %v5768_v21, 9  ;;  %v5931_v17 = vcombine.low %v1204_v52, %v1214_v22  ;;  %v9111_v20 = vld [vmem:[%s9229_s2] ss:$0 sm:$0xff]  ;;  %p7145_p12 = scmp.ne.s32.totalorder %s9175_s19, %s7144_s27  ;;  %p7152_p2 = scmp.lt.s32.totalorder %s7150_s30, %s7144_s27 }
 0x148   : > { %v6059_v18 = vcombine.low %v2002_v49, %v2005_v7  ;;  %v2010_v42 = vrot.slane %v2008_v8, 4  ;;  %v2011_v33 = vrot.slane %v8671_v50, 5  ;;  %v1233_v28 = vrot.slane %v1232_v48, 4 }
 0x149   : > { %v5785_v40 = vrot.slane %v5769_v9, 9  ;;  %v2017_v44 = vrot.slane %v2015_v0, 4  ;;  %v2018_v25 = vrot.slane %v8700_v46, 5  ;;  %6693 = vmatmul.mubr.msk.bf16.gmra.mrb[20].mxu0 %vm2092_vm1, %v6058_v3  ;;  %v2009_v27 = vsel %vm7661_vm7, %v5784_v54, %v2008_v8  ;;  %p7146_p13 = pnand %p7145_p12, %p7287_p4  ;;  %p7153_p3 = por %p7152_p2, %p7151_p1 }
 0x14a   : > { %6561 = vmatmul.mubr.msk.bf16.gmra.mrb[24].mxu1 %vm2092_vm1, %v5930_v6  ;;  %6696 = vmatprep.mubr.msk.bf16.mxu0 %vm2092_vm1, %v6059_v18  ;;  %v2012_v11 = vsel %vm7661_vm7, %v2010_v42, %v2011_v33  ;;  %v2022_v50 = vrot.slane %v7143_v56, 5  ;;  %v1228_v46 = vsel %vm7431_vm4, %v1223_v41, %v1227_v29  ;;  %v1238_v60 = vsel %vm7431_vm4, %v1233_v28, %v1237_v12 }
 0x14b   : > { %6564 = vmatprep.mubr.msk.bf16.mxu1 %vm2092_vm1, %v5931_v17  ;;  %v2016_v58 = vsel %vm7661_vm7, %v5785_v40, %v2015_v0  ;;  %v2019_v51 = vsel %vm7661_vm7, %v2017_v44, %v2018_v25  ;;  %v6060_v19 = vcombine.low %v2009_v27, %v2012_v11  ;;  %v5786_v5 = vrot.slane %v5770_v30, 9  ;;  %p7147_p0 = pneg %p7146_p13 }
 0x14c   : > { %v5932_v38 = vcombine.low %v1228_v46, %v1238_v60  ;;  %v6061_v26 = vcombine.low %v2016_v58, %v2019_v51  ;;  %v2024_v1 = vrot.slane %v2022_v50, 4  ;;  %v2025_v32 = vrot.slane %v8715_v59, 5 }
 0x14d   : > { %v2023_v23 = vsel %vm7661_vm7, %v5786_v5, %v2022_v50  ;;  %p7154_p5 = pnand %p7153_p3, %p7147_p0 }
 0x14e   : > { %v2026_v47 = vsel %vm7661_vm7, %v2024_v1, %v2025_v32 }
 0x14f   : > { %v6062_v14 = vcombine.low %v2023_v23, %v2026_v47 }
 0x151   : > { %6697 = vmatmul.mubr.msk.bf16.gmra.mrb[24].mxu0 %vm2092_vm1, %v6060_v19 }
 0x152   : > { %6565 = vmatmul.mubr.msk.bf16.gmra.mrb[28].mxu1 %vm2092_vm1, %v5932_v38  ;;  %6700 = vmatprep.mubr.msk.bf16.mxu0 %vm2092_vm1, %v6061_v26 }
 0x159   : > { %6701 = vmatmul.mubr.msk.bf16.gmra.mrb[28].mxu0 %vm2092_vm1, %v6062_v14 }
 0x1cd   : > { %v6504_v37 = vpop.f32.mrb[0].mxu1 }
 0x1ce   : > { %v3242_v31 = vpop.f32.mrb[1].mxu1 }
 0x1cf   : > { %v6505_v16 = vpop.f32.mrb[2].mxu1 }
 0x1d0   : > { %v3245_v13 = vpop.f32.mrb[3].mxu1 }
 0x1d5   : > { %v6508_v59 = vpop.f32.mrb[4].mxu1 }
 0x1d6   : > { %v3258_v10 = vpop.f32.mrb[5].mxu1 }
 0x1d7   : > { %v6509_v2 = vpop.f32.mrb[6].mxu1 }
 0x1d8   : > { %v3261_v29 = vpop.f32.mrb[7].mxu1 }
 0x1dd   : > { %v6512_v39 = vpop.f32.mrb[8].mxu1 }
 0x1de   : > { %v3274_v62 = vpop.f32.mrb[9].mxu1 }
 0x1df   : > { %v6513_v55 = vpop.f32.mrb[10].mxu1 }
 0x1e0   : > { %v3277_v57 = vpop.f32.mrb[11].mxu1 }
 0x1e5   : > { %v9100_v45 = vpop.f32.mrb[12].mxu1 }
 0x1e6   : > { %v9102_v15 = vpop.f32.mrb[13].mxu1 }
 0x1e7   : > { %v9104_v24 = vpop.f32.mrb[14].mxu1 }
 0x1e8   : > { %v9106_v35 = vpop.f32.mrb[15].mxu1 }
 0x1f4   : > { %v6674_v4 = vpop.f32.mrb[0].mxu0 }
 0x1f5   : > { %v6706_v53 = vadd.f32 %v6674_v4, %v6504_v37  ;;  %v5051_v36 = vpop.f32.mrb[1].mxu0 }
 0x1f6   : > { %v6707_v34 = vadd.f32 %v5051_v36, %v3242_v31  ;;  %v6675_v52 = vpop.f32.mrb[2].mxu0 }
 0x1f7   : > { %v5283_v61 = vadd.f32 %v6706_v53, %v9111_v20  ;;  %v6708_v21 = vadd.f32 %v6675_v52, %v6505_v16  ;;  %v5054_v22 = vpop.f32.mrb[3].mxu0 }
 0x1f8   : > { %v5281_v48 = vadd.f32 %v6707_v34, %v9111_v20  ;;  %v6709_v49 = vadd.f32 %v5054_v22, %v3245_v13 }
 0x1f9   : > { %v5284_v63 = vadd.f32 %v6708_v21, %v9111_v20  ;;  %v5315_v3 = vmax.f32 %v5283_v61, 0.0 }
 0x1fa   : > { %v5282_v8 = vadd.f32 %v6709_v49, %v9111_v20  ;;  %v5313_v9 = vmax.f32 %v5281_v48, 0.0 }
 0x1fb   : > { %v5316_v7 = vmax.f32 %v5284_v63, 0.0 }
 0x1fc   : > { %v5314_v43 = vmax.f32 %v5282_v8, 0.0  ;;  %v6678_v0 = vpop.f32.mrb[4].mxu0 }
 0x1fd   : > { %v6158_v6 = vpack.c.bf16 %v5316_v7, %v5315_v3  ;;  %v6710_v41 = vadd.f32 %v6678_v0, %v6508_v59  ;;  %v5067_v12 = vpop.f32.mrb[5].mxu0 }
 0x1fe   : > { %v6153_v54 = vpack.c.bf16 %v5314_v43, %v5313_v9  ;;  %v6711_v17 = vadd.f32 %v5067_v12, %v3258_v10  ;;  %v6679_v18 = vpop.f32.mrb[6].mxu0 }
 0x1ff   : > { %6230 = vst [vmem:[%s9120_s11 + $0x8] sm:$0xff] %v6158_v6   ;;  %v5287_v42 = vadd.f32 %v6710_v41, %v9111_v20  ;;  %v6712_v33 = vadd.f32 %v6679_v18, %v6509_v2  ;;  %v5070_v28 = vpop.f32.mrb[7].mxu0 }
 0x200   : > { %6154 = vst [vmem:[%s9120_s11] sm:$0xff] %v6153_v54   ;;  %v5285_v40 = vadd.f32 %v6711_v17, %v9111_v20  ;;  %v6713_v44 = vadd.f32 %v5070_v28, %v3261_v29 }
 0x201   : > { %v5288_v25 = vadd.f32 %v6712_v33, %v9111_v20  ;;  %v5319_v11 = vmax.f32 %v5287_v42, 0.0 }
 0x202   : > { %v5286_v27 = vadd.f32 %v6713_v44, %v9111_v20  ;;  %v5317_v56 = vmax.f32 %v5285_v40, 0.0 }
 0x203   : > { %v5320_v30 = vmax.f32 %v5288_v25, 0.0 }
 0x204   : > { %v5318_v50 = vmax.f32 %v5286_v27, 0.0  ;;  %v6682_v46 = vpop.f32.mrb[8].mxu0 }
 0x205   : > { %v6168_v60 = vpack.c.bf16 %v5320_v30, %v5319_v11  ;;  %v6714_v58 = vadd.f32 %v6682_v46, %v6512_v39  ;;  %v5083_v51 = vpop.f32.mrb[9].mxu0 }
 0x206   : > { %v6163_v19 = vpack.c.bf16 %v5318_v50, %v5317_v56  ;;  %v6715_v5 = vadd.f32 %v5083_v51, %v3274_v62  ;;  %v6683_v38 = vpop.f32.mrb[10].mxu0 }
 0x207   : > { %6232 = vst [vmem:[%s9120_s11 + $0x18] sm:$0xff] %v6168_v60   ;;  %v5291_v26 = vadd.f32 %v6714_v58, %v9111_v20  ;;  %v6716_v1 = vadd.f32 %v6683_v38, %v6513_v55  ;;  %v5086_v32 = vpop.f32.mrb[11].mxu0 }
 0x208   : > { %6231 = vst [vmem:[%s9120_s11 + $0x10] sm:$0xff] %v6163_v19   ;;  %v5289_v23 = vadd.f32 %v6715_v5, %v9111_v20  ;;  %v6717_v47 = vadd.f32 %v5086_v32, %v3277_v57 }
 0x209   : > { %v5292_v14 = vadd.f32 %v6716_v1, %v9111_v20  ;;  %v5323_v31 = vmax.f32 %v5291_v26, 0.0 }
 0x20a   : > { %v5290_v37 = vadd.f32 %v6717_v47, %v9111_v20  ;;  %v5321_v13 = vmax.f32 %v5289_v23, 0.0 }
 0x20b   : > { %v5324_v16 = vmax.f32 %v5292_v14, 0.0 }
 0x20c   : > { %v5322_v59 = vmax.f32 %v5290_v37, 0.0  ;;  %v6686_v10 = vpop.f32.mrb[12].mxu0 }
 0x20d   : > { %v6178_v2 = vpack.c.bf16 %v5324_v16, %v5323_v31  ;;  %v6554_v29 = vpop.f32.mrb[16].mxu1  ;;  %v6718_v39 = vadd.f32 %v6686_v10, %v9100_v45  ;;  %v5099_v62 = vpop.f32.mrb[13].mxu0 }
 0x20e   : > { %v6173_v55 = vpack.c.bf16 %v5322_v59, %v5321_v13  ;;  %v3663_v4 = vpop.f32.mrb[17].mxu1  ;;  %v6719_v57 = vadd.f32 %v5099_v62, %v9102_v15  ;;  %v6687_v53 = vpop.f32.mrb[14].mxu0 }
 0x20f   : > { %6234 = vst [vmem:[%s9120_s11 + $0x28] sm:$0xff] %v6178_v2   ;;  %v5295_v36 = vadd.f32 %v6718_v39, %v9111_v20  ;;  %v6555_v34 = vpop.f32.mrb[18].mxu1  ;;  %v6720_v52 = vadd.f32 %v6687_v53, %v9104_v24  ;;  %v5102_v61 = vpop.f32.mrb[15].mxu0 }
 0x210   : > { %6233 = vst [vmem:[%s9120_s11 + $0x20] sm:$0xff] %v6173_v55   ;;  %v5293_v21 = vadd.f32 %v6719_v57, %v9111_v20  ;;  %v3666_v22 = vpop.f32.mrb[19].mxu1  ;;  %v6721_v48 = vadd.f32 %v5102_v61, %v9106_v35 }
 0x211   : > { %v5296_v45 = vadd.f32 %v6720_v52, %v9111_v20  ;;  %v5327_v15 = vmax.f32 %v5295_v36, 0.0 }
 0x212   : > { %v5294_v49 = vadd.f32 %v6721_v48, %v9111_v20  ;;  %v5325_v8 = vmax.f32 %v5293_v21, 0.0 }
 0x213   : > { %v5328_v63 = vmax.f32 %v5296_v45, 0.0 }
 0x214   : > { %v5326_v3 = vmax.f32 %v5294_v49, 0.0  ;;  %v6690_v7 = vpop.f32.mrb[16].mxu0 }
 0x215   : > { %v6188_v9 = vpack.c.bf16 %v5328_v63, %v5327_v15  ;;  %v6558_v24 = vpop.f32.mrb[20].mxu1  ;;  %v6722_v43 = vadd.f32 %v6690_v7, %v6554_v29  ;;  %v5115_v0 = vpop.f32.mrb[17].mxu0 }
 0x216   : > { %v6183_v6 = vpack.c.bf16 %v5326_v3, %v5325_v8  ;;  %v3679_v41 = vpop.f32.mrb[21].mxu1  ;;  %v6723_v12 = vadd.f32 %v5115_v0, %v3663_v4  ;;  %v6691_v54 = vpop.f32.mrb[18].mxu0 }
 0x217   : > { %6236 = vst [vmem:[%s9120_s11 + $0x38] sm:$0xff] %v6188_v9   ;;  %v5299_v35 = vadd.f32 %v6722_v43, %v9111_v20  ;;  %v6559_v17 = vpop.f32.mrb[22].mxu1  ;;  %v6724_v18 = vadd.f32 %v6691_v54, %v6555_v34  ;;  %v5118_v42 = vpop.f32.mrb[19].mxu0 }
 0x218   : > { %6235 = vst [vmem:[%s9120_s11 + $0x30] sm:$0xff] %v6183_v6   ;;  %v5297_v33 = vadd.f32 %v6723_v12, %v9111_v20  ;;  %v3682_v28 = vpop.f32.mrb[23].mxu1  ;;  %v6725_v40 = vadd.f32 %v5118_v42, %v3666_v22 }
 0x219   : > { %v5300_v44 = vadd.f32 %v6724_v18, %v9111_v20  ;;  %v5331_v27 = vmax.f32 %v5299_v35, 0.0 }
 0x21a   : > { %v5298_v25 = vadd.f32 %v6725_v40, %v9111_v20  ;;  %v5329_v30 = vmax.f32 %v5297_v33, 0.0 }
 0x21b   : > { %v5332_v11 = vmax.f32 %v5300_v44, 0.0 }
 0x21c   : > { %v5330_v56 = vmax.f32 %v5298_v25, 0.0  ;;  %v6694_v50 = vpop.f32.mrb[20].mxu0 }
 0x21d   : > { %v6198_v46 = vpack.c.bf16 %v5332_v11, %v5331_v27  ;;  %v6562_v60 = vpop.f32.mrb[24].mxu1  ;;  %v6726_v58 = vadd.f32 %v6694_v50, %v6558_v24  ;;  %v5131_v51 = vpop.f32.mrb[21].mxu0 }
 0x21e   : > { %v6193_v19 = vpack.c.bf16 %v5330_v56, %v5329_v30  ;;  %v3695_v5 = vpop.f32.mrb[25].mxu1  ;;  %v6727_v38 = vadd.f32 %v5131_v51, %v3679_v41  ;;  %v6695_v26 = vpop.f32.mrb[22].mxu0 }
 0x21f   : > { %6238 = vst [vmem:[%s9120_s11 + $0x48] sm:$0xff] %v6198_v46   ;;  %v5303_v1 = vadd.f32 %v6726_v58, %v9111_v20  ;;  %v6563_v32 = vpop.f32.mrb[26].mxu1  ;;  %v6728_v23 = vadd.f32 %v6695_v26, %v6559_v17  ;;  %v5134_v47 = vpop.f32.mrb[23].mxu0 }
 0x220   : > { %6237 = vst [vmem:[%s9120_s11 + $0x40] sm:$0xff] %v6193_v19   ;;  %v5301_v14 = vadd.f32 %v6727_v38, %v9111_v20  ;;  %v3698_v37 = vpop.f32.mrb[27].mxu1  ;;  %v6729_v31 = vadd.f32 %v5134_v47, %v3682_v28 }
 0x221   : > { %v5304_v16 = vadd.f32 %v6728_v23, %v9111_v20  ;;  %v5335_v59 = vmax.f32 %v5303_v1, 0.0 }
 0x222   : > { %v5302_v13 = vadd.f32 %v6729_v31, %v9111_v20  ;;  %v5333_v2 = vmax.f32 %v5301_v14, 0.0 }
 0x223   : > { %v5336_v10 = vmax.f32 %v5304_v16, 0.0 }
 0x224   : > { %v5334_v29 = vmax.f32 %v5302_v13, 0.0  ;;  %v6698_v39 = vpop.f32.mrb[24].mxu0 }
 0x225   : > { %v6208_v62 = vpack.c.bf16 %v5336_v10, %v5335_v59  ;;  %v6566_v55 = vpop.f32.mrb[28].mxu1  ;;  %v6730_v4 = vadd.f32 %v6698_v39, %v6562_v60  ;;  %v5147_v57 = vpop.f32.mrb[25].mxu0 }
 0x226   : > { %v6203_v53 = vpack.c.bf16 %v5334_v29, %v5333_v2  ;;  %v3711_v36 = vpop.f32.mrb[29].mxu1  ;;  %v6731_v34 = vadd.f32 %v5147_v57, %v3695_v5  ;;  %v6699_v52 = vpop.f32.mrb[26].mxu0 }
 0x227   : > { %6240 = vst [vmem:[%s9120_s11 + $0x58] sm:$0xff] %v6208_v62   ;;  %v5307_v61 = vadd.f32 %v6730_v4, %v9111_v20  ;;  %v6567_v21 = vpop.f32.mrb[30].mxu1  ;;  %v6732_v22 = vadd.f32 %v6699_v52, %v6563_v32  ;;  %v5150_v48 = vpop.f32.mrb[27].mxu0 }
 0x228   : > { %6239 = vst [vmem:[%s9120_s11 + $0x50] sm:$0xff] %v6203_v53   ;;  %v5305_v45 = vadd.f32 %v6731_v34, %v9111_v20  ;;  %v3714_v49 = vpop.f32.mrb[31].mxu1  ;;  %v6733_v15 = vadd.f32 %v5150_v48, %v3698_v37 }
 0x229   : > { %v5308_v63 = vadd.f32 %v6732_v22, %v9111_v20  ;;  %v5339_v3 = vmax.f32 %v5307_v61, 0.0 }
 0x22a   : > { %v5306_v8 = vadd.f32 %v6733_v15, %v9111_v20  ;;  %v5337_v9 = vmax.f32 %v5305_v45, 0.0 }
 0x22b   : > { %v5340_v7 = vmax.f32 %v5308_v63, 0.0 }
 0x22c   : > { %v5338_v24 = vmax.f32 %v5306_v8, 0.0  ;;  %v6702_v43 = vpop.f32.mrb[28].mxu0 }
 0x22d   : > { %v6218_v0 = vpack.c.bf16 %v5340_v7, %v5339_v3  ;;  %v6734_v6 = vadd.f32 %v6702_v43, %v6566_v55  ;;  %v5163_v41 = vpop.f32.mrb[29].mxu0 }
 0x22e   : > { %v6213_v12 = vpack.c.bf16 %v5338_v24, %v5337_v9  ;;  %v6735_v54 = vadd.f32 %v5163_v41, %v3711_v36  ;;  %v6703_v35 = vpop.f32.mrb[30].mxu0 }
 0x22f   : > { %6242 = vst [vmem:[%s9120_s11 + $0x68] sm:$0xff] %v6218_v0   ;;  %v5311_v17 = vadd.f32 %v6734_v6, %v9111_v20  ;;  %v6736_v18 = vadd.f32 %v6703_v35, %v6567_v21  ;;  %v5166_v42 = vpop.f32.mrb[31].mxu0 }
 0x230   : > { %6241 = vst [vmem:[%s9120_s11 + $0x60] sm:$0xff] %v6213_v12   ;;  %v5309_v33 = vadd.f32 %v6735_v54, %v9111_v20  ;;  %v6737_v28 = vadd.f32 %v5166_v42, %v3714_v49 }
 0x231   : > { %v5312_v40 = vadd.f32 %v6736_v18, %v9111_v20  ;;  %v5343_v25 = vmax.f32 %v5311_v17, 0.0 }
 0x232   : > { %v5310_v44 = vadd.f32 %v6737_v28, %v9111_v20  ;;  %v5341_v11 = vmax.f32 %v5309_v33, 0.0 }
 0x233   : > { %v5344_v27 = vmax.f32 %v5312_v40, 0.0 }
 0x234   : > { %v5342_v30 = vmax.f32 %v5310_v44, 0.0 }
 0x235   : > { %v6228_v56 = vpack.c.bf16 %v5344_v27, %v5343_v25 }
 0x236   : > { %v6223_v50 = vpack.c.bf16 %v5342_v30, %v5341_v11 }
 0x237   : > { %6244 = vst [vmem:[%s9120_s11 + $0x78] sm:$0xff] %v6228_v56  }
 0x238   : > { %6243 = vst [vmem:[%s9120_s11 + $0x70] sm:$0xff] %v6223_v50  }
 0x239   : > { %7157 = shalt.err (!%p7154_p5)
}
 0x23a   : > { %s7158_s4 = scalar_lea.hbm %s9173_s26, 2048  ;;  %s7162_s7 = scalar_lea.hbm %s9230_s3, 4096 }
 0x23b   : > { %p7159_p6 = scmp.ne.s32.totalorder %s9173_s26, %s7158_s4  ;;  %p7163_p10 = scmp.lt.u32.totalorder %s9173_s26, %s9230_s3 }
 0x23c   : > { %p7164_p11 = scmp.lt.u32.totalorder %s7162_s7, %s7158_s4  ;;  %p7166_p13 = scmp.lt.u32.totalorder %s7158_s4, %s9173_s26 }
 0x23d   : > { %p7160_p7 = pnand %p7159_p6, %p7287_p4 }
 0x23e   : > { %p7165_p12 = por %p7164_p11, %p7163_p10 }
 0x23f   : > { %p7161_p9 = pneg %p7160_p7 }
 0x240   : > { %p7167_p0 = por %p7166_p13, %p7165_p12 }
 0x242   : > { %p7168_p1 = pnand %p7167_p0, %p7161_p9 }
 0x244   : > { %7171 = shalt.err (!%p7168_p1)
}
 0x245   : > { %s7225_s10 = smov 64   ;;  %s7226_s11 = smov 4  }
 0x246   : > { %6973 = dma.vmem_to_hbm [thread:$0]  (%p7287_p4), %s9175_s19, 2048, %s9173_s26, %s9181_s15, %s7225_s10, %s7225_s10, %s7226_s11  }
 0x247 PF: > { %p6979_p2 = scmp.ge.s32.totalorder %s7222_s17, 2  ;;  %s5536_s18 = sand.u32 1, %s7202_s12  }
 0x248   : > { %s5537_s21 = scalar_lea.sflag [#allocation4], %s5536_s18 }
 0x249   : > { %p6976_p3 = pnand %p6979_p2, %p7294_p8 }
 0x24b   : > { %7197 = dma.done.wait (!%p6976_p3), %s5537_s21, 2048  }
 0x24c   : > { %7199 = vsyncadd (!%p6976_p3), %s5537_s21, 4294965248  ;;  %s16_s17 = sadd.s32 1, %s7222_s17   ;;  %s9376_s12 = smov %s7206_s13 }
 0x24d   : > { %p13_p5 = scmp.ge.s32.totalorder %s16_s17, 4   ;;  %s9377_s13 = smov %s7210_s14 }
 0x24e   : > { %s9378_s14 = smov %s7300_s25  ;;  %s9379_s15 = smov %s7218_s16 }
 0x24f   : > { %s9380_s16 = smov %s9382_s20  ;;  %15 = sbr.rel (!%p13_p5) target bundleno = 4 (0x4), region = 70 }
 0x256   :  { %5542 = vsyncpa [#allocation4], 1 }
 0x257   :  { %5544 = vsyncpa [#allocation4 + $0x1], 1 }

</bundles_post_ra>
